<compile_context>
chip_gen: v6e
topology: v6e:2x2x1
jax: 0.10.0
libtpu: 0.0.40
codegen_flags: <defaults>
</compile_context>

<pallas_src>
import jax
import jax.numpy as jnp
from jax import lax
from jax.experimental import pallas as pl
from jax.experimental.pallas import tpu as pltpu

EMBEDDING_DIM = 300          # EMBEDDING_TYPE == 'w2v'
HIDDEN = 128                 # HIDDEN_LAYER_SIZE
PROJ = 64                    # PROJECTION_SIZE
NUM_CLASSES = 5
SEQ_LEN = 8                  # small sequence length for the demo
EMB_PAD = ((EMBEDDING_DIM + 127) // 128) * 128   # zero-pad 300 -> 384 lanes (harmless)


# --------------------------------- Pallas kernel ---------------------------------

def classifier_kernel(
    x_ref, wr_ref, br_ref,
    wih1_ref, b1_ref, whh1_ref,
    wp_ref,
    wih2_ref, b2_ref, whh2_ref,
    wc1_ref, wc2_ref, bc_ref,
    out_ref,
):
    f32 = jnp.float32
    bf16 = jnp.bfloat16
    H = HIDDEN
    H2 = 2 * H
    L = x_ref.shape[0]

    # reshape Linear(300 -> 128) computed ONCE; backward sequence = row-reversal.
    xr = jnp.dot(x_ref[...], wr_ref[...], preferred_element_type=f32) + br_ref[...]
    xr_rev = jnp.concatenate([xr[L - 1 - t:L - t, :] for t in range(L)], axis=0)
    u1 = jnp.concatenate([xr, xr_rev], axis=1)           # (L, 2H): [fwd in | bwd in]

    def bilstm(u, wih_ref, b_ref, whh_ref, collect_seq):
        """Fused fwd+bwd LSTM.  u = [x_fwd | x_bwd] per recurrence step.

        Gate columns are packed gate-major: [i_f,i_b,f_f,f_b,g_f,g_b,o_f,o_b],
        each 128 wide; state h,c are (1, 2H) = [fwd | bwd]."""
        # Gate pre-activations for all timesteps and BOTH directions in one matmul.
        gx = jnp.dot(u.astype(bf16), wih_ref[...],
                     preferred_element_type=f32) + b_ref[...]        # (L, 8H)
        h = jnp.zeros((1, H2), f32)
        c = jnp.zeros((1, H2), f32)
        hs = []
        for t in range(L):                                # fully unrolled, static idx
            gates = gx[t:t + 1, :] + jnp.dot(             # (1, 8H) block-diag W_hh
                h.astype(bf16), whh_ref[...], preferred_element_type=f32)
            i = jax.nn.sigmoid(gates[:, 0 * H2:1 * H2])
            f = jax.nn.sigmoid(gates[:, 1 * H2:2 * H2])
            g = jnp.tanh(gates[:, 2 * H2:3 * H2])
            o = jax.nn.sigmoid(gates[:, 3 * H2:4 * H2])
            c = f * c + i * g
            h = o * jnp.tanh(c)
            if collect_seq:
                hs.append(h)
        hseq = jnp.concatenate(hs, axis=0) if collect_seq else None   # (L, 2H)
        return hseq, h

    # first bidirectional LSTM layer
    hseq1, h1 = bilstm(u1, wih1_ref, b1_ref, whh1_ref, collect_seq=True)

    # residual add + shared projection Linear(128->64, no bias), both directions in
    # one block-diagonal matmul.   (dropout = eval identity)
    u2 = jnp.dot((hseq1 + u1).astype(bf16), wp_ref[...],
                 preferred_element_type=f32)               # (L, 2*PROJ) = [x2f | x2b]

    # second bidirectional LSTM layer (only final hidden states needed)
    _, h2 = bilstm(u2, wih2_ref, b2_ref, whh2_ref, collect_seq=False)

    # ElMO scalar mixture + classifier head.  gamma and softmax(scalar_params) were
    # folded into wc1/wc2 in prepare_params, so no scalar inputs are needed here.
    emb1 = jnp.concatenate([h1[:, :H], h1[:, H:]], axis=0)   # (2, H) = stack(h_f1,h_b1)
    emb2 = jnp.concatenate([h2[:, :H], h2[:, H:]], axis=0)   # (2, H)
    logits = (jnp.dot(emb1, wc1_ref[...], preferred_element_type=jnp.float32)
              + jnp.dot(emb2, wc2_ref[...], preferred_element_type=jnp.float32)
              + bc_ref[...])
    m = jnp.max(logits, axis=1, keepdims=True)
    e = jnp.exp(logits - m)
    out_ref[...] = e / jnp.sum(e, axis=1, keepdims=True)


# ----------------------------- wrapper & param packing -----------------------------

def prepare_params(p):
    """One-time packing: transpose, pad, fold biases/gamma/mixture, build the
    gate-major block-diagonal bidirectional weights, cast to bf16."""
    f32, bf16 = jnp.float32, jnp.bfloat16
    H = HIDDEN

    def pack_w_bi(wf, wb):
        # wf: (4H, Df), wb: (4H, Db)  ->  (Df+Db, 8H) with gate-major columns
        # [i_f, i_b, f_f, f_b, g_f, g_b, o_f, o_b]; row blocks select the direction.
        wf_t = wf.T.astype(f32)
        wb_t = wb.T.astype(f32)
        Df, Db = wf_t.shape[0], wb_t.shape[0]
        zf = jnp.zeros((Df, H), f32)
        zb = jnp.zeros((Db, H), f32)
        cols = []
        for g in range(4):                      # PyTorch gate order i, f, g, o
            cols.append(jnp.concatenate([wf_t[:, g * H:(g + 1) * H], zb], axis=0))
            cols.append(jnp.concatenate([zf, wb_t[:, g * H:(g + 1) * H]], axis=0))
        return jnp.concatenate(cols, axis=1)

    def pack_b_bi(name_f, name_b):
        bf = (p[f'{name_f}_b_ih'] + p[f'{name_f}_b_hh']).astype(f32)
        bb = (p[f'{name_b}_b_ih'] + p[f'{name_b}_b_hh']).astype(f32)
        parts = []
        for g in range(4):
            parts.append(bf[g * H:(g + 1) * H])
            parts.append(bb[g * H:(g + 1) * H])
        return jnp.concatenate(parts).reshape(1, 8 * H)

    # reshape weight: (H, E) -> (E_pad, H)
    pad = EMB_PAD - EMBEDDING_DIM
    wr_t = jnp.pad(p['reshape_w'].T.astype(f32), ((0, pad), (0, 0)))

    # shared projection, block-diagonal over the two directions: (2H, 2P)
    wp_t = p['proj_w'].T.astype(f32)                     # (H, P)
    zp = jnp.zeros((H, PROJ), f32)
    wp_bi = jnp.concatenate(
        [jnp.concatenate([wp_t, zp], axis=1),
         jnp.concatenate([zp, wp_t], axis=1)], axis=0)

    # ElMO mixture scalars + gamma folded into the classifier weights.
    mix = jax.nn.softmax(p['scalar_params'].astype(f32))
    gamma = p['gamma'].astype(f32)[0]
    wc_t = p['cls_w'].T.astype(f32)                      # (H, C)
    wc1 = (mix[0] * gamma) * wc_t
    wc2 = (mix[1] * gamma) * wc_t

    return dict(
        wr_t=wr_t.astype(bf16),
        br=p['reshape_b'].reshape(1, -1).astype(f32),
        wih1=pack_w_bi(p['lstm1f_w_ih'], p['lstm1b_w_ih']).astype(bf16),
        b1=pack_b_bi('lstm1f', 'lstm1b'),
        whh1=pack_w_bi(p['lstm1f_w_hh'], p['lstm1b_w_hh']).astype(bf16),
        wp=wp_bi.astype(bf16),
        wih2=pack_w_bi(p['lstm2f_w_ih'], p['lstm2b_w_ih']).astype(bf16),
        b2=pack_b_bi('lstm2f', 'lstm2b'),
        whh2=pack_w_bi(p['lstm2f_w_hh'], p['lstm2b_w_hh']).astype(bf16),
        wc1=wc1, wc2=wc2,
        bc=p['cls_b'].reshape(1, -1).astype(f32),
    )


@jax.jit
def classifier_forward(x, packed):
    """x: (SEQ_LEN, EMBEDDING_DIM) float32. Returns (2, NUM_CLASSES) float32."""
    pad = EMB_PAD - EMBEDDING_DIM
    x_p = jnp.pad(x.astype(jnp.float32), ((0, 0), (0, pad))).astype(jnp.bfloat16)

    args = [
        x_p, packed['wr_t'], packed['br'],
        packed['wih1'], packed['b1'], packed['whh1'],
        packed['wp'],
        packed['wih2'], packed['b2'], packed['whh2'],
        packed['wc1'], packed['wc2'], packed['bc'],
    ]

    # Single invocation, no grid: total resident data (~2 MiB) fits VMEM on every
    # TPU generation, and the kernel is latency-bound, not bandwidth-bound.
    return pl.pallas_call(
        classifier_kernel,
        out_shape=jax.ShapeDtypeStruct((2, NUM_CLASSES), jnp.float32),
        in_specs=[pl.BlockSpec(memory_space=pltpu.MemorySpace.VMEM)] * len(args),
        out_specs=pl.BlockSpec(memory_space=pltpu.MemorySpace.VMEM),
    )(*args)


# ------------------------- parameter init & pure-JAX reference -------------------------

def init_params(key):
    keys = iter(jax.random.split(key, 64))

    def uni(shape, fan_in):
        b = float(fan_in) ** -0.5
        return jax.random.uniform(next(keys), shape, jnp.float32, -b, b)

    p = {
        'reshape_w': uni((HIDDEN, EMBEDDING_DIM), EMBEDDING_DIM),
        'reshape_b': uni((HIDDEN,), EMBEDDING_DIM),
        'proj_w': uni((PROJ, HIDDEN), HIDDEN),
        'scalar_params': jnp.zeros((2,), jnp.float32),   # ElMO scalar mixture params
        'gamma': jnp.ones((1,), jnp.float32),
        'cls_w': uni((NUM_CLASSES, HIDDEN), HIDDEN),
        'cls_b': uni((NUM_CLASSES,), HIDDEN),
    }
    for name, din in [('lstm1f', HIDDEN), ('lstm1b', HIDDEN),
                      ('lstm2f', PROJ), ('lstm2b', PROJ)]:
        p[f'{name}_w_ih'] = uni((4 * HIDDEN, din), HIDDEN)
        p[f'{name}_w_hh'] = uni((4 * HIDDEN, HIDDEN), HIDDEN)
        p[f'{name}_b_ih'] = uni((4 * HIDDEN,), HIDDEN)
        p[f'{name}_b_hh'] = uni((4 * HIDDEN,), HIDDEN)
    return p


def reference_forward(x, p):
    hp = lax.Precision.HIGHEST
    H = HIDDEN

    def lstm(xs, w_ih, w_hh, b_ih, b_hh):
        def step(carry, xt):
            h, c = carry
            gates = (jnp.dot(xt, w_ih.T, precision=hp) + b_ih +
                     jnp.dot(h, w_hh.T, precision=hp) + b_hh)
            i = jax.nn.sigmoid(gates[0:H])
            f = jax.nn.sigmoid(gates[H:2 * H])
            g = jnp.tanh(gates[2 * H:3 * H])
            o = jax.nn.sigmoid(gates[3 * H:4 * H])
            c = f * c + i * g
            h = o * jnp.tanh(c)
            return (h, c), h
        (h, _), outs = lax.scan(step, (jnp.zeros(H), jnp.zeros(H)), xs)
        return outs, h

    xr = jnp.dot(x, p['reshape_w'].T, precision=hp) + p['reshape_b']
    x_f, x_b = xr, xr[::-1]
    out_f1, h_f1 = lstm(x_f, p['lstm1f_w_ih'], p['lstm1f_w_hh'], p['lstm1f_b_ih'], p['lstm1f_b_hh'])
    out_b1, h_b1 = lstm(x_b, p['lstm1b_w_ih'], p['lstm1b_w_hh'], p['lstm1b_b_ih'], p['lstm1b_b_hh'])
    h1 = jnp.stack([h_f1, h_b1])
    x2f = jnp.dot(out_f1 + x_f, p['proj_w'].T, precision=hp)
    x2b = jnp.dot(out_b1 + x_b, p['proj_w'].T, precision=hp)
    _, h_f2 = lstm(x2f, p['lstm2f_w_ih'], p['lstm2f_w_hh'], p['lstm2f_b_ih'], p['lstm2f_b_hh'])
    _, h_b2 = lstm(x2b, p['lstm2b_w_ih'], p['lstm2b_w_hh'], p['lstm2b_b_ih'], p['lstm2b_b_hh'])
    h2 = jnp.stack([h_f2, h_b2])
    w = jax.nn.softmax(p['scalar_params'])
    emb = p['gamma'][0] * (w[0] * h1 + w[1] * h2)
    logits = jnp.dot(emb, p['cls_w'].T, precision=hp) + p['cls_b']
    return jax.nn.softmax(logits, axis=1)


if __name__ == "__main__":
    key = jax.random.PRNGKey(0)
    pkey, xkey = jax.random.split(key)
    params = init_params(pkey)
    x = jax.random.normal(xkey, (SEQ_LEN, EMBEDDING_DIM), jnp.float32)

    packed = prepare_params(params)   # one-time pre-pack (hoisted out of the call path)

    out = jax.block_until_ready(classifier_forward(x, packed))
    ref = jax.block_until_ready(reference_forward(x, params))

    assert out.shape == (2, NUM_CLASSES), out.shape
    assert bool(jnp.all(jnp.isfinite(out)))
    assert bool(jnp.allclose(jnp.sum(out, axis=1), 1.0, atol=1e-4))
    assert bool(jnp.allclose(out, ref, atol=5e-3, rtol=5e-3)), (out, ref)
    print("KERNEL_OK")
</pallas_src>

<mosaic_0001>
module attributes {stable_mosaic.version = 11 : i64} {
  func.func @classifier_kernel(%arg0: memref<8x384xbf16, #tpu.memory_space<vmem>>, %arg1: memref<384x128xbf16, #tpu.memory_space<vmem>>, %arg2: memref<1x128xf32, #tpu.memory_space<vmem>>, %arg3: memref<256x1024xbf16, #tpu.memory_space<vmem>>, %arg4: memref<1x1024xf32, #tpu.memory_space<vmem>>, %arg5: memref<256x1024xbf16, #tpu.memory_space<vmem>>, %arg6: memref<256x128xbf16, #tpu.memory_space<vmem>>, %arg7: memref<128x1024xbf16, #tpu.memory_space<vmem>>, %arg8: memref<1x1024xf32, #tpu.memory_space<vmem>>, %arg9: memref<256x1024xbf16, #tpu.memory_space<vmem>>, %arg10: memref<128x5xf32, #tpu.memory_space<vmem>>, %arg11: memref<128x5xf32, #tpu.memory_space<vmem>>, %arg12: memref<1x5xf32, #tpu.memory_space<vmem>>, %arg13: memref<2x5xf32, #tpu.memory_space<vmem>>) attributes {dimension_semantics = [], scalar_prefetch = 0 : i64, scratch_operands = 0 : i64, tpu.core_type = #tpu.core_type<tc>} {
    %c0 = arith.constant 0 : index
    %c0_0 = arith.constant 0 : index
    %0 = vector.load %arg0[%c0, %c0_0] : memref<8x384xbf16, #tpu.memory_space<vmem>>, vector<8x384xbf16>
    %c0_1 = arith.constant 0 : index
    %c0_2 = arith.constant 0 : index
    %1 = vector.load %arg1[%c0_1, %c0_2] : memref<384x128xbf16, #tpu.memory_space<vmem>>, vector<384x128xbf16>
    %cst = arith.constant dense<0.000000e+00> : vector<8x128xf32>
    %2 = tpu.matmul %0, %1, %cst {dimension_numbers = #tpu.dot_dimension_numbers<[1], [0], [0], [1], [0, 0, 1, 1], [], []>} : vector<8x384xbf16>, vector<384x128xbf16>, vector<8x128xf32> -> vector<8x128xf32>
    %c0_3 = arith.constant 0 : index
    %c0_4 = arith.constant 0 : index
    %3 = vector.load %arg2[%c0_3, %c0_4] : memref<1x128xf32, #tpu.memory_space<vmem>>, vector<1x128xf32>
    %4 = vector.broadcast %3 : vector<1x128xf32> to vector<8x128xf32>
    %5 = arith.addf %2, %4 : vector<8x128xf32>
    %6 = vector.extract_strided_slice %5 {offsets = [7, 0], sizes = [1, 128], strides = [1, 1]} : vector<8x128xf32> to vector<1x128xf32>
    %7 = vector.extract_strided_slice %5 {offsets = [6, 0], sizes = [1, 128], strides = [1, 1]} : vector<8x128xf32> to vector<1x128xf32>
    %8 = vector.extract_strided_slice %5 {offsets = [5, 0], sizes = [1, 128], strides = [1, 1]} : vector<8x128xf32> to vector<1x128xf32>
    %9 = vector.extract_strided_slice %5 {offsets = [4, 0], sizes = [1, 128], strides = [1, 1]} : vector<8x128xf32> to vector<1x128xf32>
    %10 = vector.extract_strided_slice %5 {offsets = [3, 0], sizes = [1, 128], strides = [1, 1]} : vector<8x128xf32> to vector<1x128xf32>
    %11 = vector.extract_strided_slice %5 {offsets = [2, 0], sizes = [1, 128], strides = [1, 1]} : vector<8x128xf32> to vector<1x128xf32>
    %12 = vector.extract_strided_slice %5 {offsets = [1, 0], sizes = [1, 128], strides = [1, 1]} : vector<8x128xf32> to vector<1x128xf32>
    %13 = vector.extract_strided_slice %5 {offsets = [0, 0], sizes = [1, 128], strides = [1, 1]} : vector<8x128xf32> to vector<1x128xf32>
    %14 = tpu.concatenate %6, %7, %8, %9, %10, %11, %12, %13 in 0 : vector<1x128xf32>, vector<1x128xf32>, vector<1x128xf32>, vector<1x128xf32>, vector<1x128xf32>, vector<1x128xf32>, vector<1x128xf32>, vector<1x128xf32> -> vector<8x128xf32>
    %15 = tpu.concatenate %5, %14 in 1 : vector<8x128xf32>, vector<8x128xf32> -> vector<8x256xf32>
    %16 = arith.truncf %15 : vector<8x256xf32> to vector<8x256xbf16>
    %c0_5 = arith.constant 0 : index
    %c0_6 = arith.constant 0 : index
    %17 = vector.load %arg3[%c0_5, %c0_6] : memref<256x1024xbf16, #tpu.memory_space<vmem>>, vector<256x1024xbf16>
    %cst_7 = arith.constant dense<0.000000e+00> : vector<8x1024xf32>
    %18 = tpu.matmul %16, %17, %cst_7 {dimension_numbers = #tpu.dot_dimension_numbers<[1], [0], [0], [1], [0, 0, 1, 1], [], []>} : vector<8x256xbf16>, vector<256x1024xbf16>, vector<8x1024xf32> -> vector<8x1024xf32>
    %c0_8 = arith.constant 0 : index
    %c0_9 = arith.constant 0 : index
    %19 = vector.load %arg4[%c0_8, %c0_9] : memref<1x1024xf32, #tpu.memory_space<vmem>>, vector<1x1024xf32>
    %20 = vector.broadcast %19 : vector<1x1024xf32> to vector<8x1024xf32>
    %21 = arith.addf %18, %20 : vector<8x1024xf32>
    %cst_10 = arith.constant 0.000000e+00 : f32
    %22 = vector.broadcast %cst_10 : f32 to vector<1x256xf32>
    %cst_11 = arith.constant 0.000000e+00 : f32
    %23 = vector.broadcast %cst_11 : f32 to vector<1x256xf32>
    %24 = vector.extract_strided_slice %21 {offsets = [0, 0], sizes = [1, 1024], strides = [1, 1]} : vector<8x1024xf32> to vector<1x1024xf32>
    %25 = arith.truncf %22 : vector<1x256xf32> to vector<1x256xbf16>
    %c0_12 = arith.constant 0 : index
    %c0_13 = arith.constant 0 : index
    %26 = vector.load %arg5[%c0_12, %c0_13] : memref<256x1024xbf16, #tpu.memory_space<vmem>>, vector<256x1024xbf16>
    %cst_14 = arith.constant dense<0.000000e+00> : vector<1x1024xf32>
    %27 = tpu.matmul %25, %26, %cst_14 {dimension_numbers = #tpu.dot_dimension_numbers<[1], [0], [0], [1], [0, 0, 1, 1], [], []>} : vector<1x256xbf16>, vector<256x1024xbf16>, vector<1x1024xf32> -> vector<1x1024xf32>
    %28 = arith.addf %24, %27 : vector<1x1024xf32>
    %29 = vector.extract_strided_slice %28 {offsets = [0, 0], sizes = [1, 256], strides = [1, 1]} : vector<1x1024xf32> to vector<1x256xf32>
    %30 = arith.negf %29 : vector<1x256xf32>
    %31 = math.exp %30 : vector<1x256xf32>
    %cst_15 = arith.constant 1.000000e+00 : f32
    %32 = vector.broadcast %cst_15 : f32 to vector<1x256xf32>
    %33 = arith.addf %32, %31 : vector<1x256xf32>
    %34 = arith.divf %32, %33 : vector<1x256xf32>
    %35 = vector.extract_strided_slice %28 {offsets = [0, 256], sizes = [1, 256], strides = [1, 1]} : vector<1x1024xf32> to vector<1x256xf32>
    %36 = arith.negf %35 : vector<1x256xf32>
    %37 = math.exp %36 : vector<1x256xf32>
    %cst_16 = arith.constant 1.000000e+00 : f32
    %38 = vector.broadcast %cst_16 : f32 to vector<1x256xf32>
    %39 = arith.addf %38, %37 : vector<1x256xf32>
    %40 = arith.divf %38, %39 : vector<1x256xf32>
    %41 = vector.extract_strided_slice %28 {offsets = [0, 512], sizes = [1, 256], strides = [1, 1]} : vector<1x1024xf32> to vector<1x256xf32>
    %42 = math.tanh %41 : vector<1x256xf32>
    %43 = vector.extract_strided_slice %28 {offsets = [0, 768], sizes = [1, 256], strides = [1, 1]} : vector<1x1024xf32> to vector<1x256xf32>
    %44 = arith.negf %43 : vector<1x256xf32>
    %45 = math.exp %44 : vector<1x256xf32>
    %cst_17 = arith.constant 1.000000e+00 : f32
    %46 = vector.broadcast %cst_17 : f32 to vector<1x256xf32>
    %47 = arith.addf %46, %45 : vector<1x256xf32>
    %48 = arith.divf %46, %47 : vector<1x256xf32>
    %49 = arith.mulf %40, %23 : vector<1x256xf32>
    %50 = arith.mulf %34, %42 : vector<1x256xf32>
    %51 = arith.addf %49, %50 : vector<1x256xf32>
    %52 = math.tanh %51 : vector<1x256xf32>
    %53 = arith.mulf %48, %52 : vector<1x256xf32>
    %54 = vector.extract_strided_slice %21 {offsets = [1, 0], sizes = [1, 1024], strides = [1, 1]} : vector<8x1024xf32> to vector<1x1024xf32>
    %55 = arith.truncf %53 : vector<1x256xf32> to vector<1x256xbf16>
    %c0_18 = arith.constant 0 : index
    %c0_19 = arith.constant 0 : index
    %56 = vector.load %arg5[%c0_18, %c0_19] : memref<256x1024xbf16, #tpu.memory_space<vmem>>, vector<256x1024xbf16>
    %cst_20 = arith.constant dense<0.000000e+00> : vector<1x1024xf32>
    %57 = tpu.matmul %55, %56, %cst_20 {dimension_numbers = #tpu.dot_dimension_numbers<[1], [0], [0], [1], [0, 0, 1, 1], [], []>} : vector<1x256xbf16>, vector<256x1024xbf16>, vector<1x1024xf32> -> vector<1x1024xf32>
    %58 = arith.addf %54, %57 : vector<1x1024xf32>
    %59 = vector.extract_strided_slice %58 {offsets = [0, 0], sizes = [1, 256], strides = [1, 1]} : vector<1x1024xf32> to vector<1x256xf32>
    %60 = arith.negf %59 : vector<1x256xf32>
    %61 = math.exp %60 : vector<1x256xf32>
    %cst_21 = arith.constant 1.000000e+00 : f32
    %62 = vector.broadcast %cst_21 : f32 to vector<1x256xf32>
    %63 = arith.addf %62, %61 : vector<1x256xf32>
    %64 = arith.divf %62, %63 : vector<1x256xf32>
    %65 = vector.extract_strided_slice %58 {offsets = [0, 256], sizes = [1, 256], strides = [1, 1]} : vector<1x1024xf32> to vector<1x256xf32>
    %66 = arith.negf %65 : vector<1x256xf32>
    %67 = math.exp %66 : vector<1x256xf32>
    %cst_22 = arith.constant 1.000000e+00 : f32
    %68 = vector.broadcast %cst_22 : f32 to vector<1x256xf32>
    %69 = arith.addf %68, %67 : vector<1x256xf32>
    %70 = arith.divf %68, %69 : vector<1x256xf32>
    %71 = vector.extract_strided_slice %58 {offsets = [0, 512], sizes = [1, 256], strides = [1, 1]} : vector<1x1024xf32> to vector<1x256xf32>
    %72 = math.tanh %71 : vector<1x256xf32>
    %73 = vector.extract_strided_slice %58 {offsets = [0, 768], sizes = [1, 256], strides = [1, 1]} : vector<1x1024xf32> to vector<1x256xf32>
    %74 = arith.negf %73 : vector<1x256xf32>
    %75 = math.exp %74 : vector<1x256xf32>
    %cst_23 = arith.constant 1.000000e+00 : f32
    %76 = vector.broadcast %cst_23 : f32 to vector<1x256xf32>
    %77 = arith.addf %76, %75 : vector<1x256xf32>
    %78 = arith.divf %76, %77 : vector<1x256xf32>
    %79 = arith.mulf %70, %51 : vector<1x256xf32>
    %80 = arith.mulf %64, %72 : vector<1x256xf32>
    %81 = arith.addf %79, %80 : vector<1x256xf32>
    %82 = math.tanh %81 : vector<1x256xf32>
    %83 = arith.mulf %78, %82 : vector<1x256xf32>
    %84 = vector.extract_strided_slice %21 {offsets = [2, 0], sizes = [1, 1024], strides = [1, 1]} : vector<8x1024xf32> to vector<1x1024xf32>
    %85 = arith.truncf %83 : vector<1x256xf32> to vector<1x256xbf16>
    %c0_24 = arith.constant 0 : index
    %c0_25 = arith.constant 0 : index
    %86 = vector.load %arg5[%c0_24, %c0_25] : memref<256x1024xbf16, #tpu.memory_space<vmem>>, vector<256x1024xbf16>
    %cst_26 = arith.constant dense<0.000000e+00> : vector<1x1024xf32>
    %87 = tpu.matmul %85, %86, %cst_26 {dimension_numbers = #tpu.dot_dimension_numbers<[1], [0], [0], [1], [0, 0, 1, 1], [], []>} : vector<1x256xbf16>, vector<256x1024xbf16>, vector<1x1024xf32> -> vector<1x1024xf32>
    %88 = arith.addf %84, %87 : vector<1x1024xf32>
    %89 = vector.extract_strided_slice %88 {offsets = [0, 0], sizes = [1, 256], strides = [1, 1]} : vector<1x1024xf32> to vector<1x256xf32>
    %90 = arith.negf %89 : vector<1x256xf32>
    %91 = math.exp %90 : vector<1x256xf32>
    %cst_27 = arith.constant 1.000000e+00 : f32
    %92 = vector.broadcast %cst_27 : f32 to vector<1x256xf32>
    %93 = arith.addf %92, %91 : vector<1x256xf32>
    %94 = arith.divf %92, %93 : vector<1x256xf32>
    %95 = vector.extract_strided_slice %88 {offsets = [0, 256], sizes = [1, 256], strides = [1, 1]} : vector<1x1024xf32> to vector<1x256xf32>
    %96 = arith.negf %95 : vector<1x256xf32>
    %97 = math.exp %96 : vector<1x256xf32>
    %cst_28 = arith.constant 1.000000e+00 : f32
    %98 = vector.broadcast %cst_28 : f32 to vector<1x256xf32>
    %99 = arith.addf %98, %97 : vector<1x256xf32>
    %100 = arith.divf %98, %99 : vector<1x256xf32>
    %101 = vector.extract_strided_slice %88 {offsets = [0, 512], sizes = [1, 256], strides = [1, 1]} : vector<1x1024xf32> to vector<1x256xf32>
    %102 = math.tanh %101 : vector<1x256xf32>
    %103 = vector.extract_strided_slice %88 {offsets = [0, 768], sizes = [1, 256], strides = [1, 1]} : vector<1x1024xf32> to vector<1x256xf32>
    %104 = arith.negf %103 : vector<1x256xf32>
    %105 = math.exp %104 : vector<1x256xf32>
    %cst_29 = arith.constant 1.000000e+00 : f32
    %106 = vector.broadcast %cst_29 : f32 to vector<1x256xf32>
    %107 = arith.addf %106, %105 : vector<1x256xf32>
    %108 = arith.divf %106, %107 : vector<1x256xf32>
    %109 = arith.mulf %100, %81 : vector<1x256xf32>
    %110 = arith.mulf %94, %102 : vector<1x256xf32>
    %111 = arith.addf %109, %110 : vector<1x256xf32>
    %112 = math.tanh %111 : vector<1x256xf32>
    %113 = arith.mulf %108, %112 : vector<1x256xf32>
    %114 = vector.extract_strided_slice %21 {offsets = [3, 0], sizes = [1, 1024], strides = [1, 1]} : vector<8x1024xf32> to vector<1x1024xf32>
    %115 = arith.truncf %113 : vector<1x256xf32> to vector<1x256xbf16>
    %c0_30 = arith.constant 0 : index
    %c0_31 = arith.constant 0 : index
    %116 = vector.load %arg5[%c0_30, %c0_31] : memref<256x1024xbf16, #tpu.memory_space<vmem>>, vector<256x1024xbf16>
    %cst_32 = arith.constant dense<0.000000e+00> : vector<1x1024xf32>
    %117 = tpu.matmul %115, %116, %cst_32 {dimension_numbers = #tpu.dot_dimension_numbers<[1], [0], [0], [1], [0, 0, 1, 1], [], []>} : vector<1x256xbf16>, vector<256x1024xbf16>, vector<1x1024xf32> -> vector<1x1024xf32>
    %118 = arith.addf %114, %117 : vector<1x1024xf32>
    %119 = vector.extract_strided_slice %118 {offsets = [0, 0], sizes = [1, 256], strides = [1, 1]} : vector<1x1024xf32> to vector<1x256xf32>
    %120 = arith.negf %119 : vector<1x256xf32>
    %121 = math.exp %120 : vector<1x256xf32>
    %cst_33 = arith.constant 1.000000e+00 : f32
    %122 = vector.broadcast %cst_33 : f32 to vector<1x256xf32>
    %123 = arith.addf %122, %121 : vector<1x256xf32>
    %124 = arith.divf %122, %123 : vector<1x256xf32>
    %125 = vector.extract_strided_slice %118 {offsets = [0, 256], sizes = [1, 256], strides = [1, 1]} : vector<1x1024xf32> to vector<1x256xf32>
    %126 = arith.negf %125 : vector<1x256xf32>
    %127 = math.exp %126 : vector<1x256xf32>
    %cst_34 = arith.constant 1.000000e+00 : f32
    %128 = vector.broadcast %cst_34 : f32 to vector<1x256xf32>
    %129 = arith.addf %128, %127 : vector<1x256xf32>
    %130 = arith.divf %128, %129 : vector<1x256xf32>
    %131 = vector.extract_strided_slice %118 {offsets = [0, 512], sizes = [1, 256], strides = [1, 1]} : vector<1x1024xf32> to vector<1x256xf32>
    %132 = math.tanh %131 : vector<1x256xf32>
    %133 = vector.extract_strided_slice %118 {offsets = [0, 768], sizes = [1, 256], strides = [1, 1]} : vector<1x1024xf32> to vector<1x256xf32>
    %134 = arith.negf %133 : vector<1x256xf32>
    %135 = math.exp %134 : vector<1x256xf32>
    %cst_35 = arith.constant 1.000000e+00 : f32
    %136 = vector.broadcast %cst_35 : f32 to vector<1x256xf32>
    %137 = arith.addf %136, %135 : vector<1x256xf32>
    %138 = arith.divf %136, %137 : vector<1x256xf32>
    %139 = arith.mulf %130, %111 : vector<1x256xf32>
    %140 = arith.mulf %124, %132 : vector<1x256xf32>
    %141 = arith.addf %139, %140 : vector<1x256xf32>
    %142 = math.tanh %141 : vector<1x256xf32>
    %143 = arith.mulf %138, %142 : vector<1x256xf32>
    %144 = vector.extract_strided_slice %21 {offsets = [4, 0], sizes = [1, 1024], strides = [1, 1]} : vector<8x1024xf32> to vector<1x1024xf32>
    %145 = arith.truncf %143 : vector<1x256xf32> to vector<1x256xbf16>
    %c0_36 = arith.constant 0 : index
    %c0_37 = arith.constant 0 : index
    %146 = vector.load %arg5[%c0_36, %c0_37] : memref<256x1024xbf16, #tpu.memory_space<vmem>>, vector<256x1024xbf16>
    %cst_38 = arith.constant dense<0.000000e+00> : vector<1x1024xf32>
    %147 = tpu.matmul %145, %146, %cst_38 {dimension_numbers = #tpu.dot_dimension_numbers<[1], [0], [0], [1], [0, 0, 1, 1], [], []>} : vector<1x256xbf16>, vector<256x1024xbf16>, vector<1x1024xf32> -> vector<1x1024xf32>
    %148 = arith.addf %144, %147 : vector<1x1024xf32>
    %149 = vector.extract_strided_slice %148 {offsets = [0, 0], sizes = [1, 256], strides = [1, 1]} : vector<1x1024xf32> to vector<1x256xf32>
    %150 = arith.negf %149 : vector<1x256xf32>
    %151 = math.exp %150 : vector<1x256xf32>
    %cst_39 = arith.constant 1.000000e+00 : f32
    %152 = vector.broadcast %cst_39 : f32 to vector<1x256xf32>
    %153 = arith.addf %152, %151 : vector<1x256xf32>
    %154 = arith.divf %152, %153 : vector<1x256xf32>
    %155 = vector.extract_strided_slice %148 {offsets = [0, 256], sizes = [1, 256], strides = [1, 1]} : vector<1x1024xf32> to vector<1x256xf32>
    %156 = arith.negf %155 : vector<1x256xf32>
    %157 = math.exp %156 : vector<1x256xf32>
    %cst_40 = arith.constant 1.000000e+00 : f32
    %158 = vector.broadcast %cst_40 : f32 to vector<1x256xf32>
    %159 = arith.addf %158, %157 : vector<1x256xf32>
    %160 = arith.divf %158, %159 : vector<1x256xf32>
    %161 = vector.extract_strided_slice %148 {offsets = [0, 512], sizes = [1, 256], strides = [1, 1]} : vector<1x1024xf32> to vector<1x256xf32>
    %162 = math.tanh %161 : vector<1x256xf32>
    %163 = vector.extract_strided_slice %148 {offsets = [0, 768], sizes = [1, 256], strides = [1, 1]} : vector<1x1024xf32> to vector<1x256xf32>
    %164 = arith.negf %163 : vector<1x256xf32>
    %165 = math.exp %164 : vector<1x256xf32>
    %cst_41 = arith.constant 1.000000e+00 : f32
    %166 = vector.broadcast %cst_41 : f32 to vector<1x256xf32>
    %167 = arith.addf %166, %165 : vector<1x256xf32>
    %168 = arith.divf %166, %167 : vector<1x256xf32>
    %169 = arith.mulf %160, %141 : vector<1x256xf32>
    %170 = arith.mulf %154, %162 : vector<1x256xf32>
    %171 = arith.addf %169, %170 : vector<1x256xf32>
    %172 = math.tanh %171 : vector<1x256xf32>
    %173 = arith.mulf %168, %172 : vector<1x256xf32>
    %174 = vector.extract_strided_slice %21 {offsets = [5, 0], sizes = [1, 1024], strides = [1, 1]} : vector<8x1024xf32> to vector<1x1024xf32>
    %175 = arith.truncf %173 : vector<1x256xf32> to vector<1x256xbf16>
    %c0_42 = arith.constant 0 : index
    %c0_43 = arith.constant 0 : index
    %176 = vector.load %arg5[%c0_42, %c0_43] : memref<256x1024xbf16, #tpu.memory_space<vmem>>, vector<256x1024xbf16>
    %cst_44 = arith.constant dense<0.000000e+00> : vector<1x1024xf32>
    %177 = tpu.matmul %175, %176, %cst_44 {dimension_numbers = #tpu.dot_dimension_numbers<[1], [0], [0], [1], [0, 0, 1, 1], [], []>} : vector<1x256xbf16>, vector<256x1024xbf16>, vector<1x1024xf32> -> vector<1x1024xf32>
    %178 = arith.addf %174, %177 : vector<1x1024xf32>
    %179 = vector.extract_strided_slice %178 {offsets = [0, 0], sizes = [1, 256], strides = [1, 1]} : vector<1x1024xf32> to vector<1x256xf32>
    %180 = arith.negf %179 : vector<1x256xf32>
    %181 = math.exp %180 : vector<1x256xf32>
    %cst_45 = arith.constant 1.000000e+00 : f32
    %182 = vector.broadcast %cst_45 : f32 to vector<1x256xf32>
    %183 = arith.addf %182, %181 : vector<1x256xf32>
    %184 = arith.divf %182, %183 : vector<1x256xf32>
    %185 = vector.extract_strided_slice %178 {offsets = [0, 256], sizes = [1, 256], strides = [1, 1]} : vector<1x1024xf32> to vector<1x256xf32>
    %186 = arith.negf %185 : vector<1x256xf32>
    %187 = math.exp %186 : vector<1x256xf32>
    %cst_46 = arith.constant 1.000000e+00 : f32
    %188 = vector.broadcast %cst_46 : f32 to vector<1x256xf32>
    %189 = arith.addf %188, %187 : vector<1x256xf32>
    %190 = arith.divf %188, %189 : vector<1x256xf32>
    %191 = vector.extract_strided_slice %178 {offsets = [0, 512], sizes = [1, 256], strides = [1, 1]} : vector<1x1024xf32> to vector<1x256xf32>
    %192 = math.tanh %191 : vector<1x256xf32>
    %193 = vector.extract_strided_slice %178 {offsets = [0, 768], sizes = [1, 256], strides = [1, 1]} : vector<1x1024xf32> to vector<1x256xf32>
    %194 = arith.negf %193 : vector<1x256xf32>
    %195 = math.exp %194 : vector<1x256xf32>
    %cst_47 = arith.constant 1.000000e+00 : f32
    %196 = vector.broadcast %cst_47 : f32 to vector<1x256xf32>
    %197 = arith.addf %196, %195 : vector<1x256xf32>
    %198 = arith.divf %196, %197 : vector<1x256xf32>
    %199 = arith.mulf %190, %171 : vector<1x256xf32>
    %200 = arith.mulf %184, %192 : vector<1x256xf32>
    %201 = arith.addf %199, %200 : vector<1x256xf32>
    %202 = math.tanh %201 : vector<1x256xf32>
    %203 = arith.mulf %198, %202 : vector<1x256xf32>
    %204 = vector.extract_strided_slice %21 {offsets = [6, 0], sizes = [1, 1024], strides = [1, 1]} : vector<8x1024xf32> to vector<1x1024xf32>
    %205 = arith.truncf %203 : vector<1x256xf32> to vector<1x256xbf16>
    %c0_48 = arith.constant 0 : index
    %c0_49 = arith.constant 0 : index
    %206 = vector.load %arg5[%c0_48, %c0_49] : memref<256x1024xbf16, #tpu.memory_space<vmem>>, vector<256x1024xbf16>
    %cst_50 = arith.constant dense<0.000000e+00> : vector<1x1024xf32>
    %207 = tpu.matmul %205, %206, %cst_50 {dimension_numbers = #tpu.dot_dimension_numbers<[1], [0], [0], [1], [0, 0, 1, 1], [], []>} : vector<1x256xbf16>, vector<256x1024xbf16>, vector<1x1024xf32> -> vector<1x1024xf32>
    %208 = arith.addf %204, %207 : vector<1x1024xf32>
    %209 = vector.extract_strided_slice %208 {offsets = [0, 0], sizes = [1, 256], strides = [1, 1]} : vector<1x1024xf32> to vector<1x256xf32>
    %210 = arith.negf %209 : vector<1x256xf32>
    %211 = math.exp %210 : vector<1x256xf32>
    %cst_51 = arith.constant 1.000000e+00 : f32
    %212 = vector.broadcast %cst_51 : f32 to vector<1x256xf32>
    %213 = arith.addf %212, %211 : vector<1x256xf32>
    %214 = arith.divf %212, %213 : vector<1x256xf32>
    %215 = vector.extract_strided_slice %208 {offsets = [0, 256], sizes = [1, 256], strides = [1, 1]} : vector<1x1024xf32> to vector<1x256xf32>
    %216 = arith.negf %215 : vector<1x256xf32>
    %217 = math.exp %216 : vector<1x256xf32>
    %cst_52 = arith.constant 1.000000e+00 : f32
    %218 = vector.broadcast %cst_52 : f32 to vector<1x256xf32>
    %219 = arith.addf %218, %217 : vector<1x256xf32>
    %220 = arith.divf %218, %219 : vector<1x256xf32>
    %221 = vector.extract_strided_slice %208 {offsets = [0, 512], sizes = [1, 256], strides = [1, 1]} : vector<1x1024xf32> to vector<1x256xf32>
    %222 = math.tanh %221 : vector<1x256xf32>
    %223 = vector.extract_strided_slice %208 {offsets = [0, 768], sizes = [1, 256], strides = [1, 1]} : vector<1x1024xf32> to vector<1x256xf32>
    %224 = arith.negf %223 : vector<1x256xf32>
    %225 = math.exp %224 : vector<1x256xf32>
    %cst_53 = arith.constant 1.000000e+00 : f32
    %226 = vector.broadcast %cst_53 : f32 to vector<1x256xf32>
    %227 = arith.addf %226, %225 : vector<1x256xf32>
    %228 = arith.divf %226, %227 : vector<1x256xf32>
    %229 = arith.mulf %220, %201 : vector<1x256xf32>
    %230 = arith.mulf %214, %222 : vector<1x256xf32>
    %231 = arith.addf %229, %230 : vector<1x256xf32>
    %232 = math.tanh %231 : vector<1x256xf32>
    %233 = arith.mulf %228, %232 : vector<1x256xf32>
    %234 = vector.extract_strided_slice %21 {offsets = [7, 0], sizes = [1, 1024], strides = [1, 1]} : vector<8x1024xf32> to vector<1x1024xf32>
    %235 = arith.truncf %233 : vector<1x256xf32> to vector<1x256xbf16>
    %c0_54 = arith.constant 0 : index
    %c0_55 = arith.constant 0 : index
    %236 = vector.load %arg5[%c0_54, %c0_55] : memref<256x1024xbf16, #tpu.memory_space<vmem>>, vector<256x1024xbf16>
    %cst_56 = arith.constant dense<0.000000e+00> : vector<1x1024xf32>
    %237 = tpu.matmul %235, %236, %cst_56 {dimension_numbers = #tpu.dot_dimension_numbers<[1], [0], [0], [1], [0, 0, 1, 1], [], []>} : vector<1x256xbf16>, vector<256x1024xbf16>, vector<1x1024xf32> -> vector<1x1024xf32>
    %238 = arith.addf %234, %237 : vector<1x1024xf32>
    %239 = vector.extract_strided_slice %238 {offsets = [0, 0], sizes = [1, 256], strides = [1, 1]} : vector<1x1024xf32> to vector<1x256xf32>
    %240 = arith.negf %239 : vector<1x256xf32>
    %241 = math.exp %240 : vector<1x256xf32>
    %cst_57 = arith.constant 1.000000e+00 : f32
    %242 = vector.broadcast %cst_57 : f32 to vector<1x256xf32>
    %243 = arith.addf %242, %241 : vector<1x256xf32>
    %244 = arith.divf %242, %243 : vector<1x256xf32>
    %245 = vector.extract_strided_slice %238 {offsets = [0, 256], sizes = [1, 256], strides = [1, 1]} : vector<1x1024xf32> to vector<1x256xf32>
    %246 = arith.negf %245 : vector<1x256xf32>
    %247 = math.exp %246 : vector<1x256xf32>
    %cst_58 = arith.constant 1.000000e+00 : f32
    %248 = vector.broadcast %cst_58 : f32 to vector<1x256xf32>
    %249 = arith.addf %248, %247 : vector<1x256xf32>
    %250 = arith.divf %248, %249 : vector<1x256xf32>
    %251 = vector.extract_strided_slice %238 {offsets = [0, 512], sizes = [1, 256], strides = [1, 1]} : vector<1x1024xf32> to vector<1x256xf32>
    %252 = math.tanh %251 : vector<1x256xf32>
    %253 = vector.extract_strided_slice %238 {offsets = [0, 768], sizes = [1, 256], strides = [1, 1]} : vector<1x1024xf32> to vector<1x256xf32>
    %254 = arith.negf %253 : vector<1x256xf32>
    %255 = math.exp %254 : vector<1x256xf32>
    %cst_59 = arith.constant 1.000000e+00 : f32
    %256 = vector.broadcast %cst_59 : f32 to vector<1x256xf32>
    %257 = arith.addf %256, %255 : vector<1x256xf32>
    %258 = arith.divf %256, %257 : vector<1x256xf32>
    %259 = arith.mulf %250, %231 : vector<1x256xf32>
    %260 = arith.mulf %244, %252 : vector<1x256xf32>
    %261 = arith.addf %259, %260 : vector<1x256xf32>
    %262 = math.tanh %261 : vector<1x256xf32>
    %263 = arith.mulf %258, %262 : vector<1x256xf32>
    %264 = tpu.concatenate %53, %83, %113, %143, %173, %203, %233, %263 in 0 : vector<1x256xf32>, vector<1x256xf32>, vector<1x256xf32>, vector<1x256xf32>, vector<1x256xf32>, vector<1x256xf32>, vector<1x256xf32>, vector<1x256xf32> -> vector<8x256xf32>
    %265 = arith.addf %264, %15 : vector<8x256xf32>
    %266 = arith.truncf %265 : vector<8x256xf32> to vector<8x256xbf16>
    %c0_60 = arith.constant 0 : index
    %c0_61 = arith.constant 0 : index
    %267 = vector.load %arg6[%c0_60, %c0_61] : memref<256x128xbf16, #tpu.memory_space<vmem>>, vector<256x128xbf16>
    %cst_62 = arith.constant dense<0.000000e+00> : vector<8x128xf32>
    %268 = tpu.matmul %266, %267, %cst_62 {dimension_numbers = #tpu.dot_dimension_numbers<[1], [0], [0], [1], [0, 0, 1, 1], [], []>} : vector<8x256xbf16>, vector<256x128xbf16>, vector<8x128xf32> -> vector<8x128xf32>
    %269 = arith.truncf %268 : vector<8x128xf32> to vector<8x128xbf16>
    %c0_63 = arith.constant 0 : index
    %c0_64 = arith.constant 0 : index
    %270 = vector.load %arg7[%c0_63, %c0_64] : memref<128x1024xbf16, #tpu.memory_space<vmem>>, vector<128x1024xbf16>
    %cst_65 = arith.constant dense<0.000000e+00> : vector<8x1024xf32>
    %271 = tpu.matmul %269, %270, %cst_65 {dimension_numbers = #tpu.dot_dimension_numbers<[1], [0], [0], [1], [0, 0, 1, 1], [], []>} : vector<8x128xbf16>, vector<128x1024xbf16>, vector<8x1024xf32> -> vector<8x1024xf32>
    %c0_66 = arith.constant 0 : index
    %c0_67 = arith.constant 0 : index
    %272 = vector.load %arg8[%c0_66, %c0_67] : memref<1x1024xf32, #tpu.memory_space<vmem>>, vector<1x1024xf32>
    %273 = vector.broadcast %272 : vector<1x1024xf32> to vector<8x1024xf32>
    %274 = arith.addf %271, %273 : vector<8x1024xf32>
    %cst_68 = arith.constant 0.000000e+00 : f32
    %275 = vector.broadcast %cst_68 : f32 to vector<1x256xf32>
    %cst_69 = arith.constant 0.000000e+00 : f32
    %276 = vector.broadcast %cst_69 : f32 to vector<1x256xf32>
    %277 = vector.extract_strided_slice %274 {offsets = [0, 0], sizes = [1, 1024], strides = [1, 1]} : vector<8x1024xf32> to vector<1x1024xf32>
    %278 = arith.truncf %275 : vector<1x256xf32> to vector<1x256xbf16>
    %c0_70 = arith.constant 0 : index
    %c0_71 = arith.constant 0 : index
    %279 = vector.load %arg9[%c0_70, %c0_71] : memref<256x1024xbf16, #tpu.memory_space<vmem>>, vector<256x1024xbf16>
    %cst_72 = arith.constant dense<0.000000e+00> : vector<1x1024xf32>
    %280 = tpu.matmul %278, %279, %cst_72 {dimension_numbers = #tpu.dot_dimension_numbers<[1], [0], [0], [1], [0, 0, 1, 1], [], []>} : vector<1x256xbf16>, vector<256x1024xbf16>, vector<1x1024xf32> -> vector<1x1024xf32>
    %281 = arith.addf %277, %280 : vector<1x1024xf32>
    %282 = vector.extract_strided_slice %281 {offsets = [0, 0], sizes = [1, 256], strides = [1, 1]} : vector<1x1024xf32> to vector<1x256xf32>
    %283 = arith.negf %282 : vector<1x256xf32>
    %284 = math.exp %283 : vector<1x256xf32>
    %cst_73 = arith.constant 1.000000e+00 : f32
    %285 = vector.broadcast %cst_73 : f32 to vector<1x256xf32>
    %286 = arith.addf %285, %284 : vector<1x256xf32>
    %287 = arith.divf %285, %286 : vector<1x256xf32>
    %288 = vector.extract_strided_slice %281 {offsets = [0, 256], sizes = [1, 256], strides = [1, 1]} : vector<1x1024xf32> to vector<1x256xf32>
    %289 = arith.negf %288 : vector<1x256xf32>
    %290 = math.exp %289 : vector<1x256xf32>
    %cst_74 = arith.constant 1.000000e+00 : f32
    %291 = vector.broadcast %cst_74 : f32 to vector<1x256xf32>
    %292 = arith.addf %291, %290 : vector<1x256xf32>
    %293 = arith.divf %291, %292 : vector<1x256xf32>
    %294 = vector.extract_strided_slice %281 {offsets = [0, 512], sizes = [1, 256], strides = [1, 1]} : vector<1x1024xf32> to vector<1x256xf32>
    %295 = math.tanh %294 : vector<1x256xf32>
    %296 = vector.extract_strided_slice %281 {offsets = [0, 768], sizes = [1, 256], strides = [1, 1]} : vector<1x1024xf32> to vector<1x256xf32>
    %297 = arith.negf %296 : vector<1x256xf32>
    %298 = math.exp %297 : vector<1x256xf32>
    %cst_75 = arith.constant 1.000000e+00 : f32
    %299 = vector.broadcast %cst_75 : f32 to vector<1x256xf32>
    %300 = arith.addf %299, %298 : vector<1x256xf32>
    %301 = arith.divf %299, %300 : vector<1x256xf32>
    %302 = arith.mulf %293, %276 : vector<1x256xf32>
    %303 = arith.mulf %287, %295 : vector<1x256xf32>
    %304 = arith.addf %302, %303 : vector<1x256xf32>
    %305 = math.tanh %304 : vector<1x256xf32>
    %306 = arith.mulf %301, %305 : vector<1x256xf32>
    %307 = vector.extract_strided_slice %274 {offsets = [1, 0], sizes = [1, 1024], strides = [1, 1]} : vector<8x1024xf32> to vector<1x1024xf32>
    %308 = arith.truncf %306 : vector<1x256xf32> to vector<1x256xbf16>
    %c0_76 = arith.constant 0 : index
    %c0_77 = arith.constant 0 : index
    %309 = vector.load %arg9[%c0_76, %c0_77] : memref<256x1024xbf16, #tpu.memory_space<vmem>>, vector<256x1024xbf16>
    %cst_78 = arith.constant dense<0.000000e+00> : vector<1x1024xf32>
    %310 = tpu.matmul %308, %309, %cst_78 {dimension_numbers = #tpu.dot_dimension_numbers<[1], [0], [0], [1], [0, 0, 1, 1], [], []>} : vector<1x256xbf16>, vector<256x1024xbf16>, vector<1x1024xf32> -> vector<1x1024xf32>
    %311 = arith.addf %307, %310 : vector<1x1024xf32>
    %312 = vector.extract_strided_slice %311 {offsets = [0, 0], sizes = [1, 256], strides = [1, 1]} : vector<1x1024xf32> to vector<1x256xf32>
    %313 = arith.negf %312 : vector<1x256xf32>
    %314 = math.exp %313 : vector<1x256xf32>
    %cst_79 = arith.constant 1.000000e+00 : f32
    %315 = vector.broadcast %cst_79 : f32 to vector<1x256xf32>
    %316 = arith.addf %315, %314 : vector<1x256xf32>
    %317 = arith.divf %315, %316 : vector<1x256xf32>
    %318 = vector.extract_strided_slice %311 {offsets = [0, 256], sizes = [1, 256], strides = [1, 1]} : vector<1x1024xf32> to vector<1x256xf32>
    %319 = arith.negf %318 : vector<1x256xf32>
    %320 = math.exp %319 : vector<1x256xf32>
    %cst_80 = arith.constant 1.000000e+00 : f32
    %321 = vector.broadcast %cst_80 : f32 to vector<1x256xf32>
    %322 = arith.addf %321, %320 : vector<1x256xf32>
    %323 = arith.divf %321, %322 : vector<1x256xf32>
    %324 = vector.extract_strided_slice %311 {offsets = [0, 512], sizes = [1, 256], strides = [1, 1]} : vector<1x1024xf32> to vector<1x256xf32>
    %325 = math.tanh %324 : vector<1x256xf32>
    %326 = vector.extract_strided_slice %311 {offsets = [0, 768], sizes = [1, 256], strides = [1, 1]} : vector<1x1024xf32> to vector<1x256xf32>
    %327 = arith.negf %326 : vector<1x256xf32>
    %328 = math.exp %327 : vector<1x256xf32>
    %cst_81 = arith.constant 1.000000e+00 : f32
    %329 = vector.broadcast %cst_81 : f32 to vector<1x256xf32>
    %330 = arith.addf %329, %328 : vector<1x256xf32>
    %331 = arith.divf %329, %330 : vector<1x256xf32>
    %332 = arith.mulf %323, %304 : vector<1x256xf32>
    %333 = arith.mulf %317, %325 : vector<1x256xf32>
    %334 = arith.addf %332, %333 : vector<1x256xf32>
    %335 = math.tanh %334 : vector<1x256xf32>
    %336 = arith.mulf %331, %335 : vector<1x256xf32>
    %337 = vector.extract_strided_slice %274 {offsets = [2, 0], sizes = [1, 1024], strides = [1, 1]} : vector<8x1024xf32> to vector<1x1024xf32>
    %338 = arith.truncf %336 : vector<1x256xf32> to vector<1x256xbf16>
    %c0_82 = arith.constant 0 : index
    %c0_83 = arith.constant 0 : index
    %339 = vector.load %arg9[%c0_82, %c0_83] : memref<256x1024xbf16, #tpu.memory_space<vmem>>, vector<256x1024xbf16>
    %cst_84 = arith.constant dense<0.000000e+00> : vector<1x1024xf32>
    %340 = tpu.matmul %338, %339, %cst_84 {dimension_numbers = #tpu.dot_dimension_numbers<[1], [0], [0], [1], [0, 0, 1, 1], [], []>} : vector<1x256xbf16>, vector<256x1024xbf16>, vector<1x1024xf32> -> vector<1x1024xf32>
    %341 = arith.addf %337, %340 : vector<1x1024xf32>
    %342 = vector.extract_strided_slice %341 {offsets = [0, 0], sizes = [1, 256], strides = [1, 1]} : vector<1x1024xf32> to vector<1x256xf32>
    %343 = arith.negf %342 : vector<1x256xf32>
    %344 = math.exp %343 : vector<1x256xf32>
    %cst_85 = arith.constant 1.000000e+00 : f32
    %345 = vector.broadcast %cst_85 : f32 to vector<1x256xf32>
    %346 = arith.addf %345, %344 : vector<1x256xf32>
    %347 = arith.divf %345, %346 : vector<1x256xf32>
    %348 = vector.extract_strided_slice %341 {offsets = [0, 256], sizes = [1, 256], strides = [1, 1]} : vector<1x1024xf32> to vector<1x256xf32>
    %349 = arith.negf %348 : vector<1x256xf32>
    %350 = math.exp %349 : vector<1x256xf32>
    %cst_86 = arith.constant 1.000000e+00 : f32
    %351 = vector.broadcast %cst_86 : f32 to vector<1x256xf32>
    %352 = arith.addf %351, %350 : vector<1x256xf32>
    %353 = arith.divf %351, %352 : vector<1x256xf32>
    %354 = vector.extract_strided_slice %341 {offsets = [0, 512], sizes = [1, 256], strides = [1, 1]} : vector<1x1024xf32> to vector<1x256xf32>
    %355 = math.tanh %354 : vector<1x256xf32>
    %356 = vector.extract_strided_slice %341 {offsets = [0, 768], sizes = [1, 256], strides = [1, 1]} : vector<1x1024xf32> to vector<1x256xf32>
    %357 = arith.negf %356 : vector<1x256xf32>
    %358 = math.exp %357 : vector<1x256xf32>
    %cst_87 = arith.constant 1.000000e+00 : f32
    %359 = vector.broadcast %cst_87 : f32 to vector<1x256xf32>
    %360 = arith.addf %359, %358 : vector<1x256xf32>
    %361 = arith.divf %359, %360 : vector<1x256xf32>
    %362 = arith.mulf %353, %334 : vector<1x256xf32>
    %363 = arith.mulf %347, %355 : vector<1x256xf32>
    %364 = arith.addf %362, %363 : vector<1x256xf32>
    %365 = math.tanh %364 : vector<1x256xf32>
    %366 = arith.mulf %361, %365 : vector<1x256xf32>
    %367 = vector.extract_strided_slice %274 {offsets = [3, 0], sizes = [1, 1024], strides = [1, 1]} : vector<8x1024xf32> to vector<1x1024xf32>
    %368 = arith.truncf %366 : vector<1x256xf32> to vector<1x256xbf16>
    %c0_88 = arith.constant 0 : index
    %c0_89 = arith.constant 0 : index
    %369 = vector.load %arg9[%c0_88, %c0_89] : memref<256x1024xbf16, #tpu.memory_space<vmem>>, vector<256x1024xbf16>
    %cst_90 = arith.constant dense<0.000000e+00> : vector<1x1024xf32>
    %370 = tpu.matmul %368, %369, %cst_90 {dimension_numbers = #tpu.dot_dimension_numbers<[1], [0], [0], [1], [0, 0, 1, 1], [], []>} : vector<1x256xbf16>, vector<256x1024xbf16>, vector<1x1024xf32> -> vector<1x1024xf32>
    %371 = arith.addf %367, %370 : vector<1x1024xf32>
    %372 = vector.extract_strided_slice %371 {offsets = [0, 0], sizes = [1, 256], strides = [1, 1]} : vector<1x1024xf32> to vector<1x256xf32>
    %373 = arith.negf %372 : vector<1x256xf32>
    %374 = math.exp %373 : vector<1x256xf32>
    %cst_91 = arith.constant 1.000000e+00 : f32
    %375 = vector.broadcast %cst_91 : f32 to vector<1x256xf32>
    %376 = arith.addf %375, %374 : vector<1x256xf32>
    %377 = arith.divf %375, %376 : vector<1x256xf32>
    %378 = vector.extract_strided_slice %371 {offsets = [0, 256], sizes = [1, 256], strides = [1, 1]} : vector<1x1024xf32> to vector<1x256xf32>
    %379 = arith.negf %378 : vector<1x256xf32>
    %380 = math.exp %379 : vector<1x256xf32>
    %cst_92 = arith.constant 1.000000e+00 : f32
    %381 = vector.broadcast %cst_92 : f32 to vector<1x256xf32>
    %382 = arith.addf %381, %380 : vector<1x256xf32>
    %383 = arith.divf %381, %382 : vector<1x256xf32>
    %384 = vector.extract_strided_slice %371 {offsets = [0, 512], sizes = [1, 256], strides = [1, 1]} : vector<1x1024xf32> to vector<1x256xf32>
    %385 = math.tanh %384 : vector<1x256xf32>
    %386 = vector.extract_strided_slice %371 {offsets = [0, 768], sizes = [1, 256], strides = [1, 1]} : vector<1x1024xf32> to vector<1x256xf32>
    %387 = arith.negf %386 : vector<1x256xf32>
    %388 = math.exp %387 : vector<1x256xf32>
    %cst_93 = arith.constant 1.000000e+00 : f32
    %389 = vector.broadcast %cst_93 : f32 to vector<1x256xf32>
    %390 = arith.addf %389, %388 : vector<1x256xf32>
    %391 = arith.divf %389, %390 : vector<1x256xf32>
    %392 = arith.mulf %383, %364 : vector<1x256xf32>
    %393 = arith.mulf %377, %385 : vector<1x256xf32>
    %394 = arith.addf %392, %393 : vector<1x256xf32>
    %395 = math.tanh %394 : vector<1x256xf32>
    %396 = arith.mulf %391, %395 : vector<1x256xf32>
    %397 = vector.extract_strided_slice %274 {offsets = [4, 0], sizes = [1, 1024], strides = [1, 1]} : vector<8x1024xf32> to vector<1x1024xf32>
    %398 = arith.truncf %396 : vector<1x256xf32> to vector<1x256xbf16>
    %c0_94 = arith.constant 0 : index
    %c0_95 = arith.constant 0 : index
    %399 = vector.load %arg9[%c0_94, %c0_95] : memref<256x1024xbf16, #tpu.memory_space<vmem>>, vector<256x1024xbf16>
    %cst_96 = arith.constant dense<0.000000e+00> : vector<1x1024xf32>
    %400 = tpu.matmul %398, %399, %cst_96 {dimension_numbers = #tpu.dot_dimension_numbers<[1], [0], [0], [1], [0, 0, 1, 1], [], []>} : vector<1x256xbf16>, vector<256x1024xbf16>, vector<1x1024xf32> -> vector<1x1024xf32>
    %401 = arith.addf %397, %400 : vector<1x1024xf32>
    %402 = vector.extract_strided_slice %401 {offsets = [0, 0], sizes = [1, 256], strides = [1, 1]} : vector<1x1024xf32> to vector<1x256xf32>
    %403 = arith.negf %402 : vector<1x256xf32>
    %404 = math.exp %403 : vector<1x256xf32>
    %cst_97 = arith.constant 1.000000e+00 : f32
    %405 = vector.broadcast %cst_97 : f32 to vector<1x256xf32>
    %406 = arith.addf %405, %404 : vector<1x256xf32>
    %407 = arith.divf %405, %406 : vector<1x256xf32>
    %408 = vector.extract_strided_slice %401 {offsets = [0, 256], sizes = [1, 256], strides = [1, 1]} : vector<1x1024xf32> to vector<1x256xf32>
    %409 = arith.negf %408 : vector<1x256xf32>
    %410 = math.exp %409 : vector<1x256xf32>
    %cst_98 = arith.constant 1.000000e+00 : f32
    %411 = vector.broadcast %cst_98 : f32 to vector<1x256xf32>
    %412 = arith.addf %411, %410 : vector<1x256xf32>
    %413 = arith.divf %411, %412 : vector<1x256xf32>
    %414 = vector.extract_strided_slice %401 {offsets = [0, 512], sizes = [1, 256], strides = [1, 1]} : vector<1x1024xf32> to vector<1x256xf32>
    %415 = math.tanh %414 : vector<1x256xf32>
    %416 = vector.extract_strided_slice %401 {offsets = [0, 768], sizes = [1, 256], strides = [1, 1]} : vector<1x1024xf32> to vector<1x256xf32>
    %417 = arith.negf %416 : vector<1x256xf32>
    %418 = math.exp %417 : vector<1x256xf32>
    %cst_99 = arith.constant 1.000000e+00 : f32
    %419 = vector.broadcast %cst_99 : f32 to vector<1x256xf32>
    %420 = arith.addf %419, %418 : vector<1x256xf32>
    %421 = arith.divf %419, %420 : vector<1x256xf32>
    %422 = arith.mulf %413, %394 : vector<1x256xf32>
    %423 = arith.mulf %407, %415 : vector<1x256xf32>
    %424 = arith.addf %422, %423 : vector<1x256xf32>
    %425 = math.tanh %424 : vector<1x256xf32>
    %426 = arith.mulf %421, %425 : vector<1x256xf32>
    %427 = vector.extract_strided_slice %274 {offsets = [5, 0], sizes = [1, 1024], strides = [1, 1]} : vector<8x1024xf32> to vector<1x1024xf32>
    %428 = arith.truncf %426 : vector<1x256xf32> to vector<1x256xbf16>
    %c0_100 = arith.constant 0 : index
    %c0_101 = arith.constant 0 : index
    %429 = vector.load %arg9[%c0_100, %c0_101] : memref<256x1024xbf16, #tpu.memory_space<vmem>>, vector<256x1024xbf16>
    %cst_102 = arith.constant dense<0.000000e+00> : vector<1x1024xf32>
    %430 = tpu.matmul %428, %429, %cst_102 {dimension_numbers = #tpu.dot_dimension_numbers<[1], [0], [0], [1], [0, 0, 1, 1], [], []>} : vector<1x256xbf16>, vector<256x1024xbf16>, vector<1x1024xf32> -> vector<1x1024xf32>
    %431 = arith.addf %427, %430 : vector<1x1024xf32>
    %432 = vector.extract_strided_slice %431 {offsets = [0, 0], sizes = [1, 256], strides = [1, 1]} : vector<1x1024xf32> to vector<1x256xf32>
    %433 = arith.negf %432 : vector<1x256xf32>
    %434 = math.exp %433 : vector<1x256xf32>
    %cst_103 = arith.constant 1.000000e+00 : f32
    %435 = vector.broadcast %cst_103 : f32 to vector<1x256xf32>
    %436 = arith.addf %435, %434 : vector<1x256xf32>
    %437 = arith.divf %435, %436 : vector<1x256xf32>
    %438 = vector.extract_strided_slice %431 {offsets = [0, 256], sizes = [1, 256], strides = [1, 1]} : vector<1x1024xf32> to vector<1x256xf32>
    %439 = arith.negf %438 : vector<1x256xf32>
    %440 = math.exp %439 : vector<1x256xf32>
    %cst_104 = arith.constant 1.000000e+00 : f32
    %441 = vector.broadcast %cst_104 : f32 to vector<1x256xf32>
    %442 = arith.addf %441, %440 : vector<1x256xf32>
    %443 = arith.divf %441, %442 : vector<1x256xf32>
    %444 = vector.extract_strided_slice %431 {offsets = [0, 512], sizes = [1, 256], strides = [1, 1]} : vector<1x1024xf32> to vector<1x256xf32>
    %445 = math.tanh %444 : vector<1x256xf32>
    %446 = vector.extract_strided_slice %431 {offsets = [0, 768], sizes = [1, 256], strides = [1, 1]} : vector<1x1024xf32> to vector<1x256xf32>
    %447 = arith.negf %446 : vector<1x256xf32>
    %448 = math.exp %447 : vector<1x256xf32>
    %cst_105 = arith.constant 1.000000e+00 : f32
    %449 = vector.broadcast %cst_105 : f32 to vector<1x256xf32>
    %450 = arith.addf %449, %448 : vector<1x256xf32>
    %451 = arith.divf %449, %450 : vector<1x256xf32>
    %452 = arith.mulf %443, %424 : vector<1x256xf32>
    %453 = arith.mulf %437, %445 : vector<1x256xf32>
    %454 = arith.addf %452, %453 : vector<1x256xf32>
    %455 = math.tanh %454 : vector<1x256xf32>
    %456 = arith.mulf %451, %455 : vector<1x256xf32>
    %457 = vector.extract_strided_slice %274 {offsets = [6, 0], sizes = [1, 1024], strides = [1, 1]} : vector<8x1024xf32> to vector<1x1024xf32>
    %458 = arith.truncf %456 : vector<1x256xf32> to vector<1x256xbf16>
    %c0_106 = arith.constant 0 : index
    %c0_107 = arith.constant 0 : index
    %459 = vector.load %arg9[%c0_106, %c0_107] : memref<256x1024xbf16, #tpu.memory_space<vmem>>, vector<256x1024xbf16>
    %cst_108 = arith.constant dense<0.000000e+00> : vector<1x1024xf32>
    %460 = tpu.matmul %458, %459, %cst_108 {dimension_numbers = #tpu.dot_dimension_numbers<[1], [0], [0], [1], [0, 0, 1, 1], [], []>} : vector<1x256xbf16>, vector<256x1024xbf16>, vector<1x1024xf32> -> vector<1x1024xf32>
    %461 = arith.addf %457, %460 : vector<1x1024xf32>
    %462 = vector.extract_strided_slice %461 {offsets = [0, 0], sizes = [1, 256], strides = [1, 1]} : vector<1x1024xf32> to vector<1x256xf32>
    %463 = arith.negf %462 : vector<1x256xf32>
    %464 = math.exp %463 : vector<1x256xf32>
    %cst_109 = arith.constant 1.000000e+00 : f32
    %465 = vector.broadcast %cst_109 : f32 to vector<1x256xf32>
    %466 = arith.addf %465, %464 : vector<1x256xf32>
    %467 = arith.divf %465, %466 : vector<1x256xf32>
    %468 = vector.extract_strided_slice %461 {offsets = [0, 256], sizes = [1, 256], strides = [1, 1]} : vector<1x1024xf32> to vector<1x256xf32>
    %469 = arith.negf %468 : vector<1x256xf32>
    %470 = math.exp %469 : vector<1x256xf32>
    %cst_110 = arith.constant 1.000000e+00 : f32
    %471 = vector.broadcast %cst_110 : f32 to vector<1x256xf32>
    %472 = arith.addf %471, %470 : vector<1x256xf32>
    %473 = arith.divf %471, %472 : vector<1x256xf32>
    %474 = vector.extract_strided_slice %461 {offsets = [0, 512], sizes = [1, 256], strides = [1, 1]} : vector<1x1024xf32> to vector<1x256xf32>
    %475 = math.tanh %474 : vector<1x256xf32>
    %476 = vector.extract_strided_slice %461 {offsets = [0, 768], sizes = [1, 256], strides = [1, 1]} : vector<1x1024xf32> to vector<1x256xf32>
    %477 = arith.negf %476 : vector<1x256xf32>
    %478 = math.exp %477 : vector<1x256xf32>
    %cst_111 = arith.constant 1.000000e+00 : f32
    %479 = vector.broadcast %cst_111 : f32 to vector<1x256xf32>
    %480 = arith.addf %479, %478 : vector<1x256xf32>
    %481 = arith.divf %479, %480 : vector<1x256xf32>
    %482 = arith.mulf %473, %454 : vector<1x256xf32>
    %483 = arith.mulf %467, %475 : vector<1x256xf32>
    %484 = arith.addf %482, %483 : vector<1x256xf32>
    %485 = math.tanh %484 : vector<1x256xf32>
    %486 = arith.mulf %481, %485 : vector<1x256xf32>
    %487 = vector.extract_strided_slice %274 {offsets = [7, 0], sizes = [1, 1024], strides = [1, 1]} : vector<8x1024xf32> to vector<1x1024xf32>
    %488 = arith.truncf %486 : vector<1x256xf32> to vector<1x256xbf16>
    %c0_112 = arith.constant 0 : index
    %c0_113 = arith.constant 0 : index
    %489 = vector.load %arg9[%c0_112, %c0_113] : memref<256x1024xbf16, #tpu.memory_space<vmem>>, vector<256x1024xbf16>
    %cst_114 = arith.constant dense<0.000000e+00> : vector<1x1024xf32>
    %490 = tpu.matmul %488, %489, %cst_114 {dimension_numbers = #tpu.dot_dimension_numbers<[1], [0], [0], [1], [0, 0, 1, 1], [], []>} : vector<1x256xbf16>, vector<256x1024xbf16>, vector<1x1024xf32> -> vector<1x1024xf32>
    %491 = arith.addf %487, %490 : vector<1x1024xf32>
    %492 = vector.extract_strided_slice %491 {offsets = [0, 0], sizes = [1, 256], strides = [1, 1]} : vector<1x1024xf32> to vector<1x256xf32>
    %493 = arith.negf %492 : vector<1x256xf32>
    %494 = math.exp %493 : vector<1x256xf32>
    %cst_115 = arith.constant 1.000000e+00 : f32
    %495 = vector.broadcast %cst_115 : f32 to vector<1x256xf32>
    %496 = arith.addf %495, %494 : vector<1x256xf32>
    %497 = arith.divf %495, %496 : vector<1x256xf32>
    %498 = vector.extract_strided_slice %491 {offsets = [0, 256], sizes = [1, 256], strides = [1, 1]} : vector<1x1024xf32> to vector<1x256xf32>
    %499 = arith.negf %498 : vector<1x256xf32>
    %500 = math.exp %499 : vector<1x256xf32>
    %cst_116 = arith.constant 1.000000e+00 : f32
    %501 = vector.broadcast %cst_116 : f32 to vector<1x256xf32>
    %502 = arith.addf %501, %500 : vector<1x256xf32>
    %503 = arith.divf %501, %502 : vector<1x256xf32>
    %504 = vector.extract_strided_slice %491 {offsets = [0, 512], sizes = [1, 256], strides = [1, 1]} : vector<1x1024xf32> to vector<1x256xf32>
    %505 = math.tanh %504 : vector<1x256xf32>
    %506 = vector.extract_strided_slice %491 {offsets = [0, 768], sizes = [1, 256], strides = [1, 1]} : vector<1x1024xf32> to vector<1x256xf32>
    %507 = arith.negf %506 : vector<1x256xf32>
    %508 = math.exp %507 : vector<1x256xf32>
    %cst_117 = arith.constant 1.000000e+00 : f32
    %509 = vector.broadcast %cst_117 : f32 to vector<1x256xf32>
    %510 = arith.addf %509, %508 : vector<1x256xf32>
    %511 = arith.divf %509, %510 : vector<1x256xf32>
    %512 = arith.mulf %503, %484 : vector<1x256xf32>
    %513 = arith.mulf %497, %505 : vector<1x256xf32>
    %514 = arith.addf %512, %513 : vector<1x256xf32>
    %515 = math.tanh %514 : vector<1x256xf32>
    %516 = arith.mulf %511, %515 : vector<1x256xf32>
    %517 = vector.extract_strided_slice %263 {offsets = [0, 0], sizes = [1, 128], strides = [1, 1]} : vector<1x256xf32> to vector<1x128xf32>
    %518 = vector.extract_strided_slice %263 {offsets = [0, 128], sizes = [1, 128], strides = [1, 1]} : vector<1x256xf32> to vector<1x128xf32>
    %519 = tpu.concatenate %517, %518 in 0 : vector<1x128xf32>, vector<1x128xf32> -> vector<2x128xf32>
    %520 = vector.extract_strided_slice %516 {offsets = [0, 0], sizes = [1, 128], strides = [1, 1]} : vector<1x256xf32> to vector<1x128xf32>
    %521 = vector.extract_strided_slice %516 {offsets = [0, 128], sizes = [1, 128], strides = [1, 1]} : vector<1x256xf32> to vector<1x128xf32>
    %522 = tpu.concatenate %520, %521 in 0 : vector<1x128xf32>, vector<1x128xf32> -> vector<2x128xf32>
    %c0_118 = arith.constant 0 : index
    %c0_119 = arith.constant 0 : index
    %523 = vector.load %arg10[%c0_118, %c0_119] : memref<128x5xf32, #tpu.memory_space<vmem>>, vector<128x5xf32>
    %cst_120 = arith.constant dense<0.000000e+00> : vector<2x5xf32>
    %524 = tpu.matmul %519, %523, %cst_120 {dimension_numbers = #tpu.dot_dimension_numbers<[1], [0], [0], [1], [0, 0, 1, 1], [], []>} : vector<2x128xf32>, vector<128x5xf32>, vector<2x5xf32> -> vector<2x5xf32>
    %c0_121 = arith.constant 0 : index
    %c0_122 = arith.constant 0 : index
    %525 = vector.load %arg11[%c0_121, %c0_122] : memref<128x5xf32, #tpu.memory_space<vmem>>, vector<128x5xf32>
    %cst_123 = arith.constant dense<0.000000e+00> : vector<2x5xf32>
    %526 = tpu.matmul %522, %525, %cst_123 {dimension_numbers = #tpu.dot_dimension_numbers<[1], [0], [0], [1], [0, 0, 1, 1], [], []>} : vector<2x128xf32>, vector<128x5xf32>, vector<2x5xf32> -> vector<2x5xf32>
    %527 = arith.addf %524, %526 : vector<2x5xf32>
    %c0_124 = arith.constant 0 : index
    %c0_125 = arith.constant 0 : index
    %528 = vector.load %arg12[%c0_124, %c0_125] : memref<1x5xf32, #tpu.memory_space<vmem>>, vector<1x5xf32>
    %529 = vector.broadcast %528 : vector<1x5xf32> to vector<2x5xf32>
    %530 = arith.addf %527, %529 : vector<2x5xf32>
    %cst_126 = arith.constant dense<0xFF800000> : vector<2xf32>
    %531 = vector.multi_reduction <maximumf>, %530, %cst_126 [1] : vector<2x5xf32> to vector<2xf32>
    %532 = vector.shape_cast %531 : vector<2xf32> to vector<2x1xf32>
    %533 = vector.broadcast %532 : vector<2x1xf32> to vector<2x5xf32>
    %534 = arith.subf %530, %533 : vector<2x5xf32>
    %535 = math.exp %534 : vector<2x5xf32>
    %cst_127 = arith.constant dense<0.000000e+00> : vector<2xf32>
    %536 = vector.multi_reduction <add>, %535, %cst_127 [1] : vector<2x5xf32> to vector<2xf32>
    %537 = vector.shape_cast %536 : vector<2xf32> to vector<2x1xf32>
    %538 = vector.broadcast %537 : vector<2x1xf32> to vector<2x5xf32>
    %539 = arith.divf %535, %538 : vector<2x5xf32>
    %c0_128 = arith.constant 0 : index
    %c0_129 = arith.constant 0 : index
    %540 = vector.load %arg13[%c0_128, %c0_129] : memref<2x5xf32, #tpu.memory_space<vmem>>, vector<2x5xf32>
    tpu.vector_store %arg13[%c0_128, %c0_129], %539 {strides = array<i32>} : memref<2x5xf32, #tpu.memory_space<vmem>>, vector<2x5xf32>,
    return
  }
}

</mosaic_0001>

<bundles_post_ra>
// kernel: classifier_forward.1
= control target key start
LH: loop header
LB: loop body
LE: loop exit
PB: predicated region body
PF: predicated region fallthrough
CT: control target
= control target key end

     0   :  { %18 = vsyncpa [#allocation3], 0  ;;  %s12925_s0 = inlined_call_operand.vmem [shape: bf16[8,384], index: 0, kind: input, shape index: {}]   ;;  %s12926_s1 = inlined_call_operand.vmem [shape: bf16[384,128], index: 1, kind: input, shape index: {}]   ;;  %s12927_s2 = inlined_call_operand.vmem [shape: f32[1,128], index: 2, kind: input, shape index: {}]   ;;  %s12928_s3 = inlined_call_operand.hbm [shape: bf16[256,1024], index: 3, kind: input, shape index: {}]   ;;  %s12929_s4 = inlined_call_operand.vmem [shape: f32[1,1024], index: 4, kind: input, shape index: {}]   ;;  %s12930_s5 = inlined_call_operand.hbm [shape: bf16[256,1024], index: 5, kind: input, shape index: {}]   ;;  %s12931_s6 = inlined_call_operand.vmem [shape: bf16[256,128], index: 6, kind: input, shape index: {}]   ;;  %s12932_s7 = inlined_call_operand.hbm [shape: bf16[128,1024], index: 7, kind: input, shape index: {}]   ;;  %s12933_s8 = inlined_call_operand.vmem [shape: f32[1,1024], index: 8, kind: input, shape index: {}]   ;;  %s12934_s9 = inlined_call_operand.hbm [shape: bf16[256,1024], index: 9, kind: input, shape index: {}]   ;;  %s12935_s10 = inlined_call_operand.vmem [shape: f32[128,5], index: 10, kind: input, shape index: {}]   ;;  %s12936_s11 = inlined_call_operand.vmem [shape: f32[128,5], index: 11, kind: input, shape index: {}]   ;;  %s12937_s12 = inlined_call_operand.vmem [shape: f32[1,5], index: 12, kind: input, shape index: {}]   ;;  %s12938_s13 = inlined_call_operand.hbm [shape: f32[2,5], index: 13, kind: output, shape index: {}]  }
   0x1   :  { %19 = vsyncpa [#allocation6], 0 }
   0x2   :  { %20 = vsyncpa [#allocation9], 0 }
   0x3   :  { %21 = vsyncpa [#allocation4], 0  ;;  %s9432_s25 = smov [#allocation5]   ;;  %s9433_s27 = smov [#allocation2]  }
   0x4   :  { %s47_s26 = sshll.u32 %s9432_s25, 4  ;;  %s33_s28 = sshll.u32 %s9433_s27, 4  ;;  %s48_s26 = int_to_ptr.vmem [resolvable:$true] %s47_s26  ;;  %s34_s28 = int_to_ptr.vmem [resolvable:$true] %s33_s28 }
   0x5   :  { %s9332_s29 = scalar_lea.vmem %s48_s26, 16384  ;;  %p9337_p1 = scmp.lt.s32.totalorder %s48_s26, %s48_s26 }
   0x6   :  { %p9333_p0 = scmp.ne.s32.totalorder %s48_s26, %s9332_s29  ;;  %p9338_p2 = scmp.lt.s32.totalorder %s9332_s29, %s9332_s29 }
   0x8   :  { %p9339_p3 = por %p9338_p2, %p9337_p1 }
   0xa   :  { %p9340_p4 = pnand %p9339_p3, %p9333_p0 }
   0xc   :  { %9343 = shalt.err (!%p9340_p4)
}
   0xd   :  { %s9434_s30 = smov 512   ;;  %s9435_s14 = smov 32  }
   0xe   :  { %53 = dma.hbm_to_vmem [thread:$0]  %s12930_s5, 16384, %s48_s26, [#allocation6], %s9434_s30, %s9434_s30, %s9435_s14  }
   0xf   :  { %s9352_s17 = scalar_lea.vmem %s34_s28, 16384  ;;  %p9357_p6 = scmp.lt.s32.totalorder %s34_s28, %s34_s28 }
  0x10   :  { %p9353_p5 = scmp.ne.s32.totalorder %s34_s28, %s9352_s17  ;;  %p9358_p7 = scmp.lt.s32.totalorder %s9352_s17, %s9352_s17 }
  0x12   :  { %p9359_p8 = por %p9358_p7, %p9357_p6 }
  0x14   :  { %p9360_p9 = pnand %p9359_p8, %p9353_p5 }
  0x16   :  { %9363 = shalt.err (!%p9360_p9)
}
  0x17   :  { %39 = dma.hbm_to_vmem [thread:$0]  %s12928_s3, 16384, %s34_s28, [#allocation3], %s9434_s30, %s9434_s30, %s9435_s14  }
  0x18   :  { %s9436_s20 = smov [#allocation7]   ;;  %s9437_s22 = smov [#allocation8]  }
  0x19   :  { %s61_s21 = sshll.u32 %s9436_s20, 4  ;;  %s75_s23 = sshll.u32 %s9437_s22, 4  ;;  %s62_s21 = int_to_ptr.vmem [resolvable:$true] %s61_s21  ;;  %s76_s23 = int_to_ptr.vmem [resolvable:$true] %s75_s23 }
  0x1a   :  { %s9372_s5 = scalar_lea.vmem %s62_s21, 8192  ;;  %p9377_p11 = scmp.lt.s32.totalorder %s62_s21, %s62_s21 }
  0x1b   :  { %p9373_p10 = scmp.ne.s32.totalorder %s62_s21, %s9372_s5  ;;  %p9378_p12 = scmp.lt.s32.totalorder %s9372_s5, %s9372_s5 }
  0x1d   :  { %p9379_p13 = por %p9378_p12, %p9377_p11 }
  0x1f   :  { %p9380_p0 = pnand %p9379_p13, %p9373_p10 }
  0x21   :  { %9383 = shalt.err (!%p9380_p0)
}
  0x22   :  { %67 = dma.hbm_to_vmem [thread:$0]  %s12932_s7, 8192, %s62_s21, [#allocation6], %s9434_s30, %s9434_s30, %s9435_s14  }
  0x23   :  { %s9392_s3 = scalar_lea.vmem %s76_s23, 16384  ;;  %p9397_p2 = scmp.lt.s32.totalorder %s76_s23, %s76_s23 }
  0x24   :  { %p9393_p1 = scmp.ne.s32.totalorder %s76_s23, %s9392_s3  ;;  %p9398_p3 = scmp.lt.s32.totalorder %s9392_s3, %s9392_s3 }
  0x26   :  { %p9399_p4 = por %p9398_p3, %p9397_p2 }
  0x28   :  { %p9400_p5 = pnand %p9399_p4, %p9393_p1 }
  0x2a   :  { %9403 = shalt.err (!%p9400_p5)
}
  0x2b   :  { %81 = dma.hbm_to_vmem [thread:$0]  %s12934_s9, 16384, %s76_s23, [#allocation9], %s9434_s30, %s9434_s30, %s9435_s14  }
  0x2c   :  { %9424 = dma.done.wait [#allocation3], 16384  }
  0x2d   :  { %9425 = vsyncadd [#allocation3], 4294950912 }
  0x2e   :  { %9426 = dma.done.wait [#allocation6], 24576  }
  0x2f   :  { %9427 = vsyncadd [#allocation6], 4294942720 }
  0x30   :  { %9428 = dma.done.wait [#allocation9], 16384  }
  0x31   :  { %9429 = vsyncadd [#allocation9], 4294950912  ;;  %v12939_v0 = vmov 0.0   ;;  %vm9439_vm0 = vmmov 0   ;;  %v8765_v1 = vld [vmem:[%s12926_s1 + $0x78] sm:$0xff]   ;;  %v8768_v4 = vld [vmem:[%s12926_s1 + $0x70] sm:$0xff]  }
  0x32   :  { %8665 = vmatprep.subr.bf16.mxu1 %v12939_v0  ;;  %8681 = vmatprep.mubr.msk.bf16.mxu1 %vm9439_vm0, %v12939_v0  ;;  %v8766_v2 = vld [vmem:[%s12926_s1 + $0x38] sm:$0xff]   ;;  %v8769_v5 = vld [vmem:[%s12926_s1 + $0x30] sm:$0xff]   ;;  %v8771_v7 = vld [vmem:[%s12926_s1 + $0x68] sm:$0xff]   ;;  %vm402_vm1 = vcmask 1040384   ;;  %vm404_vm2 = vcmask 1041408   ;;  %vm406_vm3 = vcmask 1042432  }
  0x33   :  { %8578 = vmatprep.subr.bf16.mxu0 %v8765_v1  ;;  %v8767_v3 = vld [vmem:[%s12926_s1 + $0xb8] sm:$0xff]   ;;  %v8770_v6 = vld [vmem:[%s12926_s1 + $0xb0] sm:$0xff]   ;;  %v8772_v8 = vld [vmem:[%s12926_s1 + $0x28] sm:$0xff]   ;;  %vm408_vm4 = vcmask 1043456   ;;  %vm410_vm5 = vcmask 1044480   ;;  %vm412_vm6 = vcmask 1045504  }
  0x34   :  { %8579 = vmatpush3.bf16.msra.mxu0 %v8766_v2  ;;  %8666 = vmatpush3.bf16.msra.mxu1 %v8767_v3  ;;  %v8773_v9 = vld [vmem:[%s12926_s1 + $0xa8] sm:$0xff]   ;;  %v8774_v10 = vld [vmem:[%s12926_s1 + $0x60] sm:$0xff]   ;;  %v8777_v13 = vld [vmem:[%s12926_s1 + $0x58] sm:$0xff]   ;;  %vm414_vm7 = vcmask 1046528   ;;  %vm7959_vm8 = vcmask 33792   ;;  %s9441_s30 = smov [#allocation10]  }
  0x35   :  { %8580 = vmatprep.subr.bf16.mxu0 %v8768_v4  ;;  %8667 = vmatprep.subr.bf16.mxu1 %v12939_v0  ;;  %v8775_v11 = vld [vmem:[%s12926_s1 + $0x20] sm:$0xff]   ;;  %v8778_v14 = vld [vmem:[%s12926_s1 + $0x18] sm:$0xff]   ;;  %v8780_v16 = vld [vmem:[%s12926_s1 + $0x50] sm:$0xff]   ;;  %s7978_s14 = sshll.u32 %s9441_s30, 4  ;;  %s7979_s14 = int_to_ptr.vmem [resolvable:$true] %s7978_s14 }
  0x36   :  { %v8776_v12 = vld [vmem:[%s12926_s1 + $0xa0] sm:$0xff]   ;;  %v8779_v15 = vld [vmem:[%s12926_s1 + $0x98] sm:$0xff]   ;;  %v8781_v17 = vld [vmem:[%s12926_s1 + $0x10] sm:$0xff]   ;;  %p9409_p7 = scmp.lt.s32.totalorder %s7979_s14, %s7979_s14 }
  0x37   :  { %v8782_v18 = vld [vmem:[%s12926_s1 + $0x90] sm:$0xff]   ;;  %v8783_v19 = vld [vmem:[%s12926_s1 + $0x48] sm:$0xff]   ;;  %v8786_v22 = vld [vmem:[%s12926_s1 + $0x40] sm:$0xff]  }
  0x38   :  { %8581 = vmatpush3.bf16.msra.mxu0 %v8769_v5  ;;  %8668 = vmatpush3.bf16.msra.mxu1 %v8770_v6  ;;  %v8784_v20 = vld [vmem:[%s12926_s1 + $0x8] sm:$0xff]   ;;  %v101_v23 = vld [vmem:[%s12925_s0] sm:$0xff] }
  0x39   :  { %8582 = vmatprep.subr.bf16.mxu0 %v8771_v7  ;;  %8669 = vmatprep.subr.bf16.mxu1 %v12939_v0  ;;  %v8785_v21 = vld [vmem:[%s12926_s1 + $0x88] sm:$0xff]   ;;  %v7991_v24 = vcombine.high %v101_v23, %v101_v23  ;;  %v474_v25 = vld [vmem:[#allocation2 + $0x1c0] sm:$0xff]  ;;  %v7990_v35 = vcombine.low %v101_v23, %v101_v23 }
  0x3a   :  { %v478_v26 = vld [vmem:[#allocation2 + $0x1e0] sm:$0xff]  ;;  %v475_v27 = vld [vmem:[#allocation2 + $0x1c8] sm:$0xff] }
  0x3b   :  { %v479_v28 = vld [vmem:[#allocation2 + $0x1e8] sm:$0xff]  ;;  %v8787_v29 = vld [vmem:[%s12926_s1] sm:$0xff]   ;;  %345 = vmatprep.mubr.bf16.mxu0 %v7991_v24  ;;  %v8074_v31 = vcombine.high %v474_v25, %v478_v26  ;;  %v8073_v39 = vcombine.low %v474_v25, %v478_v26 }
  0x3c   :  { %8583 = vmatpush3.bf16.msra.mxu0 %v8772_v8  ;;  %8670 = vmatpush3.bf16.msra.mxu1 %v8773_v9  ;;  %v8788_v30 = vld [vmem:[%s12926_s1 + $0x80] sm:$0xff]   ;;  %v8076_v32 = vcombine.high %v475_v27, %v479_v28  ;;  %v467_v36 = vld [vmem:[#allocation2 + $0x188] sm:$0xff]  ;;  %v8075_v40 = vcombine.low %v475_v27, %v479_v28 }
  0x3d   :  { %8584 = vmatprep.subr.bf16.mxu0 %v8774_v10  ;;  %8671 = vmatprep.subr.bf16.mxu1 %v12939_v0  ;;  %v466_v33 = vld [vmem:[#allocation2 + $0x180] sm:$0xff]  ;;  %v471_v37 = vld [vmem:[#allocation2 + $0x1a8] sm:$0xff] }
  0x3e   :  { %v470_v34 = vld [vmem:[#allocation2 + $0x1a0] sm:$0xff]  ;;  %v8791_v38 = vld [vmem:[%s12925_s0 + $0x8] ss:$0 sps:$4 sm:$0xff]   ;;  %v8068_v42 = vcombine.high %v467_v36, %v471_v37  ;;  %v8067_v48 = vcombine.low %v467_v36, %v471_v37 }
  0x3f   :  { %v8066_v41 = vcombine.high %v466_v33, %v470_v34  ;;  %v458_v43 = vld [vmem:[#allocation2 + $0x140] sm:$0xff]  ;;  %v459_v45 = vld [vmem:[#allocation2 + $0x148] sm:$0xff]  ;;  %v8065_v47 = vcombine.low %v466_v33, %v470_v34 }
  0x40   :  { %8585 = vmatpush3.bf16.msra.mxu0 %v8775_v11  ;;  %8672 = vmatpush3.bf16.msra.mxu1 %v8776_v12  ;;  %v462_v44 = vld [vmem:[#allocation2 + $0x160] sm:$0xff]  ;;  %v463_v46 = vld [vmem:[#allocation2 + $0x168] sm:$0xff] }
  0x41   :  { %8586 = vmatprep.subr.bf16.mxu0 %v8777_v13  ;;  %8673 = vmatprep.subr.bf16.mxu1 %v12939_v0  ;;  %v8058_v49 = vcombine.high %v458_v43, %v462_v44  ;;  %v8060_v50 = vcombine.high %v459_v45, %v463_v46  ;;  %v450_v51 = vld [vmem:[#allocation2 + $0x100] sm:$0xff]  ;;  %v451_v53 = vld [vmem:[#allocation2 + $0x108] sm:$0xff]  ;;  %v8057_v55 = vcombine.low %v458_v43, %v462_v44 }
  0x42   :  { %v454_v52 = vld [vmem:[#allocation2 + $0x120] sm:$0xff]  ;;  %v455_v54 = vld [vmem:[#allocation2 + $0x128] sm:$0xff]  ;;  %v8059_v58 = vcombine.low %v459_v45, %v463_v46 }
  0x43   :  { %v442_v56 = vld [vmem:[#allocation2 + $0xc0] sm:$0xff]  ;;  %v8050_v59 = vcombine.high %v450_v51, %v454_v52  ;;  %v443_v60 = vld [vmem:[#allocation2 + $0xc8] sm:$0xff]  ;;  %v8052_v62 = vcombine.high %v451_v53, %v455_v54  ;;  %v8049_v63 = vcombine.low %v450_v51, %v454_v52  ;;  %v8051_v3 = vcombine.low %v451_v53, %v455_v54 }
  0x44   :  { %8587 = vmatpush3.bf16.msra.mxu0 %v8778_v14  ;;  %8674 = vmatpush3.bf16.msra.mxu1 %v8779_v15  ;;  %v446_v57 = vld [vmem:[#allocation2 + $0xe0] sm:$0xff]  ;;  %v447_v61 = vld [vmem:[#allocation2 + $0xe8] sm:$0xff] }
  0x45   :  { %8588 = vmatprep.subr.bf16.mxu0 %v8780_v16  ;;  %8675 = vmatprep.subr.bf16.mxu1 %v12939_v0  ;;  %v434_v1 = vld [vmem:[#allocation2 + $0x80] sm:$0xff]  ;;  %v8042_v4 = vcombine.high %v442_v56, %v446_v57  ;;  %v435_v5 = vld [vmem:[#allocation2 + $0x88] sm:$0xff]  ;;  %v8044_v7 = vcombine.high %v443_v60, %v447_v61  ;;  %v8041_v8 = vcombine.low %v442_v56, %v446_v57 }
  0x46   :  { %v438_v2 = vld [vmem:[#allocation2 + $0xa0] sm:$0xff]  ;;  %v439_v6 = vld [vmem:[#allocation2 + $0xa8] sm:$0xff]  ;;  %v8043_v11 = vcombine.low %v443_v60, %v447_v61 }
  0x47   :  { %v426_v9 = vld [vmem:[#allocation2 + $0x40] sm:$0xff]  ;;  %v8034_v12 = vcombine.high %v434_v1, %v438_v2  ;;  %v8036_v13 = vcombine.high %v435_v5, %v439_v6  ;;  %v427_v14 = vld [vmem:[#allocation2 + $0x48] sm:$0xff]  ;;  %v8033_v16 = vcombine.low %v434_v1, %v438_v2 }
  0x48   :  { %8589 = vmatpush3.bf16.msra.mxu0 %v8781_v17  ;;  %8676 = vmatpush3.bf16.msra.mxu1 %v8782_v18  ;;  %v430_v10 = vld [vmem:[#allocation2 + $0x60] sm:$0xff]  ;;  %v431_v15 = vld [vmem:[#allocation2 + $0x68] sm:$0xff]  ;;  %v8035_v17 = vcombine.low %v435_v5, %v439_v6 }
  0x49   :  { %8590 = vmatprep.subr.bf16.mxu0 %v8783_v19  ;;  %8677 = vmatprep.subr.bf16.mxu1 %v12939_v0  ;;  %v8026_v18 = vcombine.high %v426_v9, %v430_v10  ;;  %v8028_v19 = vcombine.high %v427_v14, %v431_v15  ;;  %v423_v23 = vld [vmem:[#allocation2 + $0x28] sm:$0xff]  ;;  %v8025_v24 = vcombine.low %v426_v9, %v430_v10  ;;  %v538_v28 = vld [vmem:[#allocation2 + $0x3c0] sm:$0xff] }
  0x4a   :  { %v8027_v25 = vcombine.low %v427_v14, %v431_v15  ;;  %v530_v36 = vld [vmem:[#allocation2 + $0x380] sm:$0xff]  ;;  %v523_v46 = vld [vmem:[#allocation2 + $0x348] sm:$0xff] }
  0x4b   :  { %v534_v37 = vld [vmem:[#allocation2 + $0x3a0] sm:$0xff]  ;;  %v515_v56 = vld [vmem:[#allocation2 + $0x308] sm:$0xff] }
  0x4c   :  { %8591 = vmatpush3.bf16.msra.mxu0 %v8784_v20  ;;  %8678 = vmatpush3.bf16.msra.mxu1 %v8785_v21  ;;  %v418_v20 = vld [vmem:[#allocation2] sm:$0xff]  ;;  %v507_v1 = vld [vmem:[#allocation2 + $0x2c8] sm:$0xff] }
  0x4d   :  { %8592 = vmatprep.subr.bf16.mxu0 %v8786_v22  ;;  %8679 = vmatprep.subr.bf16.mxu1 %v12939_v0  ;;  %v422_v21 = vld [vmem:[#allocation2 + $0x20] sm:$0xff]  ;;  %v419_v22 = vld [vmem:[#allocation2 + $0x8] sm:$0xff] }
  0x4e   :  { %v8018_v26 = vcombine.high %v418_v20, %v422_v21  ;;  %v8020_v27 = vcombine.high %v419_v22, %v423_v23  ;;  %v8019_v33 = vcombine.low %v419_v22, %v423_v23  ;;  %v522_v44 = vld [vmem:[#allocation2 + $0x340] sm:$0xff]  ;;  %v499_v9 = vld [vmem:[#allocation2 + $0x288] sm:$0xff] }
  0x4f   :  { %v526_v45 = vld [vmem:[#allocation2 + $0x360] sm:$0xff]  ;;  %v483_v23 = vld [vmem:[#allocation2 + $0x208] sm:$0xff] }
  0x50   :  { %8593 = vmatpush3.bf16.msra.mxu0 %v8787_v29  ;;  %8680 = vmatpush3.bf16.msra.mxu1 %v8788_v30  ;;  %v542_v29 = vld [vmem:[#allocation2 + $0x3e0] sm:$0xff]  ;;  %v539_v30 = vld [vmem:[#allocation2 + $0x3c8] sm:$0xff]  ;;  %v8121_v52 = vcombine.low %v522_v44, %v526_v45 }
  0x51   :  { %1228 = vmatprep.subr.bf16.mxu0 %v8074_v31  ;;  %1269 = vmatprep.subr.bf16.mxu1 %v8076_v32  ;;  %v543_v31 = vld [vmem:[#allocation2 + $0x3e8] sm:$0xff]  ;;  %v8017_v32 = vcombine.low %v418_v20, %v422_v21  ;;  %v8138_v34 = vcombine.high %v538_v28, %v542_v29  ;;  %v514_v54 = vld [vmem:[#allocation2 + $0x300] sm:$0xff] }
  0x52   :  { %v494_v14 = vld [vmem:[#allocation2 + $0x260] sm:$0xff]  ;;  %v1473_v0 = vld [vmem:[#allocation5 + $0x288] sm:$0xff] }
  0x53   :  { %346 = vmatmul.mubr.bf16.vlgmr.msra.gmra.mxu0 %v7990_v35  ;;  %8682 = vmatmul.mubr.bf16.vlgmr.msra.gmra.mxu1 %v8791_v38  ;;  %v8140_v35 = vcombine.high %v539_v30, %v543_v31  ;;  %v531_v38 = vld [vmem:[#allocation2 + $0x388] sm:$0xff]  ;;  %v482_v20 = vld [vmem:[#allocation2 + $0x200] sm:$0xff] }
  0x54   :  { %1229 = vmatpush1.bf16.msra.mxu0 %v8073_v39  ;;  %1270 = vmatpush1.bf16.msra.mxu1 %v8075_v40  ;;  %v535_v39 = vld [vmem:[#allocation2 + $0x3a8] sm:$0xff]  ;;  %v8137_v40 = vcombine.low %v538_v28, %v542_v29  ;;  %v486_v22 = vld [vmem:[#allocation2 + $0x220] sm:$0xff] }
  0x55   :  { %1230 = vmatprep.subr.bf16.mxu0 %v8066_v41  ;;  %1271 = vmatprep.subr.bf16.mxu1 %v8068_v42  ;;  %v8139_v41 = vcombine.low %v539_v30, %v543_v31  ;;  %v8130_v42 = vcombine.high %v530_v36, %v534_v37  ;;  %v8132_v43 = vcombine.high %v531_v38, %v535_v39  ;;  %v476_v31 = vld [vmem:[#allocation2 + $0x1d0] sm:$0xff] }
  0x56   :  { %v8081_v29 = vcombine.low %v482_v20, %v486_v22 }
  0x58   :  { %1231 = vmatpush1.bf16.msra.mxu0 %v8065_v47  ;;  %1272 = vmatpush1.bf16.msra.mxu1 %v8067_v48  ;;  %v527_v47 = vld [vmem:[#allocation2 + $0x368] sm:$0xff]  ;;  %v8129_v48 = vcombine.low %v530_v36, %v534_v37 }
  0x59   :  { %1232 = vmatprep.subr.bf16.mxu0 %v8058_v49  ;;  %1273 = vmatprep.subr.bf16.mxu1 %v8060_v50  ;;  %v8131_v49 = vcombine.low %v531_v38, %v535_v39  ;;  %v8122_v50 = vcombine.high %v522_v44, %v526_v45  ;;  %v8124_v51 = vcombine.high %v523_v46, %v527_v47 }
  0x5a   :  { %v8123_v53 = vcombine.low %v523_v46, %v527_v47 }
  0x5c   :  { %1233 = vmatpush1.bf16.msra.mxu0 %v8057_v55  ;;  %1274 = vmatpush1.bf16.msra.mxu1 %v8059_v58  ;;  %v518_v55 = vld [vmem:[#allocation2 + $0x320] sm:$0xff]  ;;  %v519_v58 = vld [vmem:[#allocation2 + $0x328] sm:$0xff] }
  0x5d   :  { %1234 = vmatprep.subr.bf16.mxu0 %v8050_v59  ;;  %1275 = vmatprep.subr.bf16.mxu1 %v8052_v62  ;;  %v8114_v57 = vcombine.high %v514_v54, %v518_v55  ;;  %v8113_v59 = vcombine.low %v514_v54, %v518_v55  ;;  %v8115_v60 = vcombine.low %v515_v56, %v519_v58  ;;  %v506_v62 = vld [vmem:[#allocation2 + $0x2c0] sm:$0xff] }
  0x5e   :  { %v8116_v61 = vcombine.high %v515_v56, %v519_v58 }
  0x60   :  { %1235 = vmatpush1.bf16.msra.mxu0 %v8049_v63  ;;  %1276 = vmatpush1.bf16.msra.mxu1 %v8051_v3  ;;  %v510_v63 = vld [vmem:[#allocation2 + $0x2e0] sm:$0xff]  ;;  %v511_v3 = vld [vmem:[#allocation2 + $0x2e8] sm:$0xff] }
  0x61   :  { %1236 = vmatprep.subr.bf16.mxu0 %v8042_v4  ;;  %1277 = vmatprep.subr.bf16.mxu1 %v8044_v7  ;;  %v8106_v2 = vcombine.high %v506_v62, %v510_v63  ;;  %v8105_v4 = vcombine.low %v506_v62, %v510_v63  ;;  %v8107_v5 = vcombine.low %v507_v1, %v511_v3  ;;  %v498_v7 = vld [vmem:[#allocation2 + $0x280] sm:$0xff]  ;;  %v472_v63 = vld [vmem:[#allocation2 + $0x1b0] sm:$0xff] }
  0x62   :  { %v8108_v6 = vcombine.high %v507_v1, %v511_v3  ;;  %v469_v1 = vld [vmem:[#allocation2 + $0x198] sm:$0xff] }
  0x64   :  { %1237 = vmatpush1.bf16.msra.mxu0 %v8041_v8  ;;  %1278 = vmatpush1.bf16.msra.mxu1 %v8043_v11  ;;  %v502_v8 = vld [vmem:[#allocation2 + $0x2a0] sm:$0xff] }
  0x65   :  { %1238 = vmatprep.subr.bf16.mxu0 %v8034_v12  ;;  %1279 = vmatprep.subr.bf16.mxu1 %v8036_v13  ;;  %v8097_v10 = vcombine.low %v498_v7, %v502_v8  ;;  %v8098_v11 = vcombine.high %v498_v7, %v502_v8  ;;  %v503_v12 = vld [vmem:[#allocation2 + $0x2a8] sm:$0xff]  ;;  %v490_v13 = vld [vmem:[#allocation2 + $0x240] sm:$0xff]  ;;  %v464_v8 = vld [vmem:[#allocation2 + $0x170] sm:$0xff] }
  0x66   :  { %v8099_v15 = vcombine.low %v499_v9, %v503_v12 }
  0x68   :  { %1239 = vmatpush1.bf16.msra.mxu0 %v8033_v16  ;;  %1280 = vmatpush1.bf16.msra.mxu1 %v8035_v17  ;;  %v8100_v16 = vcombine.high %v499_v9, %v503_v12  ;;  %v8090_v17 = vcombine.high %v490_v13, %v494_v14  ;;  %v461_v9 = vld [vmem:[#allocation2 + $0x158] sm:$0xff] }
  0x69   :  { %1240 = vmatprep.subr.bf16.mxu0 %v8026_v18  ;;  %1281 = vmatprep.subr.bf16.mxu1 %v8028_v19  ;;  %v491_v18 = vld [vmem:[#allocation2 + $0x248] sm:$0xff] }
  0x6a   :  { %v495_v19 = vld [vmem:[#allocation2 + $0x268] sm:$0xff] }
  0x6b   :  { %v8092_v21 = vcombine.high %v491_v18, %v495_v19 }
  0x6c   :  { %1241 = vmatpush1.bf16.msra.mxu0 %v8025_v24  ;;  %1282 = vmatpush1.bf16.msra.mxu1 %v8027_v25  ;;  %v487_v24 = vld [vmem:[#allocation2 + $0x228] sm:$0xff]  ;;  %v8089_v25 = vcombine.low %v490_v13, %v494_v14 }
  0x6d   :  { %1242 = vmatprep.subr.bf16.mxu0 %v8018_v26  ;;  %1283 = vmatprep.subr.bf16.mxu1 %v8020_v27  ;;  %v8091_v26 = vcombine.low %v491_v18, %v495_v19  ;;  %v8082_v27 = vcombine.high %v482_v20, %v486_v22  ;;  %v8084_v28 = vcombine.high %v483_v23, %v487_v24  ;;  %v457_v18 = vld [vmem:[#allocation2 + $0x138] sm:$0xff] }
  0x6e   :  { %v8083_v30 = vcombine.low %v483_v23, %v487_v24  ;;  %v444_v23 = vld [vmem:[#allocation2 + $0xd0] sm:$0xff] }
  0x6f   :  { %v448_v24 = vld [vmem:[#allocation2 + $0xf0] sm:$0xff] }
  0x70   :  { %1243 = vmatpush1.bf16.msra.mxu0 %v8017_v32  ;;  %1284 = vmatpush1.bf16.msra.mxu1 %v8019_v33  ;;  %v480_v32 = vld [vmem:[#allocation2 + $0x1f0] sm:$0xff]  ;;  %v477_v33 = vld [vmem:[#allocation2 + $0x1d8] sm:$0xff] }
  0x71   :  { %1244 = vmatprep.subr.bf16.mxu0 %v8138_v34  ;;  %1285 = vmatprep.subr.bf16.mxu1 %v8140_v35  ;;  %v8078_v34 = vcombine.high %v476_v31, %v480_v32  ;;  %v481_v35 = vld [vmem:[#allocation2 + $0x1f8] sm:$0xff]  ;;  %v8077_v36 = vcombine.low %v476_v31, %v480_v32  ;;  %v436_v31 = vld [vmem:[#allocation2 + $0x90] sm:$0xff] }
  0x72   :  { %v8079_v37 = vcombine.low %v477_v33, %v481_v35  ;;  %v8080_v38 = vcombine.high %v477_v33, %v481_v35  ;;  %v440_v32 = vld [vmem:[#allocation2 + $0xb0] sm:$0xff]  ;;  %v437_v33 = vld [vmem:[#allocation2 + $0x98] sm:$0xff]  ;;  %v8045_v35 = vcombine.low %v444_v23, %v448_v24 }
  0x74   :  { %1245 = vmatpush2.bf16.msra.mxu0 %v8137_v40  ;;  %1286 = vmatpush2.bf16.msra.mxu1 %v8139_v41  ;;  %v7989_v41 = vld [vmem:[%s12927_s2] ss:$0 sm:$0xff] }
  0x75   :  { %1246 = vmatprep.subr.bf16.mxu0 %v8130_v42  ;;  %1287 = vmatprep.subr.bf16.mxu1 %v8132_v43 }
  0x78   :  { %1247 = vmatpush2.bf16.msra.mxu0 %v8129_v48  ;;  %1288 = vmatpush2.bf16.msra.mxu1 %v8131_v49 }
  0x79   :  { %1248 = vmatprep.subr.bf16.mxu0 %v8122_v50  ;;  %1289 = vmatprep.subr.bf16.mxu1 %v8124_v51 }
  0x7c   :  { %1249 = vmatpush2.bf16.msra.mxu0 %v8121_v52  ;;  %1290 = vmatpush2.bf16.msra.mxu1 %v8123_v53 }
  0x7d   :  { %1250 = vmatprep.subr.bf16.mxu0 %v8114_v57  ;;  %1291 = vmatprep.subr.bf16.mxu1 %v8116_v61  ;;  %v468_v61 = vld [vmem:[#allocation2 + $0x190] sm:$0xff] }
  0x80   :  { %1251 = vmatpush2.bf16.msra.mxu0 %v8113_v59  ;;  %1292 = vmatpush2.bf16.msra.mxu1 %v8115_v60 }
  0x81   :  { %1252 = vmatprep.subr.bf16.mxu0 %v8106_v2  ;;  %1293 = vmatprep.subr.bf16.mxu1 %v8108_v6  ;;  %v473_v2 = vld [vmem:[#allocation2 + $0x1b8] sm:$0xff]  ;;  %v8070_v6 = vcombine.high %v468_v61, %v472_v63 }
  0x82   :  { %v8072_v7 = vcombine.high %v469_v1, %v473_v2  ;;  %v8071_v12 = vcombine.low %v469_v1, %v473_v2  ;;  %v532_v2 = vld [vmem:[#allocation2 + $0x390] sm:$0xff] }
  0x84   :  { %1253 = vmatpush2.bf16.msra.mxu0 %v8105_v4  ;;  %1294 = vmatpush2.bf16.msra.mxu1 %v8107_v5  ;;  %v460_v5 = vld [vmem:[#allocation2 + $0x150] sm:$0xff] }
  0x85   :  { %1254 = vmatprep.subr.bf16.mxu0 %v8098_v11  ;;  %1295 = vmatprep.subr.bf16.mxu1 %v8100_v16  ;;  %v8069_v11 = vcombine.low %v468_v61, %v472_v63  ;;  %v8062_v13 = vcombine.high %v460_v5, %v464_v8  ;;  %v456_v16 = vld [vmem:[#allocation2 + $0x130] sm:$0xff]  ;;  %v8061_v19 = vcombine.low %v460_v5, %v464_v8  ;;  %v533_v5 = vld [vmem:[#allocation2 + $0x398] sm:$0xff] }
  0x88   :  { %1255 = vmatpush2.bf16.msra.mxu0 %v8097_v10  ;;  %1296 = vmatpush2.bf16.msra.mxu1 %v8099_v15  ;;  %v465_v10 = vld [vmem:[#allocation2 + $0x178] sm:$0xff]  ;;  %v452_v15 = vld [vmem:[#allocation2 + $0x110] sm:$0xff] }
  0x89   :  { %1256 = vmatprep.subr.bf16.mxu0 %v8090_v17  ;;  %1297 = vmatprep.subr.bf16.mxu1 %v8092_v21  ;;  %v8064_v14 = vcombine.high %v461_v9, %v465_v10  ;;  %v453_v17 = vld [vmem:[#allocation2 + $0x118] sm:$0xff]  ;;  %v8063_v20 = vcombine.low %v461_v9, %v465_v10  ;;  %v8054_v21 = vcombine.high %v452_v15, %v456_v16 }
  0x8a   :  { %v8056_v22 = vcombine.high %v453_v17, %v457_v18 }
  0x8c   :  { %1257 = vmatpush2.bf16.msra.mxu0 %v8089_v25  ;;  %1298 = vmatpush2.bf16.msra.mxu1 %v8091_v26  ;;  %v445_v25 = vld [vmem:[#allocation2 + $0xd8] sm:$0xff] }
  0x8d   :  { %1258 = vmatprep.subr.bf16.mxu0 %v8082_v27  ;;  %1299 = vmatprep.subr.bf16.mxu1 %v8084_v28  ;;  %v449_v26 = vld [vmem:[#allocation2 + $0xf8] sm:$0xff]  ;;  %v8053_v27 = vcombine.low %v452_v15, %v456_v16  ;;  %v8055_v28 = vcombine.low %v453_v17, %v457_v18 }
  0x90   :  { %1259 = vmatpush2.bf16.msra.mxu0 %v8081_v29  ;;  %1300 = vmatpush2.bf16.msra.mxu1 %v8083_v30  ;;  %v8046_v29 = vcombine.high %v444_v23, %v448_v24  ;;  %v8048_v30 = vcombine.high %v445_v25, %v449_v26 }
  0x91   :  { %1310 = vmatprep.subr.bf16.mxu0 %v8078_v34  ;;  %1351 = vmatprep.subr.bf16.mxu1 %v8080_v38  ;;  %v441_v34 = vld [vmem:[#allocation2 + $0xb8] sm:$0xff] }
  0x92   :  { %v8040_v38 = vcombine.high %v437_v33, %v441_v34 }
 0x113   :  { %v8594_v39 = vpop.f32.mrf.mxu0  ;;  %v387_v40 = vpop.f32.mrf.mxu1 }
 0x115   :  { %v8595_v42 = vpop.f32.mrf.mxu0  ;;  %v8683_v44 = vpop.f32.mrf.mxu1 }
 0x116   :  { %v8596_v43 = vadd.f32 %v8595_v42, %v8594_v39  ;;  %v428_v39 = vld [vmem:[#allocation2 + $0x50] sm:$0xff]  ;;  %v433_v42 = vld [vmem:[#allocation2 + $0x78] sm:$0xff]  ;;  %v8039_v44 = vcombine.low %v437_v33, %v441_v34 }
 0x117   :  { %v8597_v45 = vpop.f32.mrf.mxu0  ;;  %v390_v47 = vpop.f32.mrf.mxu1 }
 0x118   :  { %v348_v46 = vadd.f32 %v8596_v43, %v7989_v41  ;;  %v429_v41 = vld [vmem:[#allocation2 + $0x58] sm:$0xff]  ;;  %v8037_v43 = vcombine.low %v436_v31, %v440_v32  ;;  %v420_v47 = vld [vmem:[#allocation2 + $0x10] sm:$0xff] }
 0x119   :  { %v8598_v48 = vpop.f32.mrf.mxu0  ;;  %v8684_v50 = vpop.f32.mrf.mxu1 }
 0x11a   :  { %v9627_v49 = vadd.f32 %v387_v40, %v348_v46  ;;  %v432_v40 = vld [vmem:[#allocation2 + $0x70] sm:$0xff]  ;;  %v8032_v46 = vcombine.high %v429_v41, %v433_v42  ;;  %v421_v50 = vld [vmem:[#allocation2 + $0x18] sm:$0xff] }
 0x11b   :  { %v8030_v45 = vcombine.high %v428_v39, %v432_v40  ;;  %v424_v48 = vld [vmem:[#allocation2 + $0x30] sm:$0xff] }
 0x11c   :  { %13510 = vst [vmem:[#allocation15_spill] sm:$0xff] %v9627_v49  ;;  %v394_v51 = vrot.slane %v9627_v49, 7  ;;  %v396_v52 = vrot.slane %v9627_v49, 5  ;;  %v398_v53 = vrot.slane %v9627_v49, 3  ;;  %v400_v54 = vrot.slane %v9627_v49, 1 }
 0x11d   :  { %v9646_v4 = vpack.c.bf16 %v9627_v49, %v9627_v49  ;;  %v1468_v49 = vld [vmem:[#allocation5 + $0x260] sm:$0xff] }
 0x11e   :  { %v403_v55 = vsel %vm402_vm1, %v394_v51, %v396_v52 }
 0x11f   :  { %v405_v56 = vsel %vm404_vm2, %v403_v55, %v398_v53 }
 0x120   :  { %v407_v57 = vsel %vm406_vm3, %v405_v56, %v400_v54  ;;  %v540_v56 = vld [vmem:[#allocation2 + $0x3d0] sm:$0xff] }
 0x121   :  { %v409_v58 = vsel %vm408_vm4, %v407_v57, %v394_v51  ;;  %v425_v51 = vld [vmem:[#allocation2 + $0x38] sm:$0xff]  ;;  %v544_v57 = vld [vmem:[#allocation2 + $0x3f0] sm:$0xff] }
 0x122   :  { %v411_v59 = vsel %vm410_vm5, %v409_v58, %v396_v52  ;;  %v8029_v52 = vcombine.low %v428_v39, %v432_v40  ;;  %v8024_v55 = vcombine.high %v421_v50, %v425_v51  ;;  %v541_v58 = vld [vmem:[#allocation2 + $0x3d8] sm:$0xff]  ;;  %v8023_v61 = vcombine.low %v421_v50, %v425_v51 }
 0x123   :  { %v413_v60 = vsel %vm412_vm6, %v411_v59, %v398_v53  ;;  %v8031_v53 = vcombine.low %v429_v41, %v433_v42  ;;  %v545_v59 = vld [vmem:[#allocation2 + $0x3f8] sm:$0xff]  ;;  %v8142_v63 = vcombine.high %v540_v56, %v544_v57 }
 0x124   :  { %v9640_v62 = vsel %vm414_vm7, %v413_v60, %v400_v54  ;;  %v8022_v54 = vcombine.high %v420_v47, %v424_v48  ;;  %v8021_v60 = vcombine.low %v420_v47, %v424_v48  ;;  %v8144_v1 = vcombine.high %v541_v58, %v545_v59 }
 0x125   :  { %13511 = vst [vmem:[#allocation16_spill] sm:$0xff] %v9640_v62  ;;  %v417_v3 = vpack.c.bf16 %v9640_v62, %v9640_v62  ;;  %v8143_v8 = vcombine.low %v541_v58, %v545_v59  ;;  %v1464_v62 = vld [vmem:[#allocation5 + $0x240] sm:$0xff] }
 0x127   :  { %1260 = vmatprep.mubr.bf16.mxu0 %v417_v3  ;;  %1301 = vmatprep.mubr.bf16.mxu1 %v417_v3 }
 0x128   :  { %1261 = vmatmul.mubr.bf16.vlgmr.msra.gmra.mxu0 %v9646_v4  ;;  %1302 = vmatmul.mubr.bf16.vlgmr.msra.gmra.mxu1 %v9646_v4 }
 0x129   :  { %1311 = vmatpush1.bf16.msra.mxu0 %v8077_v36  ;;  %1352 = vmatpush1.bf16.msra.mxu1 %v8079_v37  ;;  %v8047_v36 = vcombine.low %v445_v25, %v449_v26  ;;  %v8038_v37 = vcombine.high %v436_v31, %v440_v32 }
 0x12a   :  { %1342 = vmatprep.mubr.bf16.mxu0 %v417_v3  ;;  %1383 = vmatprep.mubr.bf16.mxu1 %v417_v3  ;;  %v536_v3 = vld [vmem:[#allocation2 + $0x3b0] sm:$0xff] }
 0x12b   :  { %1312 = vmatprep.subr.bf16.mxu0 %v8070_v6  ;;  %1353 = vmatprep.subr.bf16.mxu1 %v8072_v7  ;;  %v537_v6 = vld [vmem:[#allocation2 + $0x3b8] sm:$0xff]  ;;  %v8141_v7 = vcombine.low %v540_v56, %v544_v57  ;;  %v8134_v9 = vcombine.high %v532_v2, %v536_v3  ;;  %v8133_v15 = vcombine.low %v532_v2, %v536_v3 }
 0x12c   :  { %v8136_v10 = vcombine.high %v533_v5, %v537_v6  ;;  %v8135_v16 = vcombine.low %v533_v5, %v537_v6 }
 0x12d   :  { %1313 = vmatpush1.bf16.msra.mxu0 %v8069_v11  ;;  %1354 = vmatpush1.bf16.msra.mxu1 %v8071_v12  ;;  %v524_v11 = vld [vmem:[#allocation2 + $0x350] sm:$0xff] }
 0x12e   :  { %1314 = vmatprep.subr.bf16.mxu0 %v8062_v13  ;;  %1355 = vmatprep.subr.bf16.mxu1 %v8064_v14  ;;  %v528_v12 = vld [vmem:[#allocation2 + $0x370] sm:$0xff]  ;;  %v525_v13 = vld [vmem:[#allocation2 + $0x358] sm:$0xff] }
 0x12f   :  { %v529_v14 = vld [vmem:[#allocation2 + $0x378] sm:$0xff]  ;;  %v8126_v17 = vcombine.high %v524_v11, %v528_v12  ;;  %v8125_v23 = vcombine.low %v524_v11, %v528_v12 }
 0x130   :  { %v8128_v18 = vcombine.high %v525_v13, %v529_v14  ;;  %v8127_v24 = vcombine.low %v525_v13, %v529_v14 }
 0x131   :  { %1315 = vmatpush1.bf16.msra.mxu0 %v8061_v19  ;;  %1356 = vmatpush1.bf16.msra.mxu1 %v8063_v20  ;;  %v516_v19 = vld [vmem:[#allocation2 + $0x310] sm:$0xff] }
 0x132   :  { %1316 = vmatprep.subr.bf16.mxu0 %v8054_v21  ;;  %1357 = vmatprep.subr.bf16.mxu1 %v8056_v22  ;;  %v520_v20 = vld [vmem:[#allocation2 + $0x330] sm:$0xff]  ;;  %v517_v21 = vld [vmem:[#allocation2 + $0x318] sm:$0xff] }
 0x133   :  { %v521_v22 = vld [vmem:[#allocation2 + $0x338] sm:$0xff]  ;;  %v8118_v25 = vcombine.high %v516_v19, %v520_v20  ;;  %v8117_v31 = vcombine.low %v516_v19, %v520_v20 }
 0x134   :  { %v8120_v26 = vcombine.high %v517_v21, %v521_v22  ;;  %v8119_v32 = vcombine.low %v517_v21, %v521_v22 }
 0x135   :  { %1317 = vmatpush1.bf16.msra.mxu0 %v8053_v27  ;;  %1358 = vmatpush1.bf16.msra.mxu1 %v8055_v28  ;;  %v508_v27 = vld [vmem:[#allocation2 + $0x2d0] sm:$0xff] }
 0x136   :  { %1318 = vmatprep.subr.bf16.mxu0 %v8046_v29  ;;  %1359 = vmatprep.subr.bf16.mxu1 %v8048_v30  ;;  %v512_v28 = vld [vmem:[#allocation2 + $0x2f0] sm:$0xff]  ;;  %v509_v29 = vld [vmem:[#allocation2 + $0x2d8] sm:$0xff] }
 0x137   :  { %v513_v30 = vld [vmem:[#allocation2 + $0x2f8] sm:$0xff]  ;;  %v8110_v33 = vcombine.high %v508_v27, %v512_v28  ;;  %v8109_v39 = vcombine.low %v508_v27, %v512_v28 }
 0x138   :  { %v8112_v34 = vcombine.high %v509_v29, %v513_v30  ;;  %v8111_v40 = vcombine.low %v509_v29, %v513_v30 }
 0x139   :  { %1319 = vmatpush1.bf16.msra.mxu0 %v8045_v35  ;;  %1360 = vmatpush1.bf16.msra.mxu1 %v8047_v36  ;;  %v500_v35 = vld [vmem:[#allocation2 + $0x290] sm:$0xff] }
 0x13a   :  { %1320 = vmatprep.subr.bf16.mxu0 %v8038_v37  ;;  %1361 = vmatprep.subr.bf16.mxu1 %v8040_v38  ;;  %v504_v36 = vld [vmem:[#allocation2 + $0x2b0] sm:$0xff]  ;;  %v501_v37 = vld [vmem:[#allocation2 + $0x298] sm:$0xff] }
 0x13b   :  { %v505_v38 = vld [vmem:[#allocation2 + $0x2b8] sm:$0xff]  ;;  %v8102_v41 = vcombine.high %v500_v35, %v504_v36  ;;  %v8101_v47 = vcombine.low %v500_v35, %v504_v36 }
 0x13c   :  { %v8104_v42 = vcombine.high %v501_v37, %v505_v38  ;;  %v8103_v48 = vcombine.low %v501_v37, %v505_v38 }
 0x13d   :  { %1321 = vmatpush1.bf16.msra.mxu0 %v8037_v43  ;;  %1362 = vmatpush1.bf16.msra.mxu1 %v8039_v44  ;;  %v492_v43 = vld [vmem:[#allocation2 + $0x250] sm:$0xff] }
 0x13e   :  { %1322 = vmatprep.subr.bf16.mxu0 %v8030_v45  ;;  %1363 = vmatprep.subr.bf16.mxu1 %v8032_v46  ;;  %v496_v44 = vld [vmem:[#allocation2 + $0x270] sm:$0xff]  ;;  %v493_v45 = vld [vmem:[#allocation2 + $0x258] sm:$0xff] }
 0x13f   :  { %v497_v46 = vld [vmem:[#allocation2 + $0x278] sm:$0xff]  ;;  %v8094_v50 = vcombine.high %v492_v43, %v496_v44  ;;  %v8093_v56 = vcombine.low %v492_v43, %v496_v44 }
 0x140   :  { %v8096_v51 = vcombine.high %v493_v45, %v497_v46  ;;  %v8095_v57 = vcombine.low %v493_v45, %v497_v46 }
 0x141   :  { %1323 = vmatpush1.bf16.msra.mxu0 %v8029_v52  ;;  %1364 = vmatpush1.bf16.msra.mxu1 %v8031_v53  ;;  %v484_v52 = vld [vmem:[#allocation2 + $0x210] sm:$0xff] }
 0x142   :  { %1324 = vmatprep.subr.bf16.mxu0 %v8022_v54  ;;  %1365 = vmatprep.subr.bf16.mxu1 %v8024_v55  ;;  %v488_v53 = vld [vmem:[#allocation2 + $0x230] sm:$0xff]  ;;  %v485_v54 = vld [vmem:[#allocation2 + $0x218] sm:$0xff] }
 0x143   :  { %v489_v55 = vld [vmem:[#allocation2 + $0x238] sm:$0xff]  ;;  %v8086_v58 = vcombine.high %v484_v52, %v488_v53  ;;  %v8085_v2 = vcombine.low %v484_v52, %v488_v53 }
 0x144   :  { %v8088_v59 = vcombine.high %v485_v54, %v489_v55  ;;  %v8087_v3 = vcombine.low %v485_v54, %v489_v55 }
 0x145   :  { %1325 = vmatpush1.bf16.msra.mxu0 %v8021_v60  ;;  %1366 = vmatpush1.bf16.msra.mxu1 %v8023_v61  ;;  %v1448_v60 = vld [vmem:[#allocation5 + $0x1c0] sm:$0xff] }
 0x146   :  { %1326 = vmatprep.subr.bf16.mxu0 %v8142_v63  ;;  %1367 = vmatprep.subr.bf16.mxu1 %v8144_v1  ;;  %v1452_v61 = vld [vmem:[#allocation5 + $0x1e0] sm:$0xff]  ;;  %v1449_v63 = vld [vmem:[#allocation5 + $0x1c8] sm:$0xff] }
 0x147   :  { %v1453_v1 = vld [vmem:[#allocation5 + $0x1e8] sm:$0xff]  ;;  %v9650_v5 = vcombine.high %v1448_v60, %v1452_v61  ;;  %v9654_v11 = vcombine.low %v1448_v60, %v1452_v61 }
 0x148   :  { %v9652_v6 = vcombine.high %v1449_v63, %v1453_v1  ;;  %v9656_v12 = vcombine.low %v1449_v63, %v1453_v1 }
 0x149   :  { %1327 = vmatpush2.bf16.msra.mxu0 %v8141_v7  ;;  %1368 = vmatpush2.bf16.msra.mxu1 %v8143_v8  ;;  %13512 = vst [vmem:[#allocation17_spill] sm:$0xff] %v9650_v5  ;;  %v1440_v7 = vld [vmem:[#allocation5 + $0x180] sm:$0xff]  ;;  %13514 = vst [vmem:[#allocation19_spill] sm:$0xff] %v9654_v11 }
 0x14a   :  { %1328 = vmatprep.subr.bf16.mxu0 %v8134_v9  ;;  %1369 = vmatprep.subr.bf16.mxu1 %v8136_v10  ;;  %13513 = vst [vmem:[#allocation18_spill] sm:$0xff] %v9652_v6  ;;  %v1444_v8 = vld [vmem:[#allocation5 + $0x1a0] sm:$0xff]  ;;  %v1441_v9 = vld [vmem:[#allocation5 + $0x188] sm:$0xff]  ;;  %13515 = vst [vmem:[#allocation20_spill] sm:$0xff] %v9656_v12 }
 0x14b   :  { %v1445_v10 = vld [vmem:[#allocation5 + $0x1a8] sm:$0xff]  ;;  %v9660_v13 = vcombine.high %v1440_v7, %v1444_v8  ;;  %v9668_v19 = vcombine.low %v1440_v7, %v1444_v8 }
 0x14c   :  { %v9662_v14 = vcombine.high %v1441_v9, %v1445_v10  ;;  %v9670_v20 = vcombine.low %v1441_v9, %v1445_v10  ;;  %v1513_v7 = vld [vmem:[#allocation5 + $0x3c8] sm:$0xff] }
 0x14d   :  { %1329 = vmatpush2.bf16.msra.mxu0 %v8133_v15  ;;  %1370 = vmatpush2.bf16.msra.mxu1 %v8135_v16  ;;  %13516 = vst [vmem:[#allocation21_spill] sm:$0xff] %v9660_v13  ;;  %v1432_v15 = vld [vmem:[#allocation5 + $0x140] sm:$0xff]  ;;  %13518 = vst [vmem:[#allocation23_spill] sm:$0xff] %v9668_v19  ;;  %v1517_v8 = vld [vmem:[#allocation5 + $0x3e8] sm:$0xff] }
 0x14e   :  { %1330 = vmatprep.subr.bf16.mxu0 %v8126_v17  ;;  %1371 = vmatprep.subr.bf16.mxu1 %v8128_v18  ;;  %13517 = vst [vmem:[#allocation22_spill] sm:$0xff] %v9662_v14  ;;  %v1436_v16 = vld [vmem:[#allocation5 + $0x160] sm:$0xff]  ;;  %v1433_v17 = vld [vmem:[#allocation5 + $0x148] sm:$0xff]  ;;  %13519 = vst [vmem:[#allocation24_spill] sm:$0xff] %v9670_v20 }
 0x14f   :  { %v1437_v18 = vld [vmem:[#allocation5 + $0x168] sm:$0xff]  ;;  %v9674_v21 = vcombine.high %v1432_v15, %v1436_v16  ;;  %v9682_v27 = vcombine.low %v1432_v15, %v1436_v16  ;;  %v9750_v16 = vcombine.high %v1513_v7, %v1517_v8 }
 0x150   :  { %v9676_v22 = vcombine.high %v1433_v17, %v1437_v18  ;;  %v9684_v28 = vcombine.low %v1433_v17, %v1437_v18  ;;  %v1504_v17 = vld [vmem:[#allocation5 + $0x380] sm:$0xff] }
 0x151   :  { %1331 = vmatpush2.bf16.msra.mxu0 %v8125_v23  ;;  %1372 = vmatpush2.bf16.msra.mxu1 %v8127_v24  ;;  %13520 = vst [vmem:[#allocation25_spill] sm:$0xff] %v9674_v21  ;;  %v1424_v23 = vld [vmem:[#allocation5 + $0x100] sm:$0xff]  ;;  %13522 = vst [vmem:[#allocation27_spill] sm:$0xff] %v9682_v27 }
 0x152   :  { %1332 = vmatprep.subr.bf16.mxu0 %v8118_v25  ;;  %1373 = vmatprep.subr.bf16.mxu1 %v8120_v26  ;;  %13521 = vst [vmem:[#allocation26_spill] sm:$0xff] %v9676_v22  ;;  %v1428_v24 = vld [vmem:[#allocation5 + $0x120] sm:$0xff]  ;;  %v1425_v25 = vld [vmem:[#allocation5 + $0x108] sm:$0xff]  ;;  %v12941_v26 = vmov 0   ;;  %13523 = vst [vmem:[#allocation28_spill] sm:$0xff] %v9684_v28 }
 0x153   :  { %v9688_v29 = vcombine.high %v1424_v23, %v1428_v24  ;;  %v9694_v35 = vcombine.low %v1424_v23, %v1428_v24  ;;  %13545 = vst [vmem:[#allocation50_spill] sm:$0xff] %v9750_v16  ;;  %v1508_v18 = vld [vmem:[#allocation5 + $0x3a0] sm:$0xff]  ;;  %v1505_v23 = vld [vmem:[#allocation5 + $0x388] sm:$0xff] }
 0x154   :  { %v1509_v24 = vld [vmem:[#allocation5 + $0x3a8] sm:$0xff] }
 0x155   :  { %1333 = vmatpush2.bf16.msra.mxu0 %v8117_v31  ;;  %1374 = vmatpush2.bf16.msra.mxu1 %v8119_v32  ;;  %13524 = vst [vmem:[#allocation29_spill] sm:$0xff] %v9688_v29  ;;  %v1416_v31 = vld [vmem:[#allocation5 + $0xc0] sm:$0xff]  ;;  %13526 = vst [vmem:[#allocation31_spill] sm:$0xff] %v9694_v35 }
 0x156   :  { %1334 = vmatprep.subr.bf16.mxu0 %v8110_v33  ;;  %1375 = vmatprep.subr.bf16.mxu1 %v8112_v34  ;;  %v1420_v32 = vld [vmem:[#allocation5 + $0xe0] sm:$0xff]  ;;  %v1417_v33 = vld [vmem:[#allocation5 + $0xc8] sm:$0xff] }
 0x157   :  { %v1421_v34 = vld [vmem:[#allocation5 + $0xe8] sm:$0xff]  ;;  %v9700_v37 = vcombine.high %v1416_v31, %v1420_v32  ;;  %v9706_v43 = vcombine.low %v1416_v31, %v1420_v32  ;;  %v9760_v31 = vcombine.high %v1504_v17, %v1508_v18  ;;  %v9762_v32 = vcombine.high %v1505_v23, %v1509_v24 }
 0x158   :  { %v9702_v38 = vcombine.high %v1417_v33, %v1421_v34  ;;  %v9708_v44 = vcombine.low %v1417_v33, %v1421_v34  ;;  %v1496_v33 = vld [vmem:[#allocation5 + $0x340] sm:$0xff] }
 0x159   :  { %1335 = vmatpush2.bf16.msra.mxu0 %v8109_v39  ;;  %1376 = vmatpush2.bf16.msra.mxu1 %v8111_v40  ;;  %13528 = vst [vmem:[#allocation33_spill] sm:$0xff] %v9700_v37  ;;  %v1408_v39 = vld [vmem:[#allocation5 + $0x80] sm:$0xff]  ;;  %13530 = vst [vmem:[#allocation35_spill] sm:$0xff] %v9706_v43 }
 0x15a   :  { %1336 = vmatprep.subr.bf16.mxu0 %v8102_v41  ;;  %1377 = vmatprep.subr.bf16.mxu1 %v8104_v42  ;;  %13529 = vst [vmem:[#allocation34_spill] sm:$0xff] %v9702_v38  ;;  %v1412_v40 = vld [vmem:[#allocation5 + $0xa0] sm:$0xff]  ;;  %v1409_v41 = vld [vmem:[#allocation5 + $0x88] sm:$0xff]  ;;  %13531 = vst [vmem:[#allocation36_spill] sm:$0xff] %v9708_v44 }
 0x15b   :  { %v1413_v42 = vld [vmem:[#allocation5 + $0xa8] sm:$0xff]  ;;  %v9712_v45 = vcombine.high %v1408_v39, %v1412_v40  ;;  %v9718_v52 = vcombine.low %v1408_v39, %v1412_v40  ;;  %13548 = vst [vmem:[#allocation53_spill] sm:$0xff] %v9760_v31  ;;  %13549 = vst [vmem:[#allocation54_spill] sm:$0xff] %v9762_v32  ;;  %v1500_v34 = vld [vmem:[#allocation5 + $0x360] sm:$0xff] }
 0x15c   :  { %v9714_v46 = vcombine.high %v1409_v41, %v1413_v42  ;;  %v9720_v53 = vcombine.low %v1409_v41, %v1413_v42  ;;  %v1497_v39 = vld [vmem:[#allocation5 + $0x348] sm:$0xff]  ;;  %v9766_v41 = vcombine.low %v1504_v17, %v1508_v18  ;;  %v9768_v42 = vcombine.low %v1505_v23, %v1509_v24 }
 0x15d   :  { %1337 = vmatpush2.bf16.msra.mxu0 %v8101_v47  ;;  %1378 = vmatpush2.bf16.msra.mxu1 %v8103_v48  ;;  %13532 = vst [vmem:[#allocation37_spill] sm:$0xff] %v9712_v45  ;;  %v1400_v47 = vld [vmem:[#allocation5 + $0x40] sm:$0xff]  ;;  %13534 = vst [vmem:[#allocation39_spill] sm:$0xff] %v9718_v52  ;;  %v1501_v40 = vld [vmem:[#allocation5 + $0x368] sm:$0xff] }
 0x15e   :  { %1338 = vmatprep.subr.bf16.mxu0 %v8094_v50  ;;  %1379 = vmatprep.subr.bf16.mxu1 %v8096_v51  ;;  %13533 = vst [vmem:[#allocation38_spill] sm:$0xff] %v9714_v46  ;;  %v1404_v48 = vld [vmem:[#allocation5 + $0x60] sm:$0xff]  ;;  %v1401_v50 = vld [vmem:[#allocation5 + $0x48] sm:$0xff]  ;;  %13535 = vst [vmem:[#allocation40_spill] sm:$0xff] %v9720_v53 }
 0x15f   :  { %v1405_v51 = vld [vmem:[#allocation5 + $0x68] sm:$0xff]  ;;  %v9724_v54 = vcombine.high %v1400_v47, %v1404_v48  ;;  %v9730_v60 = vcombine.low %v1400_v47, %v1404_v48  ;;  %13550 = vst [vmem:[#allocation55_spill] sm:$0xff] %v9766_v41  ;;  %13551 = vst [vmem:[#allocation56_spill] sm:$0xff] %v9768_v42  ;;  %v9772_v47 = vcombine.high %v1496_v33, %v1500_v34 }
 0x160   :  { %v9726_v55 = vcombine.high %v1401_v50, %v1405_v51  ;;  %v9732_v61 = vcombine.low %v1401_v50, %v1405_v51  ;;  %v9774_v48 = vcombine.high %v1497_v39, %v1501_v40  ;;  %v1488_v50 = vld [vmem:[#allocation5 + $0x300] sm:$0xff]  ;;  %v1481_v17 = vld [vmem:[#allocation5 + $0x2c8] sm:$0xff] }
 0x161   :  { %1339 = vmatpush2.bf16.msra.mxu0 %v8093_v56  ;;  %1380 = vmatpush2.bf16.msra.mxu1 %v8095_v57  ;;  %13536 = vst [vmem:[#allocation41_spill] sm:$0xff] %v9724_v54  ;;  %v1392_v56 = vld [vmem:[#allocation5] sm:$0xff]  ;;  %13538 = vst [vmem:[#allocation43_spill] sm:$0xff] %v9730_v60  ;;  %v1485_v18 = vld [vmem:[#allocation5 + $0x2e8] sm:$0xff] }
 0x162   :  { %1340 = vmatprep.subr.bf16.mxu0 %v8086_v58  ;;  %1381 = vmatprep.subr.bf16.mxu1 %v8088_v59  ;;  %13537 = vst [vmem:[#allocation42_spill] sm:$0xff] %v9726_v55  ;;  %v1396_v57 = vld [vmem:[#allocation5 + $0x20] sm:$0xff]  ;;  %v1393_v58 = vld [vmem:[#allocation5 + $0x8] sm:$0xff]  ;;  %13539 = vst [vmem:[#allocation44_spill] sm:$0xff] %v9732_v61 }
 0x163   :  { %v1397_v59 = vld [vmem:[#allocation5 + $0x28] sm:$0xff]  ;;  %v9736_v63 = vcombine.high %v1392_v56, %v1396_v57  ;;  %v9742_v9 = vcombine.low %v1392_v56, %v1396_v57  ;;  %13552 = vst [vmem:[#allocation57_spill] sm:$0xff] %v9772_v47  ;;  %13553 = vst [vmem:[#allocation58_spill] sm:$0xff] %v9774_v48  ;;  %v1492_v51 = vld [vmem:[#allocation5 + $0x320] sm:$0xff] }
 0x164   :  { %v9738_v1 = vcombine.high %v1393_v58, %v1397_v59  ;;  %v9744_v10 = vcombine.low %v1393_v58, %v1397_v59  ;;  %v1489_v56 = vld [vmem:[#allocation5 + $0x308] sm:$0xff]  ;;  %v9778_v58 = vcombine.low %v1496_v33, %v1500_v34  ;;  %v9780_v59 = vcombine.low %v1497_v39, %v1501_v40  ;;  %v1472_v39 = vld [vmem:[#allocation5 + $0x280] sm:$0xff] }
 0x165   :  { %1341 = vmatpush2.bf16.msra.mxu0 %v8085_v2  ;;  %1382 = vmatpush2.bf16.msra.mxu1 %v8087_v3  ;;  %13540 = vst [vmem:[#allocation45_spill] sm:$0xff] %v9736_v63  ;;  %v1512_v2 = vld [vmem:[#allocation5 + $0x3c0] sm:$0xff]  ;;  %13542 = vst [vmem:[#allocation47_spill] sm:$0xff] %v9742_v9  ;;  %v1493_v57 = vld [vmem:[#allocation5 + $0x328] sm:$0xff]  ;;  %v9790_v23 = vcombine.low %v1488_v50, %v1492_v51  ;;  %v9798_v34 = vcombine.high %v1481_v17, %v1485_v18 }
 0x166   :  { %2160 = vmatprep.subr.bf16.mxu0 %v9650_v5  ;;  %2201 = vmatprep.subr.bf16.mxu1 %v9652_v6  ;;  %13541 = vst [vmem:[#allocation46_spill] sm:$0xff] %v9738_v1  ;;  %v1516_v3 = vld [vmem:[#allocation5 + $0x3e0] sm:$0xff]  ;;  %13543 = vst [vmem:[#allocation48_spill] sm:$0xff] %v9744_v10  ;;  %v9792_v24 = vcombine.low %v1489_v56, %v1493_v57 }
 0x167   :  { %v9748_v15 = vcombine.high %v1512_v2, %v1516_v3  ;;  %13554 = vst [vmem:[#allocation59_spill] sm:$0xff] %v9778_v58  ;;  %13555 = vst [vmem:[#allocation60_spill] sm:$0xff] %v9780_v59  ;;  %v1476_v40 = vld [vmem:[#allocation5 + $0x2a0] sm:$0xff] }
 0x168   :  { %1343 = vmatmul.mubr.bf16.vlgmr.msra.gmra.mxu0 %v9646_v4  ;;  %1384 = vmatmul.mubr.bf16.vlgmr.msra.gmra.mxu1 %v9646_v4  ;;  %v1429_v4 = vld [vmem:[#allocation5 + $0x128] sm:$0xff]  ;;  %13558 = vst [vmem:[#allocation63_spill] sm:$0xff] %v9790_v23  ;;  %13559 = vst [vmem:[#allocation64_spill] sm:$0xff] %v9792_v24 }
 0x169   :  { %2161 = vmatpush1.bf16.msra.mxu0 %v9654_v11  ;;  %2202 = vmatpush1.bf16.msra.mxu1 %v9656_v12  ;;  %v9690_v30 = vcombine.high %v1425_v25, %v1429_v4  ;;  %v9696_v36 = vcombine.low %v1425_v25, %v1429_v4  ;;  %13544 = vst [vmem:[#allocation49_spill] sm:$0xff] %v9748_v15  ;;  %13561 = vst [vmem:[#allocation66_spill] sm:$0xff] %v9798_v34 }
 0x16a   :  { %2162 = vmatprep.subr.bf16.mxu0 %v9660_v13  ;;  %2203 = vmatprep.subr.bf16.mxu1 %v9662_v14  ;;  %v9754_v25 = vcombine.low %v1512_v2, %v1516_v3  ;;  %v9756_v4 = vcombine.low %v1513_v7, %v1517_v8  ;;  %v9784_v2 = vcombine.high %v1488_v50, %v1492_v51  ;;  %v1480_v7 = vld [vmem:[#allocation5 + $0x2c0] sm:$0xff] }
 0x16b   :  { %2192 = vmatprep.mubr.bf16.mxu0 %v12941_v26  ;;  %2233 = vmatprep.mubr.bf16.mxu1 %v12941_v26  ;;  %13525 = vst [vmem:[#allocation30_spill] sm:$0xff] %v9690_v30  ;;  %13527 = vst [vmem:[#allocation32_spill] sm:$0xff] %v9696_v36  ;;  %v9786_v3 = vcombine.high %v1489_v56, %v1493_v57  ;;  %v1484_v8 = vld [vmem:[#allocation5 + $0x2e0] sm:$0xff]  ;;  %v1477_v26 = vld [vmem:[#allocation5 + $0x2a8] sm:$0xff]  ;;  %v9804_v51 = vcombine.low %v1481_v17, %v1485_v18 }
 0x16c   :  { %13546 = vst [vmem:[#allocation51_spill] sm:$0xff] %v9754_v25  ;;  %13547 = vst [vmem:[#allocation52_spill] sm:$0xff] %v9756_v4  ;;  %v9796_v33 = vcombine.high %v1480_v7, %v1484_v8  ;;  %v9802_v50 = vcombine.low %v1480_v7, %v1484_v8  ;;  %v9808_v56 = vcombine.high %v1472_v39, %v1476_v40 }
 0x16d   :  { %2163 = vmatpush1.bf16.msra.mxu0 %v9668_v19  ;;  %2204 = vmatpush1.bf16.msra.mxu1 %v9670_v20  ;;  %13556 = vst [vmem:[#allocation61_spill] sm:$0xff] %v9784_v2  ;;  %13557 = vst [vmem:[#allocation62_spill] sm:$0xff] %v9786_v3  ;;  %v9810_v57 = vcombine.high %v1473_v0, %v1477_v26  ;;  %v9814_v7 = vcombine.low %v1472_v39, %v1476_v40 }
 0x16e   :  { %2164 = vmatprep.subr.bf16.mxu0 %v9674_v21  ;;  %2205 = vmatprep.subr.bf16.mxu1 %v9676_v22  ;;  %13560 = vst [vmem:[#allocation65_spill] sm:$0xff] %v9796_v33  ;;  %13562 = vst [vmem:[#allocation67_spill] sm:$0xff] %v9802_v50  ;;  %v9816_v8 = vcombine.low %v1473_v0, %v1477_v26  ;;  %v9820_v17 = vcombine.high %v1464_v62, %v1468_v49 }
 0x16f   :  { %13563 = vst [vmem:[#allocation68_spill] sm:$0xff] %v9804_v51  ;;  %13564 = vst [vmem:[#allocation69_spill] sm:$0xff] %v9808_v56  ;;  %v9826_v39 = vcombine.low %v1464_v62, %v1468_v49 }
 0x170   :  { %13565 = vst [vmem:[#allocation70_spill] sm:$0xff] %v9810_v57  ;;  %13566 = vst [vmem:[#allocation71_spill] sm:$0xff] %v9814_v7 }
 0x171   :  { %2165 = vmatpush1.bf16.msra.mxu0 %v9682_v27  ;;  %2206 = vmatpush1.bf16.msra.mxu1 %v9684_v28  ;;  %13567 = vst [vmem:[#allocation72_spill] sm:$0xff] %v9816_v8  ;;  %13568 = vst [vmem:[#allocation73_spill] sm:$0xff] %v9820_v17 }
 0x172   :  { %2166 = vmatprep.subr.bf16.mxu0 %v9688_v29  ;;  %2207 = vmatprep.subr.bf16.mxu1 %v9690_v30  ;;  %13570 = vst [vmem:[#allocation75_spill] sm:$0xff] %v9826_v39 }
 0x175   :  { %2167 = vmatpush1.bf16.msra.mxu0 %v9694_v35  ;;  %2208 = vmatpush1.bf16.msra.mxu1 %v9696_v36 }
 0x176   :  { %2168 = vmatprep.subr.bf16.mxu0 %v9700_v37  ;;  %2209 = vmatprep.subr.bf16.mxu1 %v9702_v38 }
 0x179   :  { %2169 = vmatpush1.bf16.msra.mxu0 %v9706_v43  ;;  %2210 = vmatpush1.bf16.msra.mxu1 %v9708_v44 }
 0x17a   :  { %2170 = vmatprep.subr.bf16.mxu0 %v9712_v45  ;;  %2211 = vmatprep.subr.bf16.mxu1 %v9714_v46 }
 0x17d   :  { %2171 = vmatpush1.bf16.msra.mxu0 %v9718_v52  ;;  %2212 = vmatpush1.bf16.msra.mxu1 %v9720_v53 }
 0x17e   :  { %2172 = vmatprep.subr.bf16.mxu0 %v9724_v54  ;;  %2213 = vmatprep.subr.bf16.mxu1 %v9726_v55 }
 0x181   :  { %2173 = vmatpush1.bf16.msra.mxu0 %v9730_v60  ;;  %2214 = vmatpush1.bf16.msra.mxu1 %v9732_v61 }
 0x182   :  { %2174 = vmatprep.subr.bf16.mxu0 %v9736_v63  ;;  %2215 = vmatprep.subr.bf16.mxu1 %v9738_v1 }
 0x185   :  { %2175 = vmatpush1.bf16.msra.mxu0 %v9742_v9  ;;  %2216 = vmatpush1.bf16.msra.mxu1 %v9744_v10 }
 0x186   :  { %2176 = vmatprep.subr.bf16.mxu0 %v9748_v15  ;;  %2217 = vmatprep.subr.bf16.mxu1 %v9750_v16 }
 0x189   :  { %2177 = vmatpush2.bf16.msra.mxu0 %v9754_v25  ;;  %2218 = vmatpush2.bf16.msra.mxu1 %v9756_v4 }
 0x18a   :  { %2178 = vmatprep.subr.bf16.mxu0 %v9760_v31  ;;  %2219 = vmatprep.subr.bf16.mxu1 %v9762_v32 }
 0x18d   :  { %2179 = vmatpush2.bf16.msra.mxu0 %v9766_v41  ;;  %2220 = vmatpush2.bf16.msra.mxu1 %v9768_v42 }
 0x18e   :  { %2180 = vmatprep.subr.bf16.mxu0 %v9772_v47  ;;  %2221 = vmatprep.subr.bf16.mxu1 %v9774_v48 }
 0x191   :  { %2181 = vmatpush2.bf16.msra.mxu0 %v9778_v58  ;;  %2222 = vmatpush2.bf16.msra.mxu1 %v9780_v59  ;;  %v13582_v59 = vmov 0  }
 0x192   :  { %2182 = vmatprep.subr.bf16.mxu0 %v9784_v2  ;;  %2223 = vmatprep.subr.bf16.mxu1 %v9786_v3  ;;  %v1465_v3 = vld [vmem:[#allocation5 + $0x248] sm:$0xff] }
 0x193   :  { %v1469_v2 = vld [vmem:[#allocation5 + $0x268] sm:$0xff] }
 0x194   :  { %v9822_v18 = vcombine.high %v1465_v3, %v1469_v2  ;;  %v9828_v0 = vcombine.low %v1465_v3, %v1469_v2 }
 0x195   :  { %2183 = vmatpush2.bf16.msra.mxu0 %v9790_v23  ;;  %2224 = vmatpush2.bf16.msra.mxu1 %v9792_v24  ;;  %v1457_v24 = vld [vmem:[#allocation5 + $0x208] sm:$0xff] }
 0x196   :  { %2184 = vmatprep.subr.bf16.mxu0 %v9796_v33  ;;  %2225 = vmatprep.subr.bf16.mxu1 %v9798_v34  ;;  %13569 = vst [vmem:[#allocation74_spill] sm:$0xff] %v9822_v18  ;;  %v1456_v34 = vld [vmem:[#allocation5 + $0x200] sm:$0xff]  ;;  %v1461_v23 = vld [vmem:[#allocation5 + $0x228] sm:$0xff]  ;;  %13571 = vst [vmem:[#allocation76_spill] sm:$0xff] %v9828_v0 }
 0x197   :  { %v1460_v33 = vld [vmem:[#allocation5 + $0x220] sm:$0xff]  ;;  %v9834_v40 = vcombine.high %v1457_v24, %v1461_v23  ;;  %v9840_v62 = vcombine.low %v1457_v24, %v1461_v23 }
 0x198   :  { %v9832_v26 = vcombine.high %v1456_v34, %v1460_v33  ;;  %v9838_v49 = vcombine.low %v1456_v34, %v1460_v33 }
 0x199   :  { %2185 = vmatpush2.bf16.msra.mxu0 %v9802_v50  ;;  %2226 = vmatpush2.bf16.msra.mxu1 %v9804_v51  ;;  %13573 = vst [vmem:[#allocation78_spill] sm:$0xff] %v9834_v40  ;;  %v1451_v51 = vld [vmem:[#allocation5 + $0x1d8] sm:$0xff]  ;;  %13575 = vst [vmem:[#allocation80_spill] sm:$0xff] %v9840_v62 }
 0x19a   :  { %2186 = vmatprep.subr.bf16.mxu0 %v9808_v56  ;;  %2227 = vmatprep.subr.bf16.mxu1 %v9810_v57  ;;  %13572 = vst [vmem:[#allocation77_spill] sm:$0xff] %v9832_v26  ;;  %v1450_v57 = vld [vmem:[#allocation5 + $0x1d0] sm:$0xff]  ;;  %v1455_v50 = vld [vmem:[#allocation5 + $0x1f8] sm:$0xff]  ;;  %13574 = vst [vmem:[#allocation79_spill] sm:$0xff] %v9838_v49 }
 0x19b   :  { %v1454_v56 = vld [vmem:[#allocation5 + $0x1f0] sm:$0xff]  ;;  %v9846_v3 = vcombine.high %v1451_v51, %v1455_v50  ;;  %v9852_v23 = vcombine.low %v1451_v51, %v1455_v50 }
 0x19c   :  { %v9844_v2 = vcombine.high %v1450_v57, %v1454_v56  ;;  %v9850_v33 = vcombine.low %v1450_v57, %v1454_v56 }
 0x19d   :  { %2187 = vmatpush2.bf16.msra.mxu0 %v9814_v7  ;;  %2228 = vmatpush2.bf16.msra.mxu1 %v9816_v8  ;;  %13577 = vst [vmem:[#allocation82_spill] sm:$0xff] %v9846_v3  ;;  %v1443_v8 = vld [vmem:[#allocation5 + $0x198] sm:$0xff]  ;;  %13579 = vst [vmem:[#allocation84_spill] sm:$0xff] %v9852_v23 }
 0x19e   :  { %2188 = vmatprep.subr.bf16.mxu0 %v9820_v17  ;;  %2229 = vmatprep.subr.bf16.mxu1 %v9822_v18  ;;  %13576 = vst [vmem:[#allocation81_spill] sm:$0xff] %v9844_v2  ;;  %v1442_v18 = vld [vmem:[#allocation5 + $0x190] sm:$0xff]  ;;  %v1447_v7 = vld [vmem:[#allocation5 + $0x1b8] sm:$0xff]  ;;  %13578 = vst [vmem:[#allocation83_spill] sm:$0xff] %v9850_v33 }
 0x19f   :  { %v1446_v17 = vld [vmem:[#allocation5 + $0x1b0] sm:$0xff]  ;;  %v9858_v34 = vcombine.high %v1443_v8, %v1447_v7  ;;  %v9866_v51 = vcombine.low %v1443_v8, %v1447_v7 }
 0x1a0   :  { %v9856_v24 = vcombine.high %v1442_v18, %v1446_v17  ;;  %v9864_v50 = vcombine.low %v1442_v18, %v1446_v17 }
 0x1a1   :  { %2189 = vmatpush2.bf16.msra.mxu0 %v9826_v39  ;;  %2230 = vmatpush2.bf16.msra.mxu1 %v9828_v0  ;;  %13581 = vst [vmem:[#allocation86_spill] sm:$0xff] %v9858_v34  ;;  %v1435_v0 = vld [vmem:[#allocation5 + $0x158] sm:$0xff]  ;;  %13584 = vst [vmem:[#allocation88_spill] sm:$0xff] %v9866_v51 }
 0x1a2   :  { %2190 = vmatprep.subr.bf16.mxu0 %v9832_v26  ;;  %2231 = vmatprep.subr.bf16.mxu1 %v9834_v40  ;;  %13580 = vst [vmem:[#allocation85_spill] sm:$0xff] %v9856_v24  ;;  %v1434_v40 = vld [vmem:[#allocation5 + $0x150] sm:$0xff]  ;;  %v1439_v39 = vld [vmem:[#allocation5 + $0x178] sm:$0xff]  ;;  %13583 = vst [vmem:[#allocation87_spill] sm:$0xff] %v9864_v50 }
 0x1a3   :  { %v1438_v26 = vld [vmem:[#allocation5 + $0x170] sm:$0xff]  ;;  %v9872_v57 = vcombine.high %v1435_v0, %v1439_v39  ;;  %v9880_v8 = vcombine.low %v1435_v0, %v1439_v39 }
 0x1a4   :  { %v9870_v56 = vcombine.high %v1434_v40, %v1438_v26  ;;  %v9878_v7 = vcombine.low %v1434_v40, %v1438_v26 }
 0x1a5   :  { %2191 = vmatpush2.bf16.msra.mxu0 %v9838_v49  ;;  %2232 = vmatpush2.bf16.msra.mxu1 %v9840_v62  ;;  %13586 = vst [vmem:[#allocation90_spill] sm:$0xff] %v9872_v57  ;;  %v1427_v62 = vld [vmem:[#allocation5 + $0x118] sm:$0xff]  ;;  %13588 = vst [vmem:[#allocation92_spill] sm:$0xff] %v9880_v8 }
 0x1a6   :  { %2242 = vmatprep.subr.bf16.mxu0 %v9844_v2  ;;  %2283 = vmatprep.subr.bf16.mxu1 %v9846_v3  ;;  %13585 = vst [vmem:[#allocation89_spill] sm:$0xff] %v9870_v56  ;;  %v1426_v3 = vld [vmem:[#allocation5 + $0x110] sm:$0xff]  ;;  %v1431_v49 = vld [vmem:[#allocation5 + $0x138] sm:$0xff]  ;;  %13587 = vst [vmem:[#allocation91_spill] sm:$0xff] %v9878_v7 }
 0x1a7   :  { %v1430_v2 = vld [vmem:[#allocation5 + $0x130] sm:$0xff]  ;;  %v9886_v18 = vcombine.high %v1427_v62, %v1431_v49  ;;  %v9892_v39 = vcombine.low %v1427_v62, %v1431_v49 }
 0x1a8   :  { %2193 = vmatmul.mubr.bf16.vlgmr.msra.gmra.mxu0 %v13582_v59  ;;  %2234 = vmatmul.mubr.bf16.vlgmr.msra.gmra.mxu1 %v13582_v59  ;;  %v9884_v17 = vcombine.high %v1426_v3, %v1430_v2  ;;  %v9890_v26 = vcombine.low %v1426_v3, %v1430_v2 }
 0x1a9   :  { %2243 = vmatpush1.bf16.msra.mxu0 %v9850_v33  ;;  %2284 = vmatpush1.bf16.msra.mxu1 %v9852_v23  ;;  %13590 = vst [vmem:[#allocation94_spill] sm:$0xff] %v9886_v18  ;;  %v1419_v23 = vld [vmem:[#allocation5 + $0xd8] sm:$0xff]  ;;  %13592 = vst [vmem:[#allocation96_spill] sm:$0xff] %v9892_v39 }
 0x1aa   :  { %2244 = vmatprep.subr.bf16.mxu0 %v9856_v24  ;;  %2285 = vmatprep.subr.bf16.mxu1 %v9858_v34  ;;  %13589 = vst [vmem:[#allocation93_spill] sm:$0xff] %v9884_v17  ;;  %v1418_v34 = vld [vmem:[#allocation5 + $0xd0] sm:$0xff]  ;;  %v1423_v33 = vld [vmem:[#allocation5 + $0xf8] sm:$0xff]  ;;  %13591 = vst [vmem:[#allocation95_spill] sm:$0xff] %v9890_v26 }
 0x1ab   :  { %2274 = vmatprep.mubr.bf16.mxu0 %v13582_v59  ;;  %2315 = vmatprep.mubr.bf16.mxu1 %v13582_v59  ;;  %v1422_v24 = vld [vmem:[#allocation5 + $0xf0] sm:$0xff]  ;;  %v9898_v40 = vcombine.high %v1419_v23, %v1423_v33  ;;  %v9904_v49 = vcombine.low %v1419_v23, %v1423_v33 }
 0x1ac   :  { %v9896_v0 = vcombine.high %v1418_v34, %v1422_v24  ;;  %v9902_v2 = vcombine.low %v1418_v34, %v1422_v24 }
 0x1ad   :  { %2245 = vmatpush1.bf16.msra.mxu0 %v9864_v50  ;;  %2286 = vmatpush1.bf16.msra.mxu1 %v9866_v51  ;;  %13594 = vst [vmem:[#allocation98_spill] sm:$0xff] %v9898_v40  ;;  %v1411_v51 = vld [vmem:[#allocation5 + $0x98] sm:$0xff]  ;;  %13596 = vst [vmem:[#allocation100_spill] sm:$0xff] %v9904_v49 }
 0x1ae   :  { %2246 = vmatprep.subr.bf16.mxu0 %v9870_v56  ;;  %2287 = vmatprep.subr.bf16.mxu1 %v9872_v57  ;;  %13593 = vst [vmem:[#allocation97_spill] sm:$0xff] %v9896_v0  ;;  %v1410_v57 = vld [vmem:[#allocation5 + $0x90] sm:$0xff]  ;;  %v1415_v50 = vld [vmem:[#allocation5 + $0xb8] sm:$0xff]  ;;  %13595 = vst [vmem:[#allocation99_spill] sm:$0xff] %v9902_v2 }
 0x1af   :  { %v1414_v56 = vld [vmem:[#allocation5 + $0xb0] sm:$0xff]  ;;  %v9910_v3 = vcombine.high %v1411_v51, %v1415_v50  ;;  %v9916_v33 = vcombine.low %v1411_v51, %v1415_v50 }
 0x1b0   :  { %v9908_v62 = vcombine.high %v1410_v57, %v1414_v56  ;;  %v9914_v24 = vcombine.low %v1410_v57, %v1414_v56 }
 0x1b1   :  { %2247 = vmatpush1.bf16.msra.mxu0 %v9878_v7  ;;  %2288 = vmatpush1.bf16.msra.mxu1 %v9880_v8  ;;  %13598 = vst [vmem:[#allocation102_spill] sm:$0xff] %v9910_v3  ;;  %v1403_v8 = vld [vmem:[#allocation5 + $0x58] sm:$0xff]  ;;  %13600 = vst [vmem:[#allocation104_spill] sm:$0xff] %v9916_v33 }
 0x1b2   :  { %2248 = vmatprep.subr.bf16.mxu0 %v9884_v17  ;;  %2289 = vmatprep.subr.bf16.mxu1 %v9886_v18  ;;  %13597 = vst [vmem:[#allocation101_spill] sm:$0xff] %v9908_v62  ;;  %v1402_v18 = vld [vmem:[#allocation5 + $0x50] sm:$0xff]  ;;  %v1407_v7 = vld [vmem:[#allocation5 + $0x78] sm:$0xff]  ;;  %13599 = vst [vmem:[#allocation103_spill] sm:$0xff] %v9914_v24 }
 0x1b3   :  { %v1406_v17 = vld [vmem:[#allocation5 + $0x70] sm:$0xff]  ;;  %v9922_v34 = vcombine.high %v1403_v8, %v1407_v7  ;;  %v9928_v50 = vcombine.low %v1403_v8, %v1407_v7 }
 0x1b4   :  { %v9920_v23 = vcombine.high %v1402_v18, %v1406_v17  ;;  %v9926_v56 = vcombine.low %v1402_v18, %v1406_v17 }
 0x1b5   :  { %2249 = vmatpush1.bf16.msra.mxu0 %v9890_v26  ;;  %2290 = vmatpush1.bf16.msra.mxu1 %v9892_v39  ;;  %13602 = vst [vmem:[#allocation106_spill] sm:$0xff] %v9922_v34  ;;  %v1395_v39 = vld [vmem:[#allocation5 + $0x18] sm:$0xff]  ;;  %13604 = vst [vmem:[#allocation108_spill] sm:$0xff] %v9928_v50 }
 0x1b6   :  { %2250 = vmatprep.subr.bf16.mxu0 %v9896_v0  ;;  %2291 = vmatprep.subr.bf16.mxu1 %v9898_v40  ;;  %13601 = vst [vmem:[#allocation105_spill] sm:$0xff] %v9920_v23  ;;  %v1394_v40 = vld [vmem:[#allocation5 + $0x10] sm:$0xff]  ;;  %v1399_v26 = vld [vmem:[#allocation5 + $0x38] sm:$0xff]  ;;  %13603 = vst [vmem:[#allocation107_spill] sm:$0xff] %v9926_v56 }
 0x1b7   :  { %v1398_v0 = vld [vmem:[#allocation5 + $0x30] sm:$0xff]  ;;  %v9934_v57 = vcombine.high %v1395_v39, %v1399_v26  ;;  %v9940_v7 = vcombine.low %v1395_v39, %v1399_v26 }
 0x1b8   :  { %v9932_v51 = vcombine.high %v1394_v40, %v1398_v0  ;;  %v9938_v17 = vcombine.low %v1394_v40, %v1398_v0 }
 0x1b9   :  { %2251 = vmatpush1.bf16.msra.mxu0 %v9902_v2  ;;  %2292 = vmatpush1.bf16.msra.mxu1 %v9904_v49  ;;  %13606 = vst [vmem:[#allocation110_spill] sm:$0xff] %v9934_v57  ;;  %v1515_v49 = vld [vmem:[#allocation5 + $0x3d8] sm:$0xff]  ;;  %13608 = vst [vmem:[#allocation112_spill] sm:$0xff] %v9940_v7 }
 0x1ba   :  { %2252 = vmatprep.subr.bf16.mxu0 %v9908_v62  ;;  %2293 = vmatprep.subr.bf16.mxu1 %v9910_v3  ;;  %13605 = vst [vmem:[#allocation109_spill] sm:$0xff] %v9932_v51  ;;  %v1514_v3 = vld [vmem:[#allocation5 + $0x3d0] sm:$0xff]  ;;  %v1519_v2 = vld [vmem:[#allocation5 + $0x3f8] sm:$0xff]  ;;  %13607 = vst [vmem:[#allocation111_spill] sm:$0xff] %v9938_v17 }
 0x1bb   :  { %v1518_v62 = vld [vmem:[#allocation5 + $0x3f0] sm:$0xff]  ;;  %v9946_v18 = vcombine.high %v1515_v49, %v1519_v2  ;;  %v9952_v26 = vcombine.low %v1515_v49, %v1519_v2 }
 0x1bc   :  { %v9944_v8 = vcombine.high %v1514_v3, %v1518_v62  ;;  %v9950_v0 = vcombine.low %v1514_v3, %v1518_v62 }
 0x1bd   :  { %2253 = vmatpush1.bf16.msra.mxu0 %v9914_v24  ;;  %2294 = vmatpush1.bf16.msra.mxu1 %v9916_v33  ;;  %13610 = vst [vmem:[#allocation114_spill] sm:$0xff] %v9946_v18  ;;  %v1507_v33 = vld [vmem:[#allocation5 + $0x398] sm:$0xff]  ;;  %13612 = vst [vmem:[#allocation116_spill] sm:$0xff] %v9952_v26 }
 0x1be   :  { %2254 = vmatprep.subr.bf16.mxu0 %v9920_v23  ;;  %2295 = vmatprep.subr.bf16.mxu1 %v9922_v34  ;;  %13609 = vst [vmem:[#allocation113_spill] sm:$0xff] %v9944_v8  ;;  %v1506_v34 = vld [vmem:[#allocation5 + $0x390] sm:$0xff]  ;;  %v1511_v24 = vld [vmem:[#allocation5 + $0x3b8] sm:$0xff]  ;;  %13611 = vst [vmem:[#allocation115_spill] sm:$0xff] %v9950_v0 }
 0x1bf   :  { %v1510_v23 = vld [vmem:[#allocation5 + $0x3b0] sm:$0xff]  ;;  %v9958_v40 = vcombine.high %v1507_v33, %v1511_v24  ;;  %v9964_v2 = vcombine.low %v1507_v33, %v1511_v24 }
 0x1c0   :  { %v9956_v39 = vcombine.high %v1506_v34, %v1510_v23  ;;  %v9962_v62 = vcombine.low %v1506_v34, %v1510_v23 }
 0x1c1   :  { %2255 = vmatpush1.bf16.msra.mxu0 %v9926_v56  ;;  %2296 = vmatpush1.bf16.msra.mxu1 %v9928_v50  ;;  %13614 = vst [vmem:[#allocation118_spill] sm:$0xff] %v9958_v40  ;;  %v1499_v50 = vld [vmem:[#allocation5 + $0x358] sm:$0xff]  ;;  %13616 = vst [vmem:[#allocation120_spill] sm:$0xff] %v9964_v2 }
 0x1c2   :  { %2256 = vmatprep.subr.bf16.mxu0 %v9932_v51  ;;  %2297 = vmatprep.subr.bf16.mxu1 %v9934_v57  ;;  %13613 = vst [vmem:[#allocation117_spill] sm:$0xff] %v9956_v39  ;;  %v1498_v57 = vld [vmem:[#allocation5 + $0x350] sm:$0xff]  ;;  %v1503_v56 = vld [vmem:[#allocation5 + $0x378] sm:$0xff]  ;;  %13615 = vst [vmem:[#allocation119_spill] sm:$0xff] %v9962_v62 }
 0x1c3   :  { %v1502_v51 = vld [vmem:[#allocation5 + $0x370] sm:$0xff]  ;;  %v9970_v3 = vcombine.high %v1499_v50, %v1503_v56  ;;  %v9976_v24 = vcombine.low %v1499_v50, %v1503_v56 }
 0x1c4   :  { %v9968_v49 = vcombine.high %v1498_v57, %v1502_v51  ;;  %v9974_v23 = vcombine.low %v1498_v57, %v1502_v51 }
 0x1c5   :  { %2257 = vmatpush1.bf16.msra.mxu0 %v9938_v17  ;;  %2298 = vmatpush1.bf16.msra.mxu1 %v9940_v7  ;;  %13618 = vst [vmem:[#allocation122_spill] sm:$0xff] %v9970_v3  ;;  %v1491_v7 = vld [vmem:[#allocation5 + $0x318] sm:$0xff]  ;;  %13620 = vst [vmem:[#allocation124_spill] sm:$0xff] %v9976_v24 }
 0x1c6   :  { %2258 = vmatprep.subr.bf16.mxu0 %v9944_v8  ;;  %2299 = vmatprep.subr.bf16.mxu1 %v9946_v18  ;;  %13617 = vst [vmem:[#allocation121_spill] sm:$0xff] %v9968_v49  ;;  %v1490_v18 = vld [vmem:[#allocation5 + $0x310] sm:$0xff]  ;;  %v1495_v17 = vld [vmem:[#allocation5 + $0x338] sm:$0xff]  ;;  %13619 = vst [vmem:[#allocation123_spill] sm:$0xff] %v9974_v23 }
 0x1c7   :  { %v1494_v8 = vld [vmem:[#allocation5 + $0x330] sm:$0xff]  ;;  %v9982_v34 = vcombine.high %v1491_v7, %v1495_v17  ;;  %v9988_v56 = vcombine.low %v1491_v7, %v1495_v17 }
 0x1c8   :  { %v9980_v33 = vcombine.high %v1490_v18, %v1494_v8  ;;  %v9986_v51 = vcombine.low %v1490_v18, %v1494_v8 }
 0x1c9   :  { %2259 = vmatpush2.bf16.msra.mxu0 %v9950_v0  ;;  %2300 = vmatpush2.bf16.msra.mxu1 %v9952_v26  ;;  %13622 = vst [vmem:[#allocation126_spill] sm:$0xff] %v9982_v34  ;;  %v1483_v26 = vld [vmem:[#allocation5 + $0x2d8] sm:$0xff]  ;;  %13624 = vst [vmem:[#allocation128_spill] sm:$0xff] %v9988_v56 }
 0x1ca   :  { %2260 = vmatprep.subr.bf16.mxu0 %v9956_v39  ;;  %2301 = vmatprep.subr.bf16.mxu1 %v9958_v40  ;;  %13621 = vst [vmem:[#allocation125_spill] sm:$0xff] %v9980_v33  ;;  %v1482_v40 = vld [vmem:[#allocation5 + $0x2d0] sm:$0xff]  ;;  %v1487_v0 = vld [vmem:[#allocation5 + $0x2f8] sm:$0xff]  ;;  %13623 = vst [vmem:[#allocation127_spill] sm:$0xff] %v9986_v51 }
 0x1cb   :  { %v1486_v39 = vld [vmem:[#allocation5 + $0x2f0] sm:$0xff]  ;;  %v9994_v57 = vcombine.high %v1483_v26, %v1487_v0  ;;  %v10000_v17 = vcombine.low %v1483_v26, %v1487_v0 }
 0x1cc   :  { %v9992_v50 = vcombine.high %v1482_v40, %v1486_v39  ;;  %v9998_v8 = vcombine.low %v1482_v40, %v1486_v39 }
 0x1cd   :  { %2261 = vmatpush2.bf16.msra.mxu0 %v9962_v62  ;;  %2302 = vmatpush2.bf16.msra.mxu1 %v9964_v2  ;;  %13626 = vst [vmem:[#allocation130_spill] sm:$0xff] %v9994_v57  ;;  %v1475_v2 = vld [vmem:[#allocation5 + $0x298] sm:$0xff]  ;;  %13628 = vst [vmem:[#allocation132_spill] sm:$0xff] %v10000_v17 }
 0x1ce   :  { %2262 = vmatprep.subr.bf16.mxu0 %v9968_v49  ;;  %2303 = vmatprep.subr.bf16.mxu1 %v9970_v3  ;;  %13625 = vst [vmem:[#allocation129_spill] sm:$0xff] %v9992_v50  ;;  %v1474_v3 = vld [vmem:[#allocation5 + $0x290] sm:$0xff]  ;;  %v1479_v62 = vld [vmem:[#allocation5 + $0x2b8] sm:$0xff]  ;;  %13627 = vst [vmem:[#allocation131_spill] sm:$0xff] %v9998_v8 }
 0x1cf   :  { %v1478_v49 = vld [vmem:[#allocation5 + $0x2b0] sm:$0xff]  ;;  %v10006_v18 = vcombine.high %v1475_v2, %v1479_v62  ;;  %v10012_v0 = vcombine.low %v1475_v2, %v1479_v62 }
 0x1d0   :  { %v10004_v7 = vcombine.high %v1474_v3, %v1478_v49  ;;  %v10010_v39 = vcombine.low %v1474_v3, %v1478_v49 }
 0x1d1   :  { %2263 = vmatpush2.bf16.msra.mxu0 %v9974_v23  ;;  %2304 = vmatpush2.bf16.msra.mxu1 %v9976_v24  ;;  %13630 = vst [vmem:[#allocation134_spill] sm:$0xff] %v10006_v18  ;;  %v1467_v24 = vld [vmem:[#allocation5 + $0x258] sm:$0xff]  ;;  %13632 = vst [vmem:[#allocation136_spill] sm:$0xff] %v10012_v0 }
 0x1d2   :  { %2264 = vmatprep.subr.bf16.mxu0 %v9980_v33  ;;  %2305 = vmatprep.subr.bf16.mxu1 %v9982_v34  ;;  %13629 = vst [vmem:[#allocation133_spill] sm:$0xff] %v10004_v7  ;;  %v1466_v34 = vld [vmem:[#allocation5 + $0x250] sm:$0xff]  ;;  %v1471_v23 = vld [vmem:[#allocation5 + $0x278] sm:$0xff]  ;;  %13631 = vst [vmem:[#allocation135_spill] sm:$0xff] %v10010_v39 }
 0x1d3   :  { %v1470_v33 = vld [vmem:[#allocation5 + $0x270] sm:$0xff]  ;;  %v10018_v40 = vcombine.high %v1467_v24, %v1471_v23  ;;  %v10024_v62 = vcombine.low %v1467_v24, %v1471_v23 }
 0x1d4   :  { %v10016_v26 = vcombine.high %v1466_v34, %v1470_v33  ;;  %v10022_v49 = vcombine.low %v1466_v34, %v1470_v33 }
 0x1d5   :  { %2265 = vmatpush2.bf16.msra.mxu0 %v9986_v51  ;;  %2306 = vmatpush2.bf16.msra.mxu1 %v9988_v56  ;;  %13634 = vst [vmem:[#allocation138_spill] sm:$0xff] %v10018_v40  ;;  %v1459_v56 = vld [vmem:[#allocation5 + $0x218] sm:$0xff]  ;;  %13636 = vst [vmem:[#allocation140_spill] sm:$0xff] %v10024_v62 }
 0x1d6   :  { %2266 = vmatprep.subr.bf16.mxu0 %v9992_v50  ;;  %2307 = vmatprep.subr.bf16.mxu1 %v9994_v57  ;;  %13633 = vst [vmem:[#allocation137_spill] sm:$0xff] %v10016_v26  ;;  %v1458_v57 = vld [vmem:[#allocation5 + $0x210] sm:$0xff]  ;;  %v1463_v51 = vld [vmem:[#allocation5 + $0x238] sm:$0xff]  ;;  %13635 = vst [vmem:[#allocation139_spill] sm:$0xff] %v10022_v49 }
 0x1d7   :  { %v1462_v50 = vld [vmem:[#allocation5 + $0x230] sm:$0xff]  ;;  %v10030_v3 = vcombine.high %v1459_v56, %v1463_v51 }
 0x1d8   :  { %v10028_v2 = vcombine.high %v1458_v57, %v1462_v50 }
 0x1d9   :  { %2267 = vmatpush2.bf16.msra.mxu0 %v9998_v8  ;;  %2308 = vmatpush2.bf16.msra.mxu1 %v10000_v17  ;;  %13638 = vst [vmem:[#allocation142_spill] sm:$0xff] %v10030_v3 }
 0x1da   :  { %2268 = vmatprep.subr.bf16.mxu0 %v10004_v7  ;;  %2309 = vmatprep.subr.bf16.mxu1 %v10006_v18  ;;  %13637 = vst [vmem:[#allocation141_spill] sm:$0xff] %v10028_v2  ;;  %v10034_v18 = vcombine.low %v1458_v57, %v1462_v50 }
 0x1dc   :  { %13639 = vst [vmem:[#allocation143_spill] sm:$0xff] %v10034_v18 }
 0x1dd   :  { %2269 = vmatpush2.bf16.msra.mxu0 %v10010_v39  ;;  %2310 = vmatpush2.bf16.msra.mxu1 %v10012_v0  ;;  %v10036_v39 = vcombine.low %v1459_v56, %v1463_v51 }
 0x1de   :  { %2270 = vmatprep.subr.bf16.mxu0 %v10016_v26  ;;  %2311 = vmatprep.subr.bf16.mxu1 %v10018_v40 }
 0x1df   :  { %13640 = vst [vmem:[#allocation144_spill] sm:$0xff] %v10036_v39 }
 0x1e1   :  { %2271 = vmatpush2.bf16.msra.mxu0 %v10022_v49  ;;  %2312 = vmatpush2.bf16.msra.mxu1 %v10024_v62 }
 0x1e2   :  { %2272 = vmatprep.subr.bf16.mxu0 %v10028_v2  ;;  %2313 = vmatprep.subr.bf16.mxu1 %v10030_v3 }
 0x1e5   :  { %2273 = vmatpush2.bf16.msra.mxu0 %v10034_v18  ;;  %2314 = vmatpush2.bf16.msra.mxu1 %v10036_v39 }
 0x1e6   :  { %2382 = vmatprep.subr.bf16.mxu0 %v9650_v5  ;;  %2423 = vmatprep.subr.bf16.mxu1 %v9652_v6 }
 0x1e8   :  { %2275 = vmatmul.mubr.bf16.vlgmr.msra.gmra.mxu0 %v13582_v59  ;;  %2316 = vmatmul.mubr.bf16.vlgmr.msra.gmra.mxu1 %v13582_v59  ;;  %v10046_v23 = vpop.f32.mrf.mxu0  ;;  %v10048_v24 = vpop.f32.mrf.mxu1  ;;  %v13645_v59 = vld [vmem:[#allocation64_spill] sm:$0xff] }
 0x1e9   :  { %2383 = vmatpush1.bf16.msra.mxu0 %v9654_v11  ;;  %2424 = vmatpush1.bf16.msra.mxu1 %v9656_v12 }
 0x1ea   :  { %v10052_v33 = vpop.f32.mrf.mxu0  ;;  %v10054_v34 = vpop.f32.mrf.mxu1  ;;  %2384 = vmatprep.subr.bf16.mxu0 %v9660_v13  ;;  %2425 = vmatprep.subr.bf16.mxu1 %v9662_v14 }
 0x1ec   :  { %v1266_v51 = vpop.f32.mrf.mxu0  ;;  %v1307_v56 = vpop.f32.mrf.mxu1 }
 0x1ed   :  { %2385 = vmatpush1.bf16.msra.mxu0 %v9668_v19  ;;  %2426 = vmatpush1.bf16.msra.mxu1 %v9670_v20  ;;  %v13641_v51 = vld [vmem:[#allocation60_spill] sm:$0xff]  ;;  %v13642_v56 = vld [vmem:[#allocation61_spill] sm:$0xff] }
 0x1ee   :  { %v1267_v50 = vpop.f32.mrf.mxu0  ;;  %v1308_v57 = vpop.f32.mrf.mxu1  ;;  %2386 = vmatprep.subr.bf16.mxu0 %v9674_v21  ;;  %2427 = vmatprep.subr.bf16.mxu1 %v9676_v22 }
 0x1ef   :  { %v13643_v50 = vld [vmem:[#allocation62_spill] sm:$0xff]  ;;  %v13644_v57 = vld [vmem:[#allocation63_spill] sm:$0xff] }
 0x1f1   :  { %2387 = vmatpush1.bf16.msra.mxu0 %v9682_v27  ;;  %2428 = vmatpush1.bf16.msra.mxu1 %v9684_v28 }
 0x1f2   :  { %2388 = vmatprep.subr.bf16.mxu0 %v9688_v29  ;;  %2429 = vmatprep.subr.bf16.mxu1 %v9690_v30 }
 0x1f5   :  { %2389 = vmatpush1.bf16.msra.mxu0 %v9694_v35  ;;  %2430 = vmatpush1.bf16.msra.mxu1 %v9696_v36 }
 0x1f6   :  { %2390 = vmatprep.subr.bf16.mxu0 %v9700_v37  ;;  %2431 = vmatprep.subr.bf16.mxu1 %v9702_v38 }
 0x1f9   :  { %2391 = vmatpush1.bf16.msra.mxu0 %v9706_v43  ;;  %2432 = vmatpush1.bf16.msra.mxu1 %v9708_v44 }
 0x1fa   :  { %2392 = vmatprep.subr.bf16.mxu0 %v9712_v45  ;;  %2433 = vmatprep.subr.bf16.mxu1 %v9714_v46 }
 0x1fd   :  { %2393 = vmatpush1.bf16.msra.mxu0 %v9718_v52  ;;  %2434 = vmatpush1.bf16.msra.mxu1 %v9720_v53 }
 0x1fe   :  { %2394 = vmatprep.subr.bf16.mxu0 %v9724_v54  ;;  %2435 = vmatprep.subr.bf16.mxu1 %v9726_v55 }
 0x201   :  { %2395 = vmatpush1.bf16.msra.mxu0 %v9730_v60  ;;  %2436 = vmatpush1.bf16.msra.mxu1 %v9732_v61 }
 0x202   :  { %2396 = vmatprep.subr.bf16.mxu0 %v9736_v63  ;;  %2437 = vmatprep.subr.bf16.mxu1 %v9738_v1  ;;  %v548_v1 = vlaneseq }
 0x205   :  { %2397 = vmatpush1.bf16.msra.mxu0 %v9742_v9  ;;  %2438 = vmatpush1.bf16.msra.mxu1 %v9744_v10 }
 0x206   :  { %2398 = vmatprep.subr.bf16.mxu0 %v9748_v15  ;;  %2439 = vmatprep.subr.bf16.mxu1 %v9750_v16 }
 0x209   :  { %2399 = vmatpush2.bf16.msra.mxu0 %v9754_v25  ;;  %2440 = vmatpush2.bf16.msra.mxu1 %v9756_v4 }
 0x20a   :  { %2400 = vmatprep.subr.bf16.mxu0 %v9760_v31  ;;  %2441 = vmatprep.subr.bf16.mxu1 %v9762_v32  ;;  %v13646_v32 = vld [vmem:[#allocation65_spill] sm:$0xff] }
 0x20d   :  { %2401 = vmatpush2.bf16.msra.mxu0 %v9766_v41  ;;  %2442 = vmatpush2.bf16.msra.mxu1 %v9768_v42  ;;  %v13647_v41 = vld [vmem:[#allocation66_spill] sm:$0xff]  ;;  %v13648_v42 = vld [vmem:[#allocation67_spill] sm:$0xff] }
 0x20e   :  { %2402 = vmatprep.subr.bf16.mxu0 %v9772_v47  ;;  %2443 = vmatprep.subr.bf16.mxu1 %v9774_v48  ;;  %v13649_v47 = vld [vmem:[#allocation68_spill] sm:$0xff]  ;;  %v13650_v48 = vld [vmem:[#allocation69_spill] sm:$0xff] }
 0x211   :  { %2403 = vmatpush2.bf16.msra.mxu0 %v9778_v58  ;;  %2444 = vmatpush2.bf16.msra.mxu1 %v13641_v51  ;;  %v13651_v58 = vld [vmem:[#allocation70_spill] sm:$0xff]  ;;  %v13652_v51 = vld [vmem:[#allocation71_spill] sm:$0xff] }
 0x212   :  { %2404 = vmatprep.subr.bf16.mxu0 %v13642_v56  ;;  %2445 = vmatprep.subr.bf16.mxu1 %v13643_v50  ;;  %v13653_v56 = vld [vmem:[#allocation72_spill] sm:$0xff]  ;;  %v13654_v50 = vld [vmem:[#allocation73_spill] sm:$0xff] }
 0x215   :  { %2405 = vmatpush2.bf16.msra.mxu0 %v13644_v57  ;;  %2446 = vmatpush2.bf16.msra.mxu1 %v13645_v59  ;;  %v13655_v57 = vld [vmem:[#allocation74_spill] sm:$0xff]  ;;  %v13656_v59 = vld [vmem:[#allocation75_spill] sm:$0xff] }
 0x216   :  { %2406 = vmatprep.subr.bf16.mxu0 %v13646_v32  ;;  %2447 = vmatprep.subr.bf16.mxu1 %v13647_v41  ;;  %v13657_v32 = vld [vmem:[#allocation76_spill] sm:$0xff]  ;;  %v13658_v41 = vld [vmem:[#allocation77_spill] sm:$0xff] }
 0x219   :  { %2407 = vmatpush2.bf16.msra.mxu0 %v13648_v42  ;;  %2448 = vmatpush2.bf16.msra.mxu1 %v13649_v47  ;;  %v13659_v42 = vld [vmem:[#allocation78_spill] sm:$0xff]  ;;  %v13660_v47 = vld [vmem:[#allocation79_spill] sm:$0xff] }
 0x21a   :  { %2408 = vmatprep.subr.bf16.mxu0 %v13650_v48  ;;  %2449 = vmatprep.subr.bf16.mxu1 %v13651_v58  ;;  %v13661_v48 = vld [vmem:[#allocation80_spill] sm:$0xff]  ;;  %v13662_v58 = vld [vmem:[#allocation81_spill] sm:$0xff] }
 0x21d   :  { %2409 = vmatpush2.bf16.msra.mxu0 %v13652_v51  ;;  %2450 = vmatpush2.bf16.msra.mxu1 %v13653_v56  ;;  %v13663_v51 = vld [vmem:[#allocation82_spill] sm:$0xff] }
 0x21e   :  { %2410 = vmatprep.subr.bf16.mxu0 %v13654_v50  ;;  %2451 = vmatprep.subr.bf16.mxu1 %v13655_v57 }
 0x221   :  { %2411 = vmatpush2.bf16.msra.mxu0 %v13656_v59  ;;  %2452 = vmatpush2.bf16.msra.mxu1 %v13657_v32 }
 0x222   :  { %2412 = vmatprep.subr.bf16.mxu0 %v13658_v41  ;;  %2453 = vmatprep.subr.bf16.mxu1 %v13659_v42 }
 0x225   :  { %2413 = vmatpush2.bf16.msra.mxu0 %v13660_v47  ;;  %2454 = vmatpush2.bf16.msra.mxu1 %v13661_v48 }
 0x226   :  { %2464 = vmatprep.subr.bf16.mxu0 %v13662_v58  ;;  %2505 = vmatprep.subr.bf16.mxu1 %v13663_v51  ;;  %v10118_v58 = vshrl.u32 %v548_v1, 7 }
 0x228   :  { %v1344_v56 = vpop.f32.mrf.mxu0  ;;  %v1385_v50 = vpop.f32.mrf.mxu1  ;;  %13664 = vst [vmem:[#allocation145_spill] sm:$0xff] %v10118_v58  ;;  %v13124_v51 = vsub.s32 0, %v10118_v58 }
 0x22a   :  { %v1346_v31 = vpop.f32.mrf.mxu0  ;;  %v1387_v57 = vpop.f32.mrf.mxu1 }
 0x22c   :  { %v1348_v4 = vpop.f32.mrf.mxu0  ;;  %v1389_v59 = vpop.f32.mrf.mxu1 }
 0x22d   :  { %v546_v4 = vld [vmem:[%s12929_s4] sm:$0xff] }
 0x22e   :  { %v1349_v25 = vpop.f32.mrf.mxu0  ;;  %v1390_v32 = vpop.f32.mrf.mxu1  ;;  %v551_v59 = vrot.slane %v546_v4, %v13124_v51 }
 0x22f   :  { %v13127_v25 = vsub.s32 2, %v10118_v58  ;;  %v13128_v32 = vsub.s32 1, %v10118_v58 }
 0x231   :  { %v555_v1 = vrot.slane %v546_v4, %v13128_v32 }
 0x233   :  { %v10142_v61 = vadd.f32 %v10052_v33, %v555_v1  ;;  %v13134_v33 = vsub.s32 4, %v10118_v58 }
 0x235   :  { %13666 = vst [vmem:[#allocation147_spill] sm:$0xff] %v10142_v61 }
 0x268   :  { %v2194_v16 = vpop.f32.mrf.mxu0  ;;  %v2235_v41 = vpop.f32.mrf.mxu1 }
 0x26a   :  { %v2196_v15 = vpop.f32.mrf.mxu0  ;;  %v2237_v42 = vpop.f32.mrf.mxu1 }
 0x26b   :  { %v2325_v32 = vadd.f32 %v2196_v15, %v10142_v61 }
 0x26c   :  { %v2198_v10 = vpop.f32.mrf.mxu0  ;;  %v2239_v47 = vpop.f32.mrf.mxu1 }
 0x26d   :  { %v13131_v10 = vsub.s32 3, %v10118_v58  ;;  %v10134_v47 = vadd.f32 %v10046_v23, %v551_v59 }
 0x26e   :  { %v2199_v9 = vpop.f32.mrf.mxu0  ;;  %v2240_v48 = vpop.f32.mrf.mxu1 }
 0x26f   :  { %v559_v9 = vrot.slane %v546_v4, %v13127_v25  ;;  %v563_v48 = vrot.slane %v546_v4, %v13131_v10  ;;  %v2324_v51 = vadd.f32 %v2194_v16, %v10134_v47  ;;  %v8274_v10 = vmul.f32 -1.442695, %v2325_v32 }
 0x270   :  { %v13137_v16 = vsub.s32 6, %v10118_v58 }
 0x271   :  { %v10139_v63 = vadd.f32 %v10048_v24, %v559_v9  ;;  %v10147_v25 = vadd.f32 %v10054_v34, %v563_v48  ;;  %v8273_v23 = vmul.f32 -1.442695, %v2324_v51  ;;  %v13141_v9 = vsub.s32 7, %v10118_v58 }
 0x273   :  { %13665 = vst [vmem:[#allocation146_spill] sm:$0xff] %v10139_v63  ;;  %v2326_v60 = vadd.f32 %v2235_v41, %v10139_v63  ;;  %13667 = vst [vmem:[#allocation148_spill] sm:$0xff] %v10147_v25  ;;  %v2327_v59 = vadd.f32 %v2237_v42, %v10147_v25  ;;  %8808 = vpow2.f32 %v8273_v23  ;;  %v13140_v41 = vsub.s32 5, %v10118_v58  ;;  %v13686_v58 = vld [vmem:[#allocation99_spill] sm:$0xff] }
 0x274   :  { %v575_v42 = vrot.slane %v546_v4, %v13137_v16  ;;  %v579_v1 = vrot.slane %v546_v4, %v13141_v9  ;;  %v13685_v9 = vld [vmem:[#allocation98_spill] sm:$0xff] }
 0x275   :  { %v8275_v55 = vmul.f32 -1.442695, %v2326_v60  ;;  %v8276_v24 = vmul.f32 -1.442695, %v2327_v59  ;;  %v567_v60 = vrot.slane %v546_v4, %v13134_v33 }
 0x276   :  { %v10169_v63 = vadd.f32 %v1387_v57, %v579_v1 }
 0x277   :  { %8810 = vpow2.f32 %v8275_v55  ;;  %v571_v55 = vrot.slane %v546_v4, %v13140_v41  ;;  %v10163_v59 = vadd.f32 %v1344_v56, %v567_v60 }
 0x278   :  { %8812 = vpow2.f32 %v8274_v10 }
 0x279   :  { %8814 = vpow2.f32 %v8276_v24  ;;  %v10165_v24 = vadd.f32 %v1385_v50, %v575_v42  ;;  %v10167_v25 = vadd.f32 %v1346_v31, %v571_v55 }
 0x280   :  { %v8809_v34 = vpop.eup %8808 }
 0x281   :  { %v2338_v32 = vadd.f32 1.0, %v8809_v34 }
 0x283   :  { %8816 = vrcp.f32 %v2338_v32 }
 0x284   :  { %v8811_v15 = vpop.eup %8810 }
 0x285   :  { %v8813_v51 = vpop.eup %8812  ;;  %v2350_v48 = vadd.f32 1.0, %v8811_v15 }
 0x286   :  { %v8815_v10 = vpop.eup %8814  ;;  %v2339_v23 = vadd.f32 1.0, %v8813_v51 }
 0x287   :  { %v2351_v33 = vadd.f32 1.0, %v8815_v10  ;;  %8818 = vrcp.f32 %v2350_v48 }
 0x288   :  { %8820 = vrcp.f32 %v2339_v23 }
 0x2a8   :  { %v2276_v61 = vpop.f32.mrf.mxu0  ;;  %v2317_v16 = vpop.f32.mrf.mxu1 }
 0x2a9   :  { %v2328_v34 = vadd.f32 %v2276_v61, %v10163_v59  ;;  %v2330_v41 = vadd.f32 %v2317_v16, %v10165_v24  ;;  %v8817_v61 = vpop.eup %8816 }
 0x2aa   :  { %v2278_v4 = vpop.f32.mrf.mxu0  ;;  %v2319_v15 = vpop.f32.mrf.mxu1 }
 0x2ab   :  { %8822 = vtanh.f32 %v2328_v34  ;;  %v8277_v56 = vmul.f32 -1.442695, %v2330_v41  ;;  %v2329_v50 = vadd.f32 %v2278_v4, %v10167_v25  ;;  %v2331_v31 = vadd.f32 %v2319_v15, %v10169_v63  ;;  %v8819_v16 = vpop.eup %8818 }
 0x2ac   :  { %8824 = vrcp.f32 %v2351_v33  ;;  %v2280_v51 = vpop.f32.mrf.mxu0  ;;  %v2321_v60 = vpop.f32.mrf.mxu1  ;;  %v2370_v48 = vmul.f32 0.0, %v8819_v16 }
 0x2ad   :  { %8826 = vpow2.f32 %v8277_v56  ;;  %v8278_v57 = vmul.f32 -1.442695, %v2331_v31  ;;  %v8821_v32 = vpop.eup %8820 }
 0x2ae   :  { %8828 = vtanh.f32 %v2329_v50  ;;  %v2281_v42 = vpop.f32.mrf.mxu0  ;;  %v2322_v55 = vpop.f32.mrf.mxu1 }
 0x2af   :  { %8830 = vpow2.f32 %v8278_v57 }
 0x2b8   :  { %v8823_v10 = vpop.eup %8822 }
 0x2b9   :  { %v8825_v1 = vpop.eup %8824  ;;  %v2372_v41 = vmul.f32 %v8823_v10, %v8817_v61 }
 0x2ba   :  { %v8827_v23 = vpop.eup %8826  ;;  %v2371_v51 = vmul.f32 0.0, %v8825_v1  ;;  %v13670_v1 = vld [vmem:[#allocation83_spill] sm:$0xff] }
 0x2bb   :  { %v8829_v34 = vpop.eup %8828  ;;  %v10175_v4 = vadd.f32 %v2372_v41, %v2370_v48  ;;  %v2364_v33 = vadd.f32 1.0, %v8827_v23  ;;  %v13671_v48 = vld [vmem:[#allocation84_spill] sm:$0xff]  ;;  %v13672_v41 = vld [vmem:[#allocation85_spill] sm:$0xff]  ;;  %v13673_v23 = vld [vmem:[#allocation86_spill] sm:$0xff] }
 0x2bc   :  { %v8831_v15 = vpop.eup %8830  ;;  %v2373_v56 = vmul.f32 %v8829_v34, %v8821_v32  ;;  %v13674_v34 = vld [vmem:[#allocation87_spill] sm:$0xff] }
 0x2bd   :  { %8832 = vtanh.f32 %v10175_v4  ;;  %v2365_v50 = vadd.f32 1.0, %v8831_v15  ;;  %v13676_v15 = vld [vmem:[#allocation89_spill] sm:$0xff] }
 0x2be   :  { %8834 = vrcp.f32 %v2364_v33  ;;  %v10178_v31 = vadd.f32 %v2373_v56, %v2371_v51  ;;  %v13675_v33 = vld [vmem:[#allocation88_spill] sm:$0xff]  ;;  %v13677_v51 = vld [vmem:[#allocation90_spill] sm:$0xff]  ;;  %v13678_v56 = vld [vmem:[#allocation91_spill] sm:$0xff] }
 0x2bf   :  { %8836 = vrcp.f32 %v2365_v50  ;;  %v13679_v50 = vld [vmem:[#allocation92_spill] sm:$0xff] }
 0x2c0   :  { %8838 = vtanh.f32 %v10178_v31 }
 0x2ca   :  { %v8833_v60 = vpop.eup %8832 }
 0x2cb   :  { %v8835_v57 = vpop.eup %8834 }
 0x2cc   :  { %v8837_v42 = vpop.eup %8836  ;;  %v10181_v61 = vmul.f32 %v8835_v57, %v8833_v60  ;;  %v13680_v60 = vld [vmem:[#allocation93_spill] sm:$0xff]  ;;  %v13681_v57 = vld [vmem:[#allocation94_spill] sm:$0xff] }
 0x2cd   :  { %v8839_v55 = vpop.eup %8838 }
 0x2ce   :  { %13668 = vst [vmem:[#allocation149_spill] sm:$0xff] %v10181_v61  ;;  %v10183_v16 = vmul.f32 %v8839_v55, %v8837_v42  ;;  %v10189_v10 = vpack.c.bf16 %v10181_v61, %v10181_v61  ;;  %v13682_v42 = vld [vmem:[#allocation95_spill] sm:$0xff]  ;;  %v13683_v55 = vld [vmem:[#allocation96_spill] sm:$0xff]  ;;  %v13688_v61 = vld [vmem:[#allocation101_spill] sm:$0xff] }
 0x2d0   :  { %13669 = vst [vmem:[#allocation150_spill] sm:$0xff] %v10183_v16  ;;  %v2381_v32 = vpack.c.bf16 %v10183_v16, %v10183_v16  ;;  %v13687_v16 = vld [vmem:[#allocation100_spill] sm:$0xff] }
 0x2d2   :  { %2414 = vmatprep.mubr.bf16.mxu0 %v2381_v32  ;;  %2455 = vmatprep.mubr.bf16.mxu1 %v2381_v32 }
 0x2d3   :  { %2415 = vmatmul.mubr.bf16.vlgmr.msra.gmra.mxu0 %v10189_v10  ;;  %2456 = vmatmul.mubr.bf16.vlgmr.msra.gmra.mxu1 %v10189_v10 }
 0x2d4   :  { %2465 = vmatpush1.bf16.msra.mxu0 %v13670_v1  ;;  %2506 = vmatpush1.bf16.msra.mxu1 %v13671_v48 }
 0x2d5   :  { %2496 = vmatprep.mubr.bf16.mxu0 %v2381_v32  ;;  %2537 = vmatprep.mubr.bf16.mxu1 %v2381_v32  ;;  %v13684_v32 = vld [vmem:[#allocation97_spill] sm:$0xff] }
 0x2d6   :  { %2466 = vmatprep.subr.bf16.mxu0 %v13672_v41  ;;  %2507 = vmatprep.subr.bf16.mxu1 %v13673_v23 }
 0x2d8   :  { %2467 = vmatpush1.bf16.msra.mxu0 %v13674_v34  ;;  %2508 = vmatpush1.bf16.msra.mxu1 %v13675_v33 }
 0x2d9   :  { %2468 = vmatprep.subr.bf16.mxu0 %v13676_v15  ;;  %2509 = vmatprep.subr.bf16.mxu1 %v13677_v51 }
 0x2dc   :  { %2469 = vmatpush1.bf16.msra.mxu0 %v13678_v56  ;;  %2510 = vmatpush1.bf16.msra.mxu1 %v13679_v50  ;;  %v13689_v56 = vld [vmem:[#allocation102_spill] sm:$0xff]  ;;  %v13690_v50 = vld [vmem:[#allocation103_spill] sm:$0xff] }
 0x2dd   :  { %2470 = vmatprep.subr.bf16.mxu0 %v13680_v60  ;;  %2511 = vmatprep.subr.bf16.mxu1 %v13681_v57  ;;  %v13691_v60 = vld [vmem:[#allocation104_spill] sm:$0xff]  ;;  %v13692_v57 = vld [vmem:[#allocation105_spill] sm:$0xff] }
 0x2e0   :  { %2471 = vmatpush1.bf16.msra.mxu0 %v13682_v42  ;;  %2512 = vmatpush1.bf16.msra.mxu1 %v13683_v55  ;;  %v13693_v42 = vld [vmem:[#allocation106_spill] sm:$0xff]  ;;  %v13694_v55 = vld [vmem:[#allocation107_spill] sm:$0xff] }
 0x2e1   :  { %2472 = vmatprep.subr.bf16.mxu0 %v13684_v32  ;;  %2513 = vmatprep.subr.bf16.mxu1 %v13685_v9  ;;  %v13695_v32 = vld [vmem:[#allocation108_spill] sm:$0xff]  ;;  %v13696_v9 = vld [vmem:[#allocation109_spill] sm:$0xff] }
 0x2e4   :  { %2473 = vmatpush1.bf16.msra.mxu0 %v13686_v58  ;;  %2514 = vmatpush1.bf16.msra.mxu1 %v13687_v16  ;;  %v13697_v58 = vld [vmem:[#allocation110_spill] sm:$0xff]  ;;  %v13698_v16 = vld [vmem:[#allocation111_spill] sm:$0xff] }
 0x2e5   :  { %2474 = vmatprep.subr.bf16.mxu0 %v13688_v61  ;;  %2515 = vmatprep.subr.bf16.mxu1 %v13689_v56  ;;  %v13699_v61 = vld [vmem:[#allocation112_spill] sm:$0xff]  ;;  %v13700_v56 = vld [vmem:[#allocation113_spill] sm:$0xff] }
 0x2e8   :  { %2475 = vmatpush1.bf16.msra.mxu0 %v13690_v50  ;;  %2516 = vmatpush1.bf16.msra.mxu1 %v13691_v60  ;;  %v13701_v50 = vld [vmem:[#allocation114_spill] sm:$0xff]  ;;  %v13702_v60 = vld [vmem:[#allocation115_spill] sm:$0xff] }
 0x2e9   :  { %2476 = vmatprep.subr.bf16.mxu0 %v13692_v57  ;;  %2517 = vmatprep.subr.bf16.mxu1 %v13693_v42  ;;  %v13703_v57 = vld [vmem:[#allocation116_spill] sm:$0xff]  ;;  %v13704_v42 = vld [vmem:[#allocation117_spill] sm:$0xff] }
 0x2ec   :  { %2477 = vmatpush1.bf16.msra.mxu0 %v13694_v55  ;;  %2518 = vmatpush1.bf16.msra.mxu1 %v13695_v32  ;;  %v13705_v55 = vld [vmem:[#allocation118_spill] sm:$0xff]  ;;  %v13706_v32 = vld [vmem:[#allocation119_spill] sm:$0xff] }
 0x2ed   :  { %2478 = vmatprep.subr.bf16.mxu0 %v13696_v9  ;;  %2519 = vmatprep.subr.bf16.mxu1 %v13697_v58  ;;  %v13707_v9 = vld [vmem:[#allocation120_spill] sm:$0xff]  ;;  %v13708_v58 = vld [vmem:[#allocation121_spill] sm:$0xff] }
 0x2f0   :  { %2479 = vmatpush1.bf16.msra.mxu0 %v13698_v16  ;;  %2520 = vmatpush1.bf16.msra.mxu1 %v13699_v61  ;;  %v13709_v16 = vld [vmem:[#allocation122_spill] sm:$0xff]  ;;  %v13710_v61 = vld [vmem:[#allocation123_spill] sm:$0xff] }
 0x2f1   :  { %2480 = vmatprep.subr.bf16.mxu0 %v13700_v56  ;;  %2521 = vmatprep.subr.bf16.mxu1 %v13701_v50  ;;  %v13711_v56 = vld [vmem:[#allocation124_spill] sm:$0xff]  ;;  %v13712_v50 = vld [vmem:[#allocation125_spill] sm:$0xff] }
 0x2f4   :  { %2481 = vmatpush2.bf16.msra.mxu0 %v13702_v60  ;;  %2522 = vmatpush2.bf16.msra.mxu1 %v13703_v57  ;;  %v13713_v60 = vld [vmem:[#allocation126_spill] sm:$0xff]  ;;  %v13714_v57 = vld [vmem:[#allocation127_spill] sm:$0xff] }
 0x2f5   :  { %2482 = vmatprep.subr.bf16.mxu0 %v13704_v42  ;;  %2523 = vmatprep.subr.bf16.mxu1 %v13705_v55  ;;  %v13715_v42 = vld [vmem:[#allocation128_spill] sm:$0xff]  ;;  %v13716_v55 = vld [vmem:[#allocation129_spill] sm:$0xff] }
 0x2f8   :  { %2483 = vmatpush2.bf16.msra.mxu0 %v13706_v32  ;;  %2524 = vmatpush2.bf16.msra.mxu1 %v13707_v9  ;;  %v13717_v32 = vld [vmem:[#allocation130_spill] sm:$0xff] }
 0x2f9   :  { %2484 = vmatprep.subr.bf16.mxu0 %v13708_v58  ;;  %2525 = vmatprep.subr.bf16.mxu1 %v13709_v16 }
 0x2fc   :  { %2485 = vmatpush2.bf16.msra.mxu0 %v13710_v61  ;;  %2526 = vmatpush2.bf16.msra.mxu1 %v13711_v56  ;;  %v13718_v61 = vld [vmem:[#allocation134_spill] sm:$0xff]  ;;  %v13719_v56 = vld [vmem:[#allocation135_spill] sm:$0xff] }
 0x2fd   :  { %2486 = vmatprep.subr.bf16.mxu0 %v13712_v50  ;;  %2527 = vmatprep.subr.bf16.mxu1 %v13713_v60 }
 0x300   :  { %2487 = vmatpush2.bf16.msra.mxu0 %v13714_v57  ;;  %2528 = vmatpush2.bf16.msra.mxu1 %v13715_v42 }
 0x301   :  { %2488 = vmatprep.subr.bf16.mxu0 %v13716_v55  ;;  %2529 = vmatprep.subr.bf16.mxu1 %v13717_v32 }
 0x304   :  { %2489 = vmatpush2.bf16.msra.mxu0 %v9998_v8  ;;  %2530 = vmatpush2.bf16.msra.mxu1 %v10000_v17 }
 0x305   :  { %2490 = vmatprep.subr.bf16.mxu0 %v10004_v7  ;;  %2531 = vmatprep.subr.bf16.mxu1 %v13718_v61 }
 0x308   :  { %2491 = vmatpush2.bf16.msra.mxu0 %v13719_v56  ;;  %2532 = vmatpush2.bf16.msra.mxu1 %v10012_v0 }
 0x309   :  { %2492 = vmatprep.subr.bf16.mxu0 %v10016_v26  ;;  %2533 = vmatprep.subr.bf16.mxu1 %v10018_v40 }
 0x30c   :  { %2493 = vmatpush2.bf16.msra.mxu0 %v10022_v49  ;;  %2534 = vmatpush2.bf16.msra.mxu1 %v10024_v62 }
 0x30d   :  { %2494 = vmatprep.subr.bf16.mxu0 %v10028_v2  ;;  %2535 = vmatprep.subr.bf16.mxu1 %v10030_v3 }
 0x310   :  { %2495 = vmatpush2.bf16.msra.mxu0 %v10034_v18  ;;  %2536 = vmatpush2.bf16.msra.mxu1 %v10036_v39 }
 0x311   :  { %2642 = vmatprep.subr.bf16.mxu0 %v9650_v5  ;;  %2683 = vmatprep.subr.bf16.mxu1 %v9652_v6 }
 0x313   :  { %2497 = vmatmul.mubr.bf16.vlgmr.msra.gmra.mxu0 %v10189_v10  ;;  %2538 = vmatmul.mubr.bf16.vlgmr.msra.gmra.mxu1 %v10189_v10  ;;  %v13720_v10 = vld [vmem:[#allocation42_spill] sm:$0xff] }
 0x314   :  { %2643 = vmatpush1.bf16.msra.mxu0 %v9654_v11  ;;  %2684 = vmatpush1.bf16.msra.mxu1 %v9656_v12 }
 0x315   :  { %2644 = vmatprep.subr.bf16.mxu0 %v9660_v13  ;;  %2685 = vmatprep.subr.bf16.mxu1 %v9662_v14 }
 0x318   :  { %2645 = vmatpush1.bf16.msra.mxu0 %v9668_v19  ;;  %2686 = vmatpush1.bf16.msra.mxu1 %v9670_v20  ;;  %v13763_v19 = vld [vmem:[#allocation148_spill] sm:$0xff] }
 0x319   :  { %2646 = vmatprep.subr.bf16.mxu0 %v9674_v21  ;;  %2687 = vmatprep.subr.bf16.mxu1 %v9676_v22  ;;  %v13762_v21 = vld [vmem:[#allocation147_spill] sm:$0xff] }
 0x31c   :  { %2647 = vmatpush1.bf16.msra.mxu0 %v9682_v27  ;;  %2688 = vmatpush1.bf16.msra.mxu1 %v9684_v28 }
 0x31d   :  { %2648 = vmatprep.subr.bf16.mxu0 %v9688_v29  ;;  %2689 = vmatprep.subr.bf16.mxu1 %v9690_v30 }
 0x320   :  { %2649 = vmatpush1.bf16.msra.mxu0 %v9694_v35  ;;  %2690 = vmatpush1.bf16.msra.mxu1 %v9696_v36  ;;  %v13721_v36 = vld [vmem:[#allocation43_spill] sm:$0xff] }
 0x321   :  { %2650 = vmatprep.subr.bf16.mxu0 %v9700_v37  ;;  %2691 = vmatprep.subr.bf16.mxu1 %v9702_v38  ;;  %v13722_v37 = vld [vmem:[#allocation44_spill] sm:$0xff]  ;;  %v13723_v38 = vld [vmem:[#allocation45_spill] sm:$0xff] }
 0x324   :  { %2651 = vmatpush1.bf16.msra.mxu0 %v9706_v43  ;;  %2692 = vmatpush1.bf16.msra.mxu1 %v9708_v44  ;;  %v13724_v43 = vld [vmem:[#allocation46_spill] sm:$0xff]  ;;  %v13725_v44 = vld [vmem:[#allocation47_spill] sm:$0xff] }
 0x325   :  { %2652 = vmatprep.subr.bf16.mxu0 %v9712_v45  ;;  %2693 = vmatprep.subr.bf16.mxu1 %v9714_v46  ;;  %v13726_v45 = vld [vmem:[#allocation48_spill] sm:$0xff]  ;;  %v13727_v46 = vld [vmem:[#allocation49_spill] sm:$0xff] }
 0x328   :  { %2653 = vmatpush1.bf16.msra.mxu0 %v9718_v52  ;;  %2694 = vmatpush1.bf16.msra.mxu1 %v9720_v53  ;;  %v13728_v52 = vld [vmem:[#allocation50_spill] sm:$0xff]  ;;  %v13729_v53 = vld [vmem:[#allocation51_spill] sm:$0xff] }
 0x329   :  { %2654 = vmatprep.subr.bf16.mxu0 %v9724_v54  ;;  %2695 = vmatprep.subr.bf16.mxu1 %v13720_v10  ;;  %v13730_v54 = vld [vmem:[#allocation52_spill] sm:$0xff]  ;;  %v13731_v10 = vld [vmem:[#allocation53_spill] sm:$0xff] }
 0x32c   :  { %2655 = vmatpush1.bf16.msra.mxu0 %v13721_v36  ;;  %2696 = vmatpush1.bf16.msra.mxu1 %v13722_v37  ;;  %v13732_v36 = vld [vmem:[#allocation54_spill] sm:$0xff]  ;;  %v13733_v37 = vld [vmem:[#allocation55_spill] sm:$0xff] }
 0x32d   :  { %2656 = vmatprep.subr.bf16.mxu0 %v13723_v38  ;;  %2697 = vmatprep.subr.bf16.mxu1 %v13724_v43  ;;  %v13734_v38 = vld [vmem:[#allocation56_spill] sm:$0xff]  ;;  %v13735_v43 = vld [vmem:[#allocation57_spill] sm:$0xff] }
 0x330   :  { %2657 = vmatpush1.bf16.msra.mxu0 %v13725_v44  ;;  %2698 = vmatpush1.bf16.msra.mxu1 %v13726_v45  ;;  %v13736_v44 = vld [vmem:[#allocation58_spill] sm:$0xff]  ;;  %v13737_v45 = vld [vmem:[#allocation59_spill] sm:$0xff] }
 0x331   :  { %2658 = vmatprep.subr.bf16.mxu0 %v13727_v46  ;;  %2699 = vmatprep.subr.bf16.mxu1 %v13728_v52  ;;  %v13738_v46 = vld [vmem:[#allocation60_spill] sm:$0xff]  ;;  %v13739_v52 = vld [vmem:[#allocation61_spill] sm:$0xff] }
 0x334   :  { %2659 = vmatpush2.bf16.msra.mxu0 %v13729_v53  ;;  %2700 = vmatpush2.bf16.msra.mxu1 %v13730_v54  ;;  %v13740_v53 = vld [vmem:[#allocation62_spill] sm:$0xff]  ;;  %v13741_v54 = vld [vmem:[#allocation63_spill] sm:$0xff] }
 0x335   :  { %2660 = vmatprep.subr.bf16.mxu0 %v13731_v10  ;;  %2701 = vmatprep.subr.bf16.mxu1 %v13732_v36  ;;  %v13742_v10 = vld [vmem:[#allocation64_spill] sm:$0xff]  ;;  %v13743_v36 = vld [vmem:[#allocation65_spill] sm:$0xff] }
 0x338   :  { %2661 = vmatpush2.bf16.msra.mxu0 %v13733_v37  ;;  %2702 = vmatpush2.bf16.msra.mxu1 %v13734_v38  ;;  %v13744_v37 = vld [vmem:[#allocation66_spill] sm:$0xff]  ;;  %v13745_v38 = vld [vmem:[#allocation67_spill] sm:$0xff] }
 0x339   :  { %2662 = vmatprep.subr.bf16.mxu0 %v13735_v43  ;;  %2703 = vmatprep.subr.bf16.mxu1 %v13736_v44  ;;  %v13746_v43 = vld [vmem:[#allocation68_spill] sm:$0xff]  ;;  %v13747_v44 = vld [vmem:[#allocation69_spill] sm:$0xff] }
 0x33c   :  { %2663 = vmatpush2.bf16.msra.mxu0 %v13737_v45  ;;  %2704 = vmatpush2.bf16.msra.mxu1 %v13738_v46  ;;  %v13748_v45 = vld [vmem:[#allocation70_spill] sm:$0xff]  ;;  %v13749_v46 = vld [vmem:[#allocation71_spill] sm:$0xff] }
 0x33d   :  { %2664 = vmatprep.subr.bf16.mxu0 %v13739_v52  ;;  %2705 = vmatprep.subr.bf16.mxu1 %v13740_v53  ;;  %v13750_v52 = vld [vmem:[#allocation72_spill] sm:$0xff]  ;;  %v13751_v53 = vld [vmem:[#allocation73_spill] sm:$0xff] }
 0x340   :  { %2665 = vmatpush2.bf16.msra.mxu0 %v13741_v54  ;;  %2706 = vmatpush2.bf16.msra.mxu1 %v13742_v10  ;;  %v13752_v54 = vld [vmem:[#allocation74_spill] sm:$0xff]  ;;  %v13753_v10 = vld [vmem:[#allocation75_spill] sm:$0xff] }
 0x341   :  { %2666 = vmatprep.subr.bf16.mxu0 %v13743_v36  ;;  %2707 = vmatprep.subr.bf16.mxu1 %v13744_v37  ;;  %v13754_v36 = vld [vmem:[#allocation76_spill] sm:$0xff]  ;;  %v13755_v37 = vld [vmem:[#allocation77_spill] sm:$0xff] }
 0x344   :  { %2667 = vmatpush2.bf16.msra.mxu0 %v13745_v38  ;;  %2708 = vmatpush2.bf16.msra.mxu1 %v13746_v43  ;;  %v13756_v38 = vld [vmem:[#allocation78_spill] sm:$0xff]  ;;  %v13757_v43 = vld [vmem:[#allocation79_spill] sm:$0xff] }
 0x345   :  { %2668 = vmatprep.subr.bf16.mxu0 %v13747_v44  ;;  %2709 = vmatprep.subr.bf16.mxu1 %v13748_v45  ;;  %v13758_v44 = vld [vmem:[#allocation80_spill] sm:$0xff]  ;;  %v13759_v45 = vld [vmem:[#allocation81_spill] sm:$0xff] }
 0x348   :  { %2669 = vmatpush2.bf16.msra.mxu0 %v13749_v46  ;;  %2710 = vmatpush2.bf16.msra.mxu1 %v13750_v52  ;;  %v13760_v46 = vld [vmem:[#allocation82_spill] sm:$0xff] }
 0x349   :  { %2670 = vmatprep.subr.bf16.mxu0 %v13751_v53  ;;  %2711 = vmatprep.subr.bf16.mxu1 %v13752_v54 }
 0x34c   :  { %2671 = vmatpush2.bf16.msra.mxu0 %v13753_v10  ;;  %2712 = vmatpush2.bf16.msra.mxu1 %v13754_v36 }
 0x34d   :  { %2672 = vmatprep.subr.bf16.mxu0 %v13755_v37  ;;  %2713 = vmatprep.subr.bf16.mxu1 %v13756_v38 }
 0x350   :  { %2673 = vmatpush2.bf16.msra.mxu0 %v13757_v43  ;;  %2714 = vmatpush2.bf16.msra.mxu1 %v13758_v44  ;;  %v13761_v43 = vld [vmem:[#allocation146_spill] sm:$0xff] }
 0x351   :  { %2724 = vmatprep.subr.bf16.mxu0 %v13759_v45  ;;  %2765 = vmatprep.subr.bf16.mxu1 %v13760_v46 }
 0x393   :  { %v2416_v52 = vpop.f32.mrf.mxu0  ;;  %v2457_v53 = vpop.f32.mrf.mxu1 }
 0x394   :  { %v2554_v28 = vrot.slane %v2416_v52, 7  ;;  %v2556_v37 = vrot.slane %v2457_v53, 7 }
 0x395   :  { %v2418_v35 = vpop.f32.mrf.mxu0  ;;  %v2459_v54 = vpop.f32.mrf.mxu1 }
 0x396   :  { %v2555_v27 = vrot.slane %v2418_v35, 7  ;;  %v2570_v38 = vadd.f32 %v2554_v28, %v10134_v47  ;;  %v2572_v22 = vadd.f32 %v2556_v37, %v13761_v43  ;;  %v2557_v44 = vrot.slane %v2459_v54, 7 }
 0x397   :  { %v2420_v30 = vpop.f32.mrf.mxu0  ;;  %v2461_v10 = vpop.f32.mrf.mxu1 }
 0x398   :  { %v2571_v45 = vadd.f32 %v2555_v27, %v13762_v21  ;;  %v8279_v20 = vmul.f32 -1.442695, %v2570_v38  ;;  %v8281_v46 = vmul.f32 -1.442695, %v2572_v22  ;;  %v2573_v14 = vadd.f32 %v2557_v44, %v13763_v19 }
 0x399   :  { %v2421_v29 = vpop.f32.mrf.mxu0  ;;  %v2462_v36 = vpop.f32.mrf.mxu1 }
 0x39a   :  { %v8280_v13 = vmul.f32 -1.442695, %v2571_v45  ;;  %8840 = vpow2.f32 %v8279_v20  ;;  %v8282_v30 = vmul.f32 -1.442695, %v2573_v14 }
 0x39b   :  { %8842 = vpow2.f32 %v8281_v46 }
 0x39c   :  { %8844 = vpow2.f32 %v8280_v13 }
 0x39d   :  { %8846 = vpow2.f32 %v8282_v30 }
 0x3a7   :  { %v8841_v29 = vpop.eup %8840 }
 0x3a8   :  { %v8843_v36 = vpop.eup %8842  ;;  %v2584_v52 = vadd.f32 1.0, %v8841_v29 }
 0x3a9   :  { %v8845_v35 = vpop.eup %8844  ;;  %v2596_v28 = vadd.f32 1.0, %v8843_v36 }
 0x3aa   :  { %v8847_v53 = vpop.eup %8846  ;;  %v2585_v37 = vadd.f32 1.0, %v8845_v35  ;;  %8848 = vrcp.f32 %v2584_v52 }
 0x3ab   :  { %8850 = vrcp.f32 %v2596_v28  ;;  %v2597_v38 = vadd.f32 1.0, %v8847_v53 }
 0x3ac   :  { %8852 = vrcp.f32 %v2585_v37  ;;  %v2618_v37 = vrot.slane %v10175_v4, 7 }
 0x3d3   :  { %v2498_v54 = vpop.f32.mrf.mxu0  ;;  %v2539_v10 = vpop.f32.mrf.mxu1 }
 0x3d4   :  { %v2558_v27 = vrot.slane %v2498_v54, 7  ;;  %v2560_v22 = vrot.slane %v2539_v10, 7  ;;  %v8849_v10 = vpop.eup %8848 }
 0x3d5   :  { %v2500_v44 = vpop.f32.mrf.mxu0  ;;  %v2541_v20 = vpop.f32.mrf.mxu1 }
 0x3d6   :  { %v2574_v14 = vadd.f32 %v2558_v27, %v10163_v59  ;;  %v2576_v13 = vadd.f32 %v2560_v22, %v10165_v24  ;;  %v2559_v45 = vrot.slane %v2500_v44, 7  ;;  %v2561_v46 = vrot.slane %v2541_v20, 7  ;;  %v8851_v27 = vpop.eup %8850 }
 0x3d7   :  { %v2502_v30 = vpop.f32.mrf.mxu0  ;;  %v2543_v29 = vpop.f32.mrf.mxu1 }
 0x3d8   :  { %8854 = vtanh.f32 %v2574_v14  ;;  %v8283_v36 = vmul.f32 -1.442695, %v2576_v13  ;;  %v2575_v35 = vadd.f32 %v2559_v45, %v10167_v25  ;;  %v2577_v52 = vadd.f32 %v2561_v46, %v10169_v63  ;;  %v8853_v22 = vpop.eup %8852 }
 0x3d9   :  { %8856 = vrcp.f32 %v2597_v38  ;;  %v2503_v28 = vpop.f32.mrf.mxu0  ;;  %v2544_v53 = vpop.f32.mrf.mxu1  ;;  %v2622_v14 = vmul.f32 %v8851_v27, %v2618_v37  ;;  %v2619_v45 = vrot.slane %v10178_v31, 7 }
 0x3da   :  { %8858 = vpow2.f32 %v8283_v36  ;;  %v8284_v54 = vmul.f32 -1.442695, %v2577_v52 }
 0x3db   :  { %8860 = vtanh.f32 %v2575_v35 }
 0x3dc   :  { %8862 = vpow2.f32 %v8284_v54 }
 0x3e5   :  { %v8855_v44 = vpop.eup %8854 }
 0x3e6   :  { %v8857_v20 = vpop.eup %8856  ;;  %v2624_v13 = vmul.f32 %v8855_v44, %v8849_v10 }
 0x3e7   :  { %v8859_v30 = vpop.eup %8858  ;;  %v2623_v52 = vmul.f32 %v8857_v20, %v2619_v45  ;;  %v13766_v45 = vld [vmem:[#allocation93_spill] sm:$0xff] }
 0x3e8   :  { %v8861_v46 = vpop.eup %8860  ;;  %v10333_v38 = vadd.f32 %v2624_v13, %v2622_v14  ;;  %v2610_v29 = vadd.f32 1.0, %v8859_v30  ;;  %v13764_v13 = vld [vmem:[#allocation91_spill] sm:$0xff]  ;;  %v13765_v30 = vld [vmem:[#allocation92_spill] sm:$0xff] }
 0x3e9   :  { %v8863_v36 = vpop.eup %8862  ;;  %v2625_v35 = vmul.f32 %v8861_v46, %v8853_v22  ;;  %v13767_v46 = vld [vmem:[#allocation94_spill] sm:$0xff] }
 0x3ea   :  { %8864 = vtanh.f32 %v10333_v38  ;;  %v2611_v28 = vadd.f32 1.0, %v8863_v36  ;;  %v13769_v36 = vld [vmem:[#allocation96_spill] sm:$0xff] }
 0x3eb   :  { %8866 = vrcp.f32 %v2610_v29  ;;  %v10336_v53 = vadd.f32 %v2625_v35, %v2623_v52  ;;  %v13768_v29 = vld [vmem:[#allocation95_spill] sm:$0xff]  ;;  %v13770_v52 = vld [vmem:[#allocation97_spill] sm:$0xff]  ;;  %v13771_v35 = vld [vmem:[#allocation98_spill] sm:$0xff] }
 0x3ec   :  { %8868 = vrcp.f32 %v2611_v28  ;;  %v13772_v28 = vld [vmem:[#allocation99_spill] sm:$0xff] }
 0x3ed   :  { %8870 = vtanh.f32 %v10336_v53 }
 0x3f7   :  { %v8865_v4 = vpop.eup %8864 }
 0x3f8   :  { %v8867_v54 = vpop.eup %8866 }
 0x3f9   :  { %v8869_v10 = vpop.eup %8868  ;;  %v10339_v31 = vmul.f32 %v8867_v54, %v8865_v4  ;;  %v13773_v4 = vld [vmem:[#allocation100_spill] sm:$0xff]  ;;  %v13774_v54 = vld [vmem:[#allocation101_spill] sm:$0xff] }
 0x3fa   :  { %v8871_v27 = vpop.eup %8870 }
 0x3fb   :  { %v10341_v37 = vmul.f32 %v8871_v27, %v8869_v10  ;;  %v2632_v22 = vpack.c.bf16 %v10339_v31, %v10339_v31  ;;  %v13775_v10 = vld [vmem:[#allocation102_spill] sm:$0xff]  ;;  %v13776_v27 = vld [vmem:[#allocation103_spill] sm:$0xff] }
 0x3fd   :  { %v2633_v44 = vpack.c.bf16 %v10341_v37, %v10341_v37  ;;  %v10347_v14 = vshrl.u32 %v2632_v22, 16  ;;  %v13777_v22 = vld [vmem:[#allocation104_spill] sm:$0xff] }
 0x3ff   :  { %v2638_v20 = vshrl.u32 %v2633_v44, 16  ;;  %v13778_v44 = vld [vmem:[#allocation105_spill] sm:$0xff] }
 0x401   :  { %2674 = vmatprep.mubr.bf16.mxu0 %v2638_v20  ;;  %2715 = vmatprep.mubr.bf16.mxu1 %v2638_v20 }
 0x402   :  { %2675 = vmatmul.mubr.bf16.vlgmr.msra.gmra.mxu0 %v10347_v14  ;;  %2716 = vmatmul.mubr.bf16.vlgmr.msra.gmra.mxu1 %v10347_v14 }
 0x403   :  { %2725 = vmatpush1.bf16.msra.mxu0 %v13670_v1  ;;  %2766 = vmatpush1.bf16.msra.mxu1 %v13671_v48 }
 0x404   :  { %2756 = vmatprep.mubr.bf16.mxu0 %v2638_v20  ;;  %2797 = vmatprep.mubr.bf16.mxu1 %v2638_v20  ;;  %v13779_v20 = vld [vmem:[#allocation106_spill] sm:$0xff] }
 0x405   :  { %2726 = vmatprep.subr.bf16.mxu0 %v13672_v41  ;;  %2767 = vmatprep.subr.bf16.mxu1 %v13673_v23 }
 0x407   :  { %2727 = vmatpush1.bf16.msra.mxu0 %v13674_v34  ;;  %2768 = vmatpush1.bf16.msra.mxu1 %v13675_v33 }
 0x408   :  { %2728 = vmatprep.subr.bf16.mxu0 %v13676_v15  ;;  %2769 = vmatprep.subr.bf16.mxu1 %v13677_v51 }
 0x40b   :  { %2729 = vmatpush1.bf16.msra.mxu0 %v13764_v13  ;;  %2770 = vmatpush1.bf16.msra.mxu1 %v13765_v30 }
 0x40c   :  { %2730 = vmatprep.subr.bf16.mxu0 %v13766_v45  ;;  %2771 = vmatprep.subr.bf16.mxu1 %v13767_v46 }
 0x40f   :  { %2731 = vmatpush1.bf16.msra.mxu0 %v13768_v29  ;;  %2772 = vmatpush1.bf16.msra.mxu1 %v13769_v36  ;;  %v13780_v36 = vld [vmem:[#allocation107_spill] sm:$0xff] }
 0x410   :  { %2732 = vmatprep.subr.bf16.mxu0 %v13770_v52  ;;  %2773 = vmatprep.subr.bf16.mxu1 %v13771_v35  ;;  %v13781_v52 = vld [vmem:[#allocation108_spill] sm:$0xff]  ;;  %v13782_v35 = vld [vmem:[#allocation109_spill] sm:$0xff] }
 0x413   :  { %2733 = vmatpush1.bf16.msra.mxu0 %v13772_v28  ;;  %2774 = vmatpush1.bf16.msra.mxu1 %v13773_v4  ;;  %v13783_v28 = vld [vmem:[#allocation110_spill] sm:$0xff]  ;;  %v13784_v4 = vld [vmem:[#allocation111_spill] sm:$0xff] }
 0x414   :  { %2734 = vmatprep.subr.bf16.mxu0 %v13774_v54  ;;  %2775 = vmatprep.subr.bf16.mxu1 %v13775_v10  ;;  %v13785_v54 = vld [vmem:[#allocation112_spill] sm:$0xff]  ;;  %v13786_v10 = vld [vmem:[#allocation113_spill] sm:$0xff] }
 0x417   :  { %2735 = vmatpush1.bf16.msra.mxu0 %v13776_v27  ;;  %2776 = vmatpush1.bf16.msra.mxu1 %v13777_v22  ;;  %v13787_v27 = vld [vmem:[#allocation114_spill] sm:$0xff]  ;;  %v13788_v22 = vld [vmem:[#allocation115_spill] sm:$0xff] }
 0x418   :  { %2736 = vmatprep.subr.bf16.mxu0 %v13778_v44  ;;  %2777 = vmatprep.subr.bf16.mxu1 %v13779_v20  ;;  %v13789_v44 = vld [vmem:[#allocation116_spill] sm:$0xff]  ;;  %v13790_v20 = vld [vmem:[#allocation117_spill] sm:$0xff] }
 0x41b   :  { %2737 = vmatpush1.bf16.msra.mxu0 %v13780_v36  ;;  %2778 = vmatpush1.bf16.msra.mxu1 %v13781_v52  ;;  %v13791_v36 = vld [vmem:[#allocation118_spill] sm:$0xff]  ;;  %v13792_v52 = vld [vmem:[#allocation119_spill] sm:$0xff] }
 0x41c   :  { %2738 = vmatprep.subr.bf16.mxu0 %v13782_v35  ;;  %2779 = vmatprep.subr.bf16.mxu1 %v13783_v28 }
 0x41f   :  { %2739 = vmatpush1.bf16.msra.mxu0 %v13784_v4  ;;  %2780 = vmatpush1.bf16.msra.mxu1 %v13785_v54  ;;  %v13793_v54 = vld [vmem:[#allocation123_spill] sm:$0xff] }
 0x420   :  { %2740 = vmatprep.subr.bf16.mxu0 %v13786_v10  ;;  %2781 = vmatprep.subr.bf16.mxu1 %v13787_v27  ;;  %v13794_v10 = vld [vmem:[#allocation124_spill] sm:$0xff] }
 0x423   :  { %2741 = vmatpush2.bf16.msra.mxu0 %v13788_v22  ;;  %2782 = vmatpush2.bf16.msra.mxu1 %v13789_v44 }
 0x424   :  { %2742 = vmatprep.subr.bf16.mxu0 %v13790_v20  ;;  %2783 = vmatprep.subr.bf16.mxu1 %v13791_v36 }
 0x427   :  { %2743 = vmatpush2.bf16.msra.mxu0 %v13792_v52  ;;  %2784 = vmatpush2.bf16.msra.mxu1 %v13707_v9 }
 0x428   :  { %2744 = vmatprep.subr.bf16.mxu0 %v13708_v58  ;;  %2785 = vmatprep.subr.bf16.mxu1 %v13709_v16 }
 0x42b   :  { %2745 = vmatpush2.bf16.msra.mxu0 %v13793_v54  ;;  %2786 = vmatpush2.bf16.msra.mxu1 %v13794_v10 }
 0x42c   :  { %2746 = vmatprep.subr.bf16.mxu0 %v13712_v50  ;;  %2787 = vmatprep.subr.bf16.mxu1 %v13713_v60 }
 0x42f   :  { %2747 = vmatpush2.bf16.msra.mxu0 %v13714_v57  ;;  %2788 = vmatpush2.bf16.msra.mxu1 %v13715_v42 }
 0x430   :  { %2748 = vmatprep.subr.bf16.mxu0 %v13716_v55  ;;  %2789 = vmatprep.subr.bf16.mxu1 %v13717_v32 }
 0x433   :  { %2749 = vmatpush2.bf16.msra.mxu0 %v9998_v8  ;;  %2790 = vmatpush2.bf16.msra.mxu1 %v10000_v17 }
 0x434   :  { %2750 = vmatprep.subr.bf16.mxu0 %v10004_v7  ;;  %2791 = vmatprep.subr.bf16.mxu1 %v13718_v61 }
 0x437   :  { %2751 = vmatpush2.bf16.msra.mxu0 %v13719_v56  ;;  %2792 = vmatpush2.bf16.msra.mxu1 %v10012_v0 }
 0x438   :  { %2752 = vmatprep.subr.bf16.mxu0 %v10016_v26  ;;  %2793 = vmatprep.subr.bf16.mxu1 %v10018_v40 }
 0x43b   :  { %2753 = vmatpush2.bf16.msra.mxu0 %v10022_v49  ;;  %2794 = vmatpush2.bf16.msra.mxu1 %v10024_v62  ;;  %v13795_v62 = vld [vmem:[#allocation21_spill] sm:$0xff]  ;;  %v13802_v49 = vld [vmem:[#allocation28_spill] sm:$0xff] }
 0x43c   :  { %2754 = vmatprep.subr.bf16.mxu0 %v10028_v2  ;;  %2795 = vmatprep.subr.bf16.mxu1 %v10030_v3  ;;  %v13796_v2 = vld [vmem:[#allocation22_spill] sm:$0xff]  ;;  %v13797_v3 = vld [vmem:[#allocation23_spill] sm:$0xff] }
 0x43f   :  { %2755 = vmatpush2.bf16.msra.mxu0 %v10034_v18  ;;  %2796 = vmatpush2.bf16.msra.mxu1 %v10036_v39  ;;  %v13798_v18 = vld [vmem:[#allocation24_spill] sm:$0xff]  ;;  %v13799_v39 = vld [vmem:[#allocation25_spill] sm:$0xff] }
 0x440   :  { %2900 = vmatprep.subr.bf16.mxu0 %v9650_v5  ;;  %2941 = vmatprep.subr.bf16.mxu1 %v9652_v6  ;;  %v13800_v5 = vld [vmem:[#allocation26_spill] sm:$0xff]  ;;  %v13801_v6 = vld [vmem:[#allocation27_spill] sm:$0xff] }
 0x442   :  { %2757 = vmatmul.mubr.bf16.vlgmr.msra.gmra.mxu0 %v10347_v14  ;;  %2798 = vmatmul.mubr.bf16.vlgmr.msra.gmra.mxu1 %v10347_v14  ;;  %v13803_v14 = vld [vmem:[#allocation29_spill] sm:$0xff] }
 0x443   :  { %2901 = vmatpush1.bf16.msra.mxu0 %v9654_v11  ;;  %2942 = vmatpush1.bf16.msra.mxu1 %v9656_v12  ;;  %v13804_v11 = vld [vmem:[#allocation30_spill] sm:$0xff]  ;;  %v13805_v12 = vld [vmem:[#allocation31_spill] sm:$0xff] }
 0x444   :  { %2902 = vmatprep.subr.bf16.mxu0 %v13795_v62  ;;  %2943 = vmatprep.subr.bf16.mxu1 %v13796_v2  ;;  %v13806_v62 = vld [vmem:[#allocation32_spill] sm:$0xff]  ;;  %v13807_v2 = vld [vmem:[#allocation33_spill] sm:$0xff] }
 0x447   :  { %2903 = vmatpush1.bf16.msra.mxu0 %v13797_v3  ;;  %2944 = vmatpush1.bf16.msra.mxu1 %v13798_v18  ;;  %v13808_v3 = vld [vmem:[#allocation34_spill] sm:$0xff]  ;;  %v13809_v18 = vld [vmem:[#allocation35_spill] sm:$0xff] }
 0x448   :  { %2904 = vmatprep.subr.bf16.mxu0 %v13799_v39  ;;  %2945 = vmatprep.subr.bf16.mxu1 %v13800_v5  ;;  %v13810_v39 = vld [vmem:[#allocation36_spill] sm:$0xff]  ;;  %v13811_v5 = vld [vmem:[#allocation37_spill] sm:$0xff] }
 0x44b   :  { %2905 = vmatpush1.bf16.msra.mxu0 %v13801_v6  ;;  %2946 = vmatpush1.bf16.msra.mxu1 %v13802_v49  ;;  %v13812_v6 = vld [vmem:[#allocation38_spill] sm:$0xff]  ;;  %v13813_v49 = vld [vmem:[#allocation39_spill] sm:$0xff] }
 0x44c   :  { %2906 = vmatprep.subr.bf16.mxu0 %v13803_v14  ;;  %2947 = vmatprep.subr.bf16.mxu1 %v13804_v11  ;;  %v13814_v14 = vld [vmem:[#allocation40_spill] sm:$0xff]  ;;  %v13815_v11 = vld [vmem:[#allocation41_spill] sm:$0xff] }
 0x44f   :  { %2907 = vmatpush1.bf16.msra.mxu0 %v13805_v12  ;;  %2948 = vmatpush1.bf16.msra.mxu1 %v13806_v62  ;;  %v13816_v12 = vld [vmem:[#allocation42_spill] sm:$0xff]  ;;  %v13817_v62 = vld [vmem:[#allocation43_spill] sm:$0xff] }
 0x450   :  { %2908 = vmatprep.subr.bf16.mxu0 %v13807_v2  ;;  %2949 = vmatprep.subr.bf16.mxu1 %v13808_v3  ;;  %v13818_v2 = vld [vmem:[#allocation44_spill] sm:$0xff]  ;;  %v13819_v3 = vld [vmem:[#allocation45_spill] sm:$0xff] }
 0x453   :  { %2909 = vmatpush1.bf16.msra.mxu0 %v13809_v18  ;;  %2950 = vmatpush1.bf16.msra.mxu1 %v13810_v39  ;;  %v13820_v18 = vld [vmem:[#allocation46_spill] sm:$0xff]  ;;  %v13821_v39 = vld [vmem:[#allocation47_spill] sm:$0xff] }
 0x454   :  { %2910 = vmatprep.subr.bf16.mxu0 %v13811_v5  ;;  %2951 = vmatprep.subr.bf16.mxu1 %v13812_v6  ;;  %v13822_v5 = vld [vmem:[#allocation48_spill] sm:$0xff]  ;;  %v13823_v6 = vld [vmem:[#allocation49_spill] sm:$0xff] }
 0x457   :  { %2911 = vmatpush1.bf16.msra.mxu0 %v13813_v49  ;;  %2952 = vmatpush1.bf16.msra.mxu1 %v13814_v14  ;;  %v13824_v49 = vld [vmem:[#allocation50_spill] sm:$0xff]  ;;  %v13825_v14 = vld [vmem:[#allocation51_spill] sm:$0xff] }
 0x458   :  { %2912 = vmatprep.subr.bf16.mxu0 %v13815_v11  ;;  %2953 = vmatprep.subr.bf16.mxu1 %v13816_v12  ;;  %v13826_v11 = vld [vmem:[#allocation52_spill] sm:$0xff]  ;;  %v13827_v12 = vld [vmem:[#allocation53_spill] sm:$0xff] }
 0x45b   :  { %2913 = vmatpush1.bf16.msra.mxu0 %v13817_v62  ;;  %2954 = vmatpush1.bf16.msra.mxu1 %v13818_v2  ;;  %v13828_v62 = vld [vmem:[#allocation54_spill] sm:$0xff]  ;;  %v13829_v2 = vld [vmem:[#allocation55_spill] sm:$0xff] }
 0x45c   :  { %2914 = vmatprep.subr.bf16.mxu0 %v13819_v3  ;;  %2955 = vmatprep.subr.bf16.mxu1 %v13820_v18  ;;  %v13830_v3 = vld [vmem:[#allocation56_spill] sm:$0xff]  ;;  %v13831_v18 = vld [vmem:[#allocation57_spill] sm:$0xff] }
 0x45f   :  { %2915 = vmatpush1.bf16.msra.mxu0 %v13821_v39  ;;  %2956 = vmatpush1.bf16.msra.mxu1 %v13822_v5  ;;  %v13832_v39 = vld [vmem:[#allocation58_spill] sm:$0xff]  ;;  %v13833_v5 = vld [vmem:[#allocation59_spill] sm:$0xff] }
 0x460   :  { %2916 = vmatprep.subr.bf16.mxu0 %v13823_v6  ;;  %2957 = vmatprep.subr.bf16.mxu1 %v13824_v49  ;;  %v13834_v6 = vld [vmem:[#allocation60_spill] sm:$0xff]  ;;  %v13835_v49 = vld [vmem:[#allocation61_spill] sm:$0xff] }
 0x463   :  { %2917 = vmatpush2.bf16.msra.mxu0 %v13825_v14  ;;  %2958 = vmatpush2.bf16.msra.mxu1 %v13826_v11  ;;  %v13836_v14 = vld [vmem:[#allocation62_spill] sm:$0xff]  ;;  %v13837_v11 = vld [vmem:[#allocation63_spill] sm:$0xff] }
 0x464   :  { %2918 = vmatprep.subr.bf16.mxu0 %v13827_v12  ;;  %2959 = vmatprep.subr.bf16.mxu1 %v13828_v62  ;;  %v13838_v12 = vld [vmem:[#allocation64_spill] sm:$0xff]  ;;  %v13839_v62 = vld [vmem:[#allocation65_spill] sm:$0xff] }
 0x467   :  { %2919 = vmatpush2.bf16.msra.mxu0 %v13829_v2  ;;  %2960 = vmatpush2.bf16.msra.mxu1 %v13830_v3  ;;  %v13840_v2 = vld [vmem:[#allocation66_spill] sm:$0xff]  ;;  %v13841_v3 = vld [vmem:[#allocation67_spill] sm:$0xff] }
 0x468   :  { %2920 = vmatprep.subr.bf16.mxu0 %v13831_v18  ;;  %2961 = vmatprep.subr.bf16.mxu1 %v13832_v39  ;;  %v13842_v18 = vld [vmem:[#allocation68_spill] sm:$0xff]  ;;  %v13843_v39 = vld [vmem:[#allocation69_spill] sm:$0xff] }
 0x46b   :  { %2921 = vmatpush2.bf16.msra.mxu0 %v13833_v5  ;;  %2962 = vmatpush2.bf16.msra.mxu1 %v13834_v6  ;;  %v13844_v5 = vld [vmem:[#allocation70_spill] sm:$0xff]  ;;  %v13845_v6 = vld [vmem:[#allocation71_spill] sm:$0xff] }
 0x46c   :  { %2922 = vmatprep.subr.bf16.mxu0 %v13835_v49  ;;  %2963 = vmatprep.subr.bf16.mxu1 %v13836_v14  ;;  %v13846_v49 = vld [vmem:[#allocation72_spill] sm:$0xff]  ;;  %v13847_v14 = vld [vmem:[#allocation73_spill] sm:$0xff] }
 0x46f   :  { %2923 = vmatpush2.bf16.msra.mxu0 %v13837_v11  ;;  %2964 = vmatpush2.bf16.msra.mxu1 %v13838_v12  ;;  %v13848_v11 = vld [vmem:[#allocation74_spill] sm:$0xff]  ;;  %v13849_v12 = vld [vmem:[#allocation75_spill] sm:$0xff] }
 0x470   :  { %2924 = vmatprep.subr.bf16.mxu0 %v13839_v62  ;;  %2965 = vmatprep.subr.bf16.mxu1 %v13840_v2  ;;  %v13850_v62 = vld [vmem:[#allocation76_spill] sm:$0xff]  ;;  %v13851_v2 = vld [vmem:[#allocation77_spill] sm:$0xff] }
 0x473   :  { %2925 = vmatpush2.bf16.msra.mxu0 %v13841_v3  ;;  %2966 = vmatpush2.bf16.msra.mxu1 %v13842_v18  ;;  %v13852_v3 = vld [vmem:[#allocation78_spill] sm:$0xff]  ;;  %v13853_v18 = vld [vmem:[#allocation79_spill] sm:$0xff] }
 0x474   :  { %2926 = vmatprep.subr.bf16.mxu0 %v13843_v39  ;;  %2967 = vmatprep.subr.bf16.mxu1 %v13844_v5  ;;  %v13854_v39 = vld [vmem:[#allocation80_spill] sm:$0xff]  ;;  %v13855_v5 = vld [vmem:[#allocation81_spill] sm:$0xff] }
 0x477   :  { %2927 = vmatpush2.bf16.msra.mxu0 %v13845_v6  ;;  %2968 = vmatpush2.bf16.msra.mxu1 %v13846_v49  ;;  %v13856_v6 = vld [vmem:[#allocation82_spill] sm:$0xff] }
 0x478   :  { %2928 = vmatprep.subr.bf16.mxu0 %v13847_v14  ;;  %2969 = vmatprep.subr.bf16.mxu1 %v13848_v11 }
 0x47b   :  { %2929 = vmatpush2.bf16.msra.mxu0 %v13849_v12  ;;  %2970 = vmatpush2.bf16.msra.mxu1 %v13850_v62 }
 0x47c   :  { %2930 = vmatprep.subr.bf16.mxu0 %v13851_v2  ;;  %2971 = vmatprep.subr.bf16.mxu1 %v13852_v3 }
 0x47f   :  { %2931 = vmatpush2.bf16.msra.mxu0 %v13853_v18  ;;  %2972 = vmatpush2.bf16.msra.mxu1 %v13854_v39 }
 0x480   :  { %2982 = vmatprep.subr.bf16.mxu0 %v13855_v5  ;;  %3023 = vmatprep.subr.bf16.mxu1 %v13856_v6 }
 0x4c2   :  { %v2676_v49 = vpop.f32.mrf.mxu0  ;;  %v2717_v14 = vpop.f32.mrf.mxu1 }
 0x4c3   :  { %v2814_v56 = vrot.slane %v2676_v49, 6  ;;  %v2816_v2 = vrot.slane %v2717_v14, 6 }
 0x4c4   :  { %v2678_v40 = vpop.f32.mrf.mxu0  ;;  %v2719_v11 = vpop.f32.mrf.mxu1 }
 0x4c5   :  { %v2815_v61 = vrot.slane %v2678_v40, 6  ;;  %v2830_v3 = vadd.f32 %v2814_v56, %v10134_v47  ;;  %v2832_v18 = vadd.f32 %v2816_v2, %v13761_v43  ;;  %v2817_v39 = vrot.slane %v2719_v11, 6 }
 0x4c6   :  { %v2680_v26 = vpop.f32.mrf.mxu0  ;;  %v2721_v12 = vpop.f32.mrf.mxu1 }
 0x4c7   :  { %v2831_v5 = vadd.f32 %v2815_v61, %v13762_v21  ;;  %v8285_v7 = vmul.f32 -1.442695, %v2830_v3  ;;  %v8287_v6 = vmul.f32 -1.442695, %v2832_v18  ;;  %v2833_v17 = vadd.f32 %v2817_v39, %v13763_v19 }
 0x4c8   :  { %v2681_v0 = vpop.f32.mrf.mxu0  ;;  %v2722_v62 = vpop.f32.mrf.mxu1 }
 0x4c9   :  { %v8286_v8 = vmul.f32 -1.442695, %v2831_v5  ;;  %8872 = vpow2.f32 %v8285_v7  ;;  %v8288_v12 = vmul.f32 -1.442695, %v2833_v17 }
 0x4ca   :  { %8874 = vpow2.f32 %v8287_v6 }
 0x4cb   :  { %8876 = vpow2.f32 %v8286_v8 }
 0x4cc   :  { %8878 = vpow2.f32 %v8288_v12 }
 0x4d6   :  { %v8873_v0 = vpop.eup %8872 }
 0x4d7   :  { %v8875_v26 = vpop.eup %8874  ;;  %v2844_v49 = vadd.f32 1.0, %v8873_v0 }
 0x4d8   :  { %v8877_v40 = vpop.eup %8876  ;;  %v2856_v62 = vadd.f32 1.0, %v8875_v26 }
 0x4d9   :  { %v8879_v56 = vpop.eup %8878  ;;  %v2845_v2 = vadd.f32 1.0, %v8877_v40  ;;  %8880 = vrcp.f32 %v2844_v49 }
 0x4da   :  { %8882 = vrcp.f32 %v2856_v62  ;;  %v2857_v39 = vadd.f32 1.0, %v8879_v56 }
 0x4db   :  { %8884 = vrcp.f32 %v2845_v2  ;;  %v2878_v2 = vrot.slane %v10333_v38, 7 }
 0x502   :  { %v2758_v11 = vpop.f32.mrf.mxu0  ;;  %v2799_v14 = vpop.f32.mrf.mxu1 }
 0x503   :  { %v2818_v3 = vrot.slane %v2758_v11, 6  ;;  %v2820_v18 = vrot.slane %v2799_v14, 6  ;;  %v8881_v14 = vpop.eup %8880 }
 0x504   :  { %v2760_v5 = vpop.f32.mrf.mxu0  ;;  %v2801_v7 = vpop.f32.mrf.mxu1 }
 0x505   :  { %v2834_v6 = vadd.f32 %v2818_v3, %v10163_v59  ;;  %v2836_v8 = vadd.f32 %v2820_v18, %v10165_v24  ;;  %v2819_v17 = vrot.slane %v2760_v5, 6  ;;  %v2821_v61 = vrot.slane %v2801_v7, 6  ;;  %v8883_v3 = vpop.eup %8882 }
 0x506   :  { %v2762_v12 = vpop.f32.mrf.mxu0  ;;  %v2803_v0 = vpop.f32.mrf.mxu1 }
 0x507   :  { %8886 = vtanh.f32 %v2834_v6  ;;  %v8289_v26 = vmul.f32 -1.442695, %v2836_v8  ;;  %v2835_v40 = vadd.f32 %v2819_v17, %v10167_v25  ;;  %v2837_v49 = vadd.f32 %v2821_v61, %v10169_v63  ;;  %v8885_v18 = vpop.eup %8884 }
 0x508   :  { %8888 = vrcp.f32 %v2857_v39  ;;  %v2763_v62 = vpop.f32.mrf.mxu0  ;;  %v2804_v56 = vpop.f32.mrf.mxu1  ;;  %v2882_v6 = vmul.f32 %v8883_v3, %v2878_v2  ;;  %v2879_v17 = vrot.slane %v10336_v53, 7  ;;  %v13857_v2 = vld [vmem:[#allocation149_spill] sm:$0xff] }
 0x509   :  { %8890 = vpow2.f32 %v8289_v26  ;;  %v8290_v11 = vmul.f32 -1.442695, %v2837_v49 }
 0x50a   :  { %8892 = vtanh.f32 %v2835_v40 }
 0x50b   :  { %8894 = vpow2.f32 %v8290_v11 }
 0x514   :  { %v8887_v5 = vpop.eup %8886 }
 0x515   :  { %v8889_v7 = vpop.eup %8888  ;;  %v2884_v8 = vmul.f32 %v8887_v5, %v8881_v14  ;;  %v4190_v5 = vsel %vm402_vm1, %v13857_v2, %v10339_v31  ;;  %v13859_v31 = vld [vmem:[#allocation96_spill] sm:$0xff]  ;;  %v13869_v2 = vld [vmem:[#allocation106_spill] sm:$0xff] }
 0x516   :  { %v8891_v12 = vpop.eup %8890  ;;  %v2883_v49 = vmul.f32 %v8889_v7, %v2879_v17 }
 0x517   :  { %v8893_v61 = vpop.eup %8892  ;;  %v10491_v39 = vadd.f32 %v2884_v8, %v2882_v6  ;;  %v2870_v0 = vadd.f32 1.0, %v8891_v12  ;;  %v13858_v6 = vld [vmem:[#allocation150_spill] sm:$0xff] }
 0x518   :  { %v8895_v26 = vpop.eup %8894  ;;  %v2885_v40 = vmul.f32 %v8893_v61, %v8885_v18  ;;  %v4191_v8 = vsel %vm402_vm1, %v13858_v6, %v10341_v37  ;;  %v13860_v37 = vld [vmem:[#allocation97_spill] sm:$0xff]  ;;  %v13872_v6 = vld [vmem:[#allocation112_spill] sm:$0xff] }
 0x519   :  { %8896 = vtanh.f32 %v10491_v39  ;;  %v2871_v62 = vadd.f32 1.0, %v8895_v26 }
 0x51a   :  { %8898 = vrcp.f32 %v2870_v0  ;;  %v10494_v56 = vadd.f32 %v2885_v40, %v2883_v49  ;;  %v13861_v49 = vld [vmem:[#allocation98_spill] sm:$0xff]  ;;  %v13862_v40 = vld [vmem:[#allocation99_spill] sm:$0xff] }
 0x51b   :  { %8900 = vrcp.f32 %v2871_v62  ;;  %v13863_v62 = vld [vmem:[#allocation100_spill] sm:$0xff] }
 0x51c   :  { %8902 = vtanh.f32 %v10494_v56 }
 0x526   :  { %v8897_v38 = vpop.eup %8896 }
 0x527   :  { %v8899_v11 = vpop.eup %8898 }
 0x528   :  { %v8901_v14 = vpop.eup %8900  ;;  %v2890_v53 = vmul.f32 %v8899_v11, %v8897_v38  ;;  %v13864_v38 = vld [vmem:[#allocation101_spill] sm:$0xff]  ;;  %v13865_v11 = vld [vmem:[#allocation102_spill] sm:$0xff] }
 0x529   :  { %v8903_v3 = vpop.eup %8902 }
 0x52a   :  { %v2891_v7 = vmul.f32 %v8903_v3, %v8901_v14  ;;  %v10501_v18 = vsel %vm404_vm2, %v4190_v5, %v2890_v53  ;;  %v2892_v12 = vpack.c.bf16 %v2890_v53, %v2890_v53  ;;  %v13866_v14 = vld [vmem:[#allocation103_spill] sm:$0xff]  ;;  %v13867_v53 = vld [vmem:[#allocation104_spill] sm:$0xff]  ;;  %v13868_v3 = vld [vmem:[#allocation105_spill] sm:$0xff] }
 0x52b   :  { %v13870_v5 = vld [vmem:[#allocation107_spill] sm:$0xff] }
 0x52c   :  { %v2893_v17 = vpack.c.bf16 %v2891_v7, %v2891_v7  ;;  %v10507_v61 = vsel %vm404_vm2, %v4191_v8, %v2891_v7  ;;  %v10509_v26 = vrot.slane %v2892_v12, 1  ;;  %v13871_v7 = vld [vmem:[#allocation108_spill] sm:$0xff]  ;;  %v13873_v8 = vld [vmem:[#allocation113_spill] sm:$0xff]  ;;  %v13874_v12 = vld [vmem:[#allocation131_spill] sm:$0xff] }
 0x52e   :  { %v2897_v0 = vrot.slane %v2893_v17, 1  ;;  %v13875_v17 = vld [vmem:[#allocation132_spill] sm:$0xff] }
 0x530   :  { %2932 = vmatprep.mubr.bf16.mxu0 %v2897_v0  ;;  %2973 = vmatprep.mubr.bf16.mxu1 %v2897_v0 }
 0x531   :  { %2933 = vmatmul.mubr.bf16.vlgmr.msra.gmra.mxu0 %v10509_v26  ;;  %2974 = vmatmul.mubr.bf16.vlgmr.msra.gmra.mxu1 %v10509_v26 }
 0x532   :  { %2983 = vmatpush1.bf16.msra.mxu0 %v13670_v1  ;;  %3024 = vmatpush1.bf16.msra.mxu1 %v13671_v48 }
 0x533   :  { %3014 = vmatprep.mubr.bf16.mxu0 %v2897_v0  ;;  %3055 = vmatprep.mubr.bf16.mxu1 %v2897_v0  ;;  %v13876_v0 = vld [vmem:[#allocation133_spill] sm:$0xff] }
 0x534   :  { %2984 = vmatprep.subr.bf16.mxu0 %v13672_v41  ;;  %3025 = vmatprep.subr.bf16.mxu1 %v13673_v23 }
 0x536   :  { %2985 = vmatpush1.bf16.msra.mxu0 %v13674_v34  ;;  %3026 = vmatpush1.bf16.msra.mxu1 %v13675_v33 }
 0x537   :  { %2986 = vmatprep.subr.bf16.mxu0 %v13676_v15  ;;  %3027 = vmatprep.subr.bf16.mxu1 %v13677_v51 }
 0x53a   :  { %2987 = vmatpush1.bf16.msra.mxu0 %v13764_v13  ;;  %3028 = vmatpush1.bf16.msra.mxu1 %v13765_v30 }
 0x53b   :  { %2988 = vmatprep.subr.bf16.mxu0 %v13766_v45  ;;  %3029 = vmatprep.subr.bf16.mxu1 %v13767_v46 }
 0x53e   :  { %2989 = vmatpush1.bf16.msra.mxu0 %v13768_v29  ;;  %3030 = vmatpush1.bf16.msra.mxu1 %v13859_v31 }
 0x53f   :  { %2990 = vmatprep.subr.bf16.mxu0 %v13860_v37  ;;  %3031 = vmatprep.subr.bf16.mxu1 %v13861_v49 }
 0x542   :  { %2991 = vmatpush1.bf16.msra.mxu0 %v13862_v40  ;;  %3032 = vmatpush1.bf16.msra.mxu1 %v13863_v62 }
 0x543   :  { %2992 = vmatprep.subr.bf16.mxu0 %v13864_v38  ;;  %3033 = vmatprep.subr.bf16.mxu1 %v13865_v11 }
 0x546   :  { %2993 = vmatpush1.bf16.msra.mxu0 %v13866_v14  ;;  %3034 = vmatpush1.bf16.msra.mxu1 %v13867_v53 }
 0x547   :  { %2994 = vmatprep.subr.bf16.mxu0 %v13868_v3  ;;  %3035 = vmatprep.subr.bf16.mxu1 %v13869_v2 }
 0x54a   :  { %2995 = vmatpush1.bf16.msra.mxu0 %v13870_v5  ;;  %3036 = vmatpush1.bf16.msra.mxu1 %v13871_v7 }
 0x54b   :  { %2996 = vmatprep.subr.bf16.mxu0 %v13782_v35  ;;  %3037 = vmatprep.subr.bf16.mxu1 %v13783_v28 }
 0x54e   :  { %2997 = vmatpush1.bf16.msra.mxu0 %v13784_v4  ;;  %3038 = vmatpush1.bf16.msra.mxu1 %v13872_v6 }
 0x54f   :  { %2998 = vmatprep.subr.bf16.mxu0 %v13873_v8  ;;  %3039 = vmatprep.subr.bf16.mxu1 %v13787_v27 }
 0x552   :  { %2999 = vmatpush2.bf16.msra.mxu0 %v13788_v22  ;;  %3040 = vmatpush2.bf16.msra.mxu1 %v13789_v44 }
 0x553   :  { %3000 = vmatprep.subr.bf16.mxu0 %v13790_v20  ;;  %3041 = vmatprep.subr.bf16.mxu1 %v13791_v36 }
 0x556   :  { %3001 = vmatpush2.bf16.msra.mxu0 %v13792_v52  ;;  %3042 = vmatpush2.bf16.msra.mxu1 %v13707_v9 }
 0x557   :  { %3002 = vmatprep.subr.bf16.mxu0 %v13708_v58  ;;  %3043 = vmatprep.subr.bf16.mxu1 %v13709_v16 }
 0x55a   :  { %3003 = vmatpush2.bf16.msra.mxu0 %v13793_v54  ;;  %3044 = vmatpush2.bf16.msra.mxu1 %v13794_v10  ;;  %v13877_v54 = vld [vmem:[#allocation134_spill] sm:$0xff]  ;;  %v13878_v10 = vld [vmem:[#allocation135_spill] sm:$0xff] }
 0x55b   :  { %3004 = vmatprep.subr.bf16.mxu0 %v13712_v50  ;;  %3045 = vmatprep.subr.bf16.mxu1 %v13713_v60  ;;  %v13879_v50 = vld [vmem:[#allocation136_spill] sm:$0xff]  ;;  %v13880_v60 = vld [vmem:[#allocation137_spill] sm:$0xff] }
 0x55e   :  { %3005 = vmatpush2.bf16.msra.mxu0 %v13714_v57  ;;  %3046 = vmatpush2.bf16.msra.mxu1 %v13715_v42  ;;  %v13881_v57 = vld [vmem:[#allocation138_spill] sm:$0xff]  ;;  %v13882_v42 = vld [vmem:[#allocation139_spill] sm:$0xff] }
 0x55f   :  { %3006 = vmatprep.subr.bf16.mxu0 %v13716_v55  ;;  %3047 = vmatprep.subr.bf16.mxu1 %v13717_v32  ;;  %v13883_v55 = vld [vmem:[#allocation140_spill] sm:$0xff]  ;;  %v13884_v32 = vld [vmem:[#allocation141_spill] sm:$0xff] }
 0x562   :  { %3007 = vmatpush2.bf16.msra.mxu0 %v13874_v12  ;;  %3048 = vmatpush2.bf16.msra.mxu1 %v13875_v17  ;;  %v13885_v12 = vld [vmem:[#allocation142_spill] sm:$0xff]  ;;  %v13886_v17 = vld [vmem:[#allocation143_spill] sm:$0xff] }
 0x563   :  { %3008 = vmatprep.subr.bf16.mxu0 %v13876_v0  ;;  %3049 = vmatprep.subr.bf16.mxu1 %v13877_v54  ;;  %v13887_v0 = vld [vmem:[#allocation144_spill] sm:$0xff]  ;;  %v13888_v54 = vld [vmem:[#allocation17_spill] sm:$0xff] }
 0x566   :  { %3009 = vmatpush2.bf16.msra.mxu0 %v13878_v10  ;;  %3050 = vmatpush2.bf16.msra.mxu1 %v13879_v50  ;;  %v13889_v10 = vld [vmem:[#allocation18_spill] sm:$0xff] }
 0x567   :  { %3010 = vmatprep.subr.bf16.mxu0 %v13880_v60  ;;  %3051 = vmatprep.subr.bf16.mxu1 %v13881_v57  ;;  %v13890_v57 = vld [vmem:[#allocation19_spill] sm:$0xff]  ;;  %v13899_v60 = vld [vmem:[#allocation28_spill] sm:$0xff] }
 0x56a   :  { %3011 = vmatpush2.bf16.msra.mxu0 %v13882_v42  ;;  %3052 = vmatpush2.bf16.msra.mxu1 %v13883_v55  ;;  %v13891_v42 = vld [vmem:[#allocation20_spill] sm:$0xff]  ;;  %v13892_v55 = vld [vmem:[#allocation21_spill] sm:$0xff] }
 0x56b   :  { %3012 = vmatprep.subr.bf16.mxu0 %v13884_v32  ;;  %3053 = vmatprep.subr.bf16.mxu1 %v13885_v12  ;;  %v13893_v32 = vld [vmem:[#allocation22_spill] sm:$0xff]  ;;  %v13894_v12 = vld [vmem:[#allocation23_spill] sm:$0xff] }
 0x56e   :  { %3013 = vmatpush2.bf16.msra.mxu0 %v13886_v17  ;;  %3054 = vmatpush2.bf16.msra.mxu1 %v13887_v0  ;;  %v13895_v17 = vld [vmem:[#allocation24_spill] sm:$0xff]  ;;  %v13896_v0 = vld [vmem:[#allocation25_spill] sm:$0xff] }
 0x56f   :  { %3162 = vmatprep.subr.bf16.mxu0 %v13888_v54  ;;  %3203 = vmatprep.subr.bf16.mxu1 %v13889_v10  ;;  %v13897_v54 = vld [vmem:[#allocation26_spill] sm:$0xff]  ;;  %v13898_v10 = vld [vmem:[#allocation27_spill] sm:$0xff] }
 0x571   :  { %3015 = vmatmul.mubr.bf16.vlgmr.msra.gmra.mxu0 %v10509_v26  ;;  %3056 = vmatmul.mubr.bf16.vlgmr.msra.gmra.mxu1 %v10509_v26  ;;  %v13900_v26 = vld [vmem:[#allocation29_spill] sm:$0xff] }
 0x572   :  { %3163 = vmatpush1.bf16.msra.mxu0 %v13890_v57  ;;  %3204 = vmatpush1.bf16.msra.mxu1 %v13891_v42  ;;  %v13901_v57 = vld [vmem:[#allocation30_spill] sm:$0xff]  ;;  %v13902_v42 = vld [vmem:[#allocation31_spill] sm:$0xff] }
 0x573   :  { %3164 = vmatprep.subr.bf16.mxu0 %v13892_v55  ;;  %3205 = vmatprep.subr.bf16.mxu1 %v13893_v32  ;;  %v13903_v55 = vld [vmem:[#allocation32_spill] sm:$0xff]  ;;  %v13904_v32 = vld [vmem:[#allocation33_spill] sm:$0xff] }
 0x576   :  { %3165 = vmatpush1.bf16.msra.mxu0 %v13894_v12  ;;  %3206 = vmatpush1.bf16.msra.mxu1 %v13895_v17  ;;  %v13905_v12 = vld [vmem:[#allocation34_spill] sm:$0xff]  ;;  %v13906_v17 = vld [vmem:[#allocation35_spill] sm:$0xff] }
 0x577   :  { %3166 = vmatprep.subr.bf16.mxu0 %v13896_v0  ;;  %3207 = vmatprep.subr.bf16.mxu1 %v13897_v54  ;;  %v13907_v0 = vld [vmem:[#allocation36_spill] sm:$0xff]  ;;  %v13908_v54 = vld [vmem:[#allocation37_spill] sm:$0xff] }
 0x57a   :  { %3167 = vmatpush1.bf16.msra.mxu0 %v13898_v10  ;;  %3208 = vmatpush1.bf16.msra.mxu1 %v13899_v60  ;;  %v13909_v10 = vld [vmem:[#allocation38_spill] sm:$0xff]  ;;  %v13910_v60 = vld [vmem:[#allocation39_spill] sm:$0xff] }
 0x57b   :  { %3168 = vmatprep.subr.bf16.mxu0 %v13900_v26  ;;  %3209 = vmatprep.subr.bf16.mxu1 %v13901_v57  ;;  %v13911_v26 = vld [vmem:[#allocation40_spill] sm:$0xff]  ;;  %v13912_v57 = vld [vmem:[#allocation41_spill] sm:$0xff] }
 0x57e   :  { %3169 = vmatpush1.bf16.msra.mxu0 %v13902_v42  ;;  %3210 = vmatpush1.bf16.msra.mxu1 %v13903_v55  ;;  %v13913_v42 = vld [vmem:[#allocation42_spill] sm:$0xff]  ;;  %v13914_v55 = vld [vmem:[#allocation43_spill] sm:$0xff] }
 0x57f   :  { %3170 = vmatprep.subr.bf16.mxu0 %v13904_v32  ;;  %3211 = vmatprep.subr.bf16.mxu1 %v13905_v12  ;;  %v13915_v32 = vld [vmem:[#allocation44_spill] sm:$0xff]  ;;  %v13916_v12 = vld [vmem:[#allocation45_spill] sm:$0xff] }
 0x582   :  { %3171 = vmatpush1.bf16.msra.mxu0 %v13906_v17  ;;  %3212 = vmatpush1.bf16.msra.mxu1 %v13907_v0  ;;  %v13917_v17 = vld [vmem:[#allocation46_spill] sm:$0xff]  ;;  %v13918_v0 = vld [vmem:[#allocation47_spill] sm:$0xff] }
 0x583   :  { %3172 = vmatprep.subr.bf16.mxu0 %v13908_v54  ;;  %3213 = vmatprep.subr.bf16.mxu1 %v13909_v10  ;;  %v13919_v54 = vld [vmem:[#allocation48_spill] sm:$0xff]  ;;  %v13920_v10 = vld [vmem:[#allocation49_spill] sm:$0xff] }
 0x586   :  { %3173 = vmatpush1.bf16.msra.mxu0 %v13910_v60  ;;  %3214 = vmatpush1.bf16.msra.mxu1 %v13911_v26  ;;  %v13921_v60 = vld [vmem:[#allocation50_spill] sm:$0xff]  ;;  %v13922_v26 = vld [vmem:[#allocation51_spill] sm:$0xff] }
 0x587   :  { %3174 = vmatprep.subr.bf16.mxu0 %v13912_v57  ;;  %3215 = vmatprep.subr.bf16.mxu1 %v13913_v42  ;;  %v13923_v57 = vld [vmem:[#allocation52_spill] sm:$0xff]  ;;  %v13924_v42 = vld [vmem:[#allocation53_spill] sm:$0xff] }
 0x58a   :  { %3175 = vmatpush1.bf16.msra.mxu0 %v13914_v55  ;;  %3216 = vmatpush1.bf16.msra.mxu1 %v13915_v32  ;;  %v13925_v55 = vld [vmem:[#allocation54_spill] sm:$0xff]  ;;  %v13926_v32 = vld [vmem:[#allocation55_spill] sm:$0xff] }
 0x58b   :  { %3176 = vmatprep.subr.bf16.mxu0 %v13916_v12  ;;  %3217 = vmatprep.subr.bf16.mxu1 %v13917_v17  ;;  %v13927_v12 = vld [vmem:[#allocation56_spill] sm:$0xff]  ;;  %v13928_v17 = vld [vmem:[#allocation57_spill] sm:$0xff] }
 0x58e   :  { %3177 = vmatpush1.bf16.msra.mxu0 %v13918_v0  ;;  %3218 = vmatpush1.bf16.msra.mxu1 %v13919_v54  ;;  %v13929_v0 = vld [vmem:[#allocation58_spill] sm:$0xff]  ;;  %v13930_v54 = vld [vmem:[#allocation59_spill] sm:$0xff] }
 0x58f   :  { %3178 = vmatprep.subr.bf16.mxu0 %v13920_v10  ;;  %3219 = vmatprep.subr.bf16.mxu1 %v13921_v60  ;;  %v13931_v10 = vld [vmem:[#allocation60_spill] sm:$0xff]  ;;  %v13932_v60 = vld [vmem:[#allocation61_spill] sm:$0xff] }
 0x592   :  { %3179 = vmatpush2.bf16.msra.mxu0 %v13922_v26  ;;  %3220 = vmatpush2.bf16.msra.mxu1 %v13923_v57  ;;  %v13933_v26 = vld [vmem:[#allocation62_spill] sm:$0xff]  ;;  %v13934_v57 = vld [vmem:[#allocation63_spill] sm:$0xff] }
 0x593   :  { %3180 = vmatprep.subr.bf16.mxu0 %v13924_v42  ;;  %3221 = vmatprep.subr.bf16.mxu1 %v13925_v55  ;;  %v13935_v42 = vld [vmem:[#allocation64_spill] sm:$0xff]  ;;  %v13936_v55 = vld [vmem:[#allocation65_spill] sm:$0xff] }
 0x596   :  { %3181 = vmatpush2.bf16.msra.mxu0 %v13926_v32  ;;  %3222 = vmatpush2.bf16.msra.mxu1 %v13927_v12  ;;  %v13937_v32 = vld [vmem:[#allocation66_spill] sm:$0xff]  ;;  %v13938_v12 = vld [vmem:[#allocation67_spill] sm:$0xff] }
 0x597   :  { %3182 = vmatprep.subr.bf16.mxu0 %v13928_v17  ;;  %3223 = vmatprep.subr.bf16.mxu1 %v13929_v0  ;;  %v13939_v17 = vld [vmem:[#allocation68_spill] sm:$0xff]  ;;  %v13940_v0 = vld [vmem:[#allocation69_spill] sm:$0xff] }
 0x59a   :  { %3183 = vmatpush2.bf16.msra.mxu0 %v13930_v54  ;;  %3224 = vmatpush2.bf16.msra.mxu1 %v13931_v10  ;;  %v13941_v54 = vld [vmem:[#allocation70_spill] sm:$0xff]  ;;  %v13942_v10 = vld [vmem:[#allocation71_spill] sm:$0xff] }
 0x59b   :  { %3184 = vmatprep.subr.bf16.mxu0 %v13932_v60  ;;  %3225 = vmatprep.subr.bf16.mxu1 %v13933_v26  ;;  %v13943_v60 = vld [vmem:[#allocation72_spill] sm:$0xff]  ;;  %v13944_v26 = vld [vmem:[#allocation73_spill] sm:$0xff] }
 0x59e   :  { %3185 = vmatpush2.bf16.msra.mxu0 %v13934_v57  ;;  %3226 = vmatpush2.bf16.msra.mxu1 %v13935_v42  ;;  %v13945_v57 = vld [vmem:[#allocation74_spill] sm:$0xff]  ;;  %v13946_v42 = vld [vmem:[#allocation75_spill] sm:$0xff] }
 0x59f   :  { %3186 = vmatprep.subr.bf16.mxu0 %v13936_v55  ;;  %3227 = vmatprep.subr.bf16.mxu1 %v13937_v32  ;;  %v13947_v55 = vld [vmem:[#allocation76_spill] sm:$0xff]  ;;  %v13948_v32 = vld [vmem:[#allocation77_spill] sm:$0xff] }
 0x5a2   :  { %3187 = vmatpush2.bf16.msra.mxu0 %v13938_v12  ;;  %3228 = vmatpush2.bf16.msra.mxu1 %v13939_v17  ;;  %v13949_v12 = vld [vmem:[#allocation78_spill] sm:$0xff]  ;;  %v13950_v17 = vld [vmem:[#allocation79_spill] sm:$0xff] }
 0x5a3   :  { %3188 = vmatprep.subr.bf16.mxu0 %v13940_v0  ;;  %3229 = vmatprep.subr.bf16.mxu1 %v13941_v54  ;;  %v13951_v0 = vld [vmem:[#allocation80_spill] sm:$0xff]  ;;  %v13952_v54 = vld [vmem:[#allocation81_spill] sm:$0xff] }
 0x5a6   :  { %3189 = vmatpush2.bf16.msra.mxu0 %v13942_v10  ;;  %3230 = vmatpush2.bf16.msra.mxu1 %v13943_v60  ;;  %v13953_v10 = vld [vmem:[#allocation82_spill] sm:$0xff] }
 0x5a7   :  { %3190 = vmatprep.subr.bf16.mxu0 %v13944_v26  ;;  %3231 = vmatprep.subr.bf16.mxu1 %v13945_v57 }
 0x5aa   :  { %3191 = vmatpush2.bf16.msra.mxu0 %v13946_v42  ;;  %3232 = vmatpush2.bf16.msra.mxu1 %v13947_v55 }
 0x5ab   :  { %3192 = vmatprep.subr.bf16.mxu0 %v13948_v32  ;;  %3233 = vmatprep.subr.bf16.mxu1 %v13949_v12 }
 0x5ae   :  { %3193 = vmatpush2.bf16.msra.mxu0 %v13950_v17  ;;  %3234 = vmatpush2.bf16.msra.mxu1 %v13951_v0 }
 0x5af   :  { %3244 = vmatprep.subr.bf16.mxu0 %v13952_v54  ;;  %3285 = vmatprep.subr.bf16.mxu1 %v13953_v10 }
 0x5f1   :  { %v2934_v60 = vpop.f32.mrf.mxu0  ;;  %v2975_v26 = vpop.f32.mrf.mxu1 }
 0x5f2   :  { %v3072_v9 = vrot.slane %v2934_v60, 5  ;;  %v3074_v32 = vrot.slane %v2975_v26, 5 }
 0x5f3   :  { %v2936_v50 = vpop.f32.mrf.mxu0  ;;  %v2977_v57 = vpop.f32.mrf.mxu1 }
 0x5f4   :  { %v3073_v52 = vrot.slane %v2936_v50, 5  ;;  %v3088_v12 = vadd.f32 %v3072_v9, %v10134_v47  ;;  %v3090_v17 = vadd.f32 %v3074_v32, %v13761_v43  ;;  %v3075_v0 = vrot.slane %v2977_v57, 5 }
 0x5f5   :  { %v2938_v16 = vpop.f32.mrf.mxu0  ;;  %v2979_v42 = vpop.f32.mrf.mxu1 }
 0x5f6   :  { %v3089_v54 = vadd.f32 %v3073_v52, %v13762_v21  ;;  %v8291_v36 = vmul.f32 -1.442695, %v3088_v12  ;;  %v8293_v10 = vmul.f32 -1.442695, %v3090_v17  ;;  %v3091_v20 = vadd.f32 %v3075_v0, %v13763_v19 }
 0x5f7   :  { %v2939_v58 = vpop.f32.mrf.mxu0  ;;  %v2980_v55 = vpop.f32.mrf.mxu1 }
 0x5f8   :  { %v8292_v44 = vmul.f32 -1.442695, %v3089_v54  ;;  %8904 = vpow2.f32 %v8291_v36  ;;  %v8294_v16 = vmul.f32 -1.442695, %v3091_v20 }
 0x5f9   :  { %8906 = vpow2.f32 %v8293_v10 }
 0x5fa   :  { %8908 = vpow2.f32 %v8292_v44 }
 0x5fb   :  { %8910 = vpow2.f32 %v8294_v16 }
 0x605   :  { %v8905_v58 = vpop.eup %8904 }
 0x606   :  { %v8907_v60 = vpop.eup %8906  ;;  %v3102_v42 = vadd.f32 1.0, %v8905_v58 }
 0x607   :  { %v8909_v50 = vpop.eup %8908  ;;  %v3114_v9 = vadd.f32 1.0, %v8907_v60 }
 0x608   :  { %v8911_v55 = vpop.eup %8910  ;;  %v3103_v32 = vadd.f32 1.0, %v8909_v50  ;;  %8912 = vrcp.f32 %v3102_v42 }
 0x609   :  { %8914 = vrcp.f32 %v3114_v9  ;;  %v3115_v17 = vadd.f32 1.0, %v8911_v55 }
 0x60a   :  { %8916 = vrcp.f32 %v3103_v32  ;;  %v3136_v32 = vrot.slane %v10491_v39, 7 }
 0x631   :  { %v3016_v57 = vpop.f32.mrf.mxu0  ;;  %v3057_v26 = vpop.f32.mrf.mxu1 }
 0x632   :  { %v3076_v52 = vrot.slane %v3016_v57, 5  ;;  %v3078_v12 = vrot.slane %v3057_v26, 5  ;;  %v8913_v26 = vpop.eup %8912 }
 0x633   :  { %v3018_v54 = vpop.f32.mrf.mxu0  ;;  %v3059_v36 = vpop.f32.mrf.mxu1 }
 0x634   :  { %v3092_v10 = vadd.f32 %v3076_v52, %v10163_v59  ;;  %v3094_v44 = vadd.f32 %v3078_v12, %v10165_v24  ;;  %v3077_v20 = vrot.slane %v3018_v54, 5  ;;  %v3079_v0 = vrot.slane %v3059_v36, 5  ;;  %v8915_v52 = vpop.eup %8914 }
 0x635   :  { %v3020_v16 = vpop.f32.mrf.mxu0  ;;  %v3061_v58 = vpop.f32.mrf.mxu1 }
 0x636   :  { %8918 = vtanh.f32 %v3092_v10  ;;  %v8295_v60 = vmul.f32 -1.442695, %v3094_v44  ;;  %v3093_v50 = vadd.f32 %v3077_v20, %v10167_v25  ;;  %v3095_v42 = vadd.f32 %v3079_v0, %v10169_v63  ;;  %v8917_v12 = vpop.eup %8916 }
 0x637   :  { %8920 = vrcp.f32 %v3115_v17  ;;  %v3021_v9 = vpop.f32.mrf.mxu0  ;;  %v3062_v55 = vpop.f32.mrf.mxu1  ;;  %v3140_v10 = vmul.f32 %v8915_v52, %v3136_v32  ;;  %v3137_v20 = vrot.slane %v10494_v56, 7 }
 0x638   :  { %8922 = vpow2.f32 %v8295_v60  ;;  %v8296_v57 = vmul.f32 -1.442695, %v3095_v42 }
 0x639   :  { %8924 = vtanh.f32 %v3093_v50 }
 0x63a   :  { %8926 = vpow2.f32 %v8296_v57 }
 0x643   :  { %v8919_v54 = vpop.eup %8918 }
 0x644   :  { %v8921_v36 = vpop.eup %8920  ;;  %v3142_v44 = vmul.f32 %v8919_v54, %v8913_v26 }
 0x645   :  { %v8923_v16 = vpop.eup %8922  ;;  %v3141_v42 = vmul.f32 %v8921_v36, %v3137_v20 }
 0x646   :  { %v8925_v0 = vpop.eup %8924  ;;  %v10653_v17 = vadd.f32 %v3142_v44, %v3140_v10  ;;  %v3128_v58 = vadd.f32 1.0, %v8923_v16 }
 0x647   :  { %v8927_v60 = vpop.eup %8926  ;;  %v3143_v50 = vmul.f32 %v8925_v0, %v8917_v12 }
 0x648   :  { %8928 = vtanh.f32 %v10653_v17  ;;  %v3129_v9 = vadd.f32 1.0, %v8927_v60  ;;  %v13957_v60 = vld [vmem:[#allocation119_spill] sm:$0xff] }
 0x649   :  { %8930 = vrcp.f32 %v3128_v58  ;;  %v10656_v55 = vadd.f32 %v3143_v50, %v3141_v42  ;;  %v13956_v58 = vld [vmem:[#allocation118_spill] sm:$0xff]  ;;  %v13958_v42 = vld [vmem:[#allocation120_spill] sm:$0xff]  ;;  %v13959_v50 = vld [vmem:[#allocation121_spill] sm:$0xff] }
 0x64a   :  { %8932 = vrcp.f32 %v3129_v9  ;;  %v13960_v9 = vld [vmem:[#allocation122_spill] sm:$0xff] }
 0x64b   :  { %8934 = vtanh.f32 %v10656_v55 }
 0x655   :  { %v8929_v39 = vpop.eup %8928 }
 0x656   :  { %v8931_v57 = vpop.eup %8930 }
 0x657   :  { %v8933_v26 = vpop.eup %8932  ;;  %v3148_v56 = vmul.f32 %v8931_v57, %v8929_v39  ;;  %v13961_v39 = vld [vmem:[#allocation123_spill] sm:$0xff]  ;;  %v13962_v57 = vld [vmem:[#allocation124_spill] sm:$0xff] }
 0x658   :  { %v8935_v52 = vpop.eup %8934 }
 0x659   :  { %v3149_v32 = vmul.f32 %v8935_v52, %v8933_v26  ;;  %v3150_v54 = vpack.c.bf16 %v3148_v56, %v3148_v56  ;;  %v10661_v36 = vsel %vm406_vm3, %v10501_v18, %v3148_v56  ;;  %v13954_v18 = vld [vmem:[#allocation116_spill] sm:$0xff]  ;;  %v13963_v26 = vld [vmem:[#allocation125_spill] sm:$0xff]  ;;  %v13964_v56 = vld [vmem:[#allocation126_spill] sm:$0xff] }
 0x65a   :  { %v13965_v52 = vld [vmem:[#allocation127_spill] sm:$0xff] }
 0x65b   :  { %v3151_v12 = vpack.c.bf16 %v3149_v32, %v3149_v32  ;;  %v10665_v10 = vsel %vm406_vm3, %v10507_v61, %v3149_v32  ;;  %v3153_v44 = vshrl.u32 %v3150_v54, 16  ;;  %v13955_v61 = vld [vmem:[#allocation117_spill] sm:$0xff]  ;;  %v13966_v32 = vld [vmem:[#allocation128_spill] sm:$0xff] }
 0x65c   :  { %v13967_v54 = vld [vmem:[#allocation129_spill] sm:$0xff] }
 0x65d   :  { %v3157_v16 = vshrl.u32 %v3151_v12, 16  ;;  %v10667_v0 = vrot.slane %v3153_v44, 1  ;;  %v13968_v12 = vld [vmem:[#allocation130_spill] sm:$0xff]  ;;  %v13969_v44 = vld [vmem:[#allocation131_spill] sm:$0xff] }
 0x65f   :  { %v3159_v20 = vrot.slane %v3157_v16, 1  ;;  %v13970_v16 = vld [vmem:[#allocation132_spill] sm:$0xff] }
 0x661   :  { %3194 = vmatprep.mubr.bf16.mxu0 %v3159_v20  ;;  %3235 = vmatprep.mubr.bf16.mxu1 %v3159_v20 }
 0x662   :  { %3195 = vmatmul.mubr.bf16.vlgmr.msra.gmra.mxu0 %v10667_v0  ;;  %3236 = vmatmul.mubr.bf16.vlgmr.msra.gmra.mxu1 %v10667_v0 }
 0x663   :  { %3245 = vmatpush1.bf16.msra.mxu0 %v13670_v1  ;;  %3286 = vmatpush1.bf16.msra.mxu1 %v13671_v48 }
 0x664   :  { %3276 = vmatprep.mubr.bf16.mxu0 %v3159_v20  ;;  %3317 = vmatprep.mubr.bf16.mxu1 %v3159_v20  ;;  %v13971_v20 = vld [vmem:[#allocation133_spill] sm:$0xff] }
 0x665   :  { %3246 = vmatprep.subr.bf16.mxu0 %v13672_v41  ;;  %3287 = vmatprep.subr.bf16.mxu1 %v13673_v23 }
 0x667   :  { %3247 = vmatpush1.bf16.msra.mxu0 %v13674_v34  ;;  %3288 = vmatpush1.bf16.msra.mxu1 %v13675_v33 }
 0x668   :  { %3248 = vmatprep.subr.bf16.mxu0 %v13676_v15  ;;  %3289 = vmatprep.subr.bf16.mxu1 %v13677_v51 }
 0x66b   :  { %3249 = vmatpush1.bf16.msra.mxu0 %v13764_v13  ;;  %3290 = vmatpush1.bf16.msra.mxu1 %v13765_v30 }
 0x66c   :  { %3250 = vmatprep.subr.bf16.mxu0 %v13766_v45  ;;  %3291 = vmatprep.subr.bf16.mxu1 %v13767_v46 }
 0x66f   :  { %3251 = vmatpush1.bf16.msra.mxu0 %v13768_v29  ;;  %3292 = vmatpush1.bf16.msra.mxu1 %v13859_v31 }
 0x670   :  { %3252 = vmatprep.subr.bf16.mxu0 %v13860_v37  ;;  %3293 = vmatprep.subr.bf16.mxu1 %v13861_v49 }
 0x673   :  { %3253 = vmatpush1.bf16.msra.mxu0 %v13862_v40  ;;  %3294 = vmatpush1.bf16.msra.mxu1 %v13863_v62 }
 0x674   :  { %3254 = vmatprep.subr.bf16.mxu0 %v13864_v38  ;;  %3295 = vmatprep.subr.bf16.mxu1 %v13865_v11 }
 0x677   :  { %3255 = vmatpush1.bf16.msra.mxu0 %v13866_v14  ;;  %3296 = vmatpush1.bf16.msra.mxu1 %v13867_v53 }
 0x678   :  { %3256 = vmatprep.subr.bf16.mxu0 %v13868_v3  ;;  %3297 = vmatprep.subr.bf16.mxu1 %v13869_v2 }
 0x67b   :  { %3257 = vmatpush1.bf16.msra.mxu0 %v13870_v5  ;;  %3298 = vmatpush1.bf16.msra.mxu1 %v13871_v7 }
 0x67c   :  { %3258 = vmatprep.subr.bf16.mxu0 %v13782_v35  ;;  %3299 = vmatprep.subr.bf16.mxu1 %v13783_v28 }
 0x67f   :  { %3259 = vmatpush1.bf16.msra.mxu0 %v13784_v4  ;;  %3300 = vmatpush1.bf16.msra.mxu1 %v13872_v6 }
 0x680   :  { %3260 = vmatprep.subr.bf16.mxu0 %v13873_v8  ;;  %3301 = vmatprep.subr.bf16.mxu1 %v13787_v27 }
 0x683   :  { %3261 = vmatpush2.bf16.msra.mxu0 %v13788_v22  ;;  %3302 = vmatpush2.bf16.msra.mxu1 %v13954_v18 }
 0x684   :  { %3262 = vmatprep.subr.bf16.mxu0 %v13955_v61  ;;  %3303 = vmatprep.subr.bf16.mxu1 %v13956_v58 }
 0x687   :  { %3263 = vmatpush2.bf16.msra.mxu0 %v13957_v60  ;;  %3304 = vmatpush2.bf16.msra.mxu1 %v13958_v42 }
 0x688   :  { %3264 = vmatprep.subr.bf16.mxu0 %v13959_v50  ;;  %3305 = vmatprep.subr.bf16.mxu1 %v13960_v9 }
 0x68b   :  { %3265 = vmatpush2.bf16.msra.mxu0 %v13961_v39  ;;  %3306 = vmatpush2.bf16.msra.mxu1 %v13962_v57  ;;  %v13972_v39 = vld [vmem:[#allocation134_spill] sm:$0xff]  ;;  %v13973_v57 = vld [vmem:[#allocation135_spill] sm:$0xff] }
 0x68c   :  { %3266 = vmatprep.subr.bf16.mxu0 %v13963_v26  ;;  %3307 = vmatprep.subr.bf16.mxu1 %v13964_v56  ;;  %v13974_v26 = vld [vmem:[#allocation136_spill] sm:$0xff]  ;;  %v13975_v56 = vld [vmem:[#allocation137_spill] sm:$0xff] }
 0x68f   :  { %3267 = vmatpush2.bf16.msra.mxu0 %v13965_v52  ;;  %3308 = vmatpush2.bf16.msra.mxu1 %v13966_v32  ;;  %v13976_v52 = vld [vmem:[#allocation138_spill] sm:$0xff]  ;;  %v13977_v32 = vld [vmem:[#allocation139_spill] sm:$0xff] }
 0x690   :  { %3268 = vmatprep.subr.bf16.mxu0 %v13967_v54  ;;  %3309 = vmatprep.subr.bf16.mxu1 %v13968_v12  ;;  %v13978_v54 = vld [vmem:[#allocation140_spill] sm:$0xff]  ;;  %v13979_v12 = vld [vmem:[#allocation141_spill] sm:$0xff] }
 0x693   :  { %3269 = vmatpush2.bf16.msra.mxu0 %v13969_v44  ;;  %3310 = vmatpush2.bf16.msra.mxu1 %v13970_v16  ;;  %v13980_v44 = vld [vmem:[#allocation142_spill] sm:$0xff]  ;;  %v13981_v16 = vld [vmem:[#allocation143_spill] sm:$0xff] }
 0x694   :  { %3270 = vmatprep.subr.bf16.mxu0 %v13971_v20  ;;  %3311 = vmatprep.subr.bf16.mxu1 %v13972_v39  ;;  %v13982_v20 = vld [vmem:[#allocation144_spill] sm:$0xff]  ;;  %v13983_v39 = vld [vmem:[#allocation17_spill] sm:$0xff] }
 0x697   :  { %3271 = vmatpush2.bf16.msra.mxu0 %v13973_v57  ;;  %3312 = vmatpush2.bf16.msra.mxu1 %v13974_v26  ;;  %v13984_v57 = vld [vmem:[#allocation18_spill] sm:$0xff] }
 0x698   :  { %3272 = vmatprep.subr.bf16.mxu0 %v13975_v56  ;;  %3313 = vmatprep.subr.bf16.mxu1 %v13976_v52  ;;  %v13985_v52 = vld [vmem:[#allocation19_spill] sm:$0xff]  ;;  %v13994_v56 = vld [vmem:[#allocation28_spill] sm:$0xff] }
 0x69b   :  { %3273 = vmatpush2.bf16.msra.mxu0 %v13977_v32  ;;  %3314 = vmatpush2.bf16.msra.mxu1 %v13978_v54  ;;  %v13986_v32 = vld [vmem:[#allocation20_spill] sm:$0xff]  ;;  %v13987_v54 = vld [vmem:[#allocation21_spill] sm:$0xff] }
 0x69c   :  { %3274 = vmatprep.subr.bf16.mxu0 %v13979_v12  ;;  %3315 = vmatprep.subr.bf16.mxu1 %v13980_v44  ;;  %v13988_v12 = vld [vmem:[#allocation22_spill] sm:$0xff]  ;;  %v13989_v44 = vld [vmem:[#allocation23_spill] sm:$0xff] }
 0x69f   :  { %3275 = vmatpush2.bf16.msra.mxu0 %v13981_v16  ;;  %3316 = vmatpush2.bf16.msra.mxu1 %v13982_v20  ;;  %v13990_v16 = vld [vmem:[#allocation24_spill] sm:$0xff]  ;;  %v13991_v20 = vld [vmem:[#allocation25_spill] sm:$0xff] }
 0x6a0   :  { %3420 = vmatprep.subr.bf16.mxu0 %v13983_v39  ;;  %3461 = vmatprep.subr.bf16.mxu1 %v13984_v57  ;;  %v13992_v39 = vld [vmem:[#allocation26_spill] sm:$0xff]  ;;  %v13993_v57 = vld [vmem:[#allocation27_spill] sm:$0xff] }
 0x6a2   :  { %3277 = vmatmul.mubr.bf16.vlgmr.msra.gmra.mxu0 %v10667_v0  ;;  %3318 = vmatmul.mubr.bf16.vlgmr.msra.gmra.mxu1 %v10667_v0  ;;  %v13995_v0 = vld [vmem:[#allocation29_spill] sm:$0xff] }
 0x6a3   :  { %3421 = vmatpush1.bf16.msra.mxu0 %v13985_v52  ;;  %3462 = vmatpush1.bf16.msra.mxu1 %v13986_v32  ;;  %v13996_v52 = vld [vmem:[#allocation30_spill] sm:$0xff]  ;;  %v13997_v32 = vld [vmem:[#allocation31_spill] sm:$0xff] }
 0x6a4   :  { %3422 = vmatprep.subr.bf16.mxu0 %v13987_v54  ;;  %3463 = vmatprep.subr.bf16.mxu1 %v13988_v12  ;;  %v13998_v54 = vld [vmem:[#allocation32_spill] sm:$0xff]  ;;  %v13999_v12 = vld [vmem:[#allocation33_spill] sm:$0xff] }
 0x6a7   :  { %3423 = vmatpush1.bf16.msra.mxu0 %v13989_v44  ;;  %3464 = vmatpush1.bf16.msra.mxu1 %v13990_v16  ;;  %v14000_v44 = vld [vmem:[#allocation34_spill] sm:$0xff]  ;;  %v14001_v16 = vld [vmem:[#allocation35_spill] sm:$0xff] }
 0x6a8   :  { %3424 = vmatprep.subr.bf16.mxu0 %v13991_v20  ;;  %3465 = vmatprep.subr.bf16.mxu1 %v13992_v39  ;;  %v14002_v20 = vld [vmem:[#allocation36_spill] sm:$0xff]  ;;  %v14003_v39 = vld [vmem:[#allocation37_spill] sm:$0xff] }
 0x6ab   :  { %3425 = vmatpush1.bf16.msra.mxu0 %v13993_v57  ;;  %3466 = vmatpush1.bf16.msra.mxu1 %v13994_v56  ;;  %v14004_v57 = vld [vmem:[#allocation38_spill] sm:$0xff]  ;;  %v14005_v56 = vld [vmem:[#allocation39_spill] sm:$0xff] }
 0x6ac   :  { %3426 = vmatprep.subr.bf16.mxu0 %v13995_v0  ;;  %3467 = vmatprep.subr.bf16.mxu1 %v13996_v52  ;;  %v14006_v0 = vld [vmem:[#allocation40_spill] sm:$0xff]  ;;  %v14007_v52 = vld [vmem:[#allocation41_spill] sm:$0xff] }
 0x6af   :  { %3427 = vmatpush1.bf16.msra.mxu0 %v13997_v32  ;;  %3468 = vmatpush1.bf16.msra.mxu1 %v13998_v54  ;;  %v14008_v32 = vld [vmem:[#allocation42_spill] sm:$0xff]  ;;  %v14009_v54 = vld [vmem:[#allocation43_spill] sm:$0xff] }
 0x6b0   :  { %3428 = vmatprep.subr.bf16.mxu0 %v13999_v12  ;;  %3469 = vmatprep.subr.bf16.mxu1 %v14000_v44  ;;  %v14010_v12 = vld [vmem:[#allocation44_spill] sm:$0xff]  ;;  %v14011_v44 = vld [vmem:[#allocation45_spill] sm:$0xff] }
 0x6b3   :  { %3429 = vmatpush1.bf16.msra.mxu0 %v14001_v16  ;;  %3470 = vmatpush1.bf16.msra.mxu1 %v14002_v20  ;;  %v14012_v16 = vld [vmem:[#allocation46_spill] sm:$0xff]  ;;  %v14013_v20 = vld [vmem:[#allocation47_spill] sm:$0xff] }
 0x6b4   :  { %3430 = vmatprep.subr.bf16.mxu0 %v14003_v39  ;;  %3471 = vmatprep.subr.bf16.mxu1 %v14004_v57  ;;  %v14014_v39 = vld [vmem:[#allocation48_spill] sm:$0xff]  ;;  %v14015_v57 = vld [vmem:[#allocation49_spill] sm:$0xff] }
 0x6b7   :  { %3431 = vmatpush1.bf16.msra.mxu0 %v14005_v56  ;;  %3472 = vmatpush1.bf16.msra.mxu1 %v14006_v0  ;;  %v14016_v56 = vld [vmem:[#allocation50_spill] sm:$0xff]  ;;  %v14017_v0 = vld [vmem:[#allocation51_spill] sm:$0xff] }
 0x6b8   :  { %3432 = vmatprep.subr.bf16.mxu0 %v14007_v52  ;;  %3473 = vmatprep.subr.bf16.mxu1 %v14008_v32  ;;  %v14018_v52 = vld [vmem:[#allocation52_spill] sm:$0xff]  ;;  %v14019_v32 = vld [vmem:[#allocation53_spill] sm:$0xff] }
 0x6bb   :  { %3433 = vmatpush1.bf16.msra.mxu0 %v14009_v54  ;;  %3474 = vmatpush1.bf16.msra.mxu1 %v14010_v12  ;;  %v14020_v54 = vld [vmem:[#allocation54_spill] sm:$0xff]  ;;  %v14021_v12 = vld [vmem:[#allocation55_spill] sm:$0xff] }
 0x6bc   :  { %3434 = vmatprep.subr.bf16.mxu0 %v14011_v44  ;;  %3475 = vmatprep.subr.bf16.mxu1 %v14012_v16  ;;  %v14022_v44 = vld [vmem:[#allocation56_spill] sm:$0xff]  ;;  %v14023_v16 = vld [vmem:[#allocation57_spill] sm:$0xff] }
 0x6bf   :  { %3435 = vmatpush1.bf16.msra.mxu0 %v14013_v20  ;;  %3476 = vmatpush1.bf16.msra.mxu1 %v14014_v39  ;;  %v14024_v20 = vld [vmem:[#allocation58_spill] sm:$0xff]  ;;  %v14025_v39 = vld [vmem:[#allocation59_spill] sm:$0xff] }
 0x6c0   :  { %3436 = vmatprep.subr.bf16.mxu0 %v14015_v57  ;;  %3477 = vmatprep.subr.bf16.mxu1 %v14016_v56  ;;  %v14026_v57 = vld [vmem:[#allocation60_spill] sm:$0xff]  ;;  %v14027_v56 = vld [vmem:[#allocation61_spill] sm:$0xff] }
 0x6c3   :  { %3437 = vmatpush2.bf16.msra.mxu0 %v14017_v0  ;;  %3478 = vmatpush2.bf16.msra.mxu1 %v14018_v52  ;;  %v14028_v0 = vld [vmem:[#allocation62_spill] sm:$0xff]  ;;  %v14029_v52 = vld [vmem:[#allocation63_spill] sm:$0xff] }
 0x6c4   :  { %3438 = vmatprep.subr.bf16.mxu0 %v14019_v32  ;;  %3479 = vmatprep.subr.bf16.mxu1 %v14020_v54  ;;  %v14030_v32 = vld [vmem:[#allocation64_spill] sm:$0xff]  ;;  %v14031_v54 = vld [vmem:[#allocation65_spill] sm:$0xff] }
 0x6c7   :  { %3439 = vmatpush2.bf16.msra.mxu0 %v14021_v12  ;;  %3480 = vmatpush2.bf16.msra.mxu1 %v14022_v44  ;;  %v14032_v12 = vld [vmem:[#allocation66_spill] sm:$0xff]  ;;  %v14033_v44 = vld [vmem:[#allocation67_spill] sm:$0xff] }
 0x6c8   :  { %3440 = vmatprep.subr.bf16.mxu0 %v14023_v16  ;;  %3481 = vmatprep.subr.bf16.mxu1 %v14024_v20  ;;  %v14034_v16 = vld [vmem:[#allocation68_spill] sm:$0xff]  ;;  %v14035_v20 = vld [vmem:[#allocation69_spill] sm:$0xff] }
 0x6cb   :  { %3441 = vmatpush2.bf16.msra.mxu0 %v14025_v39  ;;  %3482 = vmatpush2.bf16.msra.mxu1 %v14026_v57  ;;  %v14036_v39 = vld [vmem:[#allocation70_spill] sm:$0xff]  ;;  %v14037_v57 = vld [vmem:[#allocation71_spill] sm:$0xff] }
 0x6cc   :  { %3442 = vmatprep.subr.bf16.mxu0 %v14027_v56  ;;  %3483 = vmatprep.subr.bf16.mxu1 %v14028_v0  ;;  %v14038_v56 = vld [vmem:[#allocation72_spill] sm:$0xff]  ;;  %v14039_v0 = vld [vmem:[#allocation73_spill] sm:$0xff] }
 0x6cf   :  { %3443 = vmatpush2.bf16.msra.mxu0 %v14029_v52  ;;  %3484 = vmatpush2.bf16.msra.mxu1 %v14030_v32  ;;  %v14040_v52 = vld [vmem:[#allocation74_spill] sm:$0xff]  ;;  %v14041_v32 = vld [vmem:[#allocation75_spill] sm:$0xff] }
 0x6d0   :  { %3444 = vmatprep.subr.bf16.mxu0 %v14031_v54  ;;  %3485 = vmatprep.subr.bf16.mxu1 %v14032_v12  ;;  %v14042_v54 = vld [vmem:[#allocation76_spill] sm:$0xff]  ;;  %v14043_v12 = vld [vmem:[#allocation77_spill] sm:$0xff] }
 0x6d3   :  { %3445 = vmatpush2.bf16.msra.mxu0 %v14033_v44  ;;  %3486 = vmatpush2.bf16.msra.mxu1 %v14034_v16  ;;  %v14044_v44 = vld [vmem:[#allocation78_spill] sm:$0xff]  ;;  %v14045_v16 = vld [vmem:[#allocation79_spill] sm:$0xff] }
 0x6d4   :  { %3446 = vmatprep.subr.bf16.mxu0 %v14035_v20  ;;  %3487 = vmatprep.subr.bf16.mxu1 %v14036_v39  ;;  %v14046_v20 = vld [vmem:[#allocation80_spill] sm:$0xff]  ;;  %v14047_v39 = vld [vmem:[#allocation81_spill] sm:$0xff] }
 0x6d7   :  { %3447 = vmatpush2.bf16.msra.mxu0 %v14037_v57  ;;  %3488 = vmatpush2.bf16.msra.mxu1 %v14038_v56  ;;  %v14048_v57 = vld [vmem:[#allocation82_spill] sm:$0xff] }
 0x6d8   :  { %3448 = vmatprep.subr.bf16.mxu0 %v14039_v0  ;;  %3489 = vmatprep.subr.bf16.mxu1 %v14040_v52 }
 0x6db   :  { %3449 = vmatpush2.bf16.msra.mxu0 %v14041_v32  ;;  %3490 = vmatpush2.bf16.msra.mxu1 %v14042_v54 }
 0x6dc   :  { %3450 = vmatprep.subr.bf16.mxu0 %v14043_v12  ;;  %3491 = vmatprep.subr.bf16.mxu1 %v14044_v44 }
 0x6df   :  { %3451 = vmatpush2.bf16.msra.mxu0 %v14045_v16  ;;  %3492 = vmatpush2.bf16.msra.mxu1 %v14046_v20 }
 0x6e0   :  { %3502 = vmatprep.subr.bf16.mxu0 %v14047_v39  ;;  %3543 = vmatprep.subr.bf16.mxu1 %v14048_v57 }
 0x722   :  { %v3196_v56 = vpop.f32.mrf.mxu0  ;;  %v3237_v0 = vpop.f32.mrf.mxu1 }
 0x723   :  { %v3334_v42 = vrot.slane %v3196_v56, 4  ;;  %v3336_v12 = vrot.slane %v3237_v0, 4 }
 0x724   :  { %v3198_v26 = vpop.f32.mrf.mxu0  ;;  %v3239_v52 = vpop.f32.mrf.mxu1 }
 0x725   :  { %v3335_v60 = vrot.slane %v3198_v26, 4  ;;  %v3350_v44 = vadd.f32 %v3334_v42, %v10134_v47  ;;  %v3352_v16 = vadd.f32 %v3336_v12, %v13761_v43  ;;  %v3337_v20 = vrot.slane %v3239_v52, 4 }
 0x726   :  { %v3200_v9 = vpop.f32.mrf.mxu0  ;;  %v3241_v32 = vpop.f32.mrf.mxu1 }
 0x727   :  { %v3351_v39 = vadd.f32 %v3335_v60, %v13762_v21  ;;  %v8297_v58 = vmul.f32 -1.442695, %v3350_v44  ;;  %v8299_v57 = vmul.f32 -1.442695, %v3352_v16  ;;  %v3353_v61 = vadd.f32 %v3337_v20, %v13763_v19 }
 0x728   :  { %v3201_v50 = vpop.f32.mrf.mxu0  ;;  %v3242_v54 = vpop.f32.mrf.mxu1 }
 0x729   :  { %v8298_v18 = vmul.f32 -1.442695, %v3351_v39  ;;  %8936 = vpow2.f32 %v8297_v58  ;;  %v8300_v9 = vmul.f32 -1.442695, %v3353_v61 }
 0x72a   :  { %8938 = vpow2.f32 %v8299_v57 }
 0x72b   :  { %8940 = vpow2.f32 %v8298_v18 }
 0x72c   :  { %8942 = vpow2.f32 %v8300_v9 }
 0x736   :  { %v8937_v50 = vpop.eup %8936 }
 0x737   :  { %v8939_v56 = vpop.eup %8938  ;;  %v3364_v32 = vadd.f32 1.0, %v8937_v50 }
 0x738   :  { %v8941_v26 = vpop.eup %8940  ;;  %v3376_v42 = vadd.f32 1.0, %v8939_v56 }
 0x739   :  { %v8943_v54 = vpop.eup %8942  ;;  %v3365_v12 = vadd.f32 1.0, %v8941_v26  ;;  %8944 = vrcp.f32 %v3364_v32 }
 0x73a   :  { %8946 = vrcp.f32 %v3376_v42  ;;  %v3377_v16 = vadd.f32 1.0, %v8943_v54 }
 0x73b   :  { %8948 = vrcp.f32 %v3365_v12  ;;  %v3398_v12 = vrot.slane %v10653_v17, 7 }
 0x762   :  { %v3278_v52 = vpop.f32.mrf.mxu0  ;;  %v3319_v0 = vpop.f32.mrf.mxu1 }
 0x763   :  { %v3338_v60 = vrot.slane %v3278_v52, 4  ;;  %v3340_v44 = vrot.slane %v3319_v0, 4  ;;  %v8945_v0 = vpop.eup %8944 }
 0x764   :  { %v3280_v39 = vpop.f32.mrf.mxu0  ;;  %v3321_v58 = vpop.f32.mrf.mxu1 }
 0x765   :  { %v3354_v61 = vadd.f32 %v3338_v60, %v10163_v59  ;;  %v3356_v18 = vadd.f32 %v3340_v44, %v10165_v24  ;;  %v3339_v57 = vrot.slane %v3280_v39, 4  ;;  %v3341_v20 = vrot.slane %v3321_v58, 4  ;;  %v8947_v60 = vpop.eup %8946 }
 0x766   :  { %v3282_v9 = vpop.f32.mrf.mxu0  ;;  %v3323_v50 = vpop.f32.mrf.mxu1 }
 0x767   :  { %8950 = vtanh.f32 %v3354_v61  ;;  %v8301_v56 = vmul.f32 -1.442695, %v3356_v18  ;;  %v3355_v26 = vadd.f32 %v3339_v57, %v10167_v25  ;;  %v3357_v32 = vadd.f32 %v3341_v20, %v10169_v63  ;;  %v8949_v44 = vpop.eup %8948 }
 0x768   :  { %8952 = vrcp.f32 %v3377_v16  ;;  %v3283_v42 = vpop.f32.mrf.mxu0  ;;  %v3324_v54 = vpop.f32.mrf.mxu1  ;;  %v3402_v61 = vmul.f32 %v8947_v60, %v3398_v12  ;;  %v3399_v57 = vrot.slane %v10656_v55, 7 }
 0x769   :  { %8954 = vpow2.f32 %v8301_v56  ;;  %v8302_v52 = vmul.f32 -1.442695, %v3357_v32 }
 0x76a   :  { %8956 = vtanh.f32 %v3355_v26 }
 0x76b   :  { %8958 = vpow2.f32 %v8302_v52 }
 0x774   :  { %v8951_v39 = vpop.eup %8950 }
 0x775   :  { %v8953_v58 = vpop.eup %8952  ;;  %v3404_v18 = vmul.f32 %v8951_v39, %v8945_v0 }
 0x776   :  { %v8955_v9 = vpop.eup %8954  ;;  %v3403_v32 = vmul.f32 %v8953_v58, %v3399_v57  ;;  %v14051_v57 = vld [vmem:[#allocation118_spill] sm:$0xff] }
 0x777   :  { %v8957_v20 = vpop.eup %8956  ;;  %v10811_v16 = vadd.f32 %v3404_v18, %v3402_v61  ;;  %v3390_v50 = vadd.f32 1.0, %v8955_v9 }
 0x778   :  { %v8959_v56 = vpop.eup %8958  ;;  %v3405_v26 = vmul.f32 %v8957_v20, %v8949_v44  ;;  %v14052_v20 = vld [vmem:[#allocation119_spill] sm:$0xff] }
 0x779   :  { %8960 = vtanh.f32 %v10811_v16  ;;  %v3391_v42 = vadd.f32 1.0, %v8959_v56  ;;  %v14054_v56 = vld [vmem:[#allocation121_spill] sm:$0xff] }
 0x77a   :  { %8962 = vrcp.f32 %v3390_v50  ;;  %v10814_v54 = vadd.f32 %v3405_v26, %v3403_v32  ;;  %v14053_v50 = vld [vmem:[#allocation120_spill] sm:$0xff]  ;;  %v14055_v32 = vld [vmem:[#allocation122_spill] sm:$0xff]  ;;  %v14056_v26 = vld [vmem:[#allocation123_spill] sm:$0xff] }
 0x77b   :  { %8964 = vrcp.f32 %v3391_v42  ;;  %v14057_v42 = vld [vmem:[#allocation124_spill] sm:$0xff] }
 0x77c   :  { %8966 = vtanh.f32 %v10814_v54 }
 0x786   :  { %v8961_v17 = vpop.eup %8960 }
 0x787   :  { %v8963_v52 = vpop.eup %8962 }
 0x788   :  { %v8965_v0 = vpop.eup %8964  ;;  %v3410_v55 = vmul.f32 %v8963_v52, %v8961_v17  ;;  %v14058_v17 = vld [vmem:[#allocation125_spill] sm:$0xff]  ;;  %v14059_v52 = vld [vmem:[#allocation126_spill] sm:$0xff] }
 0x789   :  { %v8967_v60 = vpop.eup %8966 }
 0x78a   :  { %v3411_v12 = vmul.f32 %v8967_v60, %v8965_v0  ;;  %v10819_v39 = vsel %vm408_vm4, %v10661_v36, %v3410_v55  ;;  %v3412_v44 = vpack.c.bf16 %v3410_v55, %v3410_v55  ;;  %v14049_v36 = vld [vmem:[#allocation116_spill] sm:$0xff]  ;;  %v14060_v0 = vld [vmem:[#allocation127_spill] sm:$0xff]  ;;  %v14062_v60 = vld [vmem:[#allocation129_spill] sm:$0xff] }
 0x78b   :  { %v14061_v55 = vld [vmem:[#allocation128_spill] sm:$0xff] }
 0x78c   :  { %v3413_v58 = vpack.c.bf16 %v3411_v12, %v3411_v12  ;;  %v10823_v61 = vsel %vm408_vm4, %v10665_v10, %v3411_v12  ;;  %v10825_v9 = vrot.slane %v3412_v44, 2  ;;  %v14050_v10 = vld [vmem:[#allocation117_spill] sm:$0xff]  ;;  %v14063_v12 = vld [vmem:[#allocation130_spill] sm:$0xff]  ;;  %v14064_v44 = vld [vmem:[#allocation131_spill] sm:$0xff] }
 0x78e   :  { %v3417_v18 = vrot.slane %v3413_v58, 2  ;;  %v14065_v58 = vld [vmem:[#allocation132_spill] sm:$0xff] }
 0x790   :  { %3452 = vmatprep.mubr.bf16.mxu0 %v3417_v18  ;;  %3493 = vmatprep.mubr.bf16.mxu1 %v3417_v18 }
 0x791   :  { %3453 = vmatmul.mubr.bf16.vlgmr.msra.gmra.mxu0 %v10825_v9  ;;  %3494 = vmatmul.mubr.bf16.vlgmr.msra.gmra.mxu1 %v10825_v9 }
 0x792   :  { %3503 = vmatpush1.bf16.msra.mxu0 %v13670_v1  ;;  %3544 = vmatpush1.bf16.msra.mxu1 %v13671_v48 }
 0x793   :  { %3534 = vmatprep.mubr.bf16.mxu0 %v3417_v18  ;;  %3575 = vmatprep.mubr.bf16.mxu1 %v3417_v18  ;;  %v14066_v18 = vld [vmem:[#allocation133_spill] sm:$0xff] }
 0x794   :  { %3504 = vmatprep.subr.bf16.mxu0 %v13672_v41  ;;  %3545 = vmatprep.subr.bf16.mxu1 %v13673_v23 }
 0x796   :  { %3505 = vmatpush1.bf16.msra.mxu0 %v13674_v34  ;;  %3546 = vmatpush1.bf16.msra.mxu1 %v13675_v33 }
 0x797   :  { %3506 = vmatprep.subr.bf16.mxu0 %v13676_v15  ;;  %3547 = vmatprep.subr.bf16.mxu1 %v13677_v51 }
 0x79a   :  { %3507 = vmatpush1.bf16.msra.mxu0 %v13764_v13  ;;  %3548 = vmatpush1.bf16.msra.mxu1 %v13765_v30 }
 0x79b   :  { %3508 = vmatprep.subr.bf16.mxu0 %v13766_v45  ;;  %3549 = vmatprep.subr.bf16.mxu1 %v13767_v46 }
 0x79e   :  { %3509 = vmatpush1.bf16.msra.mxu0 %v13768_v29  ;;  %3550 = vmatpush1.bf16.msra.mxu1 %v13859_v31 }
 0x79f   :  { %3510 = vmatprep.subr.bf16.mxu0 %v13860_v37  ;;  %3551 = vmatprep.subr.bf16.mxu1 %v13861_v49 }
 0x7a2   :  { %3511 = vmatpush1.bf16.msra.mxu0 %v13862_v40  ;;  %3552 = vmatpush1.bf16.msra.mxu1 %v13863_v62 }
 0x7a3   :  { %3512 = vmatprep.subr.bf16.mxu0 %v13864_v38  ;;  %3553 = vmatprep.subr.bf16.mxu1 %v13865_v11 }
 0x7a6   :  { %3513 = vmatpush1.bf16.msra.mxu0 %v13866_v14  ;;  %3554 = vmatpush1.bf16.msra.mxu1 %v13867_v53 }
 0x7a7   :  { %3514 = vmatprep.subr.bf16.mxu0 %v13868_v3  ;;  %3555 = vmatprep.subr.bf16.mxu1 %v13869_v2 }
 0x7aa   :  { %3515 = vmatpush1.bf16.msra.mxu0 %v13870_v5  ;;  %3556 = vmatpush1.bf16.msra.mxu1 %v13871_v7 }
 0x7ab   :  { %3516 = vmatprep.subr.bf16.mxu0 %v13782_v35  ;;  %3557 = vmatprep.subr.bf16.mxu1 %v13783_v28 }
 0x7ae   :  { %3517 = vmatpush1.bf16.msra.mxu0 %v13784_v4  ;;  %3558 = vmatpush1.bf16.msra.mxu1 %v13872_v6 }
 0x7af   :  { %3518 = vmatprep.subr.bf16.mxu0 %v13873_v8  ;;  %3559 = vmatprep.subr.bf16.mxu1 %v13787_v27 }
 0x7b2   :  { %3519 = vmatpush2.bf16.msra.mxu0 %v13788_v22  ;;  %3560 = vmatpush2.bf16.msra.mxu1 %v14049_v36 }
 0x7b3   :  { %3520 = vmatprep.subr.bf16.mxu0 %v14050_v10  ;;  %3561 = vmatprep.subr.bf16.mxu1 %v14051_v57 }
 0x7b6   :  { %3521 = vmatpush2.bf16.msra.mxu0 %v14052_v20  ;;  %3562 = vmatpush2.bf16.msra.mxu1 %v14053_v50 }
 0x7b7   :  { %3522 = vmatprep.subr.bf16.mxu0 %v14054_v56  ;;  %3563 = vmatprep.subr.bf16.mxu1 %v14055_v32 }
 0x7ba   :  { %3523 = vmatpush2.bf16.msra.mxu0 %v14056_v26  ;;  %3564 = vmatpush2.bf16.msra.mxu1 %v14057_v42  ;;  %v14067_v26 = vld [vmem:[#allocation134_spill] sm:$0xff]  ;;  %v14068_v42 = vld [vmem:[#allocation135_spill] sm:$0xff] }
 0x7bb   :  { %3524 = vmatprep.subr.bf16.mxu0 %v14058_v17  ;;  %3565 = vmatprep.subr.bf16.mxu1 %v14059_v52  ;;  %v14069_v17 = vld [vmem:[#allocation136_spill] sm:$0xff]  ;;  %v14070_v52 = vld [vmem:[#allocation137_spill] sm:$0xff] }
 0x7be   :  { %3525 = vmatpush2.bf16.msra.mxu0 %v14060_v0  ;;  %3566 = vmatpush2.bf16.msra.mxu1 %v14061_v55  ;;  %v14071_v0 = vld [vmem:[#allocation138_spill] sm:$0xff]  ;;  %v14072_v55 = vld [vmem:[#allocation139_spill] sm:$0xff] }
 0x7bf   :  { %3526 = vmatprep.subr.bf16.mxu0 %v14062_v60  ;;  %3567 = vmatprep.subr.bf16.mxu1 %v14063_v12  ;;  %v14073_v60 = vld [vmem:[#allocation140_spill] sm:$0xff]  ;;  %v14074_v12 = vld [vmem:[#allocation141_spill] sm:$0xff] }
 0x7c2   :  { %3527 = vmatpush2.bf16.msra.mxu0 %v14064_v44  ;;  %3568 = vmatpush2.bf16.msra.mxu1 %v14065_v58  ;;  %v14075_v44 = vld [vmem:[#allocation142_spill] sm:$0xff]  ;;  %v14076_v58 = vld [vmem:[#allocation143_spill] sm:$0xff] }
 0x7c3   :  { %3528 = vmatprep.subr.bf16.mxu0 %v14066_v18  ;;  %3569 = vmatprep.subr.bf16.mxu1 %v14067_v26  ;;  %v14077_v18 = vld [vmem:[#allocation144_spill] sm:$0xff]  ;;  %v14078_v26 = vld [vmem:[#allocation17_spill] sm:$0xff] }
 0x7c6   :  { %3529 = vmatpush2.bf16.msra.mxu0 %v14068_v42  ;;  %3570 = vmatpush2.bf16.msra.mxu1 %v14069_v17  ;;  %v14079_v42 = vld [vmem:[#allocation18_spill] sm:$0xff] }
 0x7c7   :  { %3530 = vmatprep.subr.bf16.mxu0 %v14070_v52  ;;  %3571 = vmatprep.subr.bf16.mxu1 %v14071_v0  ;;  %v14080_v0 = vld [vmem:[#allocation19_spill] sm:$0xff]  ;;  %v14089_v52 = vld [vmem:[#allocation28_spill] sm:$0xff] }
 0x7ca   :  { %3531 = vmatpush2.bf16.msra.mxu0 %v14072_v55  ;;  %3572 = vmatpush2.bf16.msra.mxu1 %v14073_v60  ;;  %v14081_v55 = vld [vmem:[#allocation20_spill] sm:$0xff]  ;;  %v14082_v60 = vld [vmem:[#allocation21_spill] sm:$0xff] }
 0x7cb   :  { %3532 = vmatprep.subr.bf16.mxu0 %v14074_v12  ;;  %3573 = vmatprep.subr.bf16.mxu1 %v14075_v44  ;;  %v14083_v12 = vld [vmem:[#allocation22_spill] sm:$0xff]  ;;  %v14084_v44 = vld [vmem:[#allocation23_spill] sm:$0xff] }
 0x7ce   :  { %3533 = vmatpush2.bf16.msra.mxu0 %v14076_v58  ;;  %3574 = vmatpush2.bf16.msra.mxu1 %v14077_v18  ;;  %v14085_v58 = vld [vmem:[#allocation24_spill] sm:$0xff]  ;;  %v14086_v18 = vld [vmem:[#allocation25_spill] sm:$0xff] }
 0x7cf   :  { %3682 = vmatprep.subr.bf16.mxu0 %v14078_v26  ;;  %3723 = vmatprep.subr.bf16.mxu1 %v14079_v42  ;;  %v14087_v26 = vld [vmem:[#allocation26_spill] sm:$0xff]  ;;  %v14088_v42 = vld [vmem:[#allocation27_spill] sm:$0xff] }
 0x7d1   :  { %3535 = vmatmul.mubr.bf16.vlgmr.msra.gmra.mxu0 %v10825_v9  ;;  %3576 = vmatmul.mubr.bf16.vlgmr.msra.gmra.mxu1 %v10825_v9  ;;  %v14090_v9 = vld [vmem:[#allocation29_spill] sm:$0xff] }
 0x7d2   :  { %3683 = vmatpush1.bf16.msra.mxu0 %v14080_v0  ;;  %3724 = vmatpush1.bf16.msra.mxu1 %v14081_v55  ;;  %v14091_v0 = vld [vmem:[#allocation30_spill] sm:$0xff]  ;;  %v14092_v55 = vld [vmem:[#allocation31_spill] sm:$0xff] }
 0x7d3   :  { %3684 = vmatprep.subr.bf16.mxu0 %v14082_v60  ;;  %3725 = vmatprep.subr.bf16.mxu1 %v14083_v12  ;;  %v14093_v60 = vld [vmem:[#allocation32_spill] sm:$0xff]  ;;  %v14094_v12 = vld [vmem:[#allocation33_spill] sm:$0xff] }
 0x7d6   :  { %3685 = vmatpush1.bf16.msra.mxu0 %v14084_v44  ;;  %3726 = vmatpush1.bf16.msra.mxu1 %v14085_v58  ;;  %v14095_v44 = vld [vmem:[#allocation34_spill] sm:$0xff]  ;;  %v14096_v58 = vld [vmem:[#allocation35_spill] sm:$0xff] }
 0x7d7   :  { %3686 = vmatprep.subr.bf16.mxu0 %v14086_v18  ;;  %3727 = vmatprep.subr.bf16.mxu1 %v14087_v26  ;;  %v14097_v18 = vld [vmem:[#allocation36_spill] sm:$0xff]  ;;  %v14098_v26 = vld [vmem:[#allocation37_spill] sm:$0xff] }
 0x7da   :  { %3687 = vmatpush1.bf16.msra.mxu0 %v14088_v42  ;;  %3728 = vmatpush1.bf16.msra.mxu1 %v14089_v52  ;;  %v14099_v42 = vld [vmem:[#allocation38_spill] sm:$0xff]  ;;  %v14100_v52 = vld [vmem:[#allocation39_spill] sm:$0xff] }
 0x7db   :  { %3688 = vmatprep.subr.bf16.mxu0 %v14090_v9  ;;  %3729 = vmatprep.subr.bf16.mxu1 %v14091_v0  ;;  %v14101_v9 = vld [vmem:[#allocation40_spill] sm:$0xff]  ;;  %v14102_v0 = vld [vmem:[#allocation41_spill] sm:$0xff] }
 0x7de   :  { %3689 = vmatpush1.bf16.msra.mxu0 %v14092_v55  ;;  %3730 = vmatpush1.bf16.msra.mxu1 %v14093_v60  ;;  %v14103_v55 = vld [vmem:[#allocation42_spill] sm:$0xff]  ;;  %v14104_v60 = vld [vmem:[#allocation43_spill] sm:$0xff] }
 0x7df   :  { %3690 = vmatprep.subr.bf16.mxu0 %v14094_v12  ;;  %3731 = vmatprep.subr.bf16.mxu1 %v14095_v44  ;;  %v14105_v12 = vld [vmem:[#allocation44_spill] sm:$0xff]  ;;  %v14106_v44 = vld [vmem:[#allocation45_spill] sm:$0xff] }
 0x7e2   :  { %3691 = vmatpush1.bf16.msra.mxu0 %v14096_v58  ;;  %3732 = vmatpush1.bf16.msra.mxu1 %v14097_v18  ;;  %v14107_v58 = vld [vmem:[#allocation46_spill] sm:$0xff]  ;;  %v14108_v18 = vld [vmem:[#allocation47_spill] sm:$0xff] }
 0x7e3   :  { %3692 = vmatprep.subr.bf16.mxu0 %v14098_v26  ;;  %3733 = vmatprep.subr.bf16.mxu1 %v14099_v42  ;;  %v14109_v26 = vld [vmem:[#allocation48_spill] sm:$0xff]  ;;  %v14110_v42 = vld [vmem:[#allocation49_spill] sm:$0xff] }
 0x7e6   :  { %3693 = vmatpush1.bf16.msra.mxu0 %v14100_v52  ;;  %3734 = vmatpush1.bf16.msra.mxu1 %v14101_v9  ;;  %v14111_v52 = vld [vmem:[#allocation50_spill] sm:$0xff]  ;;  %v14112_v9 = vld [vmem:[#allocation51_spill] sm:$0xff] }
 0x7e7   :  { %3694 = vmatprep.subr.bf16.mxu0 %v14102_v0  ;;  %3735 = vmatprep.subr.bf16.mxu1 %v14103_v55  ;;  %v14113_v0 = vld [vmem:[#allocation52_spill] sm:$0xff]  ;;  %v14114_v55 = vld [vmem:[#allocation53_spill] sm:$0xff] }
 0x7ea   :  { %3695 = vmatpush1.bf16.msra.mxu0 %v14104_v60  ;;  %3736 = vmatpush1.bf16.msra.mxu1 %v14105_v12  ;;  %v14115_v60 = vld [vmem:[#allocation54_spill] sm:$0xff]  ;;  %v14116_v12 = vld [vmem:[#allocation55_spill] sm:$0xff] }
 0x7eb   :  { %3696 = vmatprep.subr.bf16.mxu0 %v14106_v44  ;;  %3737 = vmatprep.subr.bf16.mxu1 %v14107_v58  ;;  %v14117_v44 = vld [vmem:[#allocation56_spill] sm:$0xff]  ;;  %v14118_v58 = vld [vmem:[#allocation57_spill] sm:$0xff] }
 0x7ee   :  { %3697 = vmatpush1.bf16.msra.mxu0 %v14108_v18  ;;  %3738 = vmatpush1.bf16.msra.mxu1 %v14109_v26  ;;  %v14119_v18 = vld [vmem:[#allocation58_spill] sm:$0xff]  ;;  %v14120_v26 = vld [vmem:[#allocation59_spill] sm:$0xff] }
 0x7ef   :  { %3698 = vmatprep.subr.bf16.mxu0 %v14110_v42  ;;  %3739 = vmatprep.subr.bf16.mxu1 %v14111_v52  ;;  %v14121_v42 = vld [vmem:[#allocation60_spill] sm:$0xff]  ;;  %v14122_v52 = vld [vmem:[#allocation61_spill] sm:$0xff] }
 0x7f2   :  { %3699 = vmatpush2.bf16.msra.mxu0 %v14112_v9  ;;  %3740 = vmatpush2.bf16.msra.mxu1 %v14113_v0  ;;  %v14123_v9 = vld [vmem:[#allocation62_spill] sm:$0xff]  ;;  %v14124_v0 = vld [vmem:[#allocation63_spill] sm:$0xff] }
 0x7f3   :  { %3700 = vmatprep.subr.bf16.mxu0 %v14114_v55  ;;  %3741 = vmatprep.subr.bf16.mxu1 %v14115_v60  ;;  %v14125_v55 = vld [vmem:[#allocation64_spill] sm:$0xff]  ;;  %v14126_v60 = vld [vmem:[#allocation65_spill] sm:$0xff] }
 0x7f6   :  { %3701 = vmatpush2.bf16.msra.mxu0 %v14116_v12  ;;  %3742 = vmatpush2.bf16.msra.mxu1 %v14117_v44  ;;  %v14127_v12 = vld [vmem:[#allocation66_spill] sm:$0xff]  ;;  %v14128_v44 = vld [vmem:[#allocation67_spill] sm:$0xff] }
 0x7f7   :  { %3702 = vmatprep.subr.bf16.mxu0 %v14118_v58  ;;  %3743 = vmatprep.subr.bf16.mxu1 %v14119_v18  ;;  %v14129_v58 = vld [vmem:[#allocation68_spill] sm:$0xff]  ;;  %v14130_v18 = vld [vmem:[#allocation69_spill] sm:$0xff] }
 0x7fa   :  { %3703 = vmatpush2.bf16.msra.mxu0 %v14120_v26  ;;  %3744 = vmatpush2.bf16.msra.mxu1 %v14121_v42  ;;  %v14131_v26 = vld [vmem:[#allocation70_spill] sm:$0xff]  ;;  %v14132_v42 = vld [vmem:[#allocation71_spill] sm:$0xff] }
 0x7fb   :  { %3704 = vmatprep.subr.bf16.mxu0 %v14122_v52  ;;  %3745 = vmatprep.subr.bf16.mxu1 %v14123_v9  ;;  %v14133_v52 = vld [vmem:[#allocation72_spill] sm:$0xff]  ;;  %v14134_v9 = vld [vmem:[#allocation73_spill] sm:$0xff] }
 0x7fe   :  { %3705 = vmatpush2.bf16.msra.mxu0 %v14124_v0  ;;  %3746 = vmatpush2.bf16.msra.mxu1 %v14125_v55  ;;  %v14135_v0 = vld [vmem:[#allocation74_spill] sm:$0xff]  ;;  %v14136_v55 = vld [vmem:[#allocation75_spill] sm:$0xff] }
 0x7ff   :  { %3706 = vmatprep.subr.bf16.mxu0 %v14126_v60  ;;  %3747 = vmatprep.subr.bf16.mxu1 %v14127_v12  ;;  %v14137_v60 = vld [vmem:[#allocation76_spill] sm:$0xff]  ;;  %v14138_v12 = vld [vmem:[#allocation77_spill] sm:$0xff] }
 0x802   :  { %3707 = vmatpush2.bf16.msra.mxu0 %v14128_v44  ;;  %3748 = vmatpush2.bf16.msra.mxu1 %v14129_v58  ;;  %v14139_v44 = vld [vmem:[#allocation78_spill] sm:$0xff]  ;;  %v14140_v58 = vld [vmem:[#allocation79_spill] sm:$0xff] }
 0x803   :  { %3708 = vmatprep.subr.bf16.mxu0 %v14130_v18  ;;  %3749 = vmatprep.subr.bf16.mxu1 %v14131_v26  ;;  %v14141_v18 = vld [vmem:[#allocation80_spill] sm:$0xff]  ;;  %v14142_v26 = vld [vmem:[#allocation81_spill] sm:$0xff] }
 0x806   :  { %3709 = vmatpush2.bf16.msra.mxu0 %v14132_v42  ;;  %3750 = vmatpush2.bf16.msra.mxu1 %v14133_v52  ;;  %v14143_v42 = vld [vmem:[#allocation82_spill] sm:$0xff] }
 0x807   :  { %3710 = vmatprep.subr.bf16.mxu0 %v14134_v9  ;;  %3751 = vmatprep.subr.bf16.mxu1 %v14135_v0 }
 0x80a   :  { %3711 = vmatpush2.bf16.msra.mxu0 %v14136_v55  ;;  %3752 = vmatpush2.bf16.msra.mxu1 %v14137_v60 }
 0x80b   :  { %3712 = vmatprep.subr.bf16.mxu0 %v14138_v12  ;;  %3753 = vmatprep.subr.bf16.mxu1 %v14139_v44 }
 0x80e   :  { %3713 = vmatpush2.bf16.msra.mxu0 %v14140_v58  ;;  %3754 = vmatpush2.bf16.msra.mxu1 %v14141_v18 }
 0x80f   :  { %3764 = vmatprep.subr.bf16.mxu0 %v14142_v26  ;;  %3805 = vmatprep.subr.bf16.mxu1 %v14143_v42 }
 0x851   :  { %v3454_v52 = vpop.f32.mrf.mxu0  ;;  %v3495_v9 = vpop.f32.mrf.mxu1 }
 0x852   :  { %v3592_v50 = vrot.slane %v3454_v52, 3  ;;  %v3594_v12 = vrot.slane %v3495_v9, 3 }
 0x853   :  { %v3456_v17 = vpop.f32.mrf.mxu0  ;;  %v3497_v0 = vpop.f32.mrf.mxu1 }
 0x854   :  { %v3593_v20 = vrot.slane %v3456_v17, 3  ;;  %v3608_v44 = vadd.f32 %v3592_v50, %v10134_v47  ;;  %v3610_v58 = vadd.f32 %v3594_v12, %v13761_v43  ;;  %v3595_v18 = vrot.slane %v3497_v0, 3 }
 0x855   :  { %v3458_v32 = vpop.f32.mrf.mxu0  ;;  %v3499_v55 = vpop.f32.mrf.mxu1 }
 0x856   :  { %v3609_v26 = vadd.f32 %v3593_v20, %v13762_v21  ;;  %v8303_v57 = vmul.f32 -1.442695, %v3608_v44  ;;  %v8305_v42 = vmul.f32 -1.442695, %v3610_v58  ;;  %v3611_v10 = vadd.f32 %v3595_v18, %v13763_v19 }
 0x857   :  { %v3459_v56 = vpop.f32.mrf.mxu0  ;;  %v3500_v60 = vpop.f32.mrf.mxu1 }
 0x858   :  { %v8304_v36 = vmul.f32 -1.442695, %v3609_v26  ;;  %8968 = vpow2.f32 %v8303_v57  ;;  %v8306_v32 = vmul.f32 -1.442695, %v3611_v10 }
 0x859   :  { %8970 = vpow2.f32 %v8305_v42 }
 0x85a   :  { %8972 = vpow2.f32 %v8304_v36 }
 0x85b   :  { %8974 = vpow2.f32 %v8306_v32 }
 0x865   :  { %v8969_v56 = vpop.eup %8968 }
 0x866   :  { %v8971_v52 = vpop.eup %8970  ;;  %v3622_v55 = vadd.f32 1.0, %v8969_v56 }
 0x867   :  { %v8973_v17 = vpop.eup %8972  ;;  %v3634_v50 = vadd.f32 1.0, %v8971_v52 }
 0x868   :  { %v8975_v60 = vpop.eup %8974  ;;  %v3623_v12 = vadd.f32 1.0, %v8973_v17  ;;  %8976 = vrcp.f32 %v3622_v55 }
 0x869   :  { %8978 = vrcp.f32 %v3634_v50  ;;  %v3635_v58 = vadd.f32 1.0, %v8975_v60 }
 0x86a   :  { %8980 = vrcp.f32 %v3623_v12  ;;  %v3656_v12 = vrot.slane %v10811_v16, 7 }
 0x891   :  { %v3536_v0 = vpop.f32.mrf.mxu0  ;;  %v3577_v9 = vpop.f32.mrf.mxu1 }
 0x892   :  { %v3596_v20 = vrot.slane %v3536_v0, 3  ;;  %v3598_v44 = vrot.slane %v3577_v9, 3  ;;  %v8977_v9 = vpop.eup %8976 }
 0x893   :  { %v3538_v26 = vpop.f32.mrf.mxu0  ;;  %v3579_v57 = vpop.f32.mrf.mxu1 }
 0x894   :  { %v3612_v10 = vadd.f32 %v3596_v20, %v10163_v59  ;;  %v3614_v36 = vadd.f32 %v3598_v44, %v10165_v24  ;;  %v3597_v42 = vrot.slane %v3538_v26, 3  ;;  %v3599_v18 = vrot.slane %v3579_v57, 3  ;;  %v8979_v20 = vpop.eup %8978 }
 0x895   :  { %v3540_v32 = vpop.f32.mrf.mxu0  ;;  %v3581_v56 = vpop.f32.mrf.mxu1 }
 0x896   :  { %8982 = vtanh.f32 %v3612_v10  ;;  %v8307_v52 = vmul.f32 -1.442695, %v3614_v36  ;;  %v3613_v17 = vadd.f32 %v3597_v42, %v10167_v25  ;;  %v3615_v55 = vadd.f32 %v3599_v18, %v10169_v63  ;;  %v8981_v44 = vpop.eup %8980 }
 0x897   :  { %8984 = vrcp.f32 %v3635_v58  ;;  %v3541_v50 = vpop.f32.mrf.mxu0  ;;  %v3582_v60 = vpop.f32.mrf.mxu1  ;;  %v3660_v10 = vmul.f32 %v8979_v20, %v3656_v12  ;;  %v3657_v42 = vrot.slane %v10814_v54, 7 }
 0x898   :  { %8986 = vpow2.f32 %v8307_v52  ;;  %v8308_v0 = vmul.f32 -1.442695, %v3615_v55 }
 0x899   :  { %8988 = vtanh.f32 %v3613_v17 }
 0x89a   :  { %8990 = vpow2.f32 %v8308_v0 }
 0x8a3   :  { %v8983_v26 = vpop.eup %8982 }
 0x8a4   :  { %v8985_v57 = vpop.eup %8984  ;;  %v3662_v36 = vmul.f32 %v8983_v26, %v8977_v9 }
 0x8a5   :  { %v8987_v32 = vpop.eup %8986  ;;  %v3661_v55 = vmul.f32 %v8985_v57, %v3657_v42 }
 0x8a6   :  { %v8989_v18 = vpop.eup %8988  ;;  %v10969_v58 = vadd.f32 %v3662_v36, %v3660_v10  ;;  %v3648_v56 = vadd.f32 1.0, %v8987_v32 }
 0x8a7   :  { %v8991_v52 = vpop.eup %8990  ;;  %v3663_v17 = vmul.f32 %v8989_v18, %v8981_v44 }
 0x8a8   :  { %8992 = vtanh.f32 %v10969_v58  ;;  %v3649_v50 = vadd.f32 1.0, %v8991_v52  ;;  %v14147_v52 = vld [vmem:[#allocation119_spill] sm:$0xff] }
 0x8a9   :  { %8994 = vrcp.f32 %v3648_v56  ;;  %v10972_v60 = vadd.f32 %v3663_v17, %v3661_v55  ;;  %v14146_v56 = vld [vmem:[#allocation118_spill] sm:$0xff]  ;;  %v14148_v55 = vld [vmem:[#allocation120_spill] sm:$0xff]  ;;  %v14149_v17 = vld [vmem:[#allocation121_spill] sm:$0xff] }
 0x8aa   :  { %8996 = vrcp.f32 %v3649_v50  ;;  %v14150_v50 = vld [vmem:[#allocation122_spill] sm:$0xff] }
 0x8ab   :  { %8998 = vtanh.f32 %v10972_v60 }
 0x8b5   :  { %v8993_v16 = vpop.eup %8992 }
 0x8b6   :  { %v8995_v0 = vpop.eup %8994 }
 0x8b7   :  { %v8997_v9 = vpop.eup %8996  ;;  %v3668_v54 = vmul.f32 %v8995_v0, %v8993_v16  ;;  %v14151_v16 = vld [vmem:[#allocation123_spill] sm:$0xff]  ;;  %v14152_v0 = vld [vmem:[#allocation124_spill] sm:$0xff] }
 0x8b8   :  { %v8999_v20 = vpop.eup %8998 }
 0x8b9   :  { %v3669_v12 = vmul.f32 %v8999_v20, %v8997_v9  ;;  %v3670_v26 = vpack.c.bf16 %v3668_v54, %v3668_v54  ;;  %v10977_v57 = vsel %vm410_vm5, %v10819_v39, %v3668_v54  ;;  %v14144_v39 = vld [vmem:[#allocation116_spill] sm:$0xff]  ;;  %v14153_v9 = vld [vmem:[#allocation125_spill] sm:$0xff]  ;;  %v14154_v54 = vld [vmem:[#allocation126_spill] sm:$0xff] }
 0x8ba   :  { %v14155_v20 = vld [vmem:[#allocation127_spill] sm:$0xff] }
 0x8bb   :  { %v3671_v44 = vpack.c.bf16 %v3669_v12, %v3669_v12  ;;  %v10981_v10 = vsel %vm410_vm5, %v10823_v61, %v3669_v12  ;;  %v3673_v36 = vshrl.u32 %v3670_v26, 16  ;;  %v14145_v61 = vld [vmem:[#allocation117_spill] sm:$0xff]  ;;  %v14156_v12 = vld [vmem:[#allocation128_spill] sm:$0xff] }
 0x8bc   :  { %v14157_v26 = vld [vmem:[#allocation129_spill] sm:$0xff] }
 0x8bd   :  { %v3677_v32 = vshrl.u32 %v3671_v44, 16  ;;  %v10983_v18 = vrot.slane %v3673_v36, 2  ;;  %v14158_v44 = vld [vmem:[#allocation130_spill] sm:$0xff]  ;;  %v14159_v36 = vld [vmem:[#allocation131_spill] sm:$0xff] }
 0x8bf   :  { %v3679_v42 = vrot.slane %v3677_v32, 2  ;;  %v14160_v32 = vld [vmem:[#allocation132_spill] sm:$0xff] }
 0x8c1   :  { %3714 = vmatprep.mubr.bf16.mxu0 %v3679_v42  ;;  %3755 = vmatprep.mubr.bf16.mxu1 %v3679_v42 }
 0x8c2   :  { %3715 = vmatmul.mubr.bf16.vlgmr.msra.gmra.mxu0 %v10983_v18  ;;  %3756 = vmatmul.mubr.bf16.vlgmr.msra.gmra.mxu1 %v10983_v18 }
 0x8c3   :  { %3765 = vmatpush1.bf16.msra.mxu0 %v13670_v1  ;;  %3806 = vmatpush1.bf16.msra.mxu1 %v13671_v48 }
 0x8c4   :  { %3796 = vmatprep.mubr.bf16.mxu0 %v3679_v42  ;;  %3837 = vmatprep.mubr.bf16.mxu1 %v3679_v42  ;;  %v14161_v42 = vld [vmem:[#allocation133_spill] sm:$0xff] }
 0x8c5   :  { %3766 = vmatprep.subr.bf16.mxu0 %v13672_v41  ;;  %3807 = vmatprep.subr.bf16.mxu1 %v13673_v23 }
 0x8c7   :  { %3767 = vmatpush1.bf16.msra.mxu0 %v13674_v34  ;;  %3808 = vmatpush1.bf16.msra.mxu1 %v13675_v33 }
 0x8c8   :  { %3768 = vmatprep.subr.bf16.mxu0 %v13676_v15  ;;  %3809 = vmatprep.subr.bf16.mxu1 %v13677_v51 }
 0x8cb   :  { %3769 = vmatpush1.bf16.msra.mxu0 %v13764_v13  ;;  %3810 = vmatpush1.bf16.msra.mxu1 %v13765_v30 }
 0x8cc   :  { %3770 = vmatprep.subr.bf16.mxu0 %v13766_v45  ;;  %3811 = vmatprep.subr.bf16.mxu1 %v13767_v46 }
 0x8cf   :  { %3771 = vmatpush1.bf16.msra.mxu0 %v13768_v29  ;;  %3812 = vmatpush1.bf16.msra.mxu1 %v13859_v31 }
 0x8d0   :  { %3772 = vmatprep.subr.bf16.mxu0 %v13860_v37  ;;  %3813 = vmatprep.subr.bf16.mxu1 %v13861_v49 }
 0x8d3   :  { %3773 = vmatpush1.bf16.msra.mxu0 %v13862_v40  ;;  %3814 = vmatpush1.bf16.msra.mxu1 %v13863_v62 }
 0x8d4   :  { %3774 = vmatprep.subr.bf16.mxu0 %v13864_v38  ;;  %3815 = vmatprep.subr.bf16.mxu1 %v13865_v11 }
 0x8d7   :  { %3775 = vmatpush1.bf16.msra.mxu0 %v13866_v14  ;;  %3816 = vmatpush1.bf16.msra.mxu1 %v13867_v53 }
 0x8d8   :  { %3776 = vmatprep.subr.bf16.mxu0 %v13868_v3  ;;  %3817 = vmatprep.subr.bf16.mxu1 %v13869_v2 }
 0x8db   :  { %3777 = vmatpush1.bf16.msra.mxu0 %v13870_v5  ;;  %3818 = vmatpush1.bf16.msra.mxu1 %v13871_v7 }
 0x8dc   :  { %3778 = vmatprep.subr.bf16.mxu0 %v13782_v35  ;;  %3819 = vmatprep.subr.bf16.mxu1 %v13783_v28 }
 0x8df   :  { %3779 = vmatpush1.bf16.msra.mxu0 %v13784_v4  ;;  %3820 = vmatpush1.bf16.msra.mxu1 %v13872_v6 }
 0x8e0   :  { %3780 = vmatprep.subr.bf16.mxu0 %v13873_v8  ;;  %3821 = vmatprep.subr.bf16.mxu1 %v13787_v27 }
 0x8e3   :  { %3781 = vmatpush2.bf16.msra.mxu0 %v13788_v22  ;;  %3822 = vmatpush2.bf16.msra.mxu1 %v14144_v39 }
 0x8e4   :  { %3782 = vmatprep.subr.bf16.mxu0 %v14145_v61  ;;  %3823 = vmatprep.subr.bf16.mxu1 %v14146_v56 }
 0x8e7   :  { %3783 = vmatpush2.bf16.msra.mxu0 %v14147_v52  ;;  %3824 = vmatpush2.bf16.msra.mxu1 %v14148_v55 }
 0x8e8   :  { %3784 = vmatprep.subr.bf16.mxu0 %v14149_v17  ;;  %3825 = vmatprep.subr.bf16.mxu1 %v14150_v50 }
 0x8eb   :  { %3785 = vmatpush2.bf16.msra.mxu0 %v14151_v16  ;;  %3826 = vmatpush2.bf16.msra.mxu1 %v14152_v0  ;;  %v14162_v16 = vld [vmem:[#allocation134_spill] sm:$0xff]  ;;  %v14163_v0 = vld [vmem:[#allocation135_spill] sm:$0xff] }
 0x8ec   :  { %3786 = vmatprep.subr.bf16.mxu0 %v14153_v9  ;;  %3827 = vmatprep.subr.bf16.mxu1 %v14154_v54  ;;  %v14164_v9 = vld [vmem:[#allocation136_spill] sm:$0xff]  ;;  %v14165_v54 = vld [vmem:[#allocation137_spill] sm:$0xff] }
 0x8ef   :  { %3787 = vmatpush2.bf16.msra.mxu0 %v14155_v20  ;;  %3828 = vmatpush2.bf16.msra.mxu1 %v14156_v12  ;;  %v14166_v20 = vld [vmem:[#allocation138_spill] sm:$0xff]  ;;  %v14167_v12 = vld [vmem:[#allocation139_spill] sm:$0xff] }
 0x8f0   :  { %3788 = vmatprep.subr.bf16.mxu0 %v14157_v26  ;;  %3829 = vmatprep.subr.bf16.mxu1 %v14158_v44  ;;  %v14168_v26 = vld [vmem:[#allocation140_spill] sm:$0xff]  ;;  %v14169_v44 = vld [vmem:[#allocation141_spill] sm:$0xff] }
 0x8f3   :  { %3789 = vmatpush2.bf16.msra.mxu0 %v14159_v36  ;;  %3830 = vmatpush2.bf16.msra.mxu1 %v14160_v32  ;;  %v14170_v36 = vld [vmem:[#allocation142_spill] sm:$0xff]  ;;  %v14171_v32 = vld [vmem:[#allocation143_spill] sm:$0xff] }
 0x8f4   :  { %3790 = vmatprep.subr.bf16.mxu0 %v14161_v42  ;;  %3831 = vmatprep.subr.bf16.mxu1 %v14162_v16  ;;  %v14172_v42 = vld [vmem:[#allocation144_spill] sm:$0xff]  ;;  %v14173_v16 = vld [vmem:[#allocation17_spill] sm:$0xff] }
 0x8f7   :  { %3791 = vmatpush2.bf16.msra.mxu0 %v14163_v0  ;;  %3832 = vmatpush2.bf16.msra.mxu1 %v14164_v9  ;;  %v14174_v0 = vld [vmem:[#allocation18_spill] sm:$0xff] }
 0x8f8   :  { %3792 = vmatprep.subr.bf16.mxu0 %v14165_v54  ;;  %3833 = vmatprep.subr.bf16.mxu1 %v14166_v20  ;;  %v14175_v20 = vld [vmem:[#allocation19_spill] sm:$0xff]  ;;  %v14184_v54 = vld [vmem:[#allocation28_spill] sm:$0xff] }
 0x8fb   :  { %3793 = vmatpush2.bf16.msra.mxu0 %v14167_v12  ;;  %3834 = vmatpush2.bf16.msra.mxu1 %v14168_v26  ;;  %v14176_v12 = vld [vmem:[#allocation20_spill] sm:$0xff]  ;;  %v14177_v26 = vld [vmem:[#allocation21_spill] sm:$0xff] }
 0x8fc   :  { %3794 = vmatprep.subr.bf16.mxu0 %v14169_v44  ;;  %3835 = vmatprep.subr.bf16.mxu1 %v14170_v36  ;;  %v14178_v44 = vld [vmem:[#allocation22_spill] sm:$0xff]  ;;  %v14179_v36 = vld [vmem:[#allocation23_spill] sm:$0xff] }
 0x8ff   :  { %3795 = vmatpush2.bf16.msra.mxu0 %v14171_v32  ;;  %3836 = vmatpush2.bf16.msra.mxu1 %v14172_v42  ;;  %v14180_v32 = vld [vmem:[#allocation24_spill] sm:$0xff]  ;;  %v14181_v42 = vld [vmem:[#allocation25_spill] sm:$0xff] }
 0x900   :  { %3940 = vmatprep.subr.bf16.mxu0 %v14173_v16  ;;  %3981 = vmatprep.subr.bf16.mxu1 %v14174_v0  ;;  %v14182_v16 = vld [vmem:[#allocation26_spill] sm:$0xff]  ;;  %v14183_v0 = vld [vmem:[#allocation27_spill] sm:$0xff] }
 0x902   :  { %3797 = vmatmul.mubr.bf16.vlgmr.msra.gmra.mxu0 %v10983_v18  ;;  %3838 = vmatmul.mubr.bf16.vlgmr.msra.gmra.mxu1 %v10983_v18  ;;  %v14185_v18 = vld [vmem:[#allocation29_spill] sm:$0xff] }
 0x903   :  { %3941 = vmatpush1.bf16.msra.mxu0 %v14175_v20  ;;  %3982 = vmatpush1.bf16.msra.mxu1 %v14176_v12  ;;  %v14186_v20 = vld [vmem:[#allocation30_spill] sm:$0xff]  ;;  %v14187_v12 = vld [vmem:[#allocation31_spill] sm:$0xff] }
 0x904   :  { %3942 = vmatprep.subr.bf16.mxu0 %v14177_v26  ;;  %3983 = vmatprep.subr.bf16.mxu1 %v14178_v44  ;;  %v14188_v26 = vld [vmem:[#allocation32_spill] sm:$0xff]  ;;  %v14189_v44 = vld [vmem:[#allocation33_spill] sm:$0xff] }
 0x907   :  { %3943 = vmatpush1.bf16.msra.mxu0 %v14179_v36  ;;  %3984 = vmatpush1.bf16.msra.mxu1 %v14180_v32  ;;  %v14190_v36 = vld [vmem:[#allocation34_spill] sm:$0xff]  ;;  %v14191_v32 = vld [vmem:[#allocation35_spill] sm:$0xff] }
 0x908   :  { %3944 = vmatprep.subr.bf16.mxu0 %v14181_v42  ;;  %3985 = vmatprep.subr.bf16.mxu1 %v14182_v16  ;;  %v14192_v42 = vld [vmem:[#allocation36_spill] sm:$0xff]  ;;  %v14193_v16 = vld [vmem:[#allocation37_spill] sm:$0xff] }
 0x90b   :  { %3945 = vmatpush1.bf16.msra.mxu0 %v14183_v0  ;;  %3986 = vmatpush1.bf16.msra.mxu1 %v14184_v54  ;;  %v14194_v0 = vld [vmem:[#allocation38_spill] sm:$0xff]  ;;  %v14195_v54 = vld [vmem:[#allocation39_spill] sm:$0xff] }
 0x90c   :  { %3946 = vmatprep.subr.bf16.mxu0 %v14185_v18  ;;  %3987 = vmatprep.subr.bf16.mxu1 %v14186_v20  ;;  %v14196_v18 = vld [vmem:[#allocation40_spill] sm:$0xff]  ;;  %v14197_v20 = vld [vmem:[#allocation41_spill] sm:$0xff] }
 0x90f   :  { %3947 = vmatpush1.bf16.msra.mxu0 %v14187_v12  ;;  %3988 = vmatpush1.bf16.msra.mxu1 %v14188_v26  ;;  %v14198_v12 = vld [vmem:[#allocation42_spill] sm:$0xff]  ;;  %v14199_v26 = vld [vmem:[#allocation43_spill] sm:$0xff] }
 0x910   :  { %3948 = vmatprep.subr.bf16.mxu0 %v14189_v44  ;;  %3989 = vmatprep.subr.bf16.mxu1 %v14190_v36  ;;  %v14200_v44 = vld [vmem:[#allocation44_spill] sm:$0xff]  ;;  %v14201_v36 = vld [vmem:[#allocation45_spill] sm:$0xff] }
 0x913   :  { %3949 = vmatpush1.bf16.msra.mxu0 %v14191_v32  ;;  %3990 = vmatpush1.bf16.msra.mxu1 %v14192_v42  ;;  %v14202_v32 = vld [vmem:[#allocation46_spill] sm:$0xff]  ;;  %v14203_v42 = vld [vmem:[#allocation47_spill] sm:$0xff] }
 0x914   :  { %3950 = vmatprep.subr.bf16.mxu0 %v14193_v16  ;;  %3991 = vmatprep.subr.bf16.mxu1 %v14194_v0  ;;  %v14204_v16 = vld [vmem:[#allocation48_spill] sm:$0xff]  ;;  %v14205_v0 = vld [vmem:[#allocation49_spill] sm:$0xff] }
 0x917   :  { %3951 = vmatpush1.bf16.msra.mxu0 %v14195_v54  ;;  %3992 = vmatpush1.bf16.msra.mxu1 %v14196_v18  ;;  %v14206_v54 = vld [vmem:[#allocation50_spill] sm:$0xff]  ;;  %v14207_v18 = vld [vmem:[#allocation51_spill] sm:$0xff] }
 0x918   :  { %3952 = vmatprep.subr.bf16.mxu0 %v14197_v20  ;;  %3993 = vmatprep.subr.bf16.mxu1 %v14198_v12  ;;  %v14208_v20 = vld [vmem:[#allocation52_spill] sm:$0xff]  ;;  %v14209_v12 = vld [vmem:[#allocation53_spill] sm:$0xff] }
 0x91b   :  { %3953 = vmatpush1.bf16.msra.mxu0 %v14199_v26  ;;  %3994 = vmatpush1.bf16.msra.mxu1 %v14200_v44  ;;  %v14210_v26 = vld [vmem:[#allocation54_spill] sm:$0xff]  ;;  %v14211_v44 = vld [vmem:[#allocation55_spill] sm:$0xff] }
 0x91c   :  { %3954 = vmatprep.subr.bf16.mxu0 %v14201_v36  ;;  %3995 = vmatprep.subr.bf16.mxu1 %v14202_v32  ;;  %v14212_v36 = vld [vmem:[#allocation56_spill] sm:$0xff]  ;;  %v14213_v32 = vld [vmem:[#allocation57_spill] sm:$0xff] }
 0x91f   :  { %3955 = vmatpush1.bf16.msra.mxu0 %v14203_v42  ;;  %3996 = vmatpush1.bf16.msra.mxu1 %v14204_v16  ;;  %v14214_v42 = vld [vmem:[#allocation58_spill] sm:$0xff]  ;;  %v14215_v16 = vld [vmem:[#allocation59_spill] sm:$0xff] }
 0x920   :  { %3956 = vmatprep.subr.bf16.mxu0 %v14205_v0  ;;  %3997 = vmatprep.subr.bf16.mxu1 %v14206_v54  ;;  %v14216_v0 = vld [vmem:[#allocation60_spill] sm:$0xff]  ;;  %v14217_v54 = vld [vmem:[#allocation61_spill] sm:$0xff] }
 0x923   :  { %3957 = vmatpush2.bf16.msra.mxu0 %v14207_v18  ;;  %3998 = vmatpush2.bf16.msra.mxu1 %v14208_v20  ;;  %v14218_v18 = vld [vmem:[#allocation62_spill] sm:$0xff]  ;;  %v14219_v20 = vld [vmem:[#allocation63_spill] sm:$0xff] }
 0x924   :  { %3958 = vmatprep.subr.bf16.mxu0 %v14209_v12  ;;  %3999 = vmatprep.subr.bf16.mxu1 %v14210_v26  ;;  %v14220_v12 = vld [vmem:[#allocation64_spill] sm:$0xff]  ;;  %v14221_v26 = vld [vmem:[#allocation65_spill] sm:$0xff] }
 0x927   :  { %3959 = vmatpush2.bf16.msra.mxu0 %v14211_v44  ;;  %4000 = vmatpush2.bf16.msra.mxu1 %v14212_v36  ;;  %v14222_v44 = vld [vmem:[#allocation66_spill] sm:$0xff]  ;;  %v14223_v36 = vld [vmem:[#allocation67_spill] sm:$0xff] }
 0x928   :  { %3960 = vmatprep.subr.bf16.mxu0 %v14213_v32  ;;  %4001 = vmatprep.subr.bf16.mxu1 %v14214_v42  ;;  %v14224_v32 = vld [vmem:[#allocation68_spill] sm:$0xff]  ;;  %v14225_v42 = vld [vmem:[#allocation69_spill] sm:$0xff] }
 0x92b   :  { %3961 = vmatpush2.bf16.msra.mxu0 %v14215_v16  ;;  %4002 = vmatpush2.bf16.msra.mxu1 %v14216_v0  ;;  %v14226_v16 = vld [vmem:[#allocation70_spill] sm:$0xff]  ;;  %v14227_v0 = vld [vmem:[#allocation71_spill] sm:$0xff] }
 0x92c   :  { %3962 = vmatprep.subr.bf16.mxu0 %v14217_v54  ;;  %4003 = vmatprep.subr.bf16.mxu1 %v14218_v18  ;;  %v14228_v54 = vld [vmem:[#allocation72_spill] sm:$0xff]  ;;  %v14229_v18 = vld [vmem:[#allocation73_spill] sm:$0xff] }
 0x92f   :  { %3963 = vmatpush2.bf16.msra.mxu0 %v14219_v20  ;;  %4004 = vmatpush2.bf16.msra.mxu1 %v14220_v12  ;;  %v14230_v20 = vld [vmem:[#allocation74_spill] sm:$0xff]  ;;  %v14231_v12 = vld [vmem:[#allocation75_spill] sm:$0xff] }
 0x930   :  { %3964 = vmatprep.subr.bf16.mxu0 %v14221_v26  ;;  %4005 = vmatprep.subr.bf16.mxu1 %v14222_v44  ;;  %v14232_v26 = vld [vmem:[#allocation76_spill] sm:$0xff]  ;;  %v14233_v44 = vld [vmem:[#allocation77_spill] sm:$0xff] }
 0x933   :  { %3965 = vmatpush2.bf16.msra.mxu0 %v14223_v36  ;;  %4006 = vmatpush2.bf16.msra.mxu1 %v14224_v32  ;;  %v14234_v36 = vld [vmem:[#allocation78_spill] sm:$0xff]  ;;  %v14235_v32 = vld [vmem:[#allocation79_spill] sm:$0xff] }
 0x934   :  { %3966 = vmatprep.subr.bf16.mxu0 %v14225_v42  ;;  %4007 = vmatprep.subr.bf16.mxu1 %v14226_v16  ;;  %v14236_v42 = vld [vmem:[#allocation80_spill] sm:$0xff]  ;;  %v14237_v16 = vld [vmem:[#allocation81_spill] sm:$0xff] }
 0x937   :  { %3967 = vmatpush2.bf16.msra.mxu0 %v14227_v0  ;;  %4008 = vmatpush2.bf16.msra.mxu1 %v14228_v54  ;;  %v14238_v0 = vld [vmem:[#allocation82_spill] sm:$0xff] }
 0x938   :  { %3968 = vmatprep.subr.bf16.mxu0 %v14229_v18  ;;  %4009 = vmatprep.subr.bf16.mxu1 %v14230_v20 }
 0x93b   :  { %3969 = vmatpush2.bf16.msra.mxu0 %v14231_v12  ;;  %4010 = vmatpush2.bf16.msra.mxu1 %v14232_v26 }
 0x93c   :  { %3970 = vmatprep.subr.bf16.mxu0 %v14233_v44  ;;  %4011 = vmatprep.subr.bf16.mxu1 %v14234_v36 }
 0x93f   :  { %3971 = vmatpush2.bf16.msra.mxu0 %v14235_v32  ;;  %4012 = vmatpush2.bf16.msra.mxu1 %v14236_v42 }
 0x940   :  { %4022 = vmatprep.subr.bf16.mxu0 %v14237_v16  ;;  %4063 = vmatprep.subr.bf16.mxu1 %v14238_v0 }
 0x982   :  { %v3716_v54 = vpop.f32.mrf.mxu0  ;;  %v3757_v18 = vpop.f32.mrf.mxu1 }
 0x983   :  { %v3854_v55 = vrot.slane %v3716_v54, 2  ;;  %v3856_v44 = vrot.slane %v3757_v18, 2 }
 0x984   :  { %v3718_v9 = vpop.f32.mrf.mxu0  ;;  %v3759_v20 = vpop.f32.mrf.mxu1 }
 0x985   :  { %v3855_v52 = vrot.slane %v3718_v9, 2  ;;  %v3870_v36 = vadd.f32 %v3854_v55, %v10134_v47  ;;  %v3872_v32 = vadd.f32 %v3856_v44, %v13761_v43  ;;  %v3857_v42 = vrot.slane %v3759_v20, 2 }
 0x986   :  { %v3720_v50 = vpop.f32.mrf.mxu0  ;;  %v3761_v12 = vpop.f32.mrf.mxu1 }
 0x987   :  { %v3871_v16 = vadd.f32 %v3855_v52, %v13762_v21  ;;  %v8309_v56 = vmul.f32 -1.442695, %v3870_v36  ;;  %v8311_v0 = vmul.f32 -1.442695, %v3872_v32  ;;  %v3873_v61 = vadd.f32 %v3857_v42, %v13763_v19 }
 0x988   :  { %v3721_v17 = vpop.f32.mrf.mxu0  ;;  %v3762_v26 = vpop.f32.mrf.mxu1 }
 0x989   :  { %v8310_v39 = vmul.f32 -1.442695, %v3871_v16  ;;  %9000 = vpow2.f32 %v8309_v56  ;;  %v8312_v50 = vmul.f32 -1.442695, %v3873_v61 }
 0x98a   :  { %9002 = vpow2.f32 %v8311_v0 }
 0x98b   :  { %9004 = vpow2.f32 %v8310_v39 }
 0x98c   :  { %9006 = vpow2.f32 %v8312_v50 }
 0x996   :  { %v9001_v17 = vpop.eup %9000 }
 0x997   :  { %v9003_v54 = vpop.eup %9002  ;;  %v3884_v18 = vadd.f32 1.0, %v9001_v17 }
 0x998   :  { %v9005_v9 = vpop.eup %9004  ;;  %v3896_v55 = vadd.f32 1.0, %v9003_v54 }
 0x999   :  { %v9007_v12 = vpop.eup %9006  ;;  %v3885_v26 = vadd.f32 1.0, %v9005_v9  ;;  %9008 = vrcp.f32 %v3884_v18 }
 0x99a   :  { %9010 = vrcp.f32 %v3896_v55  ;;  %v3897_v32 = vadd.f32 1.0, %v9007_v12 }
 0x99b   :  { %9012 = vrcp.f32 %v3885_v26  ;;  %v3918_v26 = vrot.slane %v10969_v58, 7 }
 0x9c2   :  { %v3798_v20 = vpop.f32.mrf.mxu0  ;;  %v3839_v44 = vpop.f32.mrf.mxu1 }
 0x9c3   :  { %v3858_v52 = vrot.slane %v3798_v20, 2  ;;  %v3860_v36 = vrot.slane %v3839_v44, 2  ;;  %v9009_v44 = vpop.eup %9008 }
 0x9c4   :  { %v3800_v42 = vpop.f32.mrf.mxu0  ;;  %v3841_v56 = vpop.f32.mrf.mxu1 }
 0x9c5   :  { %v3874_v61 = vadd.f32 %v3858_v52, %v10163_v59  ;;  %v3876_v39 = vadd.f32 %v3860_v36, %v10165_v24  ;;  %v3859_v16 = vrot.slane %v3800_v42, 2  ;;  %v3861_v0 = vrot.slane %v3841_v56, 2  ;;  %v9011_v52 = vpop.eup %9010 }
 0x9c6   :  { %v3802_v50 = vpop.f32.mrf.mxu0  ;;  %v3843_v17 = vpop.f32.mrf.mxu1 }
 0x9c7   :  { %9014 = vtanh.f32 %v3874_v61  ;;  %v8313_v54 = vmul.f32 -1.442695, %v3876_v39  ;;  %v3875_v9 = vadd.f32 %v3859_v16, %v10167_v25  ;;  %v3877_v18 = vadd.f32 %v3861_v0, %v10169_v63  ;;  %v9013_v36 = vpop.eup %9012 }
 0x9c8   :  { %9016 = vrcp.f32 %v3897_v32  ;;  %v3803_v55 = vpop.f32.mrf.mxu0  ;;  %v3844_v12 = vpop.f32.mrf.mxu1  ;;  %v3922_v61 = vmul.f32 %v9011_v52, %v3918_v26  ;;  %v3919_v16 = vrot.slane %v10972_v60, 7 }
 0x9c9   :  { %9018 = vpow2.f32 %v8313_v54  ;;  %v8314_v20 = vmul.f32 -1.442695, %v3877_v18 }
 0x9ca   :  { %9020 = vtanh.f32 %v3875_v9 }
 0x9cb   :  { %9022 = vpow2.f32 %v8314_v20 }
 0x9d4   :  { %v9015_v42 = vpop.eup %9014 }
 0x9d5   :  { %v9017_v56 = vpop.eup %9016  ;;  %v3924_v39 = vmul.f32 %v9015_v42, %v9009_v44 }
 0x9d6   :  { %v9019_v50 = vpop.eup %9018  ;;  %v3923_v18 = vmul.f32 %v9017_v56, %v3919_v16  ;;  %v8797_v16 = vld [vmem:[%s12931_s6 + $0x28] sm:$0xff]  }
 0x9d7   :  { %v9021_v0 = vpop.eup %9020  ;;  %v11127_v32 = vadd.f32 %v3924_v39, %v3922_v61  ;;  %v3910_v17 = vadd.f32 1.0, %v9019_v50 }
 0x9d8   :  { %v9023_v54 = vpop.eup %9022  ;;  %v3925_v9 = vmul.f32 %v9021_v0, %v9013_v36  ;;  %v8798_v0 = vld [vmem:[%s12931_s6 + $0x60] sm:$0xff]  }
 0x9d9   :  { %9024 = vtanh.f32 %v11127_v32  ;;  %v3911_v55 = vadd.f32 1.0, %v9023_v54  ;;  %v8800_v54 = vld [vmem:[%s12931_s6 + $0x58] sm:$0xff]  }
 0x9da   :  { %9026 = vrcp.f32 %v3910_v17  ;;  %v11130_v12 = vadd.f32 %v3925_v9, %v3923_v18  ;;  %v8799_v17 = vld [vmem:[%s12931_s6 + $0x20] sm:$0xff]   ;;  %v8801_v18 = vld [vmem:[%s12931_s6 + $0x18] sm:$0xff]   ;;  %v8802_v9 = vld [vmem:[%s12931_s6 + $0x50] sm:$0xff]  }
 0x9db   :  { %9028 = vrcp.f32 %v3911_v55  ;;  %v8803_v55 = vld [vmem:[%s12931_s6 + $0x10] sm:$0xff]  }
 0x9dc   :  { %9030 = vtanh.f32 %v11130_v12 }
 0x9e6   :  { %v9025_v58 = vpop.eup %9024 }
 0x9e7   :  { %v9027_v20 = vpop.eup %9026 }
 0x9e8   :  { %v9029_v44 = vpop.eup %9028  ;;  %v3930_v60 = vmul.f32 %v9027_v20, %v9025_v58  ;;  %v8804_v58 = vld [vmem:[%s12931_s6 + $0x48] sm:$0xff]  }
 0x9e9   :  { %v9031_v52 = vpop.eup %9030  ;;  %v8805_v20 = vld [vmem:[%s12931_s6 + $0x8] sm:$0xff]  }
 0x9ea   :  { %v3931_v26 = vmul.f32 %v9031_v52, %v9029_v44  ;;  %v11135_v42 = vsel %vm412_vm6, %v10977_v57, %v3930_v60  ;;  %v3932_v36 = vpack.c.bf16 %v3930_v60, %v3930_v60  ;;  %v8795_v57 = vld [vmem:[%s12931_s6 + $0x30] sm:$0xff]   ;;  %v8806_v44 = vld [vmem:[%s12931_s6 + $0x40] sm:$0xff]  }
 0x9eb   :  { %v8807_v60 = vld [vmem:[%s12931_s6] sm:$0xff]  }
 0x9ec   :  { %v3933_v56 = vpack.c.bf16 %v3931_v26, %v3931_v26  ;;  %v11139_v61 = vsel %vm412_vm6, %v10981_v10, %v3931_v26  ;;  %v11141_v50 = vrot.slane %v3932_v36, 3  ;;  %v8796_v10 = vld [vmem:[%s12931_s6 + $0x68] sm:$0xff]   ;;  %v4433_v52 = vld [vmem:[#allocation7 + $0x1c0] sm:$0xff] }
 0x9ed   :  { %v4437_v26 = vld [vmem:[#allocation7 + $0x1e0] sm:$0xff]  ;;  %v11258_v36 = vld [vmem:[#allocation7 + $0x1c8] sm:$0xff] }
 0x9ee   :  { %v3937_v39 = vrot.slane %v3933_v56, 3  ;;  %v8393_v56 = vcombine.low %v4433_v52, %v4437_v26 }
 0x9f0   :  { %3972 = vmatprep.mubr.bf16.mxu0 %v3937_v39  ;;  %4013 = vmatprep.mubr.bf16.mxu1 %v3937_v39 }
 0x9f1   :  { %3973 = vmatmul.mubr.bf16.vlgmr.msra.gmra.mxu0 %v11141_v50  ;;  %4014 = vmatmul.mubr.bf16.vlgmr.msra.gmra.mxu1 %v11141_v50 }
 0x9f2   :  { %4023 = vmatpush1.bf16.msra.mxu0 %v13670_v1  ;;  %4064 = vmatpush1.bf16.msra.mxu1 %v13671_v48  ;;  %v14239_v1 = vld [vmem:[#allocation116_spill] sm:$0xff]  ;;  %v14240_v48 = vld [vmem:[#allocation117_spill] sm:$0xff] }
 0x9f3   :  { %4054 = vmatprep.mubr.bf16.mxu0 %v3937_v39  ;;  %4095 = vmatprep.mubr.bf16.mxu1 %v3937_v39  ;;  %v8394_v39 = vcombine.high %v4433_v52, %v4437_v26 }
 0x9f4   :  { %4024 = vmatprep.subr.bf16.mxu0 %v13672_v41  ;;  %4065 = vmatprep.subr.bf16.mxu1 %v13673_v23  ;;  %v14241_v41 = vld [vmem:[#allocation118_spill] sm:$0xff]  ;;  %v14242_v23 = vld [vmem:[#allocation119_spill] sm:$0xff] }
 0x9f6   :  { %4025 = vmatpush1.bf16.msra.mxu0 %v13674_v34  ;;  %4066 = vmatpush1.bf16.msra.mxu1 %v13675_v33  ;;  %v14243_v34 = vld [vmem:[#allocation120_spill] sm:$0xff]  ;;  %v14244_v33 = vld [vmem:[#allocation121_spill] sm:$0xff] }
 0x9f7   :  { %4026 = vmatprep.subr.bf16.mxu0 %v13676_v15  ;;  %4067 = vmatprep.subr.bf16.mxu1 %v13677_v51  ;;  %v14245_v15 = vld [vmem:[#allocation122_spill] sm:$0xff]  ;;  %v14246_v51 = vld [vmem:[#allocation123_spill] sm:$0xff] }
 0x9fa   :  { %4027 = vmatpush1.bf16.msra.mxu0 %v13764_v13  ;;  %4068 = vmatpush1.bf16.msra.mxu1 %v13765_v30  ;;  %v14247_v13 = vld [vmem:[#allocation124_spill] sm:$0xff]  ;;  %v14248_v30 = vld [vmem:[#allocation125_spill] sm:$0xff] }
 0x9fb   :  { %4028 = vmatprep.subr.bf16.mxu0 %v13766_v45  ;;  %4069 = vmatprep.subr.bf16.mxu1 %v13767_v46  ;;  %v14249_v45 = vld [vmem:[#allocation126_spill] sm:$0xff]  ;;  %v14250_v46 = vld [vmem:[#allocation127_spill] sm:$0xff] }
 0x9fe   :  { %4029 = vmatpush1.bf16.msra.mxu0 %v13768_v29  ;;  %4070 = vmatpush1.bf16.msra.mxu1 %v13859_v31  ;;  %v14251_v29 = vld [vmem:[#allocation128_spill] sm:$0xff]  ;;  %v14257_v31 = vld [vmem:[#allocation134_spill] sm:$0xff] }
 0x9ff   :  { %4030 = vmatprep.subr.bf16.mxu0 %v13860_v37  ;;  %4071 = vmatprep.subr.bf16.mxu1 %v13861_v49  ;;  %v14258_v37 = vld [vmem:[#allocation135_spill] sm:$0xff]  ;;  %v14259_v49 = vld [vmem:[#allocation136_spill] sm:$0xff] }
 0xa02   :  { %4031 = vmatpush1.bf16.msra.mxu0 %v13862_v40  ;;  %4072 = vmatpush1.bf16.msra.mxu1 %v13863_v62  ;;  %v14260_v40 = vld [vmem:[#allocation137_spill] sm:$0xff]  ;;  %v14261_v62 = vld [vmem:[#allocation138_spill] sm:$0xff] }
 0xa03   :  { %4032 = vmatprep.subr.bf16.mxu0 %v13864_v38  ;;  %4073 = vmatprep.subr.bf16.mxu1 %v13865_v11  ;;  %v14262_v38 = vld [vmem:[#allocation139_spill] sm:$0xff]  ;;  %v14263_v11 = vld [vmem:[#allocation140_spill] sm:$0xff] }
 0xa06   :  { %4033 = vmatpush1.bf16.msra.mxu0 %v13866_v14  ;;  %4074 = vmatpush1.bf16.msra.mxu1 %v13867_v53  ;;  %v14264_v14 = vld [vmem:[#allocation141_spill] sm:$0xff]  ;;  %v14265_v53 = vld [vmem:[#allocation142_spill] sm:$0xff] }
 0xa07   :  { %4034 = vmatprep.subr.bf16.mxu0 %v13868_v3  ;;  %4075 = vmatprep.subr.bf16.mxu1 %v13869_v2  ;;  %v14266_v3 = vld [vmem:[#allocation143_spill] sm:$0xff]  ;;  %v14267_v2 = vld [vmem:[#allocation144_spill] sm:$0xff] }
 0xa0a   :  { %4035 = vmatpush1.bf16.msra.mxu0 %v13870_v5  ;;  %4076 = vmatpush1.bf16.msra.mxu1 %v13871_v7  ;;  %v14268_v5 = vmov 0   ;;  %v8792_v7 = vld [vmem:[%s12931_s6 + $0x78] sm:$0xff]  }
 0xa0b   :  { %4036 = vmatprep.subr.bf16.mxu0 %v13782_v35  ;;  %4077 = vmatprep.subr.bf16.mxu1 %v13783_v28  ;;  %v14252_v35 = vld [vmem:[#allocation129_spill] sm:$0xff]  ;;  %v14253_v28 = vld [vmem:[#allocation130_spill] sm:$0xff] }
 0xa0e   :  { %4037 = vmatpush1.bf16.msra.mxu0 %v13784_v4  ;;  %4078 = vmatpush1.bf16.msra.mxu1 %v13872_v6  ;;  %v14254_v4 = vld [vmem:[#allocation131_spill] sm:$0xff]  ;;  %v8793_v6 = vld [vmem:[%s12931_s6 + $0x38] sm:$0xff]  }
 0xa0f   :  { %4038 = vmatprep.subr.bf16.mxu0 %v13873_v8  ;;  %4079 = vmatprep.subr.bf16.mxu1 %v13787_v27  ;;  %v14255_v27 = vld [vmem:[#allocation132_spill] sm:$0xff] }
 0xa10   :  { %v8794_v8 = vld [vmem:[%s12931_s6 + $0x70] sm:$0xff]  }
 0xa12   :  { %4039 = vmatpush2.bf16.msra.mxu0 %v13788_v22  ;;  %4080 = vmatpush2.bf16.msra.mxu1 %v14239_v1  ;;  %v14256_v22 = vld [vmem:[#allocation133_spill] sm:$0xff]  ;;  %v4425_v1 = vld [vmem:[#allocation7 + $0x180] sm:$0xff] }
 0xa13   :  { %4040 = vmatprep.subr.bf16.mxu0 %v14240_v48  ;;  %4081 = vmatprep.subr.bf16.mxu1 %v14241_v41  ;;  %v4429_v48 = vld [vmem:[#allocation7 + $0x1a0] sm:$0xff] }
 0xa16   :  { %4041 = vmatpush2.bf16.msra.mxu0 %v14242_v23  ;;  %4082 = vmatpush2.bf16.msra.mxu1 %v14243_v34  ;;  %v8386_v34 = vcombine.high %v4425_v1, %v4429_v48 }
 0xa17   :  { %4042 = vmatprep.subr.bf16.mxu0 %v14244_v33  ;;  %4083 = vmatprep.subr.bf16.mxu1 %v14245_v15  ;;  %v8385_v33 = vcombine.low %v4425_v1, %v4429_v48  ;;  %v4417_v15 = vld [vmem:[#allocation7 + $0x140] sm:$0xff] }
 0xa1a   :  { %4043 = vmatpush2.bf16.msra.mxu0 %v14246_v51  ;;  %4084 = vmatpush2.bf16.msra.mxu1 %v14247_v13  ;;  %v4421_v51 = vld [vmem:[#allocation7 + $0x160] sm:$0xff] }
 0xa1b   :  { %4044 = vmatprep.subr.bf16.mxu0 %v14248_v30  ;;  %4085 = vmatprep.subr.bf16.mxu1 %v14249_v45  ;;  %v8378_v13 = vcombine.high %v4417_v15, %v4421_v51  ;;  %v8377_v30 = vcombine.low %v4417_v15, %v4421_v51  ;;  %v4409_v45 = vld [vmem:[#allocation7 + $0x100] sm:$0xff] }
 0xa1e   :  { %4045 = vmatpush2.bf16.msra.mxu0 %v14250_v46  ;;  %4086 = vmatpush2.bf16.msra.mxu1 %v14251_v29  ;;  %v4413_v46 = vld [vmem:[#allocation7 + $0x120] sm:$0xff] }
 0xa1f   :  { %4046 = vmatprep.subr.bf16.mxu0 %v14252_v35  ;;  %4087 = vmatprep.subr.bf16.mxu1 %v14253_v28  ;;  %v8370_v29 = vcombine.high %v4409_v45, %v4413_v46  ;;  %v8369_v35 = vcombine.low %v4409_v45, %v4413_v46  ;;  %v4401_v28 = vld [vmem:[#allocation7 + $0xc0] sm:$0xff] }
 0xa22   :  { %4047 = vmatpush2.bf16.msra.mxu0 %v14254_v4  ;;  %4088 = vmatpush2.bf16.msra.mxu1 %v14255_v27  ;;  %v4405_v4 = vld [vmem:[#allocation7 + $0xe0] sm:$0xff] }
 0xa23   :  { %4048 = vmatprep.subr.bf16.mxu0 %v14256_v22  ;;  %4089 = vmatprep.subr.bf16.mxu1 %v14257_v31  ;;  %v8362_v27 = vcombine.high %v4401_v28, %v4405_v4 }
 0xa26   :  { %4049 = vmatpush2.bf16.msra.mxu0 %v14258_v37  ;;  %4090 = vmatpush2.bf16.msra.mxu1 %v14259_v49  ;;  %v8361_v37 = vcombine.low %v4401_v28, %v4405_v4  ;;  %v4393_v49 = vld [vmem:[#allocation7 + $0x80] sm:$0xff] }
 0xa27   :  { %4050 = vmatprep.subr.bf16.mxu0 %v14260_v40  ;;  %4091 = vmatprep.subr.bf16.mxu1 %v14261_v62  ;;  %v4397_v40 = vld [vmem:[#allocation7 + $0xa0] sm:$0xff] }
 0xa2a   :  { %4051 = vmatpush2.bf16.msra.mxu0 %v14262_v38  ;;  %4092 = vmatpush2.bf16.msra.mxu1 %v14263_v11  ;;  %v8354_v11 = vcombine.high %v4393_v49, %v4397_v40 }
 0xa2b   :  { %4052 = vmatprep.subr.bf16.mxu0 %v14264_v14  ;;  %4093 = vmatprep.subr.bf16.mxu1 %v14265_v53 }
 0xa2e   :  { %4053 = vmatpush2.bf16.msra.mxu0 %v14266_v3  ;;  %4094 = vmatpush2.bf16.msra.mxu1 %v14267_v2  ;;  %v8353_v3 = vcombine.low %v4393_v49, %v4397_v40  ;;  %v4385_v2 = vld [vmem:[#allocation7 + $0x40] sm:$0xff]  ;;  %v4176_v40 = vrot.slane %v11127_v32, 7 }
 0xa2f   :  { %8609 = vmatprep.subr.bf16.mxu0 %v8792_v7  ;;  %4803 = vmatprep.subr.bf16.mxu1 %v8394_v39  ;;  %v4389_v7 = vld [vmem:[#allocation7 + $0x60] sm:$0xff] }
 0xa31   :  { %4055 = vmatmul.mubr.bf16.vlgmr.msra.gmra.mxu0 %v11141_v50  ;;  %4096 = vmatmul.mubr.bf16.vlgmr.msra.gmra.mxu1 %v11141_v50  ;;  %v11260_v50 = vld [vmem:[#allocation7 + $0x1e8] sm:$0xff] }
 0xa32   :  { %4835 = vmatprep.mubr.bf16.mxu1 %v14268_v5  ;;  %8610 = vmatpush3.bf16.msra.mxu0 %v8793_v6  ;;  %v8395_v41 = vcombine.low %v11258_v36, %v11260_v50  ;;  %v8396_v23 = vcombine.high %v11258_v36, %v11260_v50  ;;  %v4398_v36 = vld [vmem:[#allocation7 + $0xa8] sm:$0xff] }
 0xa33   :  { %8611 = vmatprep.subr.bf16.mxu0 %v8794_v8  ;;  %4804 = vmatpush1.bf16.msra.mxu1 %v8393_v56 }
 0xa34   :  { %4805 = vmatprep.subr.bf16.mxu1 %v8386_v34 }
 0xa36   :  { %8612 = vmatpush3.bf16.msra.mxu0 %v8795_v57  ;;  %v8346_v57 = vcombine.high %v4385_v2, %v4389_v7 }
 0xa37   :  { %8613 = vmatprep.subr.bf16.mxu0 %v8796_v10  ;;  %4806 = vmatpush1.bf16.msra.mxu1 %v8385_v33  ;;  %v8345_v10 = vcombine.low %v4385_v2, %v4389_v7 }
 0xa38   :  { %4807 = vmatprep.subr.bf16.mxu1 %v8378_v13 }
 0xa3a   :  { %8614 = vmatpush3.bf16.msra.mxu0 %v8797_v16 }
 0xa3b   :  { %8615 = vmatprep.subr.bf16.mxu0 %v8798_v0  ;;  %4808 = vmatpush1.bf16.msra.mxu1 %v8377_v30 }
 0xa3c   :  { %4809 = vmatprep.subr.bf16.mxu1 %v8370_v29 }
 0xa3e   :  { %8616 = vmatpush3.bf16.msra.mxu0 %v8799_v17 }
 0xa3f   :  { %8617 = vmatprep.subr.bf16.mxu0 %v8800_v54  ;;  %4810 = vmatpush1.bf16.msra.mxu1 %v8369_v35 }
 0xa40   :  { %4811 = vmatprep.subr.bf16.mxu1 %v8362_v27 }
 0xa42   :  { %8618 = vmatpush3.bf16.msra.mxu0 %v8801_v18 }
 0xa43   :  { %8619 = vmatprep.subr.bf16.mxu0 %v8802_v9  ;;  %4812 = vmatpush1.bf16.msra.mxu1 %v8361_v37 }
 0xa44   :  { %4813 = vmatprep.subr.bf16.mxu1 %v8354_v11 }
 0xa46   :  { %8620 = vmatpush3.bf16.msra.mxu0 %v8803_v55 }
 0xa47   :  { %8621 = vmatprep.subr.bf16.mxu0 %v8804_v58  ;;  %4814 = vmatpush1.bf16.msra.mxu1 %v8353_v3 }
 0xa48   :  { %4815 = vmatprep.subr.bf16.mxu1 %v8346_v57 }
 0xa4a   :  { %8622 = vmatpush3.bf16.msra.mxu0 %v8805_v20 }
 0xa4b   :  { %8623 = vmatprep.subr.bf16.mxu0 %v8806_v44  ;;  %4816 = vmatpush1.bf16.msra.mxu1 %v8345_v10 }
 0xa4e   :  { %8624 = vmatpush3.bf16.msra.mxu0 %v8807_v60 }
 0xa4f   :  { %4844 = vmatprep.subr.bf16.mxu0 %v8396_v23 }
 0xab1   :  { %v3974_v22 = vpop.f32.mrf.mxu0  ;;  %v4015_v31 = vpop.f32.mrf.mxu1 }
 0xab2   :  { %v4112_v16 = vrot.slane %v3974_v22, 1  ;;  %v4114_v0 = vrot.slane %v4015_v31, 1 }
 0xab3   :  { %v3976_v62 = vpop.f32.mrf.mxu0  ;;  %v4017_v38 = vpop.f32.mrf.mxu1 }
 0xab4   :  { %v4113_v17 = vrot.slane %v3976_v62, 1  ;;  %v4128_v54 = vadd.f32 %v4112_v16, %v10134_v47  ;;  %v4130_v18 = vadd.f32 %v4114_v0, %v13761_v43  ;;  %v4115_v9 = vrot.slane %v4017_v38, 1 }
 0xab5   :  { %v3978_v14 = vpop.f32.mrf.mxu0  ;;  %v4019_v53 = vpop.f32.mrf.mxu1 }
 0xab6   :  { %v4129_v55 = vadd.f32 %v4113_v17, %v13762_v21  ;;  %v8315_v58 = vmul.f32 -1.442695, %v4128_v54  ;;  %v8317_v20 = vmul.f32 -1.442695, %v4130_v18  ;;  %v4131_v44 = vadd.f32 %v4115_v9, %v13763_v19 }
 0xab7   :  { %v3979_v6 = vpop.f32.mrf.mxu0  ;;  %v4020_v8 = vpop.f32.mrf.mxu1 }
 0xab8   :  { %v8316_v60 = vmul.f32 -1.442695, %v4129_v55  ;;  %9032 = vpow2.f32 %v8315_v58  ;;  %v8318_v52 = vmul.f32 -1.442695, %v4131_v44  ;;  %v14269_v55 = vld [vmem:[#allocation15_spill] sm:$0xff] }
 0xab9   :  { %9034 = vpow2.f32 %v8317_v20 }
 0xaba   :  { %9036 = vpow2.f32 %v8316_v60  ;;  %v14270_v60 = vld [vmem:[#allocation16_spill] sm:$0xff] }
 0xabb   :  { %9038 = vpow2.f32 %v8318_v52 }
 0xac5   :  { %v9033_v26 = vpop.eup %9032 }
 0xac6   :  { %v9035_v56 = vpop.eup %9034  ;;  %v4142_v1 = vadd.f32 1.0, %v9033_v26  ;;  %v4426_v26 = vld [vmem:[#allocation7 + $0x188] sm:$0xff] }
 0xac7   :  { %v9037_v39 = vpop.eup %9036  ;;  %v4154_v47 = vadd.f32 1.0, %v9035_v56  ;;  %v4430_v56 = vld [vmem:[#allocation7 + $0x1a8] sm:$0xff] }
 0xac8   :  { %v9039_v48 = vpop.eup %9038  ;;  %v4143_v43 = vadd.f32 1.0, %v9037_v39  ;;  %9040 = vrcp.f32 %v4142_v1 }
 0xac9   :  { %9042 = vrcp.f32 %v4154_v47  ;;  %v4155_v19 = vadd.f32 1.0, %v9039_v48  ;;  %v8388_v48 = vcombine.high %v4426_v26, %v4430_v56 }
 0xaca   :  { %9044 = vrcp.f32 %v4143_v43  ;;  %v4418_v43 = vld [vmem:[#allocation7 + $0x148] sm:$0xff] }
 0xaf1   :  { %v4056_v23 = vpop.f32.mrf.mxu0  ;;  %v4097_v34 = vpop.f32.mrf.mxu1 }
 0xaf2   :  { %v4116_v21 = vrot.slane %v4056_v23, 1  ;;  %v4118_v33 = vrot.slane %v4097_v34, 1  ;;  %v4410_v34 = vld [vmem:[#allocation7 + $0x108] sm:$0xff] }
 0xaf3   :  { %v4058_v15 = vpop.f32.mrf.mxu0  ;;  %v4099_v51 = vpop.f32.mrf.mxu1 }
 0xaf4   :  { %v4132_v13 = vadd.f32 %v4116_v21, %v10163_v59  ;;  %v4134_v30 = vadd.f32 %v4118_v33, %v10165_v24  ;;  %v4117_v45 = vrot.slane %v4058_v15, 1  ;;  %v4119_v46 = vrot.slane %v4099_v51, 1  ;;  %v9041_v59 = vpop.eup %9040  ;;  %v4414_v21 = vld [vmem:[#allocation7 + $0x128] sm:$0xff] }
 0xaf5   :  { %v4060_v29 = vpop.f32.mrf.mxu0  ;;  %v4101_v35 = vpop.f32.mrf.mxu1  ;;  %v4402_v15 = vld [vmem:[#allocation7 + $0xc8] sm:$0xff] }
 0xaf6   :  { %9046 = vtanh.f32 %v4132_v13  ;;  %v8319_v28 = vmul.f32 -1.442695, %v4134_v30  ;;  %v4133_v4 = vadd.f32 %v4117_v45, %v10167_v25  ;;  %v4135_v27 = vadd.f32 %v4119_v46, %v10169_v63  ;;  %v9043_v24 = vpop.eup %9042  ;;  %v4406_v51 = vld [vmem:[#allocation7 + $0xe8] sm:$0xff] }
 0xaf7   :  { %9048 = vrcp.f32 %v4155_v19  ;;  %v4061_v22 = vpop.f32.mrf.mxu0  ;;  %v4102_v31 = vpop.f32.mrf.mxu1  ;;  %v4180_v11 = vmul.f32 %v9043_v24, %v4176_v40  ;;  %v4177_v25 = vrot.slane %v11130_v12, 7  ;;  %v8372_v19 = vcombine.high %v4410_v34, %v4414_v21  ;;  %v4394_v45 = vld [vmem:[#allocation7 + $0x88] sm:$0xff] }
 0xaf8   :  { %9050 = vpow2.f32 %v8319_v28  ;;  %v8320_v37 = vmul.f32 -1.442695, %v4135_v27  ;;  %v9045_v49 = vpop.eup %9044  ;;  %v8371_v13 = vcombine.low %v4410_v34, %v4414_v21  ;;  %v8364_v30 = vcombine.high %v4402_v15, %v4406_v51  ;;  %v4386_v46 = vld [vmem:[#allocation7 + $0x48] sm:$0xff]  ;;  %v4377_v27 = vld [vmem:[#allocation7] sm:$0xff]  ;;  %v4407_v34 = vld [vmem:[#allocation7 + $0xf0] sm:$0xff] }
 0xaf9   :  { %9052 = vtanh.f32 %v4133_v4  ;;  %v8363_v50 = vcombine.low %v4402_v15, %v4406_v51  ;;  %v4390_v29 = vld [vmem:[#allocation7 + $0x68] sm:$0xff]  ;;  %v8355_v35 = vcombine.low %v4394_v45, %v4398_v36  ;;  %v4381_v22 = vld [vmem:[#allocation7 + $0x20] sm:$0xff]  ;;  %v4404_v21 = vld [vmem:[#allocation7 + $0xd8] sm:$0xff] }
 0xafa   :  { %9054 = vpow2.f32 %v8320_v37  ;;  %v8348_v28 = vcombine.high %v4386_v46, %v4390_v29  ;;  %v8347_v4 = vcombine.low %v4386_v46, %v4390_v29  ;;  %v4378_v31 = vld [vmem:[#allocation7 + $0x8] sm:$0xff]  ;;  %v8338_v37 = vcombine.high %v4377_v27, %v4381_v22 }
 0xafb   :  { %v8337_v24 = vcombine.low %v4377_v27, %v4381_v22  ;;  %v4388_v27 = vld [vmem:[#allocation7 + $0x58] sm:$0xff] }
 0xafc   :  { %4817 = vmatprep.subr.bf16.mxu1 %v8338_v37  ;;  %v4392_v22 = vld [vmem:[#allocation7 + $0x78] sm:$0xff] }
 0xafd   :  { %4818 = vmatpush1.bf16.msra.mxu1 %v8337_v24  ;;  %v8352_v24 = vcombine.high %v4388_v27, %v4392_v22 }
 0xb03   :  { %v9047_v62 = vpop.eup %9046 }
 0xb04   :  { %v9049_v38 = vpop.eup %9048  ;;  %v4182_v14 = vmul.f32 %v9047_v62, %v9041_v59  ;;  %v4382_v59 = vld [vmem:[#allocation7 + $0x28] sm:$0xff]  ;;  %v4435_v62 = vld [vmem:[#allocation7 + $0x1d0] sm:$0xff] }
 0xb05   :  { %v9051_v53 = vpop.eup %9050  ;;  %v4181_v6 = vmul.f32 %v9049_v38, %v4177_v25  ;;  %v8340_v40 = vcombine.high %v4378_v31, %v4382_v59  ;;  %v4439_v38 = vld [vmem:[#allocation7 + $0x1f0] sm:$0xff] }
 0xb06   :  { %v9053_v63 = vpop.eup %9052  ;;  %v4184_v3 = vadd.f32 %v4182_v14, %v4180_v11  ;;  %v4168_v2 = vadd.f32 1.0, %v9051_v53  ;;  %v4436_v11 = vld [vmem:[#allocation7 + $0x1d8] sm:$0xff]  ;;  %v8398_v14 = vcombine.high %v4435_v62, %v4439_v38  ;;  %v8397_v25 = vcombine.low %v4435_v62, %v4439_v38 }
 0xb07   :  { %v9055_v7 = vpop.eup %9054  ;;  %v4183_v8 = vmul.f32 %v9053_v63, %v9045_v49  ;;  %v8339_v49 = vcombine.low %v4378_v31, %v4382_v59  ;;  %v4440_v53 = vld [vmem:[#allocation7 + $0x1f8] sm:$0xff] }
 0xb08   :  { %9056 = vtanh.f32 %v4184_v3  ;;  %v4169_v57 = vadd.f32 1.0, %v9055_v7  ;;  %v8399_v63 = vcombine.low %v4436_v11, %v4440_v53  ;;  %v8400_v3 = vcombine.high %v4436_v11, %v4440_v53  ;;  %4885 = vmatprep.subr.bf16.mxu1 %v8398_v14  ;;  %v4427_v7 = vld [vmem:[#allocation7 + $0x190] sm:$0xff]  ;;  %v4380_v62 = vld [vmem:[#allocation7 + $0x18] sm:$0xff] }
 0xb09   :  { %9058 = vrcp.f32 %v4168_v2  ;;  %v4185_v10 = vadd.f32 %v4183_v8, %v4181_v6  ;;  %v4431_v8 = vld [vmem:[#allocation7 + $0x1b0] sm:$0xff]  ;;  %v4384_v38 = vld [vmem:[#allocation7 + $0x38] sm:$0xff]  ;;  %v8351_v14 = vcombine.low %v4388_v27, %v4392_v22  ;;  %v4975_v27 = vld [vmem:[#allocation8 + $0x40] sm:$0xff] }
 0xb0a   :  { %9060 = vrcp.f32 %v4169_v57  ;;  %v4428_v57 = vld [vmem:[#allocation7 + $0x198] sm:$0xff]  ;;  %v4979_v22 = vld [vmem:[#allocation8 + $0x60] sm:$0xff] }
 0xb0b   :  { %9062 = vtanh.f32 %v4185_v10  ;;  %v4432_v10 = vld [vmem:[#allocation7 + $0x1b8] sm:$0xff] }
 0xb15   :  { %v9057_v32 = vpop.eup %9056 }
 0xb16   :  { %v9059_v16 = vpop.eup %9058 }
 0xb17   :  { %v9061_v0 = vpop.eup %9060  ;;  %v4188_v17 = vmul.f32 %v9059_v16, %v9057_v32 }
 0xb18   :  { %v9063_v54 = vpop.eup %9062 }
 0xb19   :  { %v4189_v18 = vmul.f32 %v9063_v54, %v9061_v0  ;;  %v4202_v12 = vsel %vm414_vm7, %v11135_v42, %v4188_v17  ;;  %v7766_v20 = vrot.slane %v4188_v17, 7  ;;  %v4422_v42 = vld [vmem:[#allocation7 + $0x168] sm:$0xff]  ;;  %v8390_v17 = vcombine.high %v4427_v7, %v4431_v8 }
 0xb1a   :  { %v4204_v58 = vadd.f32 %v4202_v12, %v14269_v55  ;;  %v8380_v23 = vcombine.high %v4418_v43, %v4422_v42  ;;  %v8379_v33 = vcombine.low %v4418_v43, %v4422_v42  ;;  %v8392_v54 = vcombine.high %v4428_v57, %v4432_v10  ;;  %v4420_v55 = vld [vmem:[#allocation7 + $0x158] sm:$0xff] }
 0xb1b   :  { %v4203_v9 = vsel %vm414_vm7, %v11139_v61, %v4189_v18  ;;  %v7769_v44 = vrot.slane %v4189_v18, 6  ;;  %v8387_v61 = vcombine.low %v4426_v26, %v4430_v56  ;;  %v4419_v18 = vld [vmem:[#allocation7 + $0x150] sm:$0xff] }
 0xb1c   :  { %v4205_v52 = vadd.f32 %v4203_v9, %v14270_v60  ;;  %v4206_v47 = vpack.c.bf16 %v4204_v58, %v4204_v58  ;;  %v4423_v9 = vld [vmem:[#allocation7 + $0x170] sm:$0xff]  ;;  %v4424_v58 = vld [vmem:[#allocation7 + $0x178] sm:$0xff] }
 0xb1d   :  { %v11283_v39 = vsel %vm402_vm1, %v7766_v20, %v7769_v44  ;;  %v8389_v20 = vcombine.low %v4427_v7, %v4431_v8  ;;  %v8391_v44 = vcombine.low %v4428_v57, %v4432_v10  ;;  %v8382_v60 = vcombine.high %v4419_v18, %v4423_v9  ;;  %v4411_v26 = vld [vmem:[#allocation7 + $0x110] sm:$0xff]  ;;  %v5028_v7 = vld [vmem:[#allocation8 + $0x1e8] sm:$0xff] }
 0xb1e   :  { %14271 = vst [vmem:[#allocation83_spill] sm:$0xff] %v11283_v39  ;;  %v4207_v1 = vpack.c.bf16 %v4205_v52, %v4205_v52  ;;  %v8384_v52 = vcombine.high %v4420_v55, %v4424_v58  ;;  %v4415_v56 = vld [vmem:[#allocation7 + $0x130] sm:$0xff]  ;;  %v8383_v43 = vcombine.low %v4420_v55, %v4424_v58  ;;  %v8343_v8 = vcombine.low %v4380_v62, %v4384_v38  ;;  %v5007_v58 = vld [vmem:[#allocation8 + $0x140] sm:$0xff] }
 0xb1f   :  { %v8374_v42 = vcombine.high %v4411_v26, %v4415_v56  ;;  %v5039_v39 = vld [vmem:[#allocation8 + $0x240] sm:$0xff] }
 0xb20   :  { %4368 = vmatprep.mubr.bf16.mxu0 %v4207_v1  ;;  %v4412_v1 = vld [vmem:[#allocation7 + $0x118] sm:$0xff] }
 0xb21   :  { %4369 = vmatmul.mubr.bf16.vlgmr.msra.gmra.mxu0 %v4206_v47  ;;  %v4416_v47 = vld [vmem:[#allocation7 + $0x138] sm:$0xff] }
 0xb22   :  { %4845 = vmatpush1.bf16.msra.mxu0 %v8395_v41  ;;  %4876 = vmatprep.mubr.bf16.mxu0 %v14268_v5  ;;  %v8356_v41 = vcombine.high %v4394_v45, %v4398_v36  ;;  %v8375_v15 = vcombine.low %v4412_v1, %v4416_v47  ;;  %v4399_v45 = vld [vmem:[#allocation7 + $0xb0] sm:$0xff]  ;;  %v4396_v36 = vld [vmem:[#allocation7 + $0x98] sm:$0xff] }
 0xb23   :  { %4846 = vmatprep.subr.bf16.mxu0 %v8388_v48  ;;  %v8381_v48 = vcombine.low %v4419_v18, %v4423_v9 }
 0xb26   :  { %4847 = vmatpush1.bf16.msra.mxu0 %v8387_v61  ;;  %v8376_v61 = vcombine.high %v4412_v1, %v4416_v47  ;;  %v4999_v47 = vld [vmem:[#allocation8 + $0x100] sm:$0xff] }
 0xb27   :  { %4848 = vmatprep.subr.bf16.mxu0 %v8380_v23  ;;  %v4403_v23 = vld [vmem:[#allocation7 + $0xd0] sm:$0xff] }
 0xb28   :  { %v8366_v51 = vcombine.high %v4403_v23, %v4407_v34 }
 0xb2a   :  { %4849 = vmatpush1.bf16.msra.mxu0 %v8379_v33  ;;  %v4408_v33 = vld [vmem:[#allocation7 + $0xf8] sm:$0xff] }
 0xb2b   :  { %4850 = vmatprep.subr.bf16.mxu0 %v8372_v19  ;;  %v8373_v19 = vcombine.low %v4411_v26, %v4415_v56  ;;  %v8367_v46 = vcombine.low %v4404_v21, %v4408_v33 }
 0xb2e   :  { %4851 = vmatpush1.bf16.msra.mxu0 %v8371_v13  ;;  %v8368_v13 = vcombine.high %v4404_v21, %v4408_v33  ;;  %v4991_v21 = vld [vmem:[#allocation8 + $0xc0] sm:$0xff] }
 0xb2f   :  { %4852 = vmatprep.subr.bf16.mxu0 %v8364_v30  ;;  %v4395_v30 = vld [vmem:[#allocation7 + $0x90] sm:$0xff]  ;;  %v4995_v33 = vld [vmem:[#allocation8 + $0xe0] sm:$0xff] }
 0xb30   :  { %v8358_v29 = vcombine.high %v4395_v30, %v4399_v45  ;;  %v8357_v31 = vcombine.low %v4395_v30, %v4399_v45  ;;  %v11345_v30 = vcombine.high %v4991_v21, %v4995_v33 }
 0xb32   :  { %4853 = vmatpush1.bf16.msra.mxu0 %v8363_v50  ;;  %v4400_v50 = vld [vmem:[#allocation7 + $0xb8] sm:$0xff]  ;;  %14288 = vst [vmem:[#allocation110_spill] sm:$0xff] %v11345_v30 }
 0xb33   :  { %4854 = vmatprep.subr.bf16.mxu0 %v8356_v41  ;;  %v8365_v41 = vcombine.low %v4403_v23, %v4407_v34  ;;  %v8359_v37 = vcombine.low %v4396_v36, %v4400_v50 }
 0xb36   :  { %4855 = vmatpush1.bf16.msra.mxu0 %v8355_v35  ;;  %v8360_v35 = vcombine.high %v4396_v36, %v4400_v50  ;;  %v4983_v36 = vld [vmem:[#allocation8 + $0x80] sm:$0xff] }
 0xb37   :  { %4856 = vmatprep.subr.bf16.mxu0 %v8348_v28  ;;  %v4387_v28 = vld [vmem:[#allocation7 + $0x50] sm:$0xff]  ;;  %v4987_v50 = vld [vmem:[#allocation8 + $0xa0] sm:$0xff] }
 0xb3a   :  { %4857 = vmatpush1.bf16.msra.mxu0 %v8347_v4  ;;  %v4391_v4 = vld [vmem:[#allocation7 + $0x70] sm:$0xff] }
 0xb3b   :  { %4858 = vmatprep.subr.bf16.mxu0 %v8340_v40  ;;  %v8350_v59 = vcombine.high %v4387_v28, %v4391_v4  ;;  %v4383_v40 = vld [vmem:[#allocation7 + $0x30] sm:$0xff]  ;;  %v8349_v11 = vcombine.low %v4387_v28, %v4391_v4  ;;  %v11357_v28 = vcombine.high %v4983_v36, %v4987_v50 }
 0xb3d   :  { %14292 = vst [vmem:[#allocation149_spill] sm:$0xff] %v11357_v28 }
 0xb3e   :  { %4859 = vmatpush1.bf16.msra.mxu0 %v8339_v49  ;;  %v4379_v49 = vld [vmem:[#allocation7 + $0x10] sm:$0xff] }
 0xb3f   :  { %4926 = vmatprep.subr.bf16.mxu0 %v8400_v3  ;;  %v8342_v53 = vcombine.high %v4379_v49, %v4383_v40  ;;  %v5027_v3 = vld [vmem:[#allocation8 + $0x1e0] sm:$0xff] }
 0xbe1   :  { %v8625_v2 = vpop.f32.mrf.mxu0 }
 0xbe3   :  { %v8626_v6 = vpop.f32.mrf.mxu0 }
 0xbe4   :  { %v8627_v32 = vadd.f32 %v8626_v6, %v8625_v2  ;;  %v5024_v2 = vld [vmem:[#allocation8 + $0x1c8] sm:$0xff]  ;;  %v8341_v6 = vcombine.low %v4379_v49, %v4383_v40  ;;  %v11369_v49 = vcombine.high %v4975_v27, %v4979_v22 }
 0xbe5   :  { %v8628_v16 = vpop.f32.mrf.mxu0  ;;  %v11297_v10 = vcombine.high %v5024_v2, %v5028_v7 }
 0xbe6   :  { %v11289_v0 = vpack.c.bf16 %v8627_v32, %v8627_v32  ;;  %v5015_v32 = vld [vmem:[#allocation8 + $0x180] sm:$0xff]  ;;  %14296 = vst [vmem:[#allocation98_spill] sm:$0xff] %v11369_v49 }
 0xbe7   :  { %v8629_v12 = vpop.f32.mrf.mxu0  ;;  %14273 = vst [vmem:[#allocation85_spill] sm:$0xff] %v11297_v10  ;;  %v5019_v16 = vld [vmem:[#allocation8 + $0x1a0] sm:$0xff] }
 0xbe8   :  { %4836 = vmatmul.mubr.bf16.vlgmr.msra.gmra.mxu1 %v11289_v0  ;;  %4877 = vmatmul.mubr.bf16.vlgmr.msra.gmra.mxu0 %v11289_v0  ;;  %v11301_v12 = vcombine.low %v5024_v2, %v5028_v7  ;;  %v11305_v9 = vcombine.high %v5015_v32, %v5019_v16  ;;  %v5087_v2 = vld [vmem:[#allocation8 + $0x3c0] sm:$0xff] }
 0xbe9   :  { %4886 = vmatpush1.bf16.msra.mxu1 %v8397_v25  ;;  %4927 = vmatpush1.bf16.msra.mxu0 %v8399_v63  ;;  %v8344_v25 = vcombine.high %v4380_v62, %v4384_v38  ;;  %v5023_v63 = vld [vmem:[#allocation8 + $0x1c0] sm:$0xff] }
 0xbea   :  { %4887 = vmatprep.subr.bf16.mxu1 %v8390_v17  ;;  %4928 = vmatprep.subr.bf16.mxu0 %v8392_v54  ;;  %v11295_v57 = vcombine.high %v5023_v63, %v5027_v3  ;;  %v5016_v17 = vld [vmem:[#allocation8 + $0x188] sm:$0xff]  ;;  %v11299_v18 = vcombine.low %v5023_v63, %v5027_v3  ;;  %14275 = vst [vmem:[#allocation87_spill] sm:$0xff] %v11301_v12  ;;  %14276 = vst [vmem:[#allocation88_spill] sm:$0xff] %v11305_v9  ;;  %v4967_v62 = vld [vmem:[#allocation8] sm:$0xff] }
 0xbeb   :  { %4917 = vmatprep.mubr.bf16.mxu1 %v14268_v5  ;;  %4958 = vmatprep.mubr.bf16.mxu0 %v14268_v5  ;;  %v5020_v54 = vld [vmem:[#allocation8 + $0x1a8] sm:$0xff]  ;;  %v4971_v38 = vld [vmem:[#allocation8 + $0x20] sm:$0xff] }
 0xbec   :  { %14272 = vst [vmem:[#allocation84_spill] sm:$0xff] %v11295_v57  ;;  %14274 = vst [vmem:[#allocation86_spill] sm:$0xff] %v11299_v18  ;;  %v11307_v55 = vcombine.high %v5016_v17, %v5020_v54  ;;  %v11315_v26 = vcombine.low %v5016_v17, %v5020_v54  ;;  %v11381_v63 = vcombine.high %v4967_v62, %v4971_v38  ;;  %v5091_v7 = vld [vmem:[#allocation8 + $0x3e0] sm:$0xff] }
 0xbed   :  { %4888 = vmatpush1.bf16.msra.mxu1 %v8389_v20  ;;  %4929 = vmatpush1.bf16.msra.mxu0 %v8391_v44  ;;  %v5011_v20 = vld [vmem:[#allocation8 + $0x160] sm:$0xff]  ;;  %v5008_v44 = vld [vmem:[#allocation8 + $0x148] sm:$0xff]  ;;  %v11393_v17 = vcombine.high %v5087_v2, %v5091_v7 }
 0xbee   :  { %4889 = vmatprep.subr.bf16.mxu1 %v8382_v60  ;;  %4930 = vmatprep.subr.bf16.mxu0 %v8384_v52  ;;  %14277 = vst [vmem:[#allocation89_spill] sm:$0xff] %v11307_v55  ;;  %v5012_v60 = vld [vmem:[#allocation8 + $0x168] sm:$0xff]  ;;  %v11313_v52 = vcombine.low %v5015_v32, %v5019_v16  ;;  %14279 = vst [vmem:[#allocation146_spill] sm:$0xff] %v11315_v26  ;;  %v11319_v56 = vcombine.high %v5007_v58, %v5011_v20 }
 0xbef   :  { %v11321_v1 = vcombine.high %v5008_v44, %v5012_v60  ;;  %14300 = vst [vmem:[#allocation102_spill] sm:$0xff] %v11381_v63  ;;  %v11387_v32 = vcombine.low %v4967_v62, %v4971_v38  ;;  %14304 = vst [vmem:[#allocation106_spill] sm:$0xff] %v11393_v17 }
 0xbf0   :  { %14278 = vst [vmem:[#allocation90_spill] sm:$0xff] %v11313_v52  ;;  %14280 = vst [vmem:[#allocation147_spill] sm:$0xff] %v11319_v56 }
 0xbf1   :  { %4890 = vmatpush1.bf16.msra.mxu1 %v8381_v48  ;;  %4931 = vmatpush1.bf16.msra.mxu0 %v8383_v43  ;;  %14281 = vst [vmem:[#allocation148_spill] sm:$0xff] %v11321_v1  ;;  %v5003_v48 = vld [vmem:[#allocation8 + $0x120] sm:$0xff]  ;;  %v5000_v43 = vld [vmem:[#allocation8 + $0x108] sm:$0xff]  ;;  %14302 = vst [vmem:[#allocation104_spill] sm:$0xff] %v11387_v32 }
 0xbf2   :  { %4891 = vmatprep.subr.bf16.mxu1 %v8374_v42  ;;  %4932 = vmatprep.subr.bf16.mxu0 %v8376_v61  ;;  %v11327_v42 = vcombine.low %v5007_v58, %v5011_v20  ;;  %v11329_v61 = vcombine.low %v5008_v44, %v5012_v60  ;;  %v11333_v23 = vcombine.high %v4999_v47, %v5003_v48  ;;  %v5079_v58 = vld [vmem:[#allocation8 + $0x380] sm:$0xff]  ;;  %v5080_v44 = vld [vmem:[#allocation8 + $0x388] sm:$0xff] }
 0xbf3   :  { %v5083_v20 = vld [vmem:[#allocation8 + $0x3a0] sm:$0xff]  ;;  %v5084_v60 = vld [vmem:[#allocation8 + $0x3a8] sm:$0xff] }
 0xbf4   :  { %14282 = vst [vmem:[#allocation91_spill] sm:$0xff] %v11327_v42  ;;  %14283 = vst [vmem:[#allocation92_spill] sm:$0xff] %v11329_v61 }
 0xbf5   :  { %4892 = vmatpush1.bf16.msra.mxu1 %v8373_v19  ;;  %4933 = vmatpush1.bf16.msra.mxu0 %v8375_v15  ;;  %14284 = vst [vmem:[#allocation93_spill] sm:$0xff] %v11333_v23  ;;  %v4992_v19 = vld [vmem:[#allocation8 + $0xc8] sm:$0xff] }
 0xbf6   :  { %4893 = vmatprep.subr.bf16.mxu1 %v8366_v51  ;;  %4934 = vmatprep.subr.bf16.mxu0 %v8368_v13  ;;  %v4996_v15 = vld [vmem:[#allocation8 + $0xe8] sm:$0xff]  ;;  %v11339_v51 = vcombine.low %v4999_v47, %v5003_v48  ;;  %v11399_v47 = vcombine.low %v5087_v2, %v5091_v7  ;;  %v5055_v2 = vld [vmem:[#allocation8 + $0x2c0] sm:$0xff] }
 0xbf7   :  { %v11347_v45 = vcombine.high %v4992_v19, %v4996_v15  ;;  %v5059_v7 = vld [vmem:[#allocation8 + $0x2e0] sm:$0xff] }
 0xbf8   :  { %14286 = vst [vmem:[#allocation95_spill] sm:$0xff] %v11339_v51  ;;  %14306 = vst [vmem:[#allocation108_spill] sm:$0xff] %v11399_v47 }
 0xbf9   :  { %4894 = vmatpush1.bf16.msra.mxu1 %v8365_v41  ;;  %4935 = vmatpush1.bf16.msra.mxu0 %v8367_v46  ;;  %14289 = vst [vmem:[#allocation111_spill] sm:$0xff] %v11347_v45  ;;  %v4984_v41 = vld [vmem:[#allocation8 + $0x88] sm:$0xff] }
 0xbfa   :  { %4895 = vmatprep.subr.bf16.mxu1 %v8358_v29  ;;  %4936 = vmatprep.subr.bf16.mxu0 %v8360_v35  ;;  %v4988_v46 = vld [vmem:[#allocation8 + $0xa8] sm:$0xff]  ;;  %v11351_v29 = vcombine.low %v4991_v21, %v4995_v33  ;;  %v11353_v35 = vcombine.low %v4992_v19, %v4996_v15  ;;  %v5071_v21 = vld [vmem:[#allocation8 + $0x340] sm:$0xff] }
 0xbfb   :  { %v11359_v4 = vcombine.high %v4984_v41, %v4988_v46  ;;  %v5075_v33 = vld [vmem:[#allocation8 + $0x360] sm:$0xff]  ;;  %v5072_v19 = vld [vmem:[#allocation8 + $0x348] sm:$0xff] }
 0xbfc   :  { %14290 = vst [vmem:[#allocation114_spill] sm:$0xff] %v11351_v29  ;;  %14291 = vst [vmem:[#allocation115_spill] sm:$0xff] %v11353_v35  ;;  %v5076_v15 = vld [vmem:[#allocation8 + $0x368] sm:$0xff]  ;;  %v11423_v62 = vcombine.low %v5071_v21, %v5075_v33 }
 0xbfd   :  { %4896 = vmatpush1.bf16.msra.mxu1 %v8357_v31  ;;  %4937 = vmatpush1.bf16.msra.mxu0 %v8359_v37  ;;  %14293 = vst [vmem:[#allocation150_spill] sm:$0xff] %v11359_v4  ;;  %v4976_v31 = vld [vmem:[#allocation8 + $0x48] sm:$0xff]  ;;  %v11425_v38 = vcombine.low %v5072_v19, %v5076_v15 }
 0xbfe   :  { %4897 = vmatprep.subr.bf16.mxu1 %v8350_v59  ;;  %4938 = vmatprep.subr.bf16.mxu0 %v8352_v24  ;;  %v4980_v37 = vld [vmem:[#allocation8 + $0x68] sm:$0xff]  ;;  %v11363_v59 = vcombine.low %v4983_v36, %v4987_v50  ;;  %v11365_v24 = vcombine.low %v4984_v41, %v4988_v46  ;;  %v11411_v36 = vcombine.low %v5079_v58, %v5083_v20 }
 0xbff   :  { %v11371_v40 = vcombine.high %v4976_v31, %v4980_v37  ;;  %v11413_v50 = vcombine.low %v5080_v44, %v5084_v60  ;;  %v11417_v41 = vcombine.high %v5071_v21, %v5075_v33  ;;  %v11419_v46 = vcombine.high %v5072_v19, %v5076_v15  ;;  %14314 = vst [vmem:[#allocation22_spill] sm:$0xff] %v11423_v62  ;;  %v5047_v21 = vld [vmem:[#allocation8 + $0x280] sm:$0xff]  ;;  %v5048_v19 = vld [vmem:[#allocation8 + $0x288] sm:$0xff] }
 0xc00   :  { %14294 = vst [vmem:[#allocation96_spill] sm:$0xff] %v11363_v59  ;;  %14295 = vst [vmem:[#allocation97_spill] sm:$0xff] %v11365_v24  ;;  %v5051_v33 = vld [vmem:[#allocation8 + $0x2a0] sm:$0xff]  ;;  %v5052_v15 = vld [vmem:[#allocation8 + $0x2a8] sm:$0xff] }
 0xc01   :  { %4898 = vmatpush1.bf16.msra.mxu1 %v8349_v11  ;;  %4939 = vmatpush1.bf16.msra.mxu0 %v8351_v14  ;;  %14297 = vst [vmem:[#allocation99_spill] sm:$0xff] %v11371_v40  ;;  %v4968_v11 = vld [vmem:[#allocation8 + $0x8] sm:$0xff]  ;;  %14310 = vst [vmem:[#allocation18_spill] sm:$0xff] %v11411_v36 }
 0xc02   :  { %4899 = vmatprep.subr.bf16.mxu1 %v8342_v53  ;;  %4940 = vmatprep.subr.bf16.mxu0 %v8344_v25  ;;  %v4972_v14 = vld [vmem:[#allocation8 + $0x28] sm:$0xff]  ;;  %v11375_v53 = vcombine.low %v4975_v27, %v4979_v22  ;;  %v11377_v25 = vcombine.low %v4976_v31, %v4980_v37  ;;  %14311 = vst [vmem:[#allocation19_spill] sm:$0xff] %v11413_v50  ;;  %14312 = vst [vmem:[#allocation20_spill] sm:$0xff] %v11417_v41  ;;  %v5063_v27 = vld [vmem:[#allocation8 + $0x300] sm:$0xff] }
 0xc03   :  { %v11383_v3 = vcombine.high %v4968_v11, %v4972_v14  ;;  %v11389_v16 = vcombine.low %v4968_v11, %v4972_v14  ;;  %14313 = vst [vmem:[#allocation21_spill] sm:$0xff] %v11419_v46  ;;  %v5067_v22 = vld [vmem:[#allocation8 + $0x320] sm:$0xff]  ;;  %v5064_v31 = vld [vmem:[#allocation8 + $0x308] sm:$0xff]  ;;  %14315 = vst [vmem:[#allocation23_spill] sm:$0xff] %v11425_v38 }
 0xc04   :  { %14298 = vst [vmem:[#allocation100_spill] sm:$0xff] %v11375_v53  ;;  %14299 = vst [vmem:[#allocation101_spill] sm:$0xff] %v11377_v25  ;;  %v5068_v37 = vld [vmem:[#allocation8 + $0x328] sm:$0xff]  ;;  %v11429_v11 = vcombine.high %v5063_v27, %v5067_v22 }
 0xc05   :  { %4900 = vmatpush1.bf16.msra.mxu1 %v8341_v6  ;;  %4941 = vmatpush1.bf16.msra.mxu0 %v8343_v8  ;;  %14301 = vst [vmem:[#allocation103_spill] sm:$0xff] %v11383_v3  ;;  %v5088_v6 = vld [vmem:[#allocation8 + $0x3c8] sm:$0xff]  ;;  %14303 = vst [vmem:[#allocation105_spill] sm:$0xff] %v11389_v16  ;;  %v11431_v14 = vcombine.high %v5064_v31, %v5068_v37 }
 0xc06   :  { %5735 = vmatprep.subr.bf16.mxu1 %v11295_v57  ;;  %5776 = vmatprep.subr.bf16.mxu0 %v11297_v10  ;;  %v5092_v8 = vld [vmem:[#allocation8 + $0x3e8] sm:$0xff]  ;;  %14316 = vst [vmem:[#allocation24_spill] sm:$0xff] %v11429_v11 }
 0xc07   :  { %v11395_v54 = vcombine.high %v5088_v6, %v5092_v8  ;;  %v11401_v48 = vcombine.low %v5088_v6, %v5092_v8  ;;  %14317 = vst [vmem:[#allocation25_spill] sm:$0xff] %v11431_v14  ;;  %v5056_v6 = vld [vmem:[#allocation8 + $0x2c8] sm:$0xff] }
 0xc08   :  { %4918 = vmatmul.mubr.bf16.vlgmr.msra.gmra.mxu1 %v11289_v0  ;;  %4959 = vmatmul.mubr.bf16.vlgmr.msra.gmra.mxu0 %v11289_v0  ;;  %v5004_v0 = vld [vmem:[#allocation8 + $0x128] sm:$0xff] }
 0xc09   :  { %5736 = vmatpush1.bf16.msra.mxu1 %v11299_v18  ;;  %5777 = vmatpush1.bf16.msra.mxu0 %v11301_v12  ;;  %v11335_v34 = vcombine.high %v5000_v43, %v5004_v0  ;;  %v11341_v13 = vcombine.low %v5000_v43, %v5004_v0  ;;  %14305 = vst [vmem:[#allocation107_spill] sm:$0xff] %v11395_v54  ;;  %14307 = vst [vmem:[#allocation112_spill] sm:$0xff] %v11401_v48  ;;  %v5060_v8 = vld [vmem:[#allocation8 + $0x2e8] sm:$0xff] }
 0xc0a   :  { %5737 = vmatprep.subr.bf16.mxu1 %v11305_v9  ;;  %5778 = vmatprep.subr.bf16.mxu0 %v11307_v55  ;;  %v11405_v43 = vcombine.high %v5079_v58, %v5083_v20  ;;  %v11407_v0 = vcombine.high %v5080_v44, %v5084_v60  ;;  %v11435_v58 = vcombine.low %v5063_v27, %v5067_v22 }
 0xc0b   :  { %5767 = vmatprep.mubr.bf16.mxu1 %v14268_v5  ;;  %5808 = vmatprep.mubr.bf16.mxu0 %v14268_v5  ;;  %14285 = vst [vmem:[#allocation94_spill] sm:$0xff] %v11335_v34  ;;  %14287 = vst [vmem:[#allocation109_spill] sm:$0xff] %v11341_v13  ;;  %v11437_v20 = vcombine.low %v5064_v31, %v5068_v37  ;;  %v11441_v44 = vcombine.high %v5055_v2, %v5059_v7 }
 0xc0c   :  { %14308 = vst [vmem:[#allocation113_spill] sm:$0xff] %v11405_v43  ;;  %14309 = vst [vmem:[#allocation17_spill] sm:$0xff] %v11407_v0  ;;  %v11443_v60 = vcombine.high %v5056_v6, %v5060_v8  ;;  %v11447_v27 = vcombine.low %v5055_v2, %v5059_v7  ;;  %v11449_v22 = vcombine.low %v5056_v6, %v5060_v8 }
 0xc0d   :  { %5738 = vmatpush1.bf16.msra.mxu1 %v11313_v52  ;;  %5779 = vmatpush1.bf16.msra.mxu0 %v11315_v26  ;;  %14318 = vst [vmem:[#allocation26_spill] sm:$0xff] %v11435_v58  ;;  %14319 = vst [vmem:[#allocation27_spill] sm:$0xff] %v11437_v20  ;;  %v11453_v31 = vcombine.high %v5047_v21, %v5051_v33  ;;  %v11455_v37 = vcombine.high %v5048_v19, %v5052_v15 }
 0xc0e   :  { %5739 = vmatprep.subr.bf16.mxu1 %v11319_v56  ;;  %5780 = vmatprep.subr.bf16.mxu0 %v11321_v1  ;;  %14320 = vst [vmem:[#allocation28_spill] sm:$0xff] %v11441_v44  ;;  %14321 = vst [vmem:[#allocation29_spill] sm:$0xff] %v11443_v60  ;;  %v11459_v2 = vcombine.low %v5047_v21, %v5051_v33  ;;  %v11461_v7 = vcombine.low %v5048_v19, %v5052_v15 }
 0xc0f   :  { %14322 = vst [vmem:[#allocation30_spill] sm:$0xff] %v11447_v27  ;;  %14323 = vst [vmem:[#allocation31_spill] sm:$0xff] %v11449_v22 }
 0xc10   :  { %14324 = vst [vmem:[#allocation32_spill] sm:$0xff] %v11453_v31  ;;  %14325 = vst [vmem:[#allocation33_spill] sm:$0xff] %v11455_v37 }
 0xc11   :  { %5740 = vmatpush1.bf16.msra.mxu1 %v11327_v42  ;;  %5781 = vmatpush1.bf16.msra.mxu0 %v11329_v61  ;;  %14326 = vst [vmem:[#allocation34_spill] sm:$0xff] %v11459_v2  ;;  %14327 = vst [vmem:[#allocation35_spill] sm:$0xff] %v11461_v7 }
 0xc12   :  { %5741 = vmatprep.subr.bf16.mxu1 %v11333_v23  ;;  %5782 = vmatprep.subr.bf16.mxu0 %v11335_v34 }
 0xc15   :  { %5742 = vmatpush1.bf16.msra.mxu1 %v11339_v51  ;;  %5783 = vmatpush1.bf16.msra.mxu0 %v11341_v13 }
 0xc16   :  { %5743 = vmatprep.subr.bf16.mxu1 %v11345_v30  ;;  %5784 = vmatprep.subr.bf16.mxu0 %v11347_v45 }
 0xc19   :  { %5744 = vmatpush1.bf16.msra.mxu1 %v11351_v29  ;;  %5785 = vmatpush1.bf16.msra.mxu0 %v11353_v35 }
 0xc1a   :  { %5745 = vmatprep.subr.bf16.mxu1 %v11357_v28  ;;  %5786 = vmatprep.subr.bf16.mxu0 %v11359_v4 }
 0xc1d   :  { %5746 = vmatpush1.bf16.msra.mxu1 %v11363_v59  ;;  %5787 = vmatpush1.bf16.msra.mxu0 %v11365_v24 }
 0xc1e   :  { %5747 = vmatprep.subr.bf16.mxu1 %v11369_v49  ;;  %5788 = vmatprep.subr.bf16.mxu0 %v11371_v40 }
 0xc21   :  { %5748 = vmatpush1.bf16.msra.mxu1 %v11375_v53  ;;  %5789 = vmatpush1.bf16.msra.mxu0 %v11377_v25 }
 0xc22   :  { %5749 = vmatprep.subr.bf16.mxu1 %v11381_v63  ;;  %5790 = vmatprep.subr.bf16.mxu0 %v11383_v3 }
 0xc25   :  { %5750 = vmatpush1.bf16.msra.mxu1 %v11387_v32  ;;  %5791 = vmatpush1.bf16.msra.mxu0 %v11389_v16 }
 0xc26   :  { %5751 = vmatprep.subr.bf16.mxu1 %v11393_v17  ;;  %5792 = vmatprep.subr.bf16.mxu0 %v11395_v54 }
 0xc29   :  { %5752 = vmatpush2.bf16.msra.mxu1 %v11399_v47  ;;  %5793 = vmatpush2.bf16.msra.mxu0 %v11401_v48 }
 0xc2a   :  { %5753 = vmatprep.subr.bf16.mxu1 %v11405_v43  ;;  %5794 = vmatprep.subr.bf16.mxu0 %v11407_v0 }
 0xc2d   :  { %5754 = vmatpush2.bf16.msra.mxu1 %v11411_v36  ;;  %5795 = vmatpush2.bf16.msra.mxu0 %v11413_v50 }
 0xc2e   :  { %5755 = vmatprep.subr.bf16.mxu1 %v11417_v41  ;;  %5796 = vmatprep.subr.bf16.mxu0 %v11419_v46 }
 0xc31   :  { %5756 = vmatpush2.bf16.msra.mxu1 %v11423_v62  ;;  %5797 = vmatpush2.bf16.msra.mxu0 %v11425_v38  ;;  %v5044_v38 = vld [vmem:[#allocation8 + $0x268] sm:$0xff] }
 0xc32   :  { %5757 = vmatprep.subr.bf16.mxu1 %v11429_v11  ;;  %5798 = vmatprep.subr.bf16.mxu0 %v11431_v14  ;;  %v5043_v14 = vld [vmem:[#allocation8 + $0x260] sm:$0xff]  ;;  %v5040_v11 = vld [vmem:[#allocation8 + $0x248] sm:$0xff] }
 0xc33   :  { %v11465_v6 = vcombine.high %v5039_v39, %v5043_v14  ;;  %v11467_v8 = vcombine.high %v5040_v11, %v5044_v38  ;;  %v11471_v21 = vcombine.low %v5039_v39, %v5043_v14  ;;  %v11473_v33 = vcombine.low %v5040_v11, %v5044_v38 }
 0xc35   :  { %5758 = vmatpush2.bf16.msra.mxu1 %v11435_v58  ;;  %5799 = vmatpush2.bf16.msra.mxu0 %v11437_v20  ;;  %14328 = vst [vmem:[#allocation36_spill] sm:$0xff] %v11465_v6  ;;  %14329 = vst [vmem:[#allocation37_spill] sm:$0xff] %v11467_v8  ;;  %v5032_v20 = vld [vmem:[#allocation8 + $0x208] sm:$0xff] }
 0xc36   :  { %5759 = vmatprep.subr.bf16.mxu1 %v11441_v44  ;;  %5800 = vmatprep.subr.bf16.mxu0 %v11443_v60  ;;  %v5031_v60 = vld [vmem:[#allocation8 + $0x200] sm:$0xff]  ;;  %v5036_v58 = vld [vmem:[#allocation8 + $0x228] sm:$0xff]  ;;  %14330 = vst [vmem:[#allocation38_spill] sm:$0xff] %v11471_v21  ;;  %14331 = vst [vmem:[#allocation39_spill] sm:$0xff] %v11473_v33 }
 0xc37   :  { %v5035_v44 = vld [vmem:[#allocation8 + $0x220] sm:$0xff]  ;;  %v11479_v15 = vcombine.high %v5032_v20, %v5036_v58  ;;  %v11485_v38 = vcombine.low %v5032_v20, %v5036_v58 }
 0xc38   :  { %v11477_v19 = vcombine.high %v5031_v60, %v5035_v44  ;;  %v11483_v39 = vcombine.low %v5031_v60, %v5035_v44 }
 0xc39   :  { %5760 = vmatpush2.bf16.msra.mxu1 %v11447_v27  ;;  %5801 = vmatpush2.bf16.msra.mxu0 %v11449_v22  ;;  %14333 = vst [vmem:[#allocation41_spill] sm:$0xff] %v11479_v15  ;;  %v5026_v22 = vld [vmem:[#allocation8 + $0x1d8] sm:$0xff]  ;;  %14335 = vst [vmem:[#allocation43_spill] sm:$0xff] %v11485_v38 }
 0xc3a   :  { %5761 = vmatprep.subr.bf16.mxu1 %v11453_v31  ;;  %5802 = vmatprep.subr.bf16.mxu0 %v11455_v37  ;;  %14332 = vst [vmem:[#allocation40_spill] sm:$0xff] %v11477_v19  ;;  %v5025_v37 = vld [vmem:[#allocation8 + $0x1d0] sm:$0xff]  ;;  %v5030_v27 = vld [vmem:[#allocation8 + $0x1f8] sm:$0xff]  ;;  %14334 = vst [vmem:[#allocation42_spill] sm:$0xff] %v11483_v39 }
 0xc3b   :  { %v5029_v31 = vld [vmem:[#allocation8 + $0x1f0] sm:$0xff]  ;;  %v11491_v14 = vcombine.high %v5026_v22, %v5030_v27  ;;  %v11497_v58 = vcombine.low %v5026_v22, %v5030_v27 }
 0xc3c   :  { %v11489_v11 = vcombine.high %v5025_v37, %v5029_v31  ;;  %v11495_v44 = vcombine.low %v5025_v37, %v5029_v31 }
 0xc3d   :  { %5762 = vmatpush2.bf16.msra.mxu1 %v11459_v2  ;;  %5803 = vmatpush2.bf16.msra.mxu0 %v11461_v7  ;;  %14337 = vst [vmem:[#allocation45_spill] sm:$0xff] %v11491_v14  ;;  %v5018_v7 = vld [vmem:[#allocation8 + $0x198] sm:$0xff]  ;;  %14339 = vst [vmem:[#allocation47_spill] sm:$0xff] %v11497_v58 }
 0xc3e   :  { %5763 = vmatprep.subr.bf16.mxu1 %v11465_v6  ;;  %5804 = vmatprep.subr.bf16.mxu0 %v11467_v8  ;;  %14336 = vst [vmem:[#allocation44_spill] sm:$0xff] %v11489_v11  ;;  %v5017_v8 = vld [vmem:[#allocation8 + $0x190] sm:$0xff]  ;;  %v5022_v2 = vld [vmem:[#allocation8 + $0x1b8] sm:$0xff]  ;;  %14338 = vst [vmem:[#allocation46_spill] sm:$0xff] %v11495_v44 }
 0xc3f   :  { %v5021_v6 = vld [vmem:[#allocation8 + $0x1b0] sm:$0xff]  ;;  %v11503_v60 = vcombine.high %v5018_v7, %v5022_v2  ;;  %v11511_v22 = vcombine.low %v5018_v7, %v5022_v2 }
 0xc40   :  { %v11501_v20 = vcombine.high %v5017_v8, %v5021_v6  ;;  %v11509_v27 = vcombine.low %v5017_v8, %v5021_v6 }
 0xc41   :  { %5764 = vmatpush2.bf16.msra.mxu1 %v11471_v21  ;;  %5805 = vmatpush2.bf16.msra.mxu0 %v11473_v33  ;;  %14341 = vst [vmem:[#allocation49_spill] sm:$0xff] %v11503_v60  ;;  %v5010_v33 = vld [vmem:[#allocation8 + $0x158] sm:$0xff]  ;;  %14343 = vst [vmem:[#allocation51_spill] sm:$0xff] %v11511_v22 }
 0xc42   :  { %5765 = vmatprep.subr.bf16.mxu1 %v11477_v19  ;;  %5806 = vmatprep.subr.bf16.mxu0 %v11479_v15  ;;  %14340 = vst [vmem:[#allocation48_spill] sm:$0xff] %v11501_v20  ;;  %v5009_v15 = vld [vmem:[#allocation8 + $0x150] sm:$0xff]  ;;  %v5014_v21 = vld [vmem:[#allocation8 + $0x178] sm:$0xff]  ;;  %14342 = vst [vmem:[#allocation50_spill] sm:$0xff] %v11509_v27 }
 0xc43   :  { %v5013_v19 = vld [vmem:[#allocation8 + $0x170] sm:$0xff]  ;;  %v11517_v37 = vcombine.high %v5010_v33, %v5014_v21  ;;  %v11525_v7 = vcombine.low %v5010_v33, %v5014_v21 }
 0xc44   :  { %v11515_v31 = vcombine.high %v5009_v15, %v5013_v19  ;;  %v11523_v2 = vcombine.low %v5009_v15, %v5013_v19 }
 0xc45   :  { %5766 = vmatpush2.bf16.msra.mxu1 %v11483_v39  ;;  %5807 = vmatpush2.bf16.msra.mxu0 %v11485_v38  ;;  %14345 = vst [vmem:[#allocation53_spill] sm:$0xff] %v11517_v37  ;;  %v5002_v38 = vld [vmem:[#allocation8 + $0x118] sm:$0xff]  ;;  %14347 = vst [vmem:[#allocation55_spill] sm:$0xff] %v11525_v7 }
 0xc46   :  { %5817 = vmatprep.subr.bf16.mxu1 %v11489_v11  ;;  %5858 = vmatprep.subr.bf16.mxu0 %v11491_v14  ;;  %14344 = vst [vmem:[#allocation52_spill] sm:$0xff] %v11515_v31  ;;  %v5001_v14 = vld [vmem:[#allocation8 + $0x110] sm:$0xff]  ;;  %v5006_v39 = vld [vmem:[#allocation8 + $0x138] sm:$0xff]  ;;  %14346 = vst [vmem:[#allocation54_spill] sm:$0xff] %v11523_v2 }
 0xc47   :  { %v5005_v11 = vld [vmem:[#allocation8 + $0x130] sm:$0xff]  ;;  %v11531_v8 = vcombine.high %v5002_v38, %v5006_v39  ;;  %v11537_v21 = vcombine.low %v5002_v38, %v5006_v39 }
 0xc48   :  { %5768 = vmatmul.mubr.bf16.vlgmr.msra.gmra.mxu1 %v14268_v5  ;;  %5809 = vmatmul.mubr.bf16.vlgmr.msra.gmra.mxu0 %v14268_v5  ;;  %v11529_v6 = vcombine.high %v5001_v14, %v5005_v11  ;;  %v11535_v19 = vcombine.low %v5001_v14, %v5005_v11 }
 0xc49   :  { %5818 = vmatpush1.bf16.msra.mxu1 %v11495_v44  ;;  %5859 = vmatpush1.bf16.msra.mxu0 %v11497_v58  ;;  %14349 = vst [vmem:[#allocation57_spill] sm:$0xff] %v11531_v8  ;;  %v4994_v58 = vld [vmem:[#allocation8 + $0xd8] sm:$0xff]  ;;  %14351 = vst [vmem:[#allocation59_spill] sm:$0xff] %v11537_v21 }
 0xc4a   :  { %5819 = vmatprep.subr.bf16.mxu1 %v11501_v20  ;;  %5860 = vmatprep.subr.bf16.mxu0 %v11503_v60  ;;  %14348 = vst [vmem:[#allocation56_spill] sm:$0xff] %v11529_v6  ;;  %v4993_v60 = vld [vmem:[#allocation8 + $0xd0] sm:$0xff]  ;;  %v4998_v44 = vld [vmem:[#allocation8 + $0xf8] sm:$0xff]  ;;  %14350 = vst [vmem:[#allocation58_spill] sm:$0xff] %v11535_v19 }
 0xc4b   :  { %5849 = vmatprep.mubr.bf16.mxu1 %v14268_v5  ;;  %5890 = vmatprep.mubr.bf16.mxu0 %v14268_v5  ;;  %v4997_v20 = vld [vmem:[#allocation8 + $0xf0] sm:$0xff]  ;;  %v11543_v15 = vcombine.high %v4994_v58, %v4998_v44  ;;  %v11549_v39 = vcombine.low %v4994_v58, %v4998_v44 }
 0xc4c   :  { %v11541_v33 = vcombine.high %v4993_v60, %v4997_v20  ;;  %v11547_v11 = vcombine.low %v4993_v60, %v4997_v20 }
 0xc4d   :  { %5820 = vmatpush1.bf16.msra.mxu1 %v11509_v27  ;;  %5861 = vmatpush1.bf16.msra.mxu0 %v11511_v22  ;;  %14353 = vst [vmem:[#allocation61_spill] sm:$0xff] %v11543_v15  ;;  %v4986_v22 = vld [vmem:[#allocation8 + $0x98] sm:$0xff]  ;;  %14355 = vst [vmem:[#allocation63_spill] sm:$0xff] %v11549_v39 }
 0xc4e   :  { %5821 = vmatprep.subr.bf16.mxu1 %v11515_v31  ;;  %5862 = vmatprep.subr.bf16.mxu0 %v11517_v37  ;;  %14352 = vst [vmem:[#allocation60_spill] sm:$0xff] %v11541_v33  ;;  %v4985_v37 = vld [vmem:[#allocation8 + $0x90] sm:$0xff]  ;;  %v4990_v27 = vld [vmem:[#allocation8 + $0xb8] sm:$0xff]  ;;  %14354 = vst [vmem:[#allocation62_spill] sm:$0xff] %v11547_v11 }
 0xc4f   :  { %v4989_v31 = vld [vmem:[#allocation8 + $0xb0] sm:$0xff]  ;;  %v11555_v14 = vcombine.high %v4986_v22, %v4990_v27  ;;  %v11561_v44 = vcombine.low %v4986_v22, %v4990_v27 }
 0xc50   :  { %v11553_v38 = vcombine.high %v4985_v37, %v4989_v31  ;;  %v11559_v20 = vcombine.low %v4985_v37, %v4989_v31 }
 0xc51   :  { %5822 = vmatpush1.bf16.msra.mxu1 %v11523_v2  ;;  %5863 = vmatpush1.bf16.msra.mxu0 %v11525_v7  ;;  %14357 = vst [vmem:[#allocation65_spill] sm:$0xff] %v11555_v14  ;;  %v4978_v7 = vld [vmem:[#allocation8 + $0x58] sm:$0xff]  ;;  %14359 = vst [vmem:[#allocation67_spill] sm:$0xff] %v11561_v44 }
 0xc52   :  { %5823 = vmatprep.subr.bf16.mxu1 %v11529_v6  ;;  %5864 = vmatprep.subr.bf16.mxu0 %v11531_v8  ;;  %14356 = vst [vmem:[#allocation64_spill] sm:$0xff] %v11553_v38  ;;  %v4977_v8 = vld [vmem:[#allocation8 + $0x50] sm:$0xff]  ;;  %v4982_v2 = vld [vmem:[#allocation8 + $0x78] sm:$0xff]  ;;  %14358 = vst [vmem:[#allocation66_spill] sm:$0xff] %v11559_v20 }
 0xc53   :  { %v4981_v6 = vld [vmem:[#allocation8 + $0x70] sm:$0xff]  ;;  %v11567_v60 = vcombine.high %v4978_v7, %v4982_v2  ;;  %v11573_v27 = vcombine.low %v4978_v7, %v4982_v2 }
 0xc54   :  { %v11565_v58 = vcombine.high %v4977_v8, %v4981_v6  ;;  %v11571_v31 = vcombine.low %v4977_v8, %v4981_v6 }
 0xc55   :  { %5824 = vmatpush1.bf16.msra.mxu1 %v11535_v19  ;;  %5865 = vmatpush1.bf16.msra.mxu0 %v11537_v21  ;;  %14361 = vst [vmem:[#allocation69_spill] sm:$0xff] %v11567_v60  ;;  %v4970_v21 = vld [vmem:[#allocation8 + $0x18] sm:$0xff]  ;;  %14363 = vst [vmem:[#allocation71_spill] sm:$0xff] %v11573_v27 }
 0xc56   :  { %5825 = vmatprep.subr.bf16.mxu1 %v11541_v33  ;;  %5866 = vmatprep.subr.bf16.mxu0 %v11543_v15  ;;  %14360 = vst [vmem:[#allocation68_spill] sm:$0xff] %v11565_v58  ;;  %v4969_v15 = vld [vmem:[#allocation8 + $0x10] sm:$0xff]  ;;  %v4974_v19 = vld [vmem:[#allocation8 + $0x38] sm:$0xff]  ;;  %14362 = vst [vmem:[#allocation70_spill] sm:$0xff] %v11571_v31 }
 0xc57   :  { %v4973_v33 = vld [vmem:[#allocation8 + $0x30] sm:$0xff]  ;;  %v11579_v37 = vcombine.high %v4970_v21, %v4974_v19  ;;  %v11585_v2 = vcombine.low %v4970_v21, %v4974_v19 }
 0xc58   :  { %v11577_v22 = vcombine.high %v4969_v15, %v4973_v33  ;;  %v11583_v6 = vcombine.low %v4969_v15, %v4973_v33 }
 0xc59   :  { %5826 = vmatpush1.bf16.msra.mxu1 %v11547_v11  ;;  %5867 = vmatpush1.bf16.msra.mxu0 %v11549_v39  ;;  %14365 = vst [vmem:[#allocation73_spill] sm:$0xff] %v11579_v37  ;;  %v5090_v39 = vld [vmem:[#allocation8 + $0x3d8] sm:$0xff]  ;;  %14367 = vst [vmem:[#allocation75_spill] sm:$0xff] %v11585_v2 }
 0xc5a   :  { %5827 = vmatprep.subr.bf16.mxu1 %v11553_v38  ;;  %5868 = vmatprep.subr.bf16.mxu0 %v11555_v14  ;;  %14364 = vst [vmem:[#allocation72_spill] sm:$0xff] %v11577_v22  ;;  %v5089_v14 = vld [vmem:[#allocation8 + $0x3d0] sm:$0xff]  ;;  %v5094_v11 = vld [vmem:[#allocation8 + $0x3f8] sm:$0xff]  ;;  %14366 = vst [vmem:[#allocation74_spill] sm:$0xff] %v11583_v6 }
 0xc5b   :  { %v5093_v38 = vld [vmem:[#allocation8 + $0x3f0] sm:$0xff]  ;;  %v11591_v8 = vcombine.high %v5090_v39, %v5094_v11  ;;  %v11597_v19 = vcombine.low %v5090_v39, %v5094_v11 }
 0xc5c   :  { %v11589_v7 = vcombine.high %v5089_v14, %v5093_v38  ;;  %v11595_v33 = vcombine.low %v5089_v14, %v5093_v38 }
 0xc5d   :  { %5828 = vmatpush1.bf16.msra.mxu1 %v11559_v20  ;;  %5869 = vmatpush1.bf16.msra.mxu0 %v11561_v44  ;;  %14369 = vst [vmem:[#allocation77_spill] sm:$0xff] %v11591_v8  ;;  %v5082_v44 = vld [vmem:[#allocation8 + $0x398] sm:$0xff]  ;;  %14371 = vst [vmem:[#allocation79_spill] sm:$0xff] %v11597_v19 }
 0xc5e   :  { %5829 = vmatprep.subr.bf16.mxu1 %v11565_v58  ;;  %5870 = vmatprep.subr.bf16.mxu0 %v11567_v60  ;;  %14368 = vst [vmem:[#allocation76_spill] sm:$0xff] %v11589_v7  ;;  %v5081_v60 = vld [vmem:[#allocation8 + $0x390] sm:$0xff]  ;;  %v5086_v20 = vld [vmem:[#allocation8 + $0x3b8] sm:$0xff]  ;;  %14370 = vst [vmem:[#allocation78_spill] sm:$0xff] %v11595_v33 }
 0xc5f   :  { %v5085_v58 = vld [vmem:[#allocation8 + $0x3b0] sm:$0xff]  ;;  %v11603_v15 = vcombine.high %v5082_v44, %v5086_v20  ;;  %v11609_v11 = vcombine.low %v5082_v44, %v5086_v20 }
 0xc60   :  { %v11601_v21 = vcombine.high %v5081_v60, %v5085_v58  ;;  %v11607_v38 = vcombine.low %v5081_v60, %v5085_v58 }
 0xc61   :  { %5830 = vmatpush1.bf16.msra.mxu1 %v11571_v31  ;;  %5871 = vmatpush1.bf16.msra.mxu0 %v11573_v27  ;;  %14373 = vst [vmem:[#allocation81_spill] sm:$0xff] %v11603_v15  ;;  %v5074_v27 = vld [vmem:[#allocation8 + $0x358] sm:$0xff]  ;;  %14375 = vst [vmem:[#allocation116_spill] sm:$0xff] %v11609_v11 }
 0xc62   :  { %5831 = vmatprep.subr.bf16.mxu1 %v11577_v22  ;;  %5872 = vmatprep.subr.bf16.mxu0 %v11579_v37  ;;  %14372 = vst [vmem:[#allocation80_spill] sm:$0xff] %v11601_v21  ;;  %v5073_v37 = vld [vmem:[#allocation8 + $0x350] sm:$0xff]  ;;  %v5078_v31 = vld [vmem:[#allocation8 + $0x378] sm:$0xff]  ;;  %14374 = vst [vmem:[#allocation82_spill] sm:$0xff] %v11607_v38 }
 0xc63   :  { %v5077_v22 = vld [vmem:[#allocation8 + $0x370] sm:$0xff]  ;;  %v11615_v14 = vcombine.high %v5074_v27, %v5078_v31  ;;  %v11621_v20 = vcombine.low %v5074_v27, %v5078_v31 }
 0xc64   :  { %v11613_v39 = vcombine.high %v5073_v37, %v5077_v22  ;;  %v11619_v58 = vcombine.low %v5073_v37, %v5077_v22 }
 0xc65   :  { %5832 = vmatpush1.bf16.msra.mxu1 %v11583_v6  ;;  %5873 = vmatpush1.bf16.msra.mxu0 %v11585_v2  ;;  %14377 = vst [vmem:[#allocation118_spill] sm:$0xff] %v11615_v14  ;;  %v5066_v2 = vld [vmem:[#allocation8 + $0x318] sm:$0xff]  ;;  %14379 = vst [vmem:[#allocation120_spill] sm:$0xff] %v11621_v20 }
 0xc66   :  { %5833 = vmatprep.subr.bf16.mxu1 %v11589_v7  ;;  %5874 = vmatprep.subr.bf16.mxu0 %v11591_v8  ;;  %14376 = vst [vmem:[#allocation117_spill] sm:$0xff] %v11613_v39  ;;  %v5065_v8 = vld [vmem:[#allocation8 + $0x310] sm:$0xff]  ;;  %v5070_v6 = vld [vmem:[#allocation8 + $0x338] sm:$0xff]  ;;  %14378 = vst [vmem:[#allocation119_spill] sm:$0xff] %v11619_v58 }
 0xc67   :  { %v5069_v7 = vld [vmem:[#allocation8 + $0x330] sm:$0xff]  ;;  %v11627_v60 = vcombine.high %v5066_v2, %v5070_v6  ;;  %v11633_v31 = vcombine.low %v5066_v2, %v5070_v6 }
 0xc68   :  { %v11625_v44 = vcombine.high %v5065_v8, %v5069_v7  ;;  %v11631_v22 = vcombine.low %v5065_v8, %v5069_v7 }
 0xc69   :  { %5834 = vmatpush2.bf16.msra.mxu1 %v11595_v33  ;;  %5875 = vmatpush2.bf16.msra.mxu0 %v11597_v19  ;;  %14381 = vst [vmem:[#allocation122_spill] sm:$0xff] %v11627_v60  ;;  %v5058_v19 = vld [vmem:[#allocation8 + $0x2d8] sm:$0xff]  ;;  %14383 = vst [vmem:[#allocation124_spill] sm:$0xff] %v11633_v31 }
 0xc6a   :  { %5835 = vmatprep.subr.bf16.mxu1 %v11601_v21  ;;  %5876 = vmatprep.subr.bf16.mxu0 %v11603_v15  ;;  %14380 = vst [vmem:[#allocation121_spill] sm:$0xff] %v11625_v44  ;;  %v5057_v15 = vld [vmem:[#allocation8 + $0x2d0] sm:$0xff]  ;;  %v5062_v33 = vld [vmem:[#allocation8 + $0x2f8] sm:$0xff]  ;;  %14382 = vst [vmem:[#allocation123_spill] sm:$0xff] %v11631_v22 }
 0xc6b   :  { %v5061_v21 = vld [vmem:[#allocation8 + $0x2f0] sm:$0xff]  ;;  %v11639_v37 = vcombine.high %v5058_v19, %v5062_v33  ;;  %v11645_v6 = vcombine.low %v5058_v19, %v5062_v33 }
 0xc6c   :  { %v11637_v27 = vcombine.high %v5057_v15, %v5061_v21  ;;  %v11643_v7 = vcombine.low %v5057_v15, %v5061_v21 }
 0xc6d   :  { %5836 = vmatpush2.bf16.msra.mxu1 %v11607_v38  ;;  %5877 = vmatpush2.bf16.msra.mxu0 %v11609_v11  ;;  %14385 = vst [vmem:[#allocation126_spill] sm:$0xff] %v11639_v37  ;;  %v5050_v11 = vld [vmem:[#allocation8 + $0x298] sm:$0xff]  ;;  %14387 = vst [vmem:[#allocation128_spill] sm:$0xff] %v11645_v6 }
 0xc6e   :  { %5837 = vmatprep.subr.bf16.mxu1 %v11613_v39  ;;  %5878 = vmatprep.subr.bf16.mxu0 %v11615_v14  ;;  %14384 = vst [vmem:[#allocation125_spill] sm:$0xff] %v11637_v27  ;;  %v5049_v14 = vld [vmem:[#allocation8 + $0x290] sm:$0xff]  ;;  %v5054_v38 = vld [vmem:[#allocation8 + $0x2b8] sm:$0xff]  ;;  %14386 = vst [vmem:[#allocation127_spill] sm:$0xff] %v11643_v7 }
 0xc6f   :  { %v5053_v39 = vld [vmem:[#allocation8 + $0x2b0] sm:$0xff]  ;;  %v11651_v8 = vcombine.high %v5050_v11, %v5054_v38  ;;  %v11657_v33 = vcombine.low %v5050_v11, %v5054_v38 }
 0xc70   :  { %v11649_v2 = vcombine.high %v5049_v14, %v5053_v39  ;;  %v11655_v21 = vcombine.low %v5049_v14, %v5053_v39 }
 0xc71   :  { %5838 = vmatpush2.bf16.msra.mxu1 %v11619_v58  ;;  %5879 = vmatpush2.bf16.msra.mxu0 %v11621_v20  ;;  %14389 = vst [vmem:[#allocation130_spill] sm:$0xff] %v11651_v8  ;;  %v5042_v20 = vld [vmem:[#allocation8 + $0x258] sm:$0xff]  ;;  %14391 = vst [vmem:[#allocation132_spill] sm:$0xff] %v11657_v33 }
 0xc72   :  { %5839 = vmatprep.subr.bf16.mxu1 %v11625_v44  ;;  %5880 = vmatprep.subr.bf16.mxu0 %v11627_v60  ;;  %14388 = vst [vmem:[#allocation129_spill] sm:$0xff] %v11649_v2  ;;  %v5041_v60 = vld [vmem:[#allocation8 + $0x250] sm:$0xff]  ;;  %v5046_v58 = vld [vmem:[#allocation8 + $0x278] sm:$0xff]  ;;  %14390 = vst [vmem:[#allocation131_spill] sm:$0xff] %v11655_v21 }
 0xc73   :  { %v5045_v44 = vld [vmem:[#allocation8 + $0x270] sm:$0xff]  ;;  %v11663_v15 = vcombine.high %v5042_v20, %v5046_v58  ;;  %v11669_v38 = vcombine.low %v5042_v20, %v5046_v58 }
 0xc74   :  { %v11661_v19 = vcombine.high %v5041_v60, %v5045_v44  ;;  %v11667_v39 = vcombine.low %v5041_v60, %v5045_v44 }
 0xc75   :  { %5840 = vmatpush2.bf16.msra.mxu1 %v11631_v22  ;;  %5881 = vmatpush2.bf16.msra.mxu0 %v11633_v31  ;;  %14393 = vst [vmem:[#allocation134_spill] sm:$0xff] %v11663_v15  ;;  %v5034_v31 = vld [vmem:[#allocation8 + $0x218] sm:$0xff]  ;;  %14395 = vst [vmem:[#allocation136_spill] sm:$0xff] %v11669_v38 }
 0xc76   :  { %5841 = vmatprep.subr.bf16.mxu1 %v11637_v27  ;;  %5882 = vmatprep.subr.bf16.mxu0 %v11639_v37  ;;  %14392 = vst [vmem:[#allocation133_spill] sm:$0xff] %v11661_v19  ;;  %v5033_v37 = vld [vmem:[#allocation8 + $0x210] sm:$0xff]  ;;  %v5038_v22 = vld [vmem:[#allocation8 + $0x238] sm:$0xff]  ;;  %14394 = vst [vmem:[#allocation135_spill] sm:$0xff] %v11667_v39 }
 0xc77   :  { %v5037_v27 = vld [vmem:[#allocation8 + $0x230] sm:$0xff]  ;;  %v11675_v14 = vcombine.high %v5034_v31, %v5038_v22 }
 0xc78   :  { %v11673_v11 = vcombine.high %v5033_v37, %v5037_v27 }
 0xc79   :  { %5842 = vmatpush2.bf16.msra.mxu1 %v11643_v7  ;;  %5883 = vmatpush2.bf16.msra.mxu0 %v11645_v6  ;;  %14397 = vst [vmem:[#allocation138_spill] sm:$0xff] %v11675_v14 }
 0xc7a   :  { %5843 = vmatprep.subr.bf16.mxu1 %v11649_v2  ;;  %5884 = vmatprep.subr.bf16.mxu0 %v11651_v8  ;;  %14396 = vst [vmem:[#allocation137_spill] sm:$0xff] %v11673_v11  ;;  %v11679_v8 = vcombine.low %v5033_v37, %v5037_v27  ;;  %v14400_v37 = vld [vmem:[#allocation23_spill] sm:$0xff] }
 0xc7c   :  { %14398 = vst [vmem:[#allocation139_spill] sm:$0xff] %v11679_v8 }
 0xc7d   :  { %5844 = vmatpush2.bf16.msra.mxu1 %v11655_v21  ;;  %5885 = vmatpush2.bf16.msra.mxu0 %v11657_v33  ;;  %v11681_v21 = vcombine.low %v5034_v31, %v5038_v22 }
 0xc7e   :  { %5845 = vmatprep.subr.bf16.mxu1 %v11661_v19  ;;  %5886 = vmatprep.subr.bf16.mxu0 %v11663_v15 }
 0xc7f   :  { %14399 = vst [vmem:[#allocation140_spill] sm:$0xff] %v11681_v21 }
 0xc81   :  { %5846 = vmatpush2.bf16.msra.mxu1 %v11667_v39  ;;  %5887 = vmatpush2.bf16.msra.mxu0 %v11669_v38 }
 0xc82   :  { %5847 = vmatprep.subr.bf16.mxu1 %v11673_v11  ;;  %5888 = vmatprep.subr.bf16.mxu0 %v11675_v14 }
 0xc85   :  { %5848 = vmatpush2.bf16.msra.mxu1 %v11679_v8  ;;  %5889 = vmatpush2.bf16.msra.mxu0 %v11681_v21 }
 0xc86   :  { %5957 = vmatprep.subr.bf16.mxu1 %v11295_v57  ;;  %5998 = vmatprep.subr.bf16.mxu0 %v11297_v10 }
 0xc88   :  { %5850 = vmatmul.mubr.bf16.vlgmr.msra.gmra.mxu1 %v14268_v5  ;;  %5891 = vmatmul.mubr.bf16.vlgmr.msra.gmra.mxu0 %v14268_v5 }
 0xc89   :  { %5958 = vmatpush1.bf16.msra.mxu1 %v11299_v18  ;;  %5999 = vmatpush1.bf16.msra.mxu0 %v11301_v12 }
 0xc8a   :  { %5959 = vmatprep.subr.bf16.mxu1 %v11305_v9  ;;  %6000 = vmatprep.subr.bf16.mxu0 %v11307_v55 }
 0xc8d   :  { %5960 = vmatpush1.bf16.msra.mxu1 %v11313_v52  ;;  %6001 = vmatpush1.bf16.msra.mxu0 %v11315_v26 }
 0xc8e   :  { %5961 = vmatprep.subr.bf16.mxu1 %v11319_v56  ;;  %6002 = vmatprep.subr.bf16.mxu0 %v11321_v1 }
 0xc91   :  { %5962 = vmatpush1.bf16.msra.mxu1 %v11327_v42  ;;  %6003 = vmatpush1.bf16.msra.mxu0 %v11329_v61 }
 0xc92   :  { %5963 = vmatprep.subr.bf16.mxu1 %v11333_v23  ;;  %6004 = vmatprep.subr.bf16.mxu0 %v11335_v34 }
 0xc95   :  { %5964 = vmatpush1.bf16.msra.mxu1 %v11339_v51  ;;  %6005 = vmatpush1.bf16.msra.mxu0 %v11341_v13 }
 0xc96   :  { %5965 = vmatprep.subr.bf16.mxu1 %v11345_v30  ;;  %6006 = vmatprep.subr.bf16.mxu0 %v11347_v45 }
 0xc99   :  { %5966 = vmatpush1.bf16.msra.mxu1 %v11351_v29  ;;  %6007 = vmatpush1.bf16.msra.mxu0 %v11353_v35 }
 0xc9a   :  { %5967 = vmatprep.subr.bf16.mxu1 %v11357_v28  ;;  %6008 = vmatprep.subr.bf16.mxu0 %v11359_v4 }
 0xc9d   :  { %5968 = vmatpush1.bf16.msra.mxu1 %v11363_v59  ;;  %6009 = vmatpush1.bf16.msra.mxu0 %v11365_v24 }
 0xc9e   :  { %5969 = vmatprep.subr.bf16.mxu1 %v11369_v49  ;;  %6010 = vmatprep.subr.bf16.mxu0 %v11371_v40 }
 0xca1   :  { %5970 = vmatpush1.bf16.msra.mxu1 %v11375_v53  ;;  %6011 = vmatpush1.bf16.msra.mxu0 %v11377_v25 }
 0xca2   :  { %5971 = vmatprep.subr.bf16.mxu1 %v11381_v63  ;;  %6012 = vmatprep.subr.bf16.mxu0 %v11383_v3 }
 0xca5   :  { %5972 = vmatpush1.bf16.msra.mxu1 %v11387_v32  ;;  %6013 = vmatpush1.bf16.msra.mxu0 %v11389_v16 }
 0xca6   :  { %5973 = vmatprep.subr.bf16.mxu1 %v11393_v17  ;;  %6014 = vmatprep.subr.bf16.mxu0 %v11395_v54 }
 0xca8   :  { %v4837_v5 = vpop.f32.mrf.mxu1  ;;  %v4878_v58 = vpop.f32.mrf.mxu0 }
 0xca9   :  { %5974 = vmatpush2.bf16.msra.mxu1 %v11399_v47  ;;  %6015 = vmatpush2.bf16.msra.mxu0 %v11401_v48  ;;  %v14401_v48 = vld [vmem:[#allocation24_spill] sm:$0xff] }
 0xcaa   :  { %v4839_v20 = vpop.f32.mrf.mxu1  ;;  %v4880_v44 = vpop.f32.mrf.mxu0  ;;  %5975 = vmatprep.subr.bf16.mxu1 %v11405_v43  ;;  %6016 = vmatprep.subr.bf16.mxu0 %v11407_v0  ;;  %v14402_v43 = vld [vmem:[#allocation25_spill] sm:$0xff] }
 0xcac   :  { %v4841_v60 = vpop.f32.mrf.mxu1  ;;  %v4882_v22 = vpop.f32.mrf.mxu0 }
 0xcad   :  { %5976 = vmatpush2.bf16.msra.mxu1 %v11411_v36  ;;  %6017 = vmatpush2.bf16.msra.mxu0 %v11413_v50  ;;  %v14403_v60 = vld [vmem:[#allocation26_spill] sm:$0xff]  ;;  %v14404_v22 = vld [vmem:[#allocation27_spill] sm:$0xff]  ;;  %v14405_v36 = vld [vmem:[#allocation28_spill] sm:$0xff] }
 0xcae   :  { %v4842_v31 = vpop.f32.mrf.mxu1  ;;  %v4883_v27 = vpop.f32.mrf.mxu0  ;;  %5977 = vmatprep.subr.bf16.mxu1 %v11417_v41  ;;  %6018 = vmatprep.subr.bf16.mxu0 %v11419_v46  ;;  %v14408_v41 = vld [vmem:[#allocation31_spill] sm:$0xff]  ;;  %v14409_v46 = vld [vmem:[#allocation32_spill] sm:$0xff] }
 0xcaf   :  { %v14406_v31 = vld [vmem:[#allocation29_spill] sm:$0xff]  ;;  %v14407_v27 = vld [vmem:[#allocation30_spill] sm:$0xff] }
 0xcb1   :  { %5978 = vmatpush2.bf16.msra.mxu1 %v11423_v62  ;;  %6019 = vmatpush2.bf16.msra.mxu0 %v14400_v37  ;;  %v14410_v62 = vld [vmem:[#allocation33_spill] sm:$0xff]  ;;  %v14411_v37 = vld [vmem:[#allocation34_spill] sm:$0xff] }
 0xcb2   :  { %5979 = vmatprep.subr.bf16.mxu1 %v14401_v48  ;;  %6020 = vmatprep.subr.bf16.mxu0 %v14402_v43  ;;  %v14412_v48 = vld [vmem:[#allocation35_spill] sm:$0xff]  ;;  %v14413_v43 = vld [vmem:[#allocation36_spill] sm:$0xff] }
 0xcb5   :  { %5980 = vmatpush2.bf16.msra.mxu1 %v14403_v60  ;;  %6021 = vmatpush2.bf16.msra.mxu0 %v14404_v22  ;;  %v14414_v60 = vld [vmem:[#allocation37_spill] sm:$0xff]  ;;  %v14415_v22 = vld [vmem:[#allocation38_spill] sm:$0xff] }
 0xcb6   :  { %5981 = vmatprep.subr.bf16.mxu1 %v14405_v36  ;;  %6022 = vmatprep.subr.bf16.mxu0 %v14406_v31  ;;  %v14416_v36 = vld [vmem:[#allocation39_spill] sm:$0xff]  ;;  %v14417_v31 = vld [vmem:[#allocation40_spill] sm:$0xff] }
 0xcb9   :  { %5982 = vmatpush2.bf16.msra.mxu1 %v14407_v27  ;;  %6023 = vmatpush2.bf16.msra.mxu0 %v14408_v41  ;;  %v14418_v27 = vld [vmem:[#allocation41_spill] sm:$0xff]  ;;  %v14419_v41 = vld [vmem:[#allocation42_spill] sm:$0xff] }
 0xcba   :  { %5983 = vmatprep.subr.bf16.mxu1 %v14409_v46  ;;  %6024 = vmatprep.subr.bf16.mxu0 %v14410_v62  ;;  %v14420_v46 = vld [vmem:[#allocation43_spill] sm:$0xff]  ;;  %v14421_v62 = vld [vmem:[#allocation44_spill] sm:$0xff] }
 0xcbd   :  { %5984 = vmatpush2.bf16.msra.mxu1 %v14411_v37  ;;  %6025 = vmatpush2.bf16.msra.mxu0 %v14412_v48  ;;  %v14422_v37 = vld [vmem:[#allocation45_spill] sm:$0xff] }
 0xcbe   :  { %5985 = vmatprep.subr.bf16.mxu1 %v14413_v43  ;;  %6026 = vmatprep.subr.bf16.mxu0 %v14414_v60 }
 0xcc1   :  { %5986 = vmatpush2.bf16.msra.mxu1 %v14415_v22  ;;  %6027 = vmatpush2.bf16.msra.mxu0 %v14416_v36 }
 0xcc2   :  { %5987 = vmatprep.subr.bf16.mxu1 %v14417_v31  ;;  %6028 = vmatprep.subr.bf16.mxu0 %v14418_v27 }
 0xcc5   :  { %5988 = vmatpush2.bf16.msra.mxu1 %v14419_v41  ;;  %6029 = vmatpush2.bf16.msra.mxu0 %v14420_v46 }
 0xcc6   :  { %6039 = vmatprep.subr.bf16.mxu1 %v14421_v62  ;;  %6080 = vmatprep.subr.bf16.mxu0 %v14422_v37  ;;  %v4441_v37 = vld [vmem:[%s12933_s8] sm:$0xff]  ;;  %v14423_v62 = vld [vmem:[#allocation145_spill] sm:$0xff] }
 0xcc7   :  { %v14424_v3 = vsub.s32 0, %v14423_v62 }
 0xcc8   :  { %v4919_v48 = vpop.f32.mrf.mxu1  ;;  %v4960_v43 = vpop.f32.mrf.mxu0 }
 0xcc9   :  { %v4446_v63 = vrot.slane %v4441_v37, %v14424_v3 }
 0xcca   :  { %v4921_v50 = vpop.f32.mrf.mxu1  ;;  %v4962_v60 = vpop.f32.mrf.mxu0 }
 0xccb   :  { %v11764_v25 = vadd.f32 %v4837_v5, %v4446_v63 }
 0xccc   :  { %v4923_v0 = vpop.f32.mrf.mxu1  ;;  %v4964_v22 = vpop.f32.mrf.mxu0 }
 0xccd   :  { %v14425_v0 = vsub.s32 2, %v14423_v62 }
 0xcce   :  { %v4924_v47 = vpop.f32.mrf.mxu1  ;;  %v4965_v36 = vpop.f32.mrf.mxu0 }
 0xccf   :  { %v4454_v22 = vrot.slane %v4441_v37, %v14425_v0  ;;  %v14426_v47 = vsub.s32 1, %v14423_v62 }
 0xcd1   :  { %v4450_v36 = vrot.slane %v4441_v37, %v14426_v47 }
 0xd08   :  { %v5769_v54 = vpop.f32.mrf.mxu1  ;;  %v5810_v31 = vpop.f32.mrf.mxu0 }
 0xd09   :  { %v5899_v53 = vadd.f32 %v5769_v54, %v11764_v25  ;;  %v14429_v54 = vsub.s32 4, %v14423_v62 }
 0xd0a   :  { %v5771_v17 = vpop.f32.mrf.mxu1  ;;  %v5812_v27 = vpop.f32.mrf.mxu0 }
 0xd0b   :  { %v8529_v49 = vmul.f32 -1.442695, %v5899_v53  ;;  %v14431_v53 = vsub.s32 5, %v14423_v62 }
 0xd0c   :  { %v5773_v16 = vpop.f32.mrf.mxu1  ;;  %v5814_v41 = vpop.f32.mrf.mxu0 }
 0xd0d   :  { %v14427_v16 = vsub.s32 3, %v14423_v62  ;;  %9064 = vpow2.f32 %v8529_v49  ;;  %v14432_v49 = vsub.s32 7, %v14423_v62 }
 0xd0e   :  { %v5774_v32 = vpop.f32.mrf.mxu1  ;;  %v5815_v46 = vpop.f32.mrf.mxu0 }
 0xd0f   :  { %v4458_v41 = vrot.slane %v4441_v37, %v14427_v16  ;;  %v11768_v32 = vadd.f32 %v4878_v58, %v4454_v22  ;;  %v11770_v46 = vadd.f32 %v4839_v20, %v4450_v36  ;;  %v4474_v16 = vrot.slane %v4441_v37, %v14432_v49 }
 0xd11   :  { %v5901_v40 = vadd.f32 %v5810_v31, %v11768_v32  ;;  %v11774_v3 = vadd.f32 %v4880_v44, %v4458_v41  ;;  %v5900_v0 = vadd.f32 %v5771_v17, %v11770_v46  ;;  %v4462_v31 = vrot.slane %v4441_v37, %v14429_v54 }
 0xd12   :  { %v14430_v44 = vsub.s32 6, %v14423_v62  ;;  %v4466_v17 = vrot.slane %v4441_v37, %v14431_v53 }
 0xd13   :  { %14428 = vst [vmem:[#allocation141_spill] sm:$0xff] %v11774_v3  ;;  %v5902_v47 = vadd.f32 %v5812_v27, %v11774_v3  ;;  %v8531_v63 = vmul.f32 -1.442695, %v5901_v40  ;;  %v8530_v5 = vmul.f32 -1.442695, %v5900_v0  ;;  %v11792_v3 = vadd.f32 %v4962_v60, %v4474_v16 }
 0xd14   :  { %v4470_v36 = vrot.slane %v4441_v37, %v14430_v44 }
 0xd15   :  { %v8532_v24 = vmul.f32 -1.442695, %v5902_v47  ;;  %9066 = vpow2.f32 %v8531_v63  ;;  %v11790_v63 = vadd.f32 %v4921_v50, %v4466_v17 }
 0xd16   :  { %9068 = vpow2.f32 %v8530_v5  ;;  %v11788_v47 = vadd.f32 %v4960_v43, %v4470_v36 }
 0xd17   :  { %9070 = vpow2.f32 %v8532_v24  ;;  %v11786_v24 = vadd.f32 %v4919_v48, %v4462_v31 }
 0xd1a   :  { %v9065_v58 = vpop.eup %9064 }
 0xd1b   :  { %v5913_v27 = vadd.f32 1.0, %v9065_v58 }
 0xd1d   :  { %9072 = vrcp.f32 %v5913_v27 }
 0xd22   :  { %v9067_v20 = vpop.eup %9066 }
 0xd23   :  { %v9069_v22 = vpop.eup %9068  ;;  %v5925_v41 = vadd.f32 1.0, %v9067_v20 }
 0xd24   :  { %v9071_v40 = vpop.eup %9070  ;;  %v5914_v0 = vadd.f32 1.0, %v9069_v22 }
 0xd25   :  { %v5926_v5 = vadd.f32 1.0, %v9071_v40  ;;  %9074 = vrcp.f32 %v5925_v41 }
 0xd26   :  { %9076 = vrcp.f32 %v5914_v0 }
 0xd2a   :  { %v9073_v17 = vpop.eup %9072 }
 0xd32   :  { %v9075_v27 = vpop.eup %9074 }
 0xd33   :  { %v9077_v40 = vpop.eup %9076  ;;  %v5945_v41 = vmul.f32 0.0, %v9075_v27 }
 0xd48   :  { %v5851_v54 = vpop.f32.mrf.mxu1  ;;  %v5892_v44 = vpop.f32.mrf.mxu0 }
 0xd49   :  { %v5903_v58 = vadd.f32 %v5851_v54, %v11786_v24  ;;  %v5905_v62 = vadd.f32 %v5892_v44, %v11788_v47 }
 0xd4a   :  { %v5853_v37 = vpop.f32.mrf.mxu1  ;;  %v5894_v20 = vpop.f32.mrf.mxu0 }
 0xd4b   :  { %9078 = vtanh.f32 %v5903_v58  ;;  %v8533_v48 = vmul.f32 -1.442695, %v5905_v62  ;;  %v5904_v43 = vadd.f32 %v5853_v37, %v11790_v63  ;;  %v5906_v50 = vadd.f32 %v5894_v20, %v11792_v3 }
 0xd4c   :  { %9080 = vrcp.f32 %v5926_v5  ;;  %v5855_v22 = vpop.f32.mrf.mxu1  ;;  %v5896_v31 = vpop.f32.mrf.mxu0 }
 0xd4d   :  { %9082 = vpow2.f32 %v8533_v48  ;;  %v8534_v60 = vmul.f32 -1.442695, %v5906_v50 }
 0xd4e   :  { %9084 = vtanh.f32 %v5904_v43  ;;  %v5856_v36 = vpop.f32.mrf.mxu1  ;;  %v5897_v53 = vpop.f32.mrf.mxu0 }
 0xd4f   :  { %9086 = vpow2.f32 %v8534_v60 }
 0xd58   :  { %v9079_v49 = vpop.eup %9078 }
 0xd59   :  { %v9081_v16 = vpop.eup %9080  ;;  %v5947_v0 = vmul.f32 %v9079_v49, %v9073_v17  ;;  %v14434_v49 = vld [vmem:[#allocation47_spill] sm:$0xff] }
 0xd5a   :  { %v9083_v54 = vpop.eup %9082  ;;  %v5946_v37 = vmul.f32 0.0, %v9081_v16  ;;  %v14435_v16 = vld [vmem:[#allocation48_spill] sm:$0xff] }
 0xd5b   :  { %v9085_v44 = vpop.eup %9084  ;;  %v11798_v58 = vadd.f32 %v5947_v0, %v5945_v41  ;;  %v5939_v5 = vadd.f32 1.0, %v9083_v54  ;;  %v14436_v41 = vld [vmem:[#allocation49_spill] sm:$0xff]  ;;  %v14437_v0 = vld [vmem:[#allocation50_spill] sm:$0xff]  ;;  %v14438_v54 = vld [vmem:[#allocation51_spill] sm:$0xff] }
 0xd5c   :  { %v9087_v62 = vpop.eup %9086  ;;  %v5948_v20 = vmul.f32 %v9085_v44, %v9077_v40  ;;  %v14433_v40 = vld [vmem:[#allocation46_spill] sm:$0xff]  ;;  %v14439_v44 = vld [vmem:[#allocation52_spill] sm:$0xff] }
 0xd5d   :  { %9088 = vtanh.f32 %v11798_v58  ;;  %v5940_v48 = vadd.f32 1.0, %v9087_v62  ;;  %v14441_v62 = vld [vmem:[#allocation54_spill] sm:$0xff] }
 0xd5e   :  { %9090 = vrcp.f32 %v5939_v5  ;;  %v11801_v43 = vadd.f32 %v5948_v20, %v5946_v37  ;;  %v14440_v5 = vld [vmem:[#allocation53_spill] sm:$0xff]  ;;  %v14442_v37 = vld [vmem:[#allocation55_spill] sm:$0xff]  ;;  %v14443_v20 = vld [vmem:[#allocation56_spill] sm:$0xff] }
 0xd5f   :  { %9092 = vrcp.f32 %v5940_v48  ;;  %v14444_v48 = vld [vmem:[#allocation57_spill] sm:$0xff] }
 0xd60   :  { %9094 = vtanh.f32 %v11801_v43 }
 0xd6a   :  { %v9089_v50 = vpop.eup %9088 }
 0xd6b   :  { %v9091_v22 = vpop.eup %9090 }
 0xd6c   :  { %v9093_v31 = vpop.eup %9092  ;;  %v5953_v36 = vmul.f32 %v9091_v22, %v9089_v50  ;;  %v14445_v50 = vld [vmem:[#allocation58_spill] sm:$0xff]  ;;  %v14446_v22 = vld [vmem:[#allocation59_spill] sm:$0xff] }
 0xd6d   :  { %v9095_v60 = vpop.eup %9094 }
 0xd6e   :  { %v5954_v53 = vmul.f32 %v9095_v60, %v9093_v31  ;;  %v11804_v27 = vpack.c.bf16 %v5953_v36, %v5953_v36  ;;  %v14447_v31 = vld [vmem:[#allocation60_spill] sm:$0xff]  ;;  %v14448_v60 = vld [vmem:[#allocation61_spill] sm:$0xff]  ;;  %v14449_v36 = vld [vmem:[#allocation62_spill] sm:$0xff] }
 0xd70   :  { %v5956_v17 = vpack.c.bf16 %v5954_v53, %v5954_v53  ;;  %v14450_v53 = vld [vmem:[#allocation63_spill] sm:$0xff] }
 0xd72   :  { %5989 = vmatprep.mubr.bf16.mxu1 %v5956_v17  ;;  %6030 = vmatprep.mubr.bf16.mxu0 %v5956_v17 }
 0xd73   :  { %5990 = vmatmul.mubr.bf16.vlgmr.msra.gmra.mxu1 %v11804_v27  ;;  %6031 = vmatmul.mubr.bf16.vlgmr.msra.gmra.mxu0 %v11804_v27 }
 0xd74   :  { %6040 = vmatpush1.bf16.msra.mxu1 %v14433_v40  ;;  %6081 = vmatpush1.bf16.msra.mxu0 %v14434_v49 }
 0xd75   :  { %6071 = vmatprep.mubr.bf16.mxu1 %v5956_v17  ;;  %6112 = vmatprep.mubr.bf16.mxu0 %v5956_v17  ;;  %v14451_v17 = vld [vmem:[#allocation64_spill] sm:$0xff] }
 0xd76   :  { %6041 = vmatprep.subr.bf16.mxu1 %v14435_v16  ;;  %6082 = vmatprep.subr.bf16.mxu0 %v14436_v41 }
 0xd78   :  { %6042 = vmatpush1.bf16.msra.mxu1 %v14437_v0  ;;  %6083 = vmatpush1.bf16.msra.mxu0 %v14438_v54 }
 0xd79   :  { %6043 = vmatprep.subr.bf16.mxu1 %v14439_v44  ;;  %6084 = vmatprep.subr.bf16.mxu0 %v14440_v5 }
 0xd7c   :  { %6044 = vmatpush1.bf16.msra.mxu1 %v14441_v62  ;;  %6085 = vmatpush1.bf16.msra.mxu0 %v14442_v37  ;;  %v14452_v62 = vld [vmem:[#allocation65_spill] sm:$0xff]  ;;  %v14453_v37 = vld [vmem:[#allocation66_spill] sm:$0xff] }
 0xd7d   :  { %6045 = vmatprep.subr.bf16.mxu1 %v14443_v20  ;;  %6086 = vmatprep.subr.bf16.mxu0 %v14444_v48  ;;  %v14454_v20 = vld [vmem:[#allocation67_spill] sm:$0xff]  ;;  %v14455_v48 = vld [vmem:[#allocation68_spill] sm:$0xff] }
 0xd80   :  { %6046 = vmatpush1.bf16.msra.mxu1 %v14445_v50  ;;  %6087 = vmatpush1.bf16.msra.mxu0 %v14446_v22  ;;  %v14456_v50 = vld [vmem:[#allocation69_spill] sm:$0xff]  ;;  %v14457_v22 = vld [vmem:[#allocation70_spill] sm:$0xff] }
 0xd81   :  { %6047 = vmatprep.subr.bf16.mxu1 %v14447_v31  ;;  %6088 = vmatprep.subr.bf16.mxu0 %v14448_v60  ;;  %v14458_v31 = vld [vmem:[#allocation71_spill] sm:$0xff]  ;;  %v14459_v60 = vld [vmem:[#allocation72_spill] sm:$0xff] }
 0xd84   :  { %6048 = vmatpush1.bf16.msra.mxu1 %v14449_v36  ;;  %6089 = vmatpush1.bf16.msra.mxu0 %v14450_v53  ;;  %v14460_v36 = vld [vmem:[#allocation73_spill] sm:$0xff]  ;;  %v14461_v53 = vld [vmem:[#allocation74_spill] sm:$0xff] }
 0xd85   :  { %6049 = vmatprep.subr.bf16.mxu1 %v14451_v17  ;;  %6090 = vmatprep.subr.bf16.mxu0 %v14452_v62  ;;  %v14462_v17 = vld [vmem:[#allocation75_spill] sm:$0xff]  ;;  %v14463_v62 = vld [vmem:[#allocation76_spill] sm:$0xff] }
 0xd88   :  { %6050 = vmatpush1.bf16.msra.mxu1 %v14453_v37  ;;  %6091 = vmatpush1.bf16.msra.mxu0 %v14454_v20  ;;  %v14464_v37 = vld [vmem:[#allocation77_spill] sm:$0xff]  ;;  %v14465_v20 = vld [vmem:[#allocation78_spill] sm:$0xff] }
 0xd89   :  { %6051 = vmatprep.subr.bf16.mxu1 %v14455_v48  ;;  %6092 = vmatprep.subr.bf16.mxu0 %v14456_v50  ;;  %v14466_v48 = vld [vmem:[#allocation79_spill] sm:$0xff]  ;;  %v14467_v50 = vld [vmem:[#allocation80_spill] sm:$0xff] }
 0xd8c   :  { %6052 = vmatpush1.bf16.msra.mxu1 %v14457_v22  ;;  %6093 = vmatpush1.bf16.msra.mxu0 %v14458_v31  ;;  %v14468_v22 = vld [vmem:[#allocation81_spill] sm:$0xff]  ;;  %v14469_v31 = vld [vmem:[#allocation82_spill] sm:$0xff] }
 0xd8d   :  { %6053 = vmatprep.subr.bf16.mxu1 %v14459_v60  ;;  %6094 = vmatprep.subr.bf16.mxu0 %v14460_v36  ;;  %v14470_v60 = vld [vmem:[#allocation116_spill] sm:$0xff]  ;;  %v14471_v36 = vld [vmem:[#allocation117_spill] sm:$0xff] }
 0xd90   :  { %6054 = vmatpush1.bf16.msra.mxu1 %v14461_v53  ;;  %6095 = vmatpush1.bf16.msra.mxu0 %v14462_v17  ;;  %v14472_v53 = vld [vmem:[#allocation118_spill] sm:$0xff]  ;;  %v14473_v17 = vld [vmem:[#allocation119_spill] sm:$0xff] }
 0xd91   :  { %6055 = vmatprep.subr.bf16.mxu1 %v14463_v62  ;;  %6096 = vmatprep.subr.bf16.mxu0 %v14464_v37  ;;  %v14474_v62 = vld [vmem:[#allocation120_spill] sm:$0xff]  ;;  %v14475_v37 = vld [vmem:[#allocation121_spill] sm:$0xff] }
 0xd94   :  { %6056 = vmatpush2.bf16.msra.mxu1 %v14465_v20  ;;  %6097 = vmatpush2.bf16.msra.mxu0 %v14466_v48  ;;  %v14476_v20 = vld [vmem:[#allocation122_spill] sm:$0xff]  ;;  %v14477_v48 = vld [vmem:[#allocation123_spill] sm:$0xff] }
 0xd95   :  { %6057 = vmatprep.subr.bf16.mxu1 %v14467_v50  ;;  %6098 = vmatprep.subr.bf16.mxu0 %v14468_v22  ;;  %v14478_v50 = vld [vmem:[#allocation124_spill] sm:$0xff]  ;;  %v14479_v22 = vld [vmem:[#allocation125_spill] sm:$0xff] }
 0xd98   :  { %6058 = vmatpush2.bf16.msra.mxu1 %v14469_v31  ;;  %6099 = vmatpush2.bf16.msra.mxu0 %v14470_v60  ;;  %v14480_v31 = vld [vmem:[#allocation126_spill] sm:$0xff] }
 0xd99   :  { %6059 = vmatprep.subr.bf16.mxu1 %v14471_v36  ;;  %6100 = vmatprep.subr.bf16.mxu0 %v14472_v53 }
 0xd9c   :  { %6060 = vmatpush2.bf16.msra.mxu1 %v14473_v17  ;;  %6101 = vmatpush2.bf16.msra.mxu0 %v14474_v62  ;;  %v14481_v17 = vld [vmem:[#allocation130_spill] sm:$0xff]  ;;  %v14482_v62 = vld [vmem:[#allocation131_spill] sm:$0xff] }
 0xd9d   :  { %6061 = vmatprep.subr.bf16.mxu1 %v14475_v37  ;;  %6102 = vmatprep.subr.bf16.mxu0 %v14476_v20 }
 0xda0   :  { %6062 = vmatpush2.bf16.msra.mxu1 %v14477_v48  ;;  %6103 = vmatpush2.bf16.msra.mxu0 %v14478_v50 }
 0xda1   :  { %6063 = vmatprep.subr.bf16.mxu1 %v14479_v22  ;;  %6104 = vmatprep.subr.bf16.mxu0 %v14480_v31 }
 0xda4   :  { %6064 = vmatpush2.bf16.msra.mxu1 %v11643_v7  ;;  %6105 = vmatpush2.bf16.msra.mxu0 %v11645_v6 }
 0xda5   :  { %6065 = vmatprep.subr.bf16.mxu1 %v11649_v2  ;;  %6106 = vmatprep.subr.bf16.mxu0 %v14481_v17 }
 0xda8   :  { %6066 = vmatpush2.bf16.msra.mxu1 %v14482_v62  ;;  %6107 = vmatpush2.bf16.msra.mxu0 %v11657_v33 }
 0xda9   :  { %6067 = vmatprep.subr.bf16.mxu1 %v11661_v19  ;;  %6108 = vmatprep.subr.bf16.mxu0 %v11663_v15 }
 0xdac   :  { %6068 = vmatpush2.bf16.msra.mxu1 %v11667_v39  ;;  %6109 = vmatpush2.bf16.msra.mxu0 %v11669_v38 }
 0xdad   :  { %6069 = vmatprep.subr.bf16.mxu1 %v11673_v11  ;;  %6110 = vmatprep.subr.bf16.mxu0 %v11675_v14 }
 0xdb0   :  { %6070 = vmatpush2.bf16.msra.mxu1 %v11679_v8  ;;  %6111 = vmatpush2.bf16.msra.mxu0 %v11681_v21 }
 0xdb1   :  { %6217 = vmatprep.subr.bf16.mxu1 %v11295_v57  ;;  %6258 = vmatprep.subr.bf16.mxu0 %v11297_v10 }
 0xdb3   :  { %6072 = vmatmul.mubr.bf16.vlgmr.msra.gmra.mxu1 %v11804_v27  ;;  %6113 = vmatmul.mubr.bf16.vlgmr.msra.gmra.mxu0 %v11804_v27  ;;  %v14483_v27 = vld [vmem:[#allocation97_spill] sm:$0xff] }
 0xdb4   :  { %6218 = vmatpush1.bf16.msra.mxu1 %v11299_v18  ;;  %6259 = vmatpush1.bf16.msra.mxu0 %v11301_v12 }
 0xdb5   :  { %6219 = vmatprep.subr.bf16.mxu1 %v11305_v9  ;;  %6260 = vmatprep.subr.bf16.mxu0 %v11307_v55 }
 0xdb8   :  { %6220 = vmatpush1.bf16.msra.mxu1 %v11313_v52  ;;  %6261 = vmatpush1.bf16.msra.mxu0 %v11315_v26  ;;  %v14526_v52 = vld [vmem:[#allocation141_spill] sm:$0xff] }
 0xdb9   :  { %6221 = vmatprep.subr.bf16.mxu1 %v11319_v56  ;;  %6262 = vmatprep.subr.bf16.mxu0 %v11321_v1 }
 0xdbc   :  { %6222 = vmatpush1.bf16.msra.mxu1 %v11327_v42  ;;  %6263 = vmatpush1.bf16.msra.mxu0 %v11329_v61 }
 0xdbd   :  { %6223 = vmatprep.subr.bf16.mxu1 %v11333_v23  ;;  %6264 = vmatprep.subr.bf16.mxu0 %v11335_v34  ;;  %v14484_v34 = vld [vmem:[#allocation98_spill] sm:$0xff] }
 0xdc0   :  { %6224 = vmatpush1.bf16.msra.mxu1 %v11339_v51  ;;  %6265 = vmatpush1.bf16.msra.mxu0 %v11341_v13  ;;  %v14485_v51 = vld [vmem:[#allocation99_spill] sm:$0xff]  ;;  %v14486_v13 = vld [vmem:[#allocation100_spill] sm:$0xff] }
 0xdc1   :  { %6225 = vmatprep.subr.bf16.mxu1 %v11345_v30  ;;  %6266 = vmatprep.subr.bf16.mxu0 %v11347_v45  ;;  %v14487_v30 = vld [vmem:[#allocation101_spill] sm:$0xff]  ;;  %v14488_v45 = vld [vmem:[#allocation102_spill] sm:$0xff] }
 0xdc4   :  { %6226 = vmatpush1.bf16.msra.mxu1 %v11351_v29  ;;  %6267 = vmatpush1.bf16.msra.mxu0 %v11353_v35  ;;  %v14489_v29 = vld [vmem:[#allocation103_spill] sm:$0xff]  ;;  %v14490_v35 = vld [vmem:[#allocation104_spill] sm:$0xff] }
 0xdc5   :  { %6227 = vmatprep.subr.bf16.mxu1 %v11357_v28  ;;  %6268 = vmatprep.subr.bf16.mxu0 %v11359_v4  ;;  %v14491_v28 = vld [vmem:[#allocation105_spill] sm:$0xff]  ;;  %v14492_v4 = vld [vmem:[#allocation106_spill] sm:$0xff] }
 0xdc8   :  { %6228 = vmatpush1.bf16.msra.mxu1 %v11363_v59  ;;  %6269 = vmatpush1.bf16.msra.mxu0 %v14483_v27  ;;  %v14493_v59 = vld [vmem:[#allocation107_spill] sm:$0xff]  ;;  %v14494_v27 = vld [vmem:[#allocation108_spill] sm:$0xff] }
 0xdc9   :  { %6229 = vmatprep.subr.bf16.mxu1 %v14484_v34  ;;  %6270 = vmatprep.subr.bf16.mxu0 %v14485_v51  ;;  %v14495_v34 = vld [vmem:[#allocation112_spill] sm:$0xff]  ;;  %v14496_v51 = vld [vmem:[#allocation113_spill] sm:$0xff] }
 0xdcc   :  { %6230 = vmatpush1.bf16.msra.mxu1 %v14486_v13  ;;  %6271 = vmatpush1.bf16.msra.mxu0 %v14487_v30  ;;  %v14497_v13 = vld [vmem:[#allocation17_spill] sm:$0xff]  ;;  %v14498_v30 = vld [vmem:[#allocation18_spill] sm:$0xff] }
 0xdcd   :  { %6231 = vmatprep.subr.bf16.mxu1 %v14488_v45  ;;  %6272 = vmatprep.subr.bf16.mxu0 %v14489_v29  ;;  %v14499_v45 = vld [vmem:[#allocation19_spill] sm:$0xff]  ;;  %v14500_v29 = vld [vmem:[#allocation20_spill] sm:$0xff] }
 0xdd0   :  { %6232 = vmatpush1.bf16.msra.mxu1 %v14490_v35  ;;  %6273 = vmatpush1.bf16.msra.mxu0 %v14491_v28  ;;  %v14501_v35 = vld [vmem:[#allocation21_spill] sm:$0xff]  ;;  %v14502_v28 = vld [vmem:[#allocation22_spill] sm:$0xff] }
 0xdd1   :  { %6233 = vmatprep.subr.bf16.mxu1 %v14492_v4  ;;  %6274 = vmatprep.subr.bf16.mxu0 %v14493_v59  ;;  %v14503_v4 = vld [vmem:[#allocation23_spill] sm:$0xff]  ;;  %v14504_v59 = vld [vmem:[#allocation24_spill] sm:$0xff] }
 0xdd4   :  { %6234 = vmatpush2.bf16.msra.mxu1 %v14494_v27  ;;  %6275 = vmatpush2.bf16.msra.mxu0 %v14495_v34  ;;  %v14505_v27 = vld [vmem:[#allocation25_spill] sm:$0xff]  ;;  %v14506_v34 = vld [vmem:[#allocation26_spill] sm:$0xff] }
 0xdd5   :  { %6235 = vmatprep.subr.bf16.mxu1 %v14496_v51  ;;  %6276 = vmatprep.subr.bf16.mxu0 %v14497_v13  ;;  %v14507_v51 = vld [vmem:[#allocation27_spill] sm:$0xff]  ;;  %v14508_v13 = vld [vmem:[#allocation28_spill] sm:$0xff] }
 0xdd8   :  { %6236 = vmatpush2.bf16.msra.mxu1 %v14498_v30  ;;  %6277 = vmatpush2.bf16.msra.mxu0 %v14499_v45  ;;  %v14509_v30 = vld [vmem:[#allocation29_spill] sm:$0xff]  ;;  %v14510_v45 = vld [vmem:[#allocation30_spill] sm:$0xff] }
 0xdd9   :  { %6237 = vmatprep.subr.bf16.mxu1 %v14500_v29  ;;  %6278 = vmatprep.subr.bf16.mxu0 %v14501_v35  ;;  %v14511_v29 = vld [vmem:[#allocation31_spill] sm:$0xff]  ;;  %v14512_v35 = vld [vmem:[#allocation32_spill] sm:$0xff] }
 0xddc   :  { %6238 = vmatpush2.bf16.msra.mxu1 %v14502_v28  ;;  %6279 = vmatpush2.bf16.msra.mxu0 %v14503_v4  ;;  %v14513_v28 = vld [vmem:[#allocation33_spill] sm:$0xff]  ;;  %v14514_v4 = vld [vmem:[#allocation34_spill] sm:$0xff] }
 0xddd   :  { %6239 = vmatprep.subr.bf16.mxu1 %v14504_v59  ;;  %6280 = vmatprep.subr.bf16.mxu0 %v14505_v27  ;;  %v14515_v59 = vld [vmem:[#allocation35_spill] sm:$0xff]  ;;  %v14516_v27 = vld [vmem:[#allocation36_spill] sm:$0xff] }
 0xde0   :  { %6240 = vmatpush2.bf16.msra.mxu1 %v14506_v34  ;;  %6281 = vmatpush2.bf16.msra.mxu0 %v14507_v51  ;;  %v14517_v34 = vld [vmem:[#allocation37_spill] sm:$0xff]  ;;  %v14518_v51 = vld [vmem:[#allocation38_spill] sm:$0xff] }
 0xde1   :  { %6241 = vmatprep.subr.bf16.mxu1 %v14508_v13  ;;  %6282 = vmatprep.subr.bf16.mxu0 %v14509_v30  ;;  %v14519_v13 = vld [vmem:[#allocation39_spill] sm:$0xff]  ;;  %v14520_v30 = vld [vmem:[#allocation40_spill] sm:$0xff] }
 0xde4   :  { %6242 = vmatpush2.bf16.msra.mxu1 %v14510_v45  ;;  %6283 = vmatpush2.bf16.msra.mxu0 %v14511_v29  ;;  %v14521_v45 = vld [vmem:[#allocation41_spill] sm:$0xff]  ;;  %v14522_v29 = vld [vmem:[#allocation42_spill] sm:$0xff] }
 0xde5   :  { %6243 = vmatprep.subr.bf16.mxu1 %v14512_v35  ;;  %6284 = vmatprep.subr.bf16.mxu0 %v14513_v28  ;;  %v14523_v35 = vld [vmem:[#allocation43_spill] sm:$0xff]  ;;  %v14524_v28 = vld [vmem:[#allocation44_spill] sm:$0xff] }
 0xde8   :  { %6244 = vmatpush2.bf16.msra.mxu1 %v14514_v4  ;;  %6285 = vmatpush2.bf16.msra.mxu0 %v14515_v59  ;;  %v14525_v4 = vld [vmem:[#allocation45_spill] sm:$0xff] }
 0xde9   :  { %6245 = vmatprep.subr.bf16.mxu1 %v14516_v27  ;;  %6286 = vmatprep.subr.bf16.mxu0 %v14517_v34 }
 0xdec   :  { %6246 = vmatpush2.bf16.msra.mxu1 %v14518_v51  ;;  %6287 = vmatpush2.bf16.msra.mxu0 %v14519_v13 }
 0xded   :  { %6247 = vmatprep.subr.bf16.mxu1 %v14520_v30  ;;  %6288 = vmatprep.subr.bf16.mxu0 %v14521_v45 }
 0xdf0   :  { %6248 = vmatpush2.bf16.msra.mxu1 %v14522_v29  ;;  %6289 = vmatpush2.bf16.msra.mxu0 %v14523_v35 }
 0xdf1   :  { %6299 = vmatprep.subr.bf16.mxu1 %v14524_v28  ;;  %6340 = vmatprep.subr.bf16.mxu0 %v14525_v4 }
 0xe33   :  { %v5991_v59 = vpop.f32.mrf.mxu1  ;;  %v6032_v27 = vpop.f32.mrf.mxu0 }
 0xe34   :  { %v6129_v1 = vrot.slane %v5991_v59, 7  ;;  %v6131_v30 = vrot.slane %v6032_v27, 7 }
 0xe35   :  { %v5993_v23 = vpop.f32.mrf.mxu1  ;;  %v6034_v34 = vpop.f32.mrf.mxu0 }
 0xe36   :  { %v6130_v56 = vrot.slane %v5993_v23, 7  ;;  %v6145_v45 = vadd.f32 %v6129_v1, %v11764_v25  ;;  %v6147_v29 = vadd.f32 %v6131_v30, %v11768_v32  ;;  %v6132_v35 = vrot.slane %v6034_v34, 7 }
 0xe37   :  { %v5995_v61 = vpop.f32.mrf.mxu1  ;;  %v6036_v51 = vpop.f32.mrf.mxu0 }
 0xe38   :  { %v6146_v28 = vadd.f32 %v6130_v56, %v11770_v46  ;;  %v8535_v26 = vmul.f32 -1.442695, %v6145_v45  ;;  %v8537_v4 = vmul.f32 -1.442695, %v6147_v29  ;;  %v6148_v55 = vadd.f32 %v6132_v35, %v14526_v52 }
 0xe39   :  { %v5996_v42 = vpop.f32.mrf.mxu1  ;;  %v6037_v13 = vpop.f32.mrf.mxu0 }
 0xe3a   :  { %v8536_v9 = vmul.f32 -1.442695, %v6146_v28  ;;  %9096 = vpow2.f32 %v8535_v26  ;;  %v8538_v61 = vmul.f32 -1.442695, %v6148_v55 }
 0xe3b   :  { %9098 = vpow2.f32 %v8537_v4 }
 0xe3c   :  { %9100 = vpow2.f32 %v8536_v9 }
 0xe3d   :  { %9102 = vpow2.f32 %v8538_v61 }
 0xe47   :  { %v9097_v42 = vpop.eup %9096 }
 0xe48   :  { %v9099_v51 = vpop.eup %9098  ;;  %v6159_v13 = vadd.f32 1.0, %v9097_v42 }
 0xe49   :  { %v9101_v23 = vpop.eup %9100  ;;  %v6171_v1 = vadd.f32 1.0, %v9099_v51 }
 0xe4a   :  { %v9103_v59 = vpop.eup %9102  ;;  %v6160_v30 = vadd.f32 1.0, %v9101_v23  ;;  %9104 = vrcp.f32 %v6159_v13 }
 0xe4b   :  { %9106 = vrcp.f32 %v6171_v1  ;;  %v6172_v29 = vadd.f32 1.0, %v9103_v59 }
 0xe4c   :  { %9108 = vrcp.f32 %v6160_v30  ;;  %v6193_v30 = vrot.slane %v11798_v58, 7 }
 0xe73   :  { %v6073_v34 = vpop.f32.mrf.mxu1  ;;  %v6114_v27 = vpop.f32.mrf.mxu0 }
 0xe74   :  { %v6133_v56 = vrot.slane %v6073_v34, 7  ;;  %v6135_v45 = vrot.slane %v6114_v27, 7  ;;  %v9105_v27 = vpop.eup %9104 }
 0xe75   :  { %v6075_v35 = vpop.f32.mrf.mxu1  ;;  %v6116_v26 = vpop.f32.mrf.mxu0 }
 0xe76   :  { %v6149_v55 = vadd.f32 %v6133_v56, %v11786_v24  ;;  %v6151_v9 = vadd.f32 %v6135_v45, %v11788_v47  ;;  %v6134_v28 = vrot.slane %v6075_v35, 7  ;;  %v6136_v4 = vrot.slane %v6116_v26, 7  ;;  %v9107_v56 = vpop.eup %9106 }
 0xe77   :  { %v6077_v61 = vpop.f32.mrf.mxu1  ;;  %v6118_v42 = vpop.f32.mrf.mxu0 }
 0xe78   :  { %9110 = vtanh.f32 %v6149_v55  ;;  %v8539_v51 = vmul.f32 -1.442695, %v6151_v9  ;;  %v6150_v23 = vadd.f32 %v6134_v28, %v11790_v63  ;;  %v6152_v13 = vadd.f32 %v6136_v4, %v11792_v3  ;;  %v9109_v45 = vpop.eup %9108 }
 0xe79   :  { %9112 = vrcp.f32 %v6172_v29  ;;  %v6078_v1 = vpop.f32.mrf.mxu1  ;;  %v6119_v59 = vpop.f32.mrf.mxu0  ;;  %v6197_v55 = vmul.f32 %v9107_v56, %v6193_v30  ;;  %v6194_v28 = vrot.slane %v11801_v43, 7 }
 0xe7a   :  { %9114 = vpow2.f32 %v8539_v51  ;;  %v8540_v34 = vmul.f32 -1.442695, %v6152_v13 }
 0xe7b   :  { %9116 = vtanh.f32 %v6150_v23 }
 0xe7c   :  { %9118 = vpow2.f32 %v8540_v34 }
 0xe85   :  { %v9111_v35 = vpop.eup %9110 }
 0xe86   :  { %v9113_v26 = vpop.eup %9112  ;;  %v6199_v9 = vmul.f32 %v9111_v35, %v9105_v27 }
 0xe87   :  { %v9115_v61 = vpop.eup %9114  ;;  %v6198_v13 = vmul.f32 %v9113_v26, %v6194_v28  ;;  %v14529_v28 = vld [vmem:[#allocation56_spill] sm:$0xff] }
 0xe88   :  { %v9117_v4 = vpop.eup %9116  ;;  %v11948_v29 = vadd.f32 %v6199_v9, %v6197_v55  ;;  %v6185_v42 = vadd.f32 1.0, %v9115_v61  ;;  %v14528_v61 = vld [vmem:[#allocation55_spill] sm:$0xff] }
 0xe89   :  { %v9119_v51 = vpop.eup %9118  ;;  %v6200_v23 = vmul.f32 %v9117_v4, %v9109_v45  ;;  %v14527_v45 = vld [vmem:[#allocation54_spill] sm:$0xff]  ;;  %v14530_v4 = vld [vmem:[#allocation57_spill] sm:$0xff] }
 0xe8a   :  { %9120 = vtanh.f32 %v11948_v29  ;;  %v6186_v1 = vadd.f32 1.0, %v9119_v51  ;;  %v14532_v51 = vld [vmem:[#allocation59_spill] sm:$0xff] }
 0xe8b   :  { %9122 = vrcp.f32 %v6185_v42  ;;  %v11951_v59 = vadd.f32 %v6200_v23, %v6198_v13  ;;  %v14531_v42 = vld [vmem:[#allocation58_spill] sm:$0xff]  ;;  %v14533_v13 = vld [vmem:[#allocation60_spill] sm:$0xff]  ;;  %v14534_v23 = vld [vmem:[#allocation61_spill] sm:$0xff] }
 0xe8c   :  { %9124 = vrcp.f32 %v6186_v1  ;;  %v14535_v1 = vld [vmem:[#allocation62_spill] sm:$0xff] }
 0xe8d   :  { %9126 = vtanh.f32 %v11951_v59 }
 0xe97   :  { %v9121_v58 = vpop.eup %9120 }
 0xe98   :  { %v9123_v34 = vpop.eup %9122 }
 0xe99   :  { %v9125_v27 = vpop.eup %9124  ;;  %v6205_v43 = vmul.f32 %v9123_v34, %v9121_v58  ;;  %v14536_v58 = vld [vmem:[#allocation63_spill] sm:$0xff]  ;;  %v14537_v34 = vld [vmem:[#allocation64_spill] sm:$0xff] }
 0xe9a   :  { %v9127_v56 = vpop.eup %9126 }
 0xe9b   :  { %v6206_v30 = vmul.f32 %v9127_v56, %v9125_v27  ;;  %v6207_v35 = vpack.c.bf16 %v6205_v43, %v6205_v43  ;;  %v14538_v27 = vld [vmem:[#allocation65_spill] sm:$0xff]  ;;  %v14539_v43 = vld [vmem:[#allocation66_spill] sm:$0xff]  ;;  %v14540_v56 = vld [vmem:[#allocation67_spill] sm:$0xff] }
 0xe9d   :  { %v6208_v55 = vpack.c.bf16 %v6206_v30, %v6206_v30  ;;  %v11954_v26 = vshrl.u32 %v6207_v35, 16  ;;  %v14541_v30 = vld [vmem:[#allocation68_spill] sm:$0xff]  ;;  %v14542_v35 = vld [vmem:[#allocation69_spill] sm:$0xff] }
 0xe9f   :  { %v6213_v9 = vshrl.u32 %v6208_v55, 16  ;;  %v14543_v55 = vld [vmem:[#allocation70_spill] sm:$0xff] }
 0xea1   :  { %6249 = vmatprep.mubr.bf16.mxu1 %v6213_v9  ;;  %6290 = vmatprep.mubr.bf16.mxu0 %v6213_v9 }
 0xea2   :  { %6250 = vmatmul.mubr.bf16.vlgmr.msra.gmra.mxu1 %v11954_v26  ;;  %6291 = vmatmul.mubr.bf16.vlgmr.msra.gmra.mxu0 %v11954_v26 }
 0xea3   :  { %6300 = vmatpush1.bf16.msra.mxu1 %v14433_v40  ;;  %6341 = vmatpush1.bf16.msra.mxu0 %v14434_v49 }
 0xea4   :  { %6331 = vmatprep.mubr.bf16.mxu1 %v6213_v9  ;;  %6372 = vmatprep.mubr.bf16.mxu0 %v6213_v9  ;;  %v14544_v9 = vld [vmem:[#allocation71_spill] sm:$0xff] }
 0xea5   :  { %6301 = vmatprep.subr.bf16.mxu1 %v14435_v16  ;;  %6342 = vmatprep.subr.bf16.mxu0 %v14436_v41 }
 0xea7   :  { %6302 = vmatpush1.bf16.msra.mxu1 %v14437_v0  ;;  %6343 = vmatpush1.bf16.msra.mxu0 %v14438_v54 }
 0xea8   :  { %6303 = vmatprep.subr.bf16.mxu1 %v14439_v44  ;;  %6344 = vmatprep.subr.bf16.mxu0 %v14440_v5 }
 0xeab   :  { %6304 = vmatpush1.bf16.msra.mxu1 %v14527_v45  ;;  %6345 = vmatpush1.bf16.msra.mxu0 %v14528_v61 }
 0xeac   :  { %6305 = vmatprep.subr.bf16.mxu1 %v14529_v28  ;;  %6346 = vmatprep.subr.bf16.mxu0 %v14530_v4 }
 0xeaf   :  { %6306 = vmatpush1.bf16.msra.mxu1 %v14531_v42  ;;  %6347 = vmatpush1.bf16.msra.mxu0 %v14532_v51 }
 0xeb0   :  { %6307 = vmatprep.subr.bf16.mxu1 %v14533_v13  ;;  %6348 = vmatprep.subr.bf16.mxu0 %v14534_v23  ;;  %v14545_v23 = vld [vmem:[#allocation72_spill] sm:$0xff] }
 0xeb3   :  { %6308 = vmatpush1.bf16.msra.mxu1 %v14535_v1  ;;  %6349 = vmatpush1.bf16.msra.mxu0 %v14536_v58  ;;  %v14546_v1 = vld [vmem:[#allocation73_spill] sm:$0xff]  ;;  %v14547_v58 = vld [vmem:[#allocation74_spill] sm:$0xff] }
 0xeb4   :  { %6309 = vmatprep.subr.bf16.mxu1 %v14537_v34  ;;  %6350 = vmatprep.subr.bf16.mxu0 %v14538_v27  ;;  %v14548_v34 = vld [vmem:[#allocation75_spill] sm:$0xff]  ;;  %v14549_v27 = vld [vmem:[#allocation76_spill] sm:$0xff] }
 0xeb7   :  { %6310 = vmatpush1.bf16.msra.mxu1 %v14539_v43  ;;  %6351 = vmatpush1.bf16.msra.mxu0 %v14540_v56  ;;  %v14550_v43 = vld [vmem:[#allocation77_spill] sm:$0xff]  ;;  %v14551_v56 = vld [vmem:[#allocation78_spill] sm:$0xff] }
 0xeb8   :  { %6311 = vmatprep.subr.bf16.mxu1 %v14541_v30  ;;  %6352 = vmatprep.subr.bf16.mxu0 %v14542_v35  ;;  %v14552_v30 = vld [vmem:[#allocation79_spill] sm:$0xff]  ;;  %v14553_v35 = vld [vmem:[#allocation80_spill] sm:$0xff] }
 0xebb   :  { %6312 = vmatpush1.bf16.msra.mxu1 %v14543_v55  ;;  %6353 = vmatpush1.bf16.msra.mxu0 %v14544_v9  ;;  %v14554_v55 = vld [vmem:[#allocation81_spill] sm:$0xff]  ;;  %v14555_v9 = vld [vmem:[#allocation82_spill] sm:$0xff] }
 0xebc   :  { %6313 = vmatprep.subr.bf16.mxu1 %v14545_v23  ;;  %6354 = vmatprep.subr.bf16.mxu0 %v14546_v1 }
 0xebf   :  { %6314 = vmatpush1.bf16.msra.mxu1 %v14547_v58  ;;  %6355 = vmatpush1.bf16.msra.mxu0 %v14548_v34  ;;  %v14556_v34 = vld [vmem:[#allocation119_spill] sm:$0xff] }
 0xec0   :  { %6315 = vmatprep.subr.bf16.mxu1 %v14549_v27  ;;  %6356 = vmatprep.subr.bf16.mxu0 %v14550_v43  ;;  %v14557_v27 = vld [vmem:[#allocation120_spill] sm:$0xff] }
 0xec3   :  { %6316 = vmatpush2.bf16.msra.mxu1 %v14551_v56  ;;  %6357 = vmatpush2.bf16.msra.mxu0 %v14552_v30 }
 0xec4   :  { %6317 = vmatprep.subr.bf16.mxu1 %v14553_v35  ;;  %6358 = vmatprep.subr.bf16.mxu0 %v14554_v55 }
 0xec7   :  { %6318 = vmatpush2.bf16.msra.mxu1 %v14555_v9  ;;  %6359 = vmatpush2.bf16.msra.mxu0 %v14470_v60 }
 0xec8   :  { %6319 = vmatprep.subr.bf16.mxu1 %v14471_v36  ;;  %6360 = vmatprep.subr.bf16.mxu0 %v14472_v53 }
 0xecb   :  { %6320 = vmatpush2.bf16.msra.mxu1 %v14556_v34  ;;  %6361 = vmatpush2.bf16.msra.mxu0 %v14557_v27 }
 0xecc   :  { %6321 = vmatprep.subr.bf16.mxu1 %v14475_v37  ;;  %6362 = vmatprep.subr.bf16.mxu0 %v14476_v20 }
 0xecf   :  { %6322 = vmatpush2.bf16.msra.mxu1 %v14477_v48  ;;  %6363 = vmatpush2.bf16.msra.mxu0 %v14478_v50 }
 0xed0   :  { %6323 = vmatprep.subr.bf16.mxu1 %v14479_v22  ;;  %6364 = vmatprep.subr.bf16.mxu0 %v14480_v31 }
 0xed3   :  { %6324 = vmatpush2.bf16.msra.mxu1 %v11643_v7  ;;  %6365 = vmatpush2.bf16.msra.mxu0 %v11645_v6 }
 0xed4   :  { %6325 = vmatprep.subr.bf16.mxu1 %v11649_v2  ;;  %6366 = vmatprep.subr.bf16.mxu0 %v14481_v17 }
 0xed7   :  { %6326 = vmatpush2.bf16.msra.mxu1 %v14482_v62  ;;  %6367 = vmatpush2.bf16.msra.mxu0 %v11657_v33 }
 0xed8   :  { %6327 = vmatprep.subr.bf16.mxu1 %v11661_v19  ;;  %6368 = vmatprep.subr.bf16.mxu0 %v11663_v15 }
 0xedb   :  { %6328 = vmatpush2.bf16.msra.mxu1 %v11667_v39  ;;  %6369 = vmatpush2.bf16.msra.mxu0 %v11669_v38  ;;  %v14558_v38 = vld [vmem:[#allocation88_spill] sm:$0xff] }
 0xedc   :  { %6329 = vmatprep.subr.bf16.mxu1 %v11673_v11  ;;  %6370 = vmatprep.subr.bf16.mxu0 %v11675_v14  ;;  %v14559_v11 = vld [vmem:[#allocation89_spill] sm:$0xff]  ;;  %v14560_v14 = vld [vmem:[#allocation90_spill] sm:$0xff]  ;;  %v14565_v39 = vld [vmem:[#allocation92_spill] sm:$0xff] }
 0xedf   :  { %6330 = vmatpush2.bf16.msra.mxu1 %v11679_v8  ;;  %6371 = vmatpush2.bf16.msra.mxu0 %v11681_v21  ;;  %v14561_v8 = vld [vmem:[#allocation146_spill] sm:$0xff]  ;;  %v14562_v21 = vld [vmem:[#allocation147_spill] sm:$0xff] }
 0xee0   :  { %6475 = vmatprep.subr.bf16.mxu1 %v11295_v57  ;;  %6516 = vmatprep.subr.bf16.mxu0 %v11297_v10  ;;  %v14563_v57 = vld [vmem:[#allocation148_spill] sm:$0xff]  ;;  %v14564_v10 = vld [vmem:[#allocation91_spill] sm:$0xff] }
 0xee2   :  { %6332 = vmatmul.mubr.bf16.vlgmr.msra.gmra.mxu1 %v11954_v26  ;;  %6373 = vmatmul.mubr.bf16.vlgmr.msra.gmra.mxu0 %v11954_v26  ;;  %v14566_v26 = vld [vmem:[#allocation93_spill] sm:$0xff] }
 0xee3   :  { %6476 = vmatpush1.bf16.msra.mxu1 %v11299_v18  ;;  %6517 = vmatpush1.bf16.msra.mxu0 %v11301_v12  ;;  %v14567_v18 = vld [vmem:[#allocation94_spill] sm:$0xff]  ;;  %v14568_v12 = vld [vmem:[#allocation95_spill] sm:$0xff] }
 0xee4   :  { %6477 = vmatprep.subr.bf16.mxu1 %v14558_v38  ;;  %6518 = vmatprep.subr.bf16.mxu0 %v14559_v11  ;;  %v14569_v38 = vld [vmem:[#allocation109_spill] sm:$0xff]  ;;  %v14570_v11 = vld [vmem:[#allocation110_spill] sm:$0xff] }
 0xee7   :  { %6478 = vmatpush1.bf16.msra.mxu1 %v14560_v14  ;;  %6519 = vmatpush1.bf16.msra.mxu0 %v14561_v8  ;;  %v14571_v14 = vld [vmem:[#allocation111_spill] sm:$0xff]  ;;  %v14572_v8 = vld [vmem:[#allocation114_spill] sm:$0xff] }
 0xee8   :  { %6479 = vmatprep.subr.bf16.mxu1 %v14562_v21  ;;  %6520 = vmatprep.subr.bf16.mxu0 %v14563_v57  ;;  %v14573_v21 = vld [vmem:[#allocation115_spill] sm:$0xff]  ;;  %v14574_v57 = vld [vmem:[#allocation149_spill] sm:$0xff] }
 0xeeb   :  { %6480 = vmatpush1.bf16.msra.mxu1 %v14564_v10  ;;  %6521 = vmatpush1.bf16.msra.mxu0 %v14565_v39  ;;  %v14575_v10 = vld [vmem:[#allocation150_spill] sm:$0xff]  ;;  %v14576_v39 = vld [vmem:[#allocation96_spill] sm:$0xff] }
 0xeec   :  { %6481 = vmatprep.subr.bf16.mxu1 %v14566_v26  ;;  %6522 = vmatprep.subr.bf16.mxu0 %v14567_v18  ;;  %v14577_v26 = vld [vmem:[#allocation97_spill] sm:$0xff]  ;;  %v14578_v18 = vld [vmem:[#allocation98_spill] sm:$0xff] }
 0xeef   :  { %6482 = vmatpush1.bf16.msra.mxu1 %v14568_v12  ;;  %6523 = vmatpush1.bf16.msra.mxu0 %v14569_v38  ;;  %v14579_v12 = vld [vmem:[#allocation99_spill] sm:$0xff]  ;;  %v14580_v38 = vld [vmem:[#allocation100_spill] sm:$0xff] }
 0xef0   :  { %6483 = vmatprep.subr.bf16.mxu1 %v14570_v11  ;;  %6524 = vmatprep.subr.bf16.mxu0 %v14571_v14  ;;  %v14581_v11 = vld [vmem:[#allocation101_spill] sm:$0xff]  ;;  %v14582_v14 = vld [vmem:[#allocation102_spill] sm:$0xff] }
 0xef3   :  { %6484 = vmatpush1.bf16.msra.mxu1 %v14572_v8  ;;  %6525 = vmatpush1.bf16.msra.mxu0 %v14573_v21  ;;  %v14583_v8 = vld [vmem:[#allocation103_spill] sm:$0xff]  ;;  %v14584_v21 = vld [vmem:[#allocation104_spill] sm:$0xff] }
 0xef4   :  { %6485 = vmatprep.subr.bf16.mxu1 %v14574_v57  ;;  %6526 = vmatprep.subr.bf16.mxu0 %v14575_v10  ;;  %v14585_v57 = vld [vmem:[#allocation105_spill] sm:$0xff]  ;;  %v14586_v10 = vld [vmem:[#allocation106_spill] sm:$0xff] }
 0xef7   :  { %6486 = vmatpush1.bf16.msra.mxu1 %v14576_v39  ;;  %6527 = vmatpush1.bf16.msra.mxu0 %v14577_v26  ;;  %v14587_v39 = vld [vmem:[#allocation107_spill] sm:$0xff]  ;;  %v14588_v26 = vld [vmem:[#allocation108_spill] sm:$0xff] }
 0xef8   :  { %6487 = vmatprep.subr.bf16.mxu1 %v14578_v18  ;;  %6528 = vmatprep.subr.bf16.mxu0 %v14579_v12  ;;  %v14589_v18 = vld [vmem:[#allocation112_spill] sm:$0xff]  ;;  %v14590_v12 = vld [vmem:[#allocation113_spill] sm:$0xff] }
 0xefb   :  { %6488 = vmatpush1.bf16.msra.mxu1 %v14580_v38  ;;  %6529 = vmatpush1.bf16.msra.mxu0 %v14581_v11  ;;  %v14591_v38 = vld [vmem:[#allocation17_spill] sm:$0xff]  ;;  %v14592_v11 = vld [vmem:[#allocation18_spill] sm:$0xff] }
 0xefc   :  { %6489 = vmatprep.subr.bf16.mxu1 %v14582_v14  ;;  %6530 = vmatprep.subr.bf16.mxu0 %v14583_v8  ;;  %v14593_v14 = vld [vmem:[#allocation19_spill] sm:$0xff]  ;;  %v14594_v8 = vld [vmem:[#allocation20_spill] sm:$0xff] }
 0xeff   :  { %6490 = vmatpush1.bf16.msra.mxu1 %v14584_v21  ;;  %6531 = vmatpush1.bf16.msra.mxu0 %v14585_v57  ;;  %v14595_v21 = vld [vmem:[#allocation21_spill] sm:$0xff]  ;;  %v14596_v57 = vld [vmem:[#allocation22_spill] sm:$0xff] }
 0xf00   :  { %6491 = vmatprep.subr.bf16.mxu1 %v14586_v10  ;;  %6532 = vmatprep.subr.bf16.mxu0 %v14587_v39  ;;  %v14597_v10 = vld [vmem:[#allocation23_spill] sm:$0xff]  ;;  %v14598_v39 = vld [vmem:[#allocation24_spill] sm:$0xff] }
 0xf03   :  { %6492 = vmatpush2.bf16.msra.mxu1 %v14588_v26  ;;  %6533 = vmatpush2.bf16.msra.mxu0 %v14589_v18  ;;  %v14599_v26 = vld [vmem:[#allocation25_spill] sm:$0xff]  ;;  %v14600_v18 = vld [vmem:[#allocation26_spill] sm:$0xff] }
 0xf04   :  { %6493 = vmatprep.subr.bf16.mxu1 %v14590_v12  ;;  %6534 = vmatprep.subr.bf16.mxu0 %v14591_v38  ;;  %v14601_v12 = vld [vmem:[#allocation27_spill] sm:$0xff]  ;;  %v14602_v38 = vld [vmem:[#allocation28_spill] sm:$0xff] }
 0xf07   :  { %6494 = vmatpush2.bf16.msra.mxu1 %v14592_v11  ;;  %6535 = vmatpush2.bf16.msra.mxu0 %v14593_v14  ;;  %v14603_v11 = vld [vmem:[#allocation29_spill] sm:$0xff]  ;;  %v14604_v14 = vld [vmem:[#allocation30_spill] sm:$0xff] }
 0xf08   :  { %6495 = vmatprep.subr.bf16.mxu1 %v14594_v8  ;;  %6536 = vmatprep.subr.bf16.mxu0 %v14595_v21  ;;  %v14605_v8 = vld [vmem:[#allocation31_spill] sm:$0xff]  ;;  %v14606_v21 = vld [vmem:[#allocation32_spill] sm:$0xff] }
 0xf0b   :  { %6496 = vmatpush2.bf16.msra.mxu1 %v14596_v57  ;;  %6537 = vmatpush2.bf16.msra.mxu0 %v14597_v10  ;;  %v14607_v57 = vld [vmem:[#allocation33_spill] sm:$0xff]  ;;  %v14608_v10 = vld [vmem:[#allocation34_spill] sm:$0xff] }
 0xf0c   :  { %6497 = vmatprep.subr.bf16.mxu1 %v14598_v39  ;;  %6538 = vmatprep.subr.bf16.mxu0 %v14599_v26  ;;  %v14609_v39 = vld [vmem:[#allocation35_spill] sm:$0xff]  ;;  %v14610_v26 = vld [vmem:[#allocation36_spill] sm:$0xff] }
 0xf0f   :  { %6498 = vmatpush2.bf16.msra.mxu1 %v14600_v18  ;;  %6539 = vmatpush2.bf16.msra.mxu0 %v14601_v12  ;;  %v14611_v18 = vld [vmem:[#allocation37_spill] sm:$0xff]  ;;  %v14612_v12 = vld [vmem:[#allocation38_spill] sm:$0xff] }
 0xf10   :  { %6499 = vmatprep.subr.bf16.mxu1 %v14602_v38  ;;  %6540 = vmatprep.subr.bf16.mxu0 %v14603_v11  ;;  %v14613_v38 = vld [vmem:[#allocation39_spill] sm:$0xff]  ;;  %v14614_v11 = vld [vmem:[#allocation40_spill] sm:$0xff] }
 0xf13   :  { %6500 = vmatpush2.bf16.msra.mxu1 %v14604_v14  ;;  %6541 = vmatpush2.bf16.msra.mxu0 %v14605_v8  ;;  %v14615_v14 = vld [vmem:[#allocation41_spill] sm:$0xff]  ;;  %v14616_v8 = vld [vmem:[#allocation42_spill] sm:$0xff] }
 0xf14   :  { %6501 = vmatprep.subr.bf16.mxu1 %v14606_v21  ;;  %6542 = vmatprep.subr.bf16.mxu0 %v14607_v57  ;;  %v14617_v21 = vld [vmem:[#allocation43_spill] sm:$0xff]  ;;  %v14618_v57 = vld [vmem:[#allocation44_spill] sm:$0xff] }
 0xf17   :  { %6502 = vmatpush2.bf16.msra.mxu1 %v14608_v10  ;;  %6543 = vmatpush2.bf16.msra.mxu0 %v14609_v39  ;;  %v14619_v10 = vld [vmem:[#allocation45_spill] sm:$0xff] }
 0xf18   :  { %6503 = vmatprep.subr.bf16.mxu1 %v14610_v26  ;;  %6544 = vmatprep.subr.bf16.mxu0 %v14611_v18 }
 0xf1b   :  { %6504 = vmatpush2.bf16.msra.mxu1 %v14612_v12  ;;  %6545 = vmatpush2.bf16.msra.mxu0 %v14613_v38 }
 0xf1c   :  { %6505 = vmatprep.subr.bf16.mxu1 %v14614_v11  ;;  %6546 = vmatprep.subr.bf16.mxu0 %v14615_v14 }
 0xf1f   :  { %6506 = vmatpush2.bf16.msra.mxu1 %v14616_v8  ;;  %6547 = vmatpush2.bf16.msra.mxu0 %v14617_v21 }
 0xf20   :  { %6557 = vmatprep.subr.bf16.mxu1 %v14618_v57  ;;  %6598 = vmatprep.subr.bf16.mxu0 %v14619_v10 }
 0xf62   :  { %v6251_v39 = vpop.f32.mrf.mxu1  ;;  %v6292_v26 = vpop.f32.mrf.mxu0 }
 0xf63   :  { %v6389_v62 = vrot.slane %v6251_v39, 6  ;;  %v6391_v11 = vrot.slane %v6292_v26, 6 }
 0xf64   :  { %v6253_v15 = vpop.f32.mrf.mxu1  ;;  %v6294_v18 = vpop.f32.mrf.mxu0 }
 0xf65   :  { %v6390_v17 = vrot.slane %v6253_v15, 6  ;;  %v6405_v14 = vadd.f32 %v6389_v62, %v11764_v25  ;;  %v6407_v8 = vadd.f32 %v6391_v11, %v11768_v32  ;;  %v6392_v21 = vrot.slane %v6294_v18, 6 }
 0xf66   :  { %v6255_v19 = vpop.f32.mrf.mxu1  ;;  %v6296_v12 = vpop.f32.mrf.mxu0 }
 0xf67   :  { %v6406_v57 = vadd.f32 %v6390_v17, %v11770_v46  ;;  %v8541_v2 = vmul.f32 -1.442695, %v6405_v14  ;;  %v8543_v10 = vmul.f32 -1.442695, %v6407_v8  ;;  %v6408_v6 = vadd.f32 %v6392_v21, %v14526_v52 }
 0xf68   :  { %v6256_v33 = vpop.f32.mrf.mxu1  ;;  %v6297_v38 = vpop.f32.mrf.mxu0 }
 0xf69   :  { %v8542_v7 = vmul.f32 -1.442695, %v6406_v57  ;;  %9128 = vpow2.f32 %v8541_v2  ;;  %v8544_v12 = vmul.f32 -1.442695, %v6408_v6 }
 0xf6a   :  { %9130 = vpow2.f32 %v8543_v10 }
 0xf6b   :  { %9132 = vpow2.f32 %v8542_v7 }
 0xf6c   :  { %9134 = vpow2.f32 %v8544_v12 }
 0xf76   :  { %v9129_v33 = vpop.eup %9128 }
 0xf77   :  { %v9131_v19 = vpop.eup %9130  ;;  %v6419_v39 = vadd.f32 1.0, %v9129_v33 }
 0xf78   :  { %v9133_v15 = vpop.eup %9132  ;;  %v6431_v38 = vadd.f32 1.0, %v9131_v19 }
 0xf79   :  { %v9135_v62 = vpop.eup %9134  ;;  %v6420_v11 = vadd.f32 1.0, %v9133_v15  ;;  %9136 = vrcp.f32 %v6419_v39 }
 0xf7a   :  { %9138 = vrcp.f32 %v6431_v38  ;;  %v6432_v21 = vadd.f32 1.0, %v9135_v62 }
 0xf7b   :  { %9140 = vrcp.f32 %v6420_v11  ;;  %v6453_v11 = vrot.slane %v11948_v29, 7 }
 0xfa2   :  { %v6333_v18 = vpop.f32.mrf.mxu1  ;;  %v6374_v26 = vpop.f32.mrf.mxu0 }
 0xfa3   :  { %v6393_v14 = vrot.slane %v6333_v18, 6  ;;  %v6395_v8 = vrot.slane %v6374_v26, 6  ;;  %v9137_v26 = vpop.eup %9136 }
 0xfa4   :  { %v6335_v57 = vpop.f32.mrf.mxu1  ;;  %v6376_v2 = vpop.f32.mrf.mxu0 }
 0xfa5   :  { %v6409_v10 = vadd.f32 %v6393_v14, %v11786_v24  ;;  %v6411_v7 = vadd.f32 %v6395_v8, %v11788_v47  ;;  %v6394_v6 = vrot.slane %v6335_v57, 6  ;;  %v6396_v17 = vrot.slane %v6376_v2, 6  ;;  %v9139_v14 = vpop.eup %9138 }
 0xfa6   :  { %v6337_v12 = vpop.f32.mrf.mxu1  ;;  %v6378_v33 = vpop.f32.mrf.mxu0 }
 0xfa7   :  { %9142 = vtanh.f32 %v6409_v10  ;;  %v8545_v19 = vmul.f32 -1.442695, %v6411_v7  ;;  %v6410_v15 = vadd.f32 %v6394_v6, %v11790_v63  ;;  %v6412_v39 = vadd.f32 %v6396_v17, %v11792_v3  ;;  %v9141_v8 = vpop.eup %9140 }
 0xfa8   :  { %9144 = vrcp.f32 %v6432_v21  ;;  %v6338_v38 = vpop.f32.mrf.mxu1  ;;  %v6379_v62 = vpop.f32.mrf.mxu0  ;;  %v6457_v10 = vmul.f32 %v9139_v14, %v6453_v11  ;;  %v6454_v6 = vrot.slane %v11951_v59, 7 }
 0xfa9   :  { %9146 = vpow2.f32 %v8545_v19  ;;  %v8546_v18 = vmul.f32 -1.442695, %v6412_v39 }
 0xfaa   :  { %9148 = vtanh.f32 %v6410_v15 }
 0xfab   :  { %9150 = vpow2.f32 %v8546_v18 }
 0xfb4   :  { %v9143_v57 = vpop.eup %9142 }
 0xfb5   :  { %v9145_v2 = vpop.eup %9144  ;;  %v6459_v7 = vmul.f32 %v9143_v57, %v9137_v26 }
 0xfb6   :  { %v9147_v12 = vpop.eup %9146  ;;  %v6458_v39 = vmul.f32 %v9145_v2, %v6454_v6  ;;  %v14622_v6 = vld [vmem:[#allocation63_spill] sm:$0xff] }
 0xfb7   :  { %v9149_v17 = vpop.eup %9148  ;;  %v12098_v21 = vadd.f32 %v6459_v7, %v6457_v10  ;;  %v6445_v33 = vadd.f32 1.0, %v9147_v12  ;;  %v14621_v12 = vld [vmem:[#allocation62_spill] sm:$0xff] }
 0xfb8   :  { %v9151_v19 = vpop.eup %9150  ;;  %v6460_v15 = vmul.f32 %v9149_v17, %v9141_v8  ;;  %v14620_v8 = vld [vmem:[#allocation61_spill] sm:$0xff]  ;;  %v14623_v17 = vld [vmem:[#allocation64_spill] sm:$0xff] }
 0xfb9   :  { %9152 = vtanh.f32 %v12098_v21  ;;  %v6446_v38 = vadd.f32 1.0, %v9151_v19  ;;  %v14625_v19 = vld [vmem:[#allocation66_spill] sm:$0xff] }
 0xfba   :  { %9154 = vrcp.f32 %v6445_v33  ;;  %v12101_v62 = vadd.f32 %v6460_v15, %v6458_v39  ;;  %v14624_v33 = vld [vmem:[#allocation65_spill] sm:$0xff]  ;;  %v14626_v39 = vld [vmem:[#allocation67_spill] sm:$0xff]  ;;  %v14627_v15 = vld [vmem:[#allocation68_spill] sm:$0xff] }
 0xfbb   :  { %9156 = vrcp.f32 %v6446_v38  ;;  %v14628_v38 = vld [vmem:[#allocation69_spill] sm:$0xff] }
 0xfbc   :  { %9158 = vtanh.f32 %v12101_v62 }
 0xfc6   :  { %v9153_v29 = vpop.eup %9152 }
 0xfc7   :  { %v9155_v18 = vpop.eup %9154 }
 0xfc8   :  { %v9157_v26 = vpop.eup %9156  ;;  %v6465_v59 = vmul.f32 %v9155_v18, %v9153_v29  ;;  %v14629_v29 = vld [vmem:[#allocation70_spill] sm:$0xff]  ;;  %v14630_v18 = vld [vmem:[#allocation71_spill] sm:$0xff] }
 0xfc9   :  { %v9159_v14 = vpop.eup %9158 }
 0xfca   :  { %v6466_v11 = vmul.f32 %v9159_v14, %v9157_v26  ;;  %v6467_v57 = vpack.c.bf16 %v6465_v59, %v6465_v59  ;;  %v14631_v26 = vld [vmem:[#allocation75_spill] sm:$0xff]  ;;  %v14632_v59 = vld [vmem:[#allocation76_spill] sm:$0xff] }
 0xfcb   :  { %v14633_v14 = vld [vmem:[#allocation127_spill] sm:$0xff] }
 0xfcc   :  { %v6468_v10 = vpack.c.bf16 %v6466_v11, %v6466_v11  ;;  %v12104_v2 = vrot.slane %v6467_v57, 1  ;;  %v14634_v11 = vld [vmem:[#allocation128_spill] sm:$0xff]  ;;  %v14635_v57 = vld [vmem:[#allocation129_spill] sm:$0xff] }
 0xfce   :  { %v6472_v7 = vrot.slane %v6468_v10, 1  ;;  %v14636_v10 = vld [vmem:[#allocation130_spill] sm:$0xff] }
 0xfd0   :  { %6507 = vmatprep.mubr.bf16.mxu1 %v6472_v7  ;;  %6548 = vmatprep.mubr.bf16.mxu0 %v6472_v7 }
 0xfd1   :  { %6508 = vmatmul.mubr.bf16.vlgmr.msra.gmra.mxu1 %v12104_v2  ;;  %6549 = vmatmul.mubr.bf16.vlgmr.msra.gmra.mxu0 %v12104_v2 }
 0xfd2   :  { %6558 = vmatpush1.bf16.msra.mxu1 %v14433_v40  ;;  %6599 = vmatpush1.bf16.msra.mxu0 %v14434_v49 }
 0xfd3   :  { %6589 = vmatprep.mubr.bf16.mxu1 %v6472_v7  ;;  %6630 = vmatprep.mubr.bf16.mxu0 %v6472_v7  ;;  %v14637_v7 = vld [vmem:[#allocation131_spill] sm:$0xff] }
 0xfd4   :  { %6559 = vmatprep.subr.bf16.mxu1 %v14435_v16  ;;  %6600 = vmatprep.subr.bf16.mxu0 %v14436_v41 }
 0xfd6   :  { %6560 = vmatpush1.bf16.msra.mxu1 %v14437_v0  ;;  %6601 = vmatpush1.bf16.msra.mxu0 %v14438_v54 }
 0xfd7   :  { %6561 = vmatprep.subr.bf16.mxu1 %v14439_v44  ;;  %6602 = vmatprep.subr.bf16.mxu0 %v14440_v5 }
 0xfda   :  { %6562 = vmatpush1.bf16.msra.mxu1 %v14527_v45  ;;  %6603 = vmatpush1.bf16.msra.mxu0 %v14528_v61 }
 0xfdb   :  { %6563 = vmatprep.subr.bf16.mxu1 %v14529_v28  ;;  %6604 = vmatprep.subr.bf16.mxu0 %v14530_v4 }
 0xfde   :  { %6564 = vmatpush1.bf16.msra.mxu1 %v14531_v42  ;;  %6605 = vmatpush1.bf16.msra.mxu0 %v14532_v51 }
 0xfdf   :  { %6565 = vmatprep.subr.bf16.mxu1 %v14533_v13  ;;  %6606 = vmatprep.subr.bf16.mxu0 %v14620_v8 }
 0xfe2   :  { %6566 = vmatpush1.bf16.msra.mxu1 %v14621_v12  ;;  %6607 = vmatpush1.bf16.msra.mxu0 %v14622_v6 }
 0xfe3   :  { %6567 = vmatprep.subr.bf16.mxu1 %v14623_v17  ;;  %6608 = vmatprep.subr.bf16.mxu0 %v14624_v33 }
 0xfe6   :  { %6568 = vmatpush1.bf16.msra.mxu1 %v14625_v19  ;;  %6609 = vmatpush1.bf16.msra.mxu0 %v14626_v39 }
 0xfe7   :  { %6569 = vmatprep.subr.bf16.mxu1 %v14627_v15  ;;  %6610 = vmatprep.subr.bf16.mxu0 %v14628_v38 }
 0xfea   :  { %6570 = vmatpush1.bf16.msra.mxu1 %v14629_v29  ;;  %6611 = vmatpush1.bf16.msra.mxu0 %v14630_v18 }
 0xfeb   :  { %6571 = vmatprep.subr.bf16.mxu1 %v14545_v23  ;;  %6612 = vmatprep.subr.bf16.mxu0 %v14546_v1 }
 0xfee   :  { %6572 = vmatpush1.bf16.msra.mxu1 %v14547_v58  ;;  %6613 = vmatpush1.bf16.msra.mxu0 %v14631_v26 }
 0xfef   :  { %6573 = vmatprep.subr.bf16.mxu1 %v14632_v59  ;;  %6614 = vmatprep.subr.bf16.mxu0 %v14550_v43 }
 0xff2   :  { %6574 = vmatpush2.bf16.msra.mxu1 %v14551_v56  ;;  %6615 = vmatpush2.bf16.msra.mxu0 %v14552_v30 }
 0xff3   :  { %6575 = vmatprep.subr.bf16.mxu1 %v14553_v35  ;;  %6616 = vmatprep.subr.bf16.mxu0 %v14554_v55 }
 0xff6   :  { %6576 = vmatpush2.bf16.msra.mxu1 %v14555_v9  ;;  %6617 = vmatpush2.bf16.msra.mxu0 %v14470_v60 }
 0xff7   :  { %6577 = vmatprep.subr.bf16.mxu1 %v14471_v36  ;;  %6618 = vmatprep.subr.bf16.mxu0 %v14472_v53 }
 0xffa   :  { %6578 = vmatpush2.bf16.msra.mxu1 %v14556_v34  ;;  %6619 = vmatpush2.bf16.msra.mxu0 %v14557_v27 }
 0xffb   :  { %6579 = vmatprep.subr.bf16.mxu1 %v14475_v37  ;;  %6620 = vmatprep.subr.bf16.mxu0 %v14476_v20  ;;  %v14638_v37 = vld [vmem:[#allocation132_spill] sm:$0xff]  ;;  %v14639_v20 = vld [vmem:[#allocation133_spill] sm:$0xff] }
 0xffe   :  { %6580 = vmatpush2.bf16.msra.mxu1 %v14477_v48  ;;  %6621 = vmatpush2.bf16.msra.mxu0 %v14478_v50  ;;  %v14640_v48 = vld [vmem:[#allocation134_spill] sm:$0xff]  ;;  %v14641_v50 = vld [vmem:[#allocation135_spill] sm:$0xff] }
 0xfff   :  { %6581 = vmatprep.subr.bf16.mxu1 %v14479_v22  ;;  %6622 = vmatprep.subr.bf16.mxu0 %v14480_v31  ;;  %v14642_v22 = vld [vmem:[#allocation136_spill] sm:$0xff]  ;;  %v14643_v31 = vld [vmem:[#allocation137_spill] sm:$0xff] }
0x1002   :  { %6582 = vmatpush2.bf16.msra.mxu1 %v14633_v14  ;;  %6623 = vmatpush2.bf16.msra.mxu0 %v14634_v11  ;;  %v14644_v14 = vld [vmem:[#allocation138_spill] sm:$0xff]  ;;  %v14645_v11 = vld [vmem:[#allocation139_spill] sm:$0xff] }
0x1003   :  { %6583 = vmatprep.subr.bf16.mxu1 %v14635_v57  ;;  %6624 = vmatprep.subr.bf16.mxu0 %v14636_v10  ;;  %v14646_v57 = vld [vmem:[#allocation140_spill] sm:$0xff] }
0x1004   :  { %v14647_v10 = vld [vmem:[#allocation84_spill] sm:$0xff] }
0x1006   :  { %6584 = vmatpush2.bf16.msra.mxu1 %v14637_v7  ;;  %6625 = vmatpush2.bf16.msra.mxu0 %v14638_v37  ;;  %v14648_v7 = vld [vmem:[#allocation85_spill] sm:$0xff] }
0x1007   :  { %6585 = vmatprep.subr.bf16.mxu1 %v14639_v20  ;;  %6626 = vmatprep.subr.bf16.mxu0 %v14640_v48  ;;  %v14649_v48 = vld [vmem:[#allocation86_spill] sm:$0xff]  ;;  %v14658_v20 = vld [vmem:[#allocation92_spill] sm:$0xff] }
0x100a   :  { %6586 = vmatpush2.bf16.msra.mxu1 %v14641_v50  ;;  %6627 = vmatpush2.bf16.msra.mxu0 %v14642_v22  ;;  %v14650_v50 = vld [vmem:[#allocation87_spill] sm:$0xff]  ;;  %v14651_v22 = vld [vmem:[#allocation88_spill] sm:$0xff] }
0x100b   :  { %6587 = vmatprep.subr.bf16.mxu1 %v14643_v31  ;;  %6628 = vmatprep.subr.bf16.mxu0 %v14644_v14  ;;  %v14652_v31 = vld [vmem:[#allocation89_spill] sm:$0xff]  ;;  %v14653_v14 = vld [vmem:[#allocation90_spill] sm:$0xff] }
0x100e   :  { %6588 = vmatpush2.bf16.msra.mxu1 %v14645_v11  ;;  %6629 = vmatpush2.bf16.msra.mxu0 %v14646_v57  ;;  %v14654_v11 = vld [vmem:[#allocation146_spill] sm:$0xff]  ;;  %v14655_v57 = vld [vmem:[#allocation147_spill] sm:$0xff] }
0x100f   :  { %6737 = vmatprep.subr.bf16.mxu1 %v14647_v10  ;;  %6778 = vmatprep.subr.bf16.mxu0 %v14648_v7  ;;  %v14656_v10 = vld [vmem:[#allocation148_spill] sm:$0xff]  ;;  %v14657_v7 = vld [vmem:[#allocation91_spill] sm:$0xff] }
0x1011   :  { %6590 = vmatmul.mubr.bf16.vlgmr.msra.gmra.mxu1 %v12104_v2  ;;  %6631 = vmatmul.mubr.bf16.vlgmr.msra.gmra.mxu0 %v12104_v2  ;;  %v14659_v2 = vld [vmem:[#allocation93_spill] sm:$0xff] }
0x1012   :  { %6738 = vmatpush1.bf16.msra.mxu1 %v14649_v48  ;;  %6779 = vmatpush1.bf16.msra.mxu0 %v14650_v50  ;;  %v14660_v48 = vld [vmem:[#allocation94_spill] sm:$0xff]  ;;  %v14661_v50 = vld [vmem:[#allocation95_spill] sm:$0xff] }
0x1013   :  { %6739 = vmatprep.subr.bf16.mxu1 %v14651_v22  ;;  %6780 = vmatprep.subr.bf16.mxu0 %v14652_v31  ;;  %v14662_v22 = vld [vmem:[#allocation109_spill] sm:$0xff]  ;;  %v14663_v31 = vld [vmem:[#allocation110_spill] sm:$0xff] }
0x1016   :  { %6740 = vmatpush1.bf16.msra.mxu1 %v14653_v14  ;;  %6781 = vmatpush1.bf16.msra.mxu0 %v14654_v11  ;;  %v14664_v14 = vld [vmem:[#allocation111_spill] sm:$0xff]  ;;  %v14665_v11 = vld [vmem:[#allocation114_spill] sm:$0xff] }
0x1017   :  { %6741 = vmatprep.subr.bf16.mxu1 %v14655_v57  ;;  %6782 = vmatprep.subr.bf16.mxu0 %v14656_v10  ;;  %v14666_v57 = vld [vmem:[#allocation115_spill] sm:$0xff]  ;;  %v14667_v10 = vld [vmem:[#allocation149_spill] sm:$0xff] }
0x101a   :  { %6742 = vmatpush1.bf16.msra.mxu1 %v14657_v7  ;;  %6783 = vmatpush1.bf16.msra.mxu0 %v14658_v20  ;;  %v14668_v7 = vld [vmem:[#allocation150_spill] sm:$0xff]  ;;  %v14669_v20 = vld [vmem:[#allocation96_spill] sm:$0xff] }
0x101b   :  { %6743 = vmatprep.subr.bf16.mxu1 %v14659_v2  ;;  %6784 = vmatprep.subr.bf16.mxu0 %v14660_v48  ;;  %v14670_v2 = vld [vmem:[#allocation97_spill] sm:$0xff]  ;;  %v14671_v48 = vld [vmem:[#allocation98_spill] sm:$0xff] }
0x101e   :  { %6744 = vmatpush1.bf16.msra.mxu1 %v14661_v50  ;;  %6785 = vmatpush1.bf16.msra.mxu0 %v14662_v22  ;;  %v14672_v50 = vld [vmem:[#allocation99_spill] sm:$0xff]  ;;  %v14673_v22 = vld [vmem:[#allocation100_spill] sm:$0xff] }
0x101f   :  { %6745 = vmatprep.subr.bf16.mxu1 %v14663_v31  ;;  %6786 = vmatprep.subr.bf16.mxu0 %v14664_v14  ;;  %v14674_v31 = vld [vmem:[#allocation101_spill] sm:$0xff]  ;;  %v14675_v14 = vld [vmem:[#allocation102_spill] sm:$0xff] }
0x1022   :  { %6746 = vmatpush1.bf16.msra.mxu1 %v14665_v11  ;;  %6787 = vmatpush1.bf16.msra.mxu0 %v14666_v57  ;;  %v14676_v11 = vld [vmem:[#allocation103_spill] sm:$0xff]  ;;  %v14677_v57 = vld [vmem:[#allocation104_spill] sm:$0xff] }
0x1023   :  { %6747 = vmatprep.subr.bf16.mxu1 %v14667_v10  ;;  %6788 = vmatprep.subr.bf16.mxu0 %v14668_v7  ;;  %v14678_v10 = vld [vmem:[#allocation105_spill] sm:$0xff]  ;;  %v14679_v7 = vld [vmem:[#allocation106_spill] sm:$0xff] }
0x1026   :  { %6748 = vmatpush1.bf16.msra.mxu1 %v14669_v20  ;;  %6789 = vmatpush1.bf16.msra.mxu0 %v14670_v2  ;;  %v14680_v20 = vld [vmem:[#allocation107_spill] sm:$0xff]  ;;  %v14681_v2 = vld [vmem:[#allocation108_spill] sm:$0xff] }
0x1027   :  { %6749 = vmatprep.subr.bf16.mxu1 %v14671_v48  ;;  %6790 = vmatprep.subr.bf16.mxu0 %v14672_v50  ;;  %v14682_v48 = vld [vmem:[#allocation112_spill] sm:$0xff]  ;;  %v14683_v50 = vld [vmem:[#allocation113_spill] sm:$0xff] }
0x102a   :  { %6750 = vmatpush1.bf16.msra.mxu1 %v14673_v22  ;;  %6791 = vmatpush1.bf16.msra.mxu0 %v14674_v31  ;;  %v14684_v22 = vld [vmem:[#allocation17_spill] sm:$0xff]  ;;  %v14685_v31 = vld [vmem:[#allocation18_spill] sm:$0xff] }
0x102b   :  { %6751 = vmatprep.subr.bf16.mxu1 %v14675_v14  ;;  %6792 = vmatprep.subr.bf16.mxu0 %v14676_v11  ;;  %v14686_v14 = vld [vmem:[#allocation19_spill] sm:$0xff]  ;;  %v14687_v11 = vld [vmem:[#allocation20_spill] sm:$0xff] }
0x102e   :  { %6752 = vmatpush1.bf16.msra.mxu1 %v14677_v57  ;;  %6793 = vmatpush1.bf16.msra.mxu0 %v14678_v10  ;;  %v14688_v57 = vld [vmem:[#allocation21_spill] sm:$0xff]  ;;  %v14689_v10 = vld [vmem:[#allocation22_spill] sm:$0xff] }
0x102f   :  { %6753 = vmatprep.subr.bf16.mxu1 %v14679_v7  ;;  %6794 = vmatprep.subr.bf16.mxu0 %v14680_v20  ;;  %v14690_v7 = vld [vmem:[#allocation23_spill] sm:$0xff]  ;;  %v14691_v20 = vld [vmem:[#allocation24_spill] sm:$0xff] }
0x1032   :  { %6754 = vmatpush2.bf16.msra.mxu1 %v14681_v2  ;;  %6795 = vmatpush2.bf16.msra.mxu0 %v14682_v48  ;;  %v14692_v2 = vld [vmem:[#allocation25_spill] sm:$0xff]  ;;  %v14693_v48 = vld [vmem:[#allocation26_spill] sm:$0xff] }
0x1033   :  { %6755 = vmatprep.subr.bf16.mxu1 %v14683_v50  ;;  %6796 = vmatprep.subr.bf16.mxu0 %v14684_v22  ;;  %v14694_v50 = vld [vmem:[#allocation27_spill] sm:$0xff]  ;;  %v14695_v22 = vld [vmem:[#allocation28_spill] sm:$0xff] }
0x1036   :  { %6756 = vmatpush2.bf16.msra.mxu1 %v14685_v31  ;;  %6797 = vmatpush2.bf16.msra.mxu0 %v14686_v14  ;;  %v14696_v31 = vld [vmem:[#allocation29_spill] sm:$0xff]  ;;  %v14697_v14 = vld [vmem:[#allocation30_spill] sm:$0xff] }
0x1037   :  { %6757 = vmatprep.subr.bf16.mxu1 %v14687_v11  ;;  %6798 = vmatprep.subr.bf16.mxu0 %v14688_v57  ;;  %v14698_v11 = vld [vmem:[#allocation31_spill] sm:$0xff]  ;;  %v14699_v57 = vld [vmem:[#allocation32_spill] sm:$0xff] }
0x103a   :  { %6758 = vmatpush2.bf16.msra.mxu1 %v14689_v10  ;;  %6799 = vmatpush2.bf16.msra.mxu0 %v14690_v7  ;;  %v14700_v10 = vld [vmem:[#allocation33_spill] sm:$0xff]  ;;  %v14701_v7 = vld [vmem:[#allocation34_spill] sm:$0xff] }
0x103b   :  { %6759 = vmatprep.subr.bf16.mxu1 %v14691_v20  ;;  %6800 = vmatprep.subr.bf16.mxu0 %v14692_v2  ;;  %v14702_v20 = vld [vmem:[#allocation35_spill] sm:$0xff]  ;;  %v14703_v2 = vld [vmem:[#allocation36_spill] sm:$0xff] }
0x103e   :  { %6760 = vmatpush2.bf16.msra.mxu1 %v14693_v48  ;;  %6801 = vmatpush2.bf16.msra.mxu0 %v14694_v50  ;;  %v14704_v48 = vld [vmem:[#allocation37_spill] sm:$0xff]  ;;  %v14705_v50 = vld [vmem:[#allocation38_spill] sm:$0xff] }
0x103f   :  { %6761 = vmatprep.subr.bf16.mxu1 %v14695_v22  ;;  %6802 = vmatprep.subr.bf16.mxu0 %v14696_v31  ;;  %v14706_v22 = vld [vmem:[#allocation39_spill] sm:$0xff]  ;;  %v14707_v31 = vld [vmem:[#allocation40_spill] sm:$0xff] }
0x1042   :  { %6762 = vmatpush2.bf16.msra.mxu1 %v14697_v14  ;;  %6803 = vmatpush2.bf16.msra.mxu0 %v14698_v11  ;;  %v14708_v14 = vld [vmem:[#allocation41_spill] sm:$0xff]  ;;  %v14709_v11 = vld [vmem:[#allocation42_spill] sm:$0xff] }
0x1043   :  { %6763 = vmatprep.subr.bf16.mxu1 %v14699_v57  ;;  %6804 = vmatprep.subr.bf16.mxu0 %v14700_v10  ;;  %v14710_v57 = vld [vmem:[#allocation43_spill] sm:$0xff]  ;;  %v14711_v10 = vld [vmem:[#allocation44_spill] sm:$0xff] }
0x1046   :  { %6764 = vmatpush2.bf16.msra.mxu1 %v14701_v7  ;;  %6805 = vmatpush2.bf16.msra.mxu0 %v14702_v20  ;;  %v14712_v7 = vld [vmem:[#allocation45_spill] sm:$0xff] }
0x1047   :  { %6765 = vmatprep.subr.bf16.mxu1 %v14703_v2  ;;  %6806 = vmatprep.subr.bf16.mxu0 %v14704_v48 }
0x104a   :  { %6766 = vmatpush2.bf16.msra.mxu1 %v14705_v50  ;;  %6807 = vmatpush2.bf16.msra.mxu0 %v14706_v22 }
0x104b   :  { %6767 = vmatprep.subr.bf16.mxu1 %v14707_v31  ;;  %6808 = vmatprep.subr.bf16.mxu0 %v14708_v14 }
0x104e   :  { %6768 = vmatpush2.bf16.msra.mxu1 %v14709_v11  ;;  %6809 = vmatpush2.bf16.msra.mxu0 %v14710_v57 }
0x104f   :  { %6819 = vmatprep.subr.bf16.mxu1 %v14711_v10  ;;  %6860 = vmatprep.subr.bf16.mxu0 %v14712_v7 }
0x1091   :  { %v6509_v20 = vpop.f32.mrf.mxu1  ;;  %v6550_v2 = vpop.f32.mrf.mxu0 }
0x1092   :  { %v6647_v53 = vrot.slane %v6509_v20, 5  ;;  %v6649_v31 = vrot.slane %v6550_v2, 5 }
0x1093   :  { %v6511_v37 = vpop.f32.mrf.mxu1  ;;  %v6552_v48 = vpop.f32.mrf.mxu0 }
0x1094   :  { %v6648_v36 = vrot.slane %v6511_v37, 5  ;;  %v6663_v14 = vadd.f32 %v6647_v53, %v11764_v25  ;;  %v6665_v11 = vadd.f32 %v6649_v31, %v11768_v32  ;;  %v6650_v57 = vrot.slane %v6552_v48, 5 }
0x1095   :  { %v6513_v27 = vpop.f32.mrf.mxu1  ;;  %v6554_v50 = vpop.f32.mrf.mxu0 }
0x1096   :  { %v6664_v10 = vadd.f32 %v6648_v36, %v11770_v46  ;;  %v8547_v60 = vmul.f32 -1.442695, %v6663_v14  ;;  %v8549_v7 = vmul.f32 -1.442695, %v6665_v11  ;;  %v6666_v9 = vadd.f32 %v6650_v57, %v14526_v52 }
0x1097   :  { %v6514_v34 = vpop.f32.mrf.mxu1  ;;  %v6555_v22 = vpop.f32.mrf.mxu0 }
0x1098   :  { %v8548_v55 = vmul.f32 -1.442695, %v6664_v10  ;;  %9160 = vpow2.f32 %v8547_v60  ;;  %v8550_v50 = vmul.f32 -1.442695, %v6666_v9 }
0x1099   :  { %9162 = vpow2.f32 %v8549_v7 }
0x109a   :  { %9164 = vpow2.f32 %v8548_v55 }
0x109b   :  { %9166 = vpow2.f32 %v8550_v50 }
0x10a5   :  { %v9161_v20 = vpop.eup %9160 }
0x10a6   :  { %v9163_v22 = vpop.eup %9162  ;;  %v6677_v34 = vadd.f32 1.0, %v9161_v20 }
0x10a7   :  { %v9165_v37 = vpop.eup %9164  ;;  %v6689_v53 = vadd.f32 1.0, %v9163_v22 }
0x10a8   :  { %v9167_v27 = vpop.eup %9166  ;;  %v6678_v31 = vadd.f32 1.0, %v9165_v37  ;;  %9168 = vrcp.f32 %v6677_v34 }
0x10a9   :  { %9170 = vrcp.f32 %v6689_v53  ;;  %v6690_v11 = vadd.f32 1.0, %v9167_v27 }
0x10aa   :  { %9172 = vrcp.f32 %v6678_v31  ;;  %v6711_v31 = vrot.slane %v12098_v21, 7 }
0x10d1   :  { %v6591_v48 = vpop.f32.mrf.mxu1  ;;  %v6632_v2 = vpop.f32.mrf.mxu0 }
0x10d2   :  { %v6651_v36 = vrot.slane %v6591_v48, 5  ;;  %v6653_v14 = vrot.slane %v6632_v2, 5  ;;  %v9169_v2 = vpop.eup %9168 }
0x10d3   :  { %v6593_v57 = vpop.f32.mrf.mxu1  ;;  %v6634_v60 = vpop.f32.mrf.mxu0 }
0x10d4   :  { %v6667_v9 = vadd.f32 %v6651_v36, %v11786_v24  ;;  %v6669_v55 = vadd.f32 %v6653_v14, %v11788_v47  ;;  %v6652_v10 = vrot.slane %v6593_v57, 5  ;;  %v6654_v7 = vrot.slane %v6634_v60, 5  ;;  %v9171_v36 = vpop.eup %9170 }
0x10d5   :  { %v6595_v50 = vpop.f32.mrf.mxu1  ;;  %v6636_v20 = vpop.f32.mrf.mxu0 }
0x10d6   :  { %9174 = vtanh.f32 %v6667_v9  ;;  %v8551_v22 = vmul.f32 -1.442695, %v6669_v55  ;;  %v6668_v37 = vadd.f32 %v6652_v10, %v11790_v63  ;;  %v6670_v34 = vadd.f32 %v6654_v7, %v11792_v3  ;;  %v9173_v14 = vpop.eup %9172 }
0x10d7   :  { %9176 = vrcp.f32 %v6690_v11  ;;  %v6596_v53 = vpop.f32.mrf.mxu1  ;;  %v6637_v27 = vpop.f32.mrf.mxu0  ;;  %v6715_v9 = vmul.f32 %v9171_v36, %v6711_v31  ;;  %v6712_v10 = vrot.slane %v12101_v62, 7 }
0x10d8   :  { %9178 = vpow2.f32 %v8551_v22  ;;  %v8552_v48 = vmul.f32 -1.442695, %v6670_v34 }
0x10d9   :  { %9180 = vtanh.f32 %v6668_v37 }
0x10da   :  { %9182 = vpow2.f32 %v8552_v48 }
0x10e3   :  { %v9175_v57 = vpop.eup %9174 }
0x10e4   :  { %v9177_v60 = vpop.eup %9176  ;;  %v6717_v55 = vmul.f32 %v9175_v57, %v9169_v2 }
0x10e5   :  { %v9179_v50 = vpop.eup %9178  ;;  %v6716_v34 = vmul.f32 %v9177_v60, %v6712_v10  ;;  %v14713_v10 = vld [vmem:[#allocation81_spill] sm:$0xff] }
0x10e6   :  { %v9181_v7 = vpop.eup %9180  ;;  %v12248_v11 = vadd.f32 %v6717_v55, %v6715_v9  ;;  %v6703_v20 = vadd.f32 1.0, %v9179_v50 }
0x10e7   :  { %v9183_v22 = vpop.eup %9182  ;;  %v6718_v37 = vmul.f32 %v9181_v7, %v9173_v14  ;;  %v14714_v7 = vld [vmem:[#allocation82_spill] sm:$0xff] }
0x10e8   :  { %9184 = vtanh.f32 %v12248_v11  ;;  %v6704_v53 = vadd.f32 1.0, %v9183_v22  ;;  %v14716_v22 = vld [vmem:[#allocation117_spill] sm:$0xff] }
0x10e9   :  { %9186 = vrcp.f32 %v6703_v20  ;;  %v12251_v27 = vadd.f32 %v6718_v37, %v6716_v34  ;;  %v14715_v20 = vld [vmem:[#allocation116_spill] sm:$0xff]  ;;  %v14717_v34 = vld [vmem:[#allocation118_spill] sm:$0xff]  ;;  %v14718_v37 = vld [vmem:[#allocation119_spill] sm:$0xff] }
0x10ea   :  { %9188 = vrcp.f32 %v6704_v53  ;;  %v14719_v53 = vld [vmem:[#allocation120_spill] sm:$0xff] }
0x10eb   :  { %9190 = vtanh.f32 %v12251_v27 }
0x10f5   :  { %v9185_v21 = vpop.eup %9184 }
0x10f6   :  { %v9187_v48 = vpop.eup %9186 }
0x10f7   :  { %v9189_v2 = vpop.eup %9188  ;;  %v6723_v62 = vmul.f32 %v9187_v48, %v9185_v21  ;;  %v14720_v21 = vld [vmem:[#allocation121_spill] sm:$0xff]  ;;  %v14721_v48 = vld [vmem:[#allocation122_spill] sm:$0xff] }
0x10f8   :  { %v9191_v36 = vpop.eup %9190 }
0x10f9   :  { %v6724_v31 = vmul.f32 %v9191_v36, %v9189_v2  ;;  %v6725_v57 = vpack.c.bf16 %v6723_v62, %v6723_v62  ;;  %v14722_v2 = vld [vmem:[#allocation123_spill] sm:$0xff]  ;;  %v14723_v62 = vld [vmem:[#allocation124_spill] sm:$0xff]  ;;  %v14724_v36 = vld [vmem:[#allocation125_spill] sm:$0xff] }
0x10fb   :  { %v6726_v9 = vpack.c.bf16 %v6724_v31, %v6724_v31  ;;  %v6728_v55 = vshrl.u32 %v6725_v57, 16  ;;  %v14725_v31 = vld [vmem:[#allocation126_spill] sm:$0xff]  ;;  %v14726_v57 = vld [vmem:[#allocation127_spill] sm:$0xff] }
0x10fd   :  { %v6732_v60 = vshrl.u32 %v6726_v9, 16  ;;  %v12254_v50 = vrot.slane %v6728_v55, 1  ;;  %v14727_v9 = vld [vmem:[#allocation128_spill] sm:$0xff]  ;;  %v14728_v55 = vld [vmem:[#allocation129_spill] sm:$0xff] }
0x10ff   :  { %v6734_v14 = vrot.slane %v6732_v60, 1  ;;  %v14729_v60 = vld [vmem:[#allocation130_spill] sm:$0xff] }
0x1101   :  { %6769 = vmatprep.mubr.bf16.mxu1 %v6734_v14  ;;  %6810 = vmatprep.mubr.bf16.mxu0 %v6734_v14 }
0x1102   :  { %6770 = vmatmul.mubr.bf16.vlgmr.msra.gmra.mxu1 %v12254_v50  ;;  %6811 = vmatmul.mubr.bf16.vlgmr.msra.gmra.mxu0 %v12254_v50 }
0x1103   :  { %6820 = vmatpush1.bf16.msra.mxu1 %v14433_v40  ;;  %6861 = vmatpush1.bf16.msra.mxu0 %v14434_v49 }
0x1104   :  { %6851 = vmatprep.mubr.bf16.mxu1 %v6734_v14  ;;  %6892 = vmatprep.mubr.bf16.mxu0 %v6734_v14  ;;  %v14730_v14 = vld [vmem:[#allocation131_spill] sm:$0xff] }
0x1105   :  { %6821 = vmatprep.subr.bf16.mxu1 %v14435_v16  ;;  %6862 = vmatprep.subr.bf16.mxu0 %v14436_v41 }
0x1107   :  { %6822 = vmatpush1.bf16.msra.mxu1 %v14437_v0  ;;  %6863 = vmatpush1.bf16.msra.mxu0 %v14438_v54 }
0x1108   :  { %6823 = vmatprep.subr.bf16.mxu1 %v14439_v44  ;;  %6864 = vmatprep.subr.bf16.mxu0 %v14440_v5 }
0x110b   :  { %6824 = vmatpush1.bf16.msra.mxu1 %v14527_v45  ;;  %6865 = vmatpush1.bf16.msra.mxu0 %v14528_v61 }
0x110c   :  { %6825 = vmatprep.subr.bf16.mxu1 %v14529_v28  ;;  %6866 = vmatprep.subr.bf16.mxu0 %v14530_v4 }
0x110f   :  { %6826 = vmatpush1.bf16.msra.mxu1 %v14531_v42  ;;  %6867 = vmatpush1.bf16.msra.mxu0 %v14532_v51 }
0x1110   :  { %6827 = vmatprep.subr.bf16.mxu1 %v14533_v13  ;;  %6868 = vmatprep.subr.bf16.mxu0 %v14620_v8 }
0x1113   :  { %6828 = vmatpush1.bf16.msra.mxu1 %v14621_v12  ;;  %6869 = vmatpush1.bf16.msra.mxu0 %v14622_v6 }
0x1114   :  { %6829 = vmatprep.subr.bf16.mxu1 %v14623_v17  ;;  %6870 = vmatprep.subr.bf16.mxu0 %v14624_v33 }
0x1117   :  { %6830 = vmatpush1.bf16.msra.mxu1 %v14625_v19  ;;  %6871 = vmatpush1.bf16.msra.mxu0 %v14626_v39 }
0x1118   :  { %6831 = vmatprep.subr.bf16.mxu1 %v14627_v15  ;;  %6872 = vmatprep.subr.bf16.mxu0 %v14628_v38 }
0x111b   :  { %6832 = vmatpush1.bf16.msra.mxu1 %v14629_v29  ;;  %6873 = vmatpush1.bf16.msra.mxu0 %v14630_v18 }
0x111c   :  { %6833 = vmatprep.subr.bf16.mxu1 %v14545_v23  ;;  %6874 = vmatprep.subr.bf16.mxu0 %v14546_v1 }
0x111f   :  { %6834 = vmatpush1.bf16.msra.mxu1 %v14547_v58  ;;  %6875 = vmatpush1.bf16.msra.mxu0 %v14631_v26 }
0x1120   :  { %6835 = vmatprep.subr.bf16.mxu1 %v14632_v59  ;;  %6876 = vmatprep.subr.bf16.mxu0 %v14550_v43 }
0x1123   :  { %6836 = vmatpush2.bf16.msra.mxu1 %v14551_v56  ;;  %6877 = vmatpush2.bf16.msra.mxu0 %v14552_v30 }
0x1124   :  { %6837 = vmatprep.subr.bf16.mxu1 %v14553_v35  ;;  %6878 = vmatprep.subr.bf16.mxu0 %v14713_v10 }
0x1127   :  { %6838 = vmatpush2.bf16.msra.mxu1 %v14714_v7  ;;  %6879 = vmatpush2.bf16.msra.mxu0 %v14715_v20 }
0x1128   :  { %6839 = vmatprep.subr.bf16.mxu1 %v14716_v22  ;;  %6880 = vmatprep.subr.bf16.mxu0 %v14717_v34 }
0x112b   :  { %6840 = vmatpush2.bf16.msra.mxu1 %v14718_v37  ;;  %6881 = vmatpush2.bf16.msra.mxu0 %v14719_v53 }
0x112c   :  { %6841 = vmatprep.subr.bf16.mxu1 %v14720_v21  ;;  %6882 = vmatprep.subr.bf16.mxu0 %v14721_v48  ;;  %v14731_v21 = vld [vmem:[#allocation132_spill] sm:$0xff]  ;;  %v14732_v48 = vld [vmem:[#allocation133_spill] sm:$0xff] }
0x112f   :  { %6842 = vmatpush2.bf16.msra.mxu1 %v14722_v2  ;;  %6883 = vmatpush2.bf16.msra.mxu0 %v14723_v62  ;;  %v14733_v2 = vld [vmem:[#allocation134_spill] sm:$0xff]  ;;  %v14734_v62 = vld [vmem:[#allocation135_spill] sm:$0xff] }
0x1130   :  { %6843 = vmatprep.subr.bf16.mxu1 %v14724_v36  ;;  %6884 = vmatprep.subr.bf16.mxu0 %v14725_v31  ;;  %v14735_v36 = vld [vmem:[#allocation136_spill] sm:$0xff]  ;;  %v14736_v31 = vld [vmem:[#allocation137_spill] sm:$0xff] }
0x1133   :  { %6844 = vmatpush2.bf16.msra.mxu1 %v14726_v57  ;;  %6885 = vmatpush2.bf16.msra.mxu0 %v14727_v9  ;;  %v14737_v57 = vld [vmem:[#allocation138_spill] sm:$0xff]  ;;  %v14738_v9 = vld [vmem:[#allocation139_spill] sm:$0xff] }
0x1134   :  { %6845 = vmatprep.subr.bf16.mxu1 %v14728_v55  ;;  %6886 = vmatprep.subr.bf16.mxu0 %v14729_v60  ;;  %v14739_v55 = vld [vmem:[#allocation140_spill] sm:$0xff] }
0x1135   :  { %v14740_v60 = vld [vmem:[#allocation84_spill] sm:$0xff] }
0x1137   :  { %6846 = vmatpush2.bf16.msra.mxu1 %v14730_v14  ;;  %6887 = vmatpush2.bf16.msra.mxu0 %v14731_v21  ;;  %v14741_v14 = vld [vmem:[#allocation85_spill] sm:$0xff] }
0x1138   :  { %6847 = vmatprep.subr.bf16.mxu1 %v14732_v48  ;;  %6888 = vmatprep.subr.bf16.mxu0 %v14733_v2  ;;  %v14742_v2 = vld [vmem:[#allocation86_spill] sm:$0xff]  ;;  %v14751_v48 = vld [vmem:[#allocation92_spill] sm:$0xff] }
0x113b   :  { %6848 = vmatpush2.bf16.msra.mxu1 %v14734_v62  ;;  %6889 = vmatpush2.bf16.msra.mxu0 %v14735_v36  ;;  %v14743_v62 = vld [vmem:[#allocation87_spill] sm:$0xff]  ;;  %v14744_v36 = vld [vmem:[#allocation88_spill] sm:$0xff] }
0x113c   :  { %6849 = vmatprep.subr.bf16.mxu1 %v14736_v31  ;;  %6890 = vmatprep.subr.bf16.mxu0 %v14737_v57  ;;  %v14745_v31 = vld [vmem:[#allocation89_spill] sm:$0xff]  ;;  %v14746_v57 = vld [vmem:[#allocation90_spill] sm:$0xff] }
0x113f   :  { %6850 = vmatpush2.bf16.msra.mxu1 %v14738_v9  ;;  %6891 = vmatpush2.bf16.msra.mxu0 %v14739_v55  ;;  %v14747_v9 = vld [vmem:[#allocation146_spill] sm:$0xff]  ;;  %v14748_v55 = vld [vmem:[#allocation147_spill] sm:$0xff] }
0x1140   :  { %6995 = vmatprep.subr.bf16.mxu1 %v14740_v60  ;;  %7036 = vmatprep.subr.bf16.mxu0 %v14741_v14  ;;  %v14749_v60 = vld [vmem:[#allocation148_spill] sm:$0xff]  ;;  %v14750_v14 = vld [vmem:[#allocation91_spill] sm:$0xff] }
0x1142   :  { %6852 = vmatmul.mubr.bf16.vlgmr.msra.gmra.mxu1 %v12254_v50  ;;  %6893 = vmatmul.mubr.bf16.vlgmr.msra.gmra.mxu0 %v12254_v50  ;;  %v14752_v50 = vld [vmem:[#allocation93_spill] sm:$0xff] }
0x1143   :  { %6996 = vmatpush1.bf16.msra.mxu1 %v14742_v2  ;;  %7037 = vmatpush1.bf16.msra.mxu0 %v14743_v62  ;;  %v14753_v2 = vld [vmem:[#allocation94_spill] sm:$0xff]  ;;  %v14754_v62 = vld [vmem:[#allocation95_spill] sm:$0xff] }
0x1144   :  { %6997 = vmatprep.subr.bf16.mxu1 %v14744_v36  ;;  %7038 = vmatprep.subr.bf16.mxu0 %v14745_v31  ;;  %v14755_v36 = vld [vmem:[#allocation109_spill] sm:$0xff]  ;;  %v14756_v31 = vld [vmem:[#allocation110_spill] sm:$0xff] }
0x1147   :  { %6998 = vmatpush1.bf16.msra.mxu1 %v14746_v57  ;;  %7039 = vmatpush1.bf16.msra.mxu0 %v14747_v9  ;;  %v14757_v57 = vld [vmem:[#allocation111_spill] sm:$0xff]  ;;  %v14758_v9 = vld [vmem:[#allocation114_spill] sm:$0xff] }
0x1148   :  { %6999 = vmatprep.subr.bf16.mxu1 %v14748_v55  ;;  %7040 = vmatprep.subr.bf16.mxu0 %v14749_v60  ;;  %v14759_v55 = vld [vmem:[#allocation115_spill] sm:$0xff]  ;;  %v14760_v60 = vld [vmem:[#allocation149_spill] sm:$0xff] }
0x114b   :  { %7000 = vmatpush1.bf16.msra.mxu1 %v14750_v14  ;;  %7041 = vmatpush1.bf16.msra.mxu0 %v14751_v48  ;;  %v14761_v14 = vld [vmem:[#allocation150_spill] sm:$0xff]  ;;  %v14762_v48 = vld [vmem:[#allocation96_spill] sm:$0xff] }
0x114c   :  { %7001 = vmatprep.subr.bf16.mxu1 %v14752_v50  ;;  %7042 = vmatprep.subr.bf16.mxu0 %v14753_v2  ;;  %v14763_v50 = vld [vmem:[#allocation97_spill] sm:$0xff]  ;;  %v14764_v2 = vld [vmem:[#allocation98_spill] sm:$0xff] }
0x114f   :  { %7002 = vmatpush1.bf16.msra.mxu1 %v14754_v62  ;;  %7043 = vmatpush1.bf16.msra.mxu0 %v14755_v36  ;;  %v14765_v62 = vld [vmem:[#allocation99_spill] sm:$0xff]  ;;  %v14766_v36 = vld [vmem:[#allocation100_spill] sm:$0xff] }
0x1150   :  { %7003 = vmatprep.subr.bf16.mxu1 %v14756_v31  ;;  %7044 = vmatprep.subr.bf16.mxu0 %v14757_v57  ;;  %v14767_v31 = vld [vmem:[#allocation101_spill] sm:$0xff]  ;;  %v14768_v57 = vld [vmem:[#allocation102_spill] sm:$0xff] }
0x1153   :  { %7004 = vmatpush1.bf16.msra.mxu1 %v14758_v9  ;;  %7045 = vmatpush1.bf16.msra.mxu0 %v14759_v55  ;;  %v14769_v9 = vld [vmem:[#allocation103_spill] sm:$0xff]  ;;  %v14770_v55 = vld [vmem:[#allocation104_spill] sm:$0xff] }
0x1154   :  { %7005 = vmatprep.subr.bf16.mxu1 %v14760_v60  ;;  %7046 = vmatprep.subr.bf16.mxu0 %v14761_v14  ;;  %v14771_v60 = vld [vmem:[#allocation105_spill] sm:$0xff]  ;;  %v14772_v14 = vld [vmem:[#allocation106_spill] sm:$0xff] }
0x1157   :  { %7006 = vmatpush1.bf16.msra.mxu1 %v14762_v48  ;;  %7047 = vmatpush1.bf16.msra.mxu0 %v14763_v50  ;;  %v14773_v48 = vld [vmem:[#allocation107_spill] sm:$0xff]  ;;  %v14774_v50 = vld [vmem:[#allocation108_spill] sm:$0xff] }
0x1158   :  { %7007 = vmatprep.subr.bf16.mxu1 %v14764_v2  ;;  %7048 = vmatprep.subr.bf16.mxu0 %v14765_v62  ;;  %v14775_v2 = vld [vmem:[#allocation112_spill] sm:$0xff]  ;;  %v14776_v62 = vld [vmem:[#allocation113_spill] sm:$0xff] }
0x115b   :  { %7008 = vmatpush1.bf16.msra.mxu1 %v14766_v36  ;;  %7049 = vmatpush1.bf16.msra.mxu0 %v14767_v31  ;;  %v14777_v36 = vld [vmem:[#allocation17_spill] sm:$0xff]  ;;  %v14778_v31 = vld [vmem:[#allocation18_spill] sm:$0xff] }
0x115c   :  { %7009 = vmatprep.subr.bf16.mxu1 %v14768_v57  ;;  %7050 = vmatprep.subr.bf16.mxu0 %v14769_v9  ;;  %v14779_v57 = vld [vmem:[#allocation19_spill] sm:$0xff]  ;;  %v14780_v9 = vld [vmem:[#allocation20_spill] sm:$0xff] }
0x115f   :  { %7010 = vmatpush1.bf16.msra.mxu1 %v14770_v55  ;;  %7051 = vmatpush1.bf16.msra.mxu0 %v14771_v60  ;;  %v14781_v55 = vld [vmem:[#allocation21_spill] sm:$0xff]  ;;  %v14782_v60 = vld [vmem:[#allocation22_spill] sm:$0xff] }
0x1160   :  { %7011 = vmatprep.subr.bf16.mxu1 %v14772_v14  ;;  %7052 = vmatprep.subr.bf16.mxu0 %v14773_v48  ;;  %v14783_v14 = vld [vmem:[#allocation23_spill] sm:$0xff]  ;;  %v14784_v48 = vld [vmem:[#allocation24_spill] sm:$0xff] }
0x1163   :  { %7012 = vmatpush2.bf16.msra.mxu1 %v14774_v50  ;;  %7053 = vmatpush2.bf16.msra.mxu0 %v14775_v2  ;;  %v14785_v50 = vld [vmem:[#allocation25_spill] sm:$0xff]  ;;  %v14786_v2 = vld [vmem:[#allocation26_spill] sm:$0xff] }
0x1164   :  { %7013 = vmatprep.subr.bf16.mxu1 %v14776_v62  ;;  %7054 = vmatprep.subr.bf16.mxu0 %v14777_v36  ;;  %v14787_v62 = vld [vmem:[#allocation27_spill] sm:$0xff]  ;;  %v14788_v36 = vld [vmem:[#allocation28_spill] sm:$0xff] }
0x1167   :  { %7014 = vmatpush2.bf16.msra.mxu1 %v14778_v31  ;;  %7055 = vmatpush2.bf16.msra.mxu0 %v14779_v57  ;;  %v14789_v31 = vld [vmem:[#allocation29_spill] sm:$0xff]  ;;  %v14790_v57 = vld [vmem:[#allocation30_spill] sm:$0xff] }
0x1168   :  { %7015 = vmatprep.subr.bf16.mxu1 %v14780_v9  ;;  %7056 = vmatprep.subr.bf16.mxu0 %v14781_v55  ;;  %v14791_v9 = vld [vmem:[#allocation31_spill] sm:$0xff]  ;;  %v14792_v55 = vld [vmem:[#allocation32_spill] sm:$0xff] }
0x116b   :  { %7016 = vmatpush2.bf16.msra.mxu1 %v14782_v60  ;;  %7057 = vmatpush2.bf16.msra.mxu0 %v14783_v14  ;;  %v14793_v60 = vld [vmem:[#allocation33_spill] sm:$0xff]  ;;  %v14794_v14 = vld [vmem:[#allocation34_spill] sm:$0xff] }
0x116c   :  { %7017 = vmatprep.subr.bf16.mxu1 %v14784_v48  ;;  %7058 = vmatprep.subr.bf16.mxu0 %v14785_v50  ;;  %v14795_v48 = vld [vmem:[#allocation35_spill] sm:$0xff]  ;;  %v14796_v50 = vld [vmem:[#allocation36_spill] sm:$0xff] }
0x116f   :  { %7018 = vmatpush2.bf16.msra.mxu1 %v14786_v2  ;;  %7059 = vmatpush2.bf16.msra.mxu0 %v14787_v62  ;;  %v14797_v2 = vld [vmem:[#allocation37_spill] sm:$0xff]  ;;  %v14798_v62 = vld [vmem:[#allocation38_spill] sm:$0xff] }
0x1170   :  { %7019 = vmatprep.subr.bf16.mxu1 %v14788_v36  ;;  %7060 = vmatprep.subr.bf16.mxu0 %v14789_v31  ;;  %v14799_v36 = vld [vmem:[#allocation39_spill] sm:$0xff]  ;;  %v14800_v31 = vld [vmem:[#allocation40_spill] sm:$0xff] }
0x1173   :  { %7020 = vmatpush2.bf16.msra.mxu1 %v14790_v57  ;;  %7061 = vmatpush2.bf16.msra.mxu0 %v14791_v9  ;;  %v14801_v57 = vld [vmem:[#allocation41_spill] sm:$0xff]  ;;  %v14802_v9 = vld [vmem:[#allocation42_spill] sm:$0xff] }
0x1174   :  { %7021 = vmatprep.subr.bf16.mxu1 %v14792_v55  ;;  %7062 = vmatprep.subr.bf16.mxu0 %v14793_v60  ;;  %v14803_v55 = vld [vmem:[#allocation43_spill] sm:$0xff]  ;;  %v14804_v60 = vld [vmem:[#allocation44_spill] sm:$0xff] }
0x1177   :  { %7022 = vmatpush2.bf16.msra.mxu1 %v14794_v14  ;;  %7063 = vmatpush2.bf16.msra.mxu0 %v14795_v48  ;;  %v14805_v14 = vld [vmem:[#allocation45_spill] sm:$0xff] }
0x1178   :  { %7023 = vmatprep.subr.bf16.mxu1 %v14796_v50  ;;  %7064 = vmatprep.subr.bf16.mxu0 %v14797_v2 }
0x117b   :  { %7024 = vmatpush2.bf16.msra.mxu1 %v14798_v62  ;;  %7065 = vmatpush2.bf16.msra.mxu0 %v14799_v36 }
0x117c   :  { %7025 = vmatprep.subr.bf16.mxu1 %v14800_v31  ;;  %7066 = vmatprep.subr.bf16.mxu0 %v14801_v57 }
0x117f   :  { %7026 = vmatpush2.bf16.msra.mxu1 %v14802_v9  ;;  %7067 = vmatpush2.bf16.msra.mxu0 %v14803_v55 }
0x1180   :  { %7077 = vmatprep.subr.bf16.mxu1 %v14804_v60  ;;  %7118 = vmatprep.subr.bf16.mxu0 %v14805_v14 }
0x11c2   :  { %v6771_v48 = vpop.f32.mrf.mxu1  ;;  %v6812_v50 = vpop.f32.mrf.mxu0 }
0x11c3   :  { %v6909_v34 = vrot.slane %v6771_v48, 4  ;;  %v6911_v31 = vrot.slane %v6812_v50, 4 }
0x11c4   :  { %v6773_v21 = vpop.f32.mrf.mxu1  ;;  %v6814_v2 = vpop.f32.mrf.mxu0 }
0x11c5   :  { %v6910_v22 = vrot.slane %v6773_v21, 4  ;;  %v6925_v57 = vadd.f32 %v6909_v34, %v11764_v25  ;;  %v6927_v9 = vadd.f32 %v6911_v31, %v11768_v32  ;;  %v6912_v55 = vrot.slane %v6814_v2, 4 }
0x11c6   :  { %v6775_v53 = vpop.f32.mrf.mxu1  ;;  %v6816_v62 = vpop.f32.mrf.mxu0 }
0x11c7   :  { %v6926_v60 = vadd.f32 %v6910_v22, %v11770_v46  ;;  %v8553_v20 = vmul.f32 -1.442695, %v6925_v57  ;;  %v8555_v14 = vmul.f32 -1.442695, %v6927_v9  ;;  %v6928_v7 = vadd.f32 %v6912_v55, %v14526_v52 }
0x11c8   :  { %v6776_v37 = vpop.f32.mrf.mxu1  ;;  %v6817_v36 = vpop.f32.mrf.mxu0 }
0x11c9   :  { %v8554_v10 = vmul.f32 -1.442695, %v6926_v60  ;;  %9192 = vpow2.f32 %v8553_v20  ;;  %v8556_v53 = vmul.f32 -1.442695, %v6928_v7 }
0x11ca   :  { %9194 = vpow2.f32 %v8555_v14 }
0x11cb   :  { %9196 = vpow2.f32 %v8554_v10 }
0x11cc   :  { %9198 = vpow2.f32 %v8556_v53 }
0x11d6   :  { %v9193_v37 = vpop.eup %9192 }
0x11d7   :  { %v9195_v48 = vpop.eup %9194  ;;  %v6939_v62 = vadd.f32 1.0, %v9193_v37 }
0x11d8   :  { %v9197_v21 = vpop.eup %9196  ;;  %v6951_v34 = vadd.f32 1.0, %v9195_v48 }
0x11d9   :  { %v9199_v36 = vpop.eup %9198  ;;  %v6940_v31 = vadd.f32 1.0, %v9197_v21  ;;  %9200 = vrcp.f32 %v6939_v62 }
0x11da   :  { %9202 = vrcp.f32 %v6951_v34  ;;  %v6952_v9 = vadd.f32 1.0, %v9199_v36 }
0x11db   :  { %9204 = vrcp.f32 %v6940_v31  ;;  %v6973_v31 = vrot.slane %v12248_v11, 7 }
0x1202   :  { %v6853_v2 = vpop.f32.mrf.mxu1  ;;  %v6894_v50 = vpop.f32.mrf.mxu0 }
0x1203   :  { %v6913_v22 = vrot.slane %v6853_v2, 4  ;;  %v6915_v57 = vrot.slane %v6894_v50, 4  ;;  %v9201_v50 = vpop.eup %9200 }
0x1204   :  { %v6855_v55 = vpop.f32.mrf.mxu1  ;;  %v6896_v20 = vpop.f32.mrf.mxu0 }
0x1205   :  { %v6929_v7 = vadd.f32 %v6913_v22, %v11786_v24  ;;  %v6931_v10 = vadd.f32 %v6915_v57, %v11788_v47  ;;  %v6914_v60 = vrot.slane %v6855_v55, 4  ;;  %v6916_v14 = vrot.slane %v6896_v20, 4  ;;  %v9203_v22 = vpop.eup %9202 }
0x1206   :  { %v6857_v53 = vpop.f32.mrf.mxu1  ;;  %v6898_v37 = vpop.f32.mrf.mxu0 }
0x1207   :  { %9206 = vtanh.f32 %v6929_v7  ;;  %v8557_v48 = vmul.f32 -1.442695, %v6931_v10  ;;  %v6930_v21 = vadd.f32 %v6914_v60, %v11790_v63  ;;  %v6932_v62 = vadd.f32 %v6916_v14, %v11792_v3  ;;  %v9205_v57 = vpop.eup %9204 }
0x1208   :  { %9208 = vrcp.f32 %v6952_v9  ;;  %v6858_v34 = vpop.f32.mrf.mxu1  ;;  %v6899_v36 = vpop.f32.mrf.mxu0  ;;  %v6977_v7 = vmul.f32 %v9203_v22, %v6973_v31  ;;  %v6974_v60 = vrot.slane %v12251_v27, 7 }
0x1209   :  { %9210 = vpow2.f32 %v8557_v48  ;;  %v8558_v2 = vmul.f32 -1.442695, %v6932_v62 }
0x120a   :  { %9212 = vtanh.f32 %v6930_v21 }
0x120b   :  { %9214 = vpow2.f32 %v8558_v2 }
0x1214   :  { %v9207_v55 = vpop.eup %9206 }
0x1215   :  { %v9209_v20 = vpop.eup %9208  ;;  %v6979_v10 = vmul.f32 %v9207_v55, %v9201_v50 }
0x1216   :  { %v9211_v53 = vpop.eup %9210  ;;  %v6978_v62 = vmul.f32 %v9209_v20, %v6974_v60  ;;  %v14808_v60 = vld [vmem:[#allocation116_spill] sm:$0xff] }
0x1217   :  { %v9213_v14 = vpop.eup %9212  ;;  %v12398_v9 = vadd.f32 %v6979_v10, %v6977_v7  ;;  %v6965_v37 = vadd.f32 1.0, %v9211_v53  ;;  %v14807_v53 = vld [vmem:[#allocation82_spill] sm:$0xff] }
0x1218   :  { %v9215_v48 = vpop.eup %9214  ;;  %v6980_v21 = vmul.f32 %v9213_v14, %v9205_v57  ;;  %v14806_v57 = vld [vmem:[#allocation81_spill] sm:$0xff] }
0x1219   :  { %9216 = vtanh.f32 %v12398_v9  ;;  %v6966_v34 = vadd.f32 1.0, %v9215_v48  ;;  %v14809_v14 = vld [vmem:[#allocation117_spill] sm:$0xff]  ;;  %v14811_v48 = vld [vmem:[#allocation119_spill] sm:$0xff] }
0x121a   :  { %9218 = vrcp.f32 %v6965_v37  ;;  %v12401_v36 = vadd.f32 %v6980_v21, %v6978_v62  ;;  %v14810_v37 = vld [vmem:[#allocation118_spill] sm:$0xff]  ;;  %v14812_v62 = vld [vmem:[#allocation120_spill] sm:$0xff]  ;;  %v14813_v21 = vld [vmem:[#allocation121_spill] sm:$0xff] }
0x121b   :  { %9220 = vrcp.f32 %v6966_v34  ;;  %v14814_v34 = vld [vmem:[#allocation122_spill] sm:$0xff] }
0x121c   :  { %9222 = vtanh.f32 %v12401_v36 }
0x1226   :  { %v9217_v11 = vpop.eup %9216 }
0x1227   :  { %v9219_v2 = vpop.eup %9218 }
0x1228   :  { %v9221_v50 = vpop.eup %9220  ;;  %v6985_v27 = vmul.f32 %v9219_v2, %v9217_v11  ;;  %v14815_v11 = vld [vmem:[#allocation123_spill] sm:$0xff]  ;;  %v14816_v2 = vld [vmem:[#allocation124_spill] sm:$0xff] }
0x1229   :  { %v9223_v22 = vpop.eup %9222 }
0x122a   :  { %v6986_v31 = vmul.f32 %v9223_v22, %v9221_v50  ;;  %v6987_v55 = vpack.c.bf16 %v6985_v27, %v6985_v27  ;;  %v14817_v50 = vld [vmem:[#allocation125_spill] sm:$0xff]  ;;  %v14818_v27 = vld [vmem:[#allocation126_spill] sm:$0xff]  ;;  %v14819_v22 = vld [vmem:[#allocation127_spill] sm:$0xff] }
0x122c   :  { %v6988_v7 = vpack.c.bf16 %v6986_v31, %v6986_v31  ;;  %v12404_v20 = vrot.slane %v6987_v55, 2  ;;  %v14820_v31 = vld [vmem:[#allocation128_spill] sm:$0xff]  ;;  %v14821_v55 = vld [vmem:[#allocation129_spill] sm:$0xff] }
0x122e   :  { %v6992_v10 = vrot.slane %v6988_v7, 2  ;;  %v14822_v7 = vld [vmem:[#allocation130_spill] sm:$0xff] }
0x1230   :  { %7027 = vmatprep.mubr.bf16.mxu1 %v6992_v10  ;;  %7068 = vmatprep.mubr.bf16.mxu0 %v6992_v10 }
0x1231   :  { %7028 = vmatmul.mubr.bf16.vlgmr.msra.gmra.mxu1 %v12404_v20  ;;  %7069 = vmatmul.mubr.bf16.vlgmr.msra.gmra.mxu0 %v12404_v20 }
0x1232   :  { %7078 = vmatpush1.bf16.msra.mxu1 %v14433_v40  ;;  %7119 = vmatpush1.bf16.msra.mxu0 %v14434_v49 }
0x1233   :  { %7109 = vmatprep.mubr.bf16.mxu1 %v6992_v10  ;;  %7150 = vmatprep.mubr.bf16.mxu0 %v6992_v10  ;;  %v14823_v10 = vld [vmem:[#allocation131_spill] sm:$0xff] }
0x1234   :  { %7079 = vmatprep.subr.bf16.mxu1 %v14435_v16  ;;  %7120 = vmatprep.subr.bf16.mxu0 %v14436_v41 }
0x1236   :  { %7080 = vmatpush1.bf16.msra.mxu1 %v14437_v0  ;;  %7121 = vmatpush1.bf16.msra.mxu0 %v14438_v54 }
0x1237   :  { %7081 = vmatprep.subr.bf16.mxu1 %v14439_v44  ;;  %7122 = vmatprep.subr.bf16.mxu0 %v14440_v5 }
0x123a   :  { %7082 = vmatpush1.bf16.msra.mxu1 %v14527_v45  ;;  %7123 = vmatpush1.bf16.msra.mxu0 %v14528_v61 }
0x123b   :  { %7083 = vmatprep.subr.bf16.mxu1 %v14529_v28  ;;  %7124 = vmatprep.subr.bf16.mxu0 %v14530_v4 }
0x123e   :  { %7084 = vmatpush1.bf16.msra.mxu1 %v14531_v42  ;;  %7125 = vmatpush1.bf16.msra.mxu0 %v14532_v51 }
0x123f   :  { %7085 = vmatprep.subr.bf16.mxu1 %v14533_v13  ;;  %7126 = vmatprep.subr.bf16.mxu0 %v14620_v8 }
0x1242   :  { %7086 = vmatpush1.bf16.msra.mxu1 %v14621_v12  ;;  %7127 = vmatpush1.bf16.msra.mxu0 %v14622_v6 }
0x1243   :  { %7087 = vmatprep.subr.bf16.mxu1 %v14623_v17  ;;  %7128 = vmatprep.subr.bf16.mxu0 %v14624_v33 }
0x1246   :  { %7088 = vmatpush1.bf16.msra.mxu1 %v14625_v19  ;;  %7129 = vmatpush1.bf16.msra.mxu0 %v14626_v39 }
0x1247   :  { %7089 = vmatprep.subr.bf16.mxu1 %v14627_v15  ;;  %7130 = vmatprep.subr.bf16.mxu0 %v14628_v38 }
0x124a   :  { %7090 = vmatpush1.bf16.msra.mxu1 %v14629_v29  ;;  %7131 = vmatpush1.bf16.msra.mxu0 %v14630_v18 }
0x124b   :  { %7091 = vmatprep.subr.bf16.mxu1 %v14545_v23  ;;  %7132 = vmatprep.subr.bf16.mxu0 %v14546_v1 }
0x124e   :  { %7092 = vmatpush1.bf16.msra.mxu1 %v14547_v58  ;;  %7133 = vmatpush1.bf16.msra.mxu0 %v14631_v26 }
0x124f   :  { %7093 = vmatprep.subr.bf16.mxu1 %v14632_v59  ;;  %7134 = vmatprep.subr.bf16.mxu0 %v14550_v43 }
0x1252   :  { %7094 = vmatpush2.bf16.msra.mxu1 %v14551_v56  ;;  %7135 = vmatpush2.bf16.msra.mxu0 %v14552_v30 }
0x1253   :  { %7095 = vmatprep.subr.bf16.mxu1 %v14553_v35  ;;  %7136 = vmatprep.subr.bf16.mxu0 %v14806_v57 }
0x1256   :  { %7096 = vmatpush2.bf16.msra.mxu1 %v14807_v53  ;;  %7137 = vmatpush2.bf16.msra.mxu0 %v14808_v60 }
0x1257   :  { %7097 = vmatprep.subr.bf16.mxu1 %v14809_v14  ;;  %7138 = vmatprep.subr.bf16.mxu0 %v14810_v37 }
0x125a   :  { %7098 = vmatpush2.bf16.msra.mxu1 %v14811_v48  ;;  %7139 = vmatpush2.bf16.msra.mxu0 %v14812_v62 }
0x125b   :  { %7099 = vmatprep.subr.bf16.mxu1 %v14813_v21  ;;  %7140 = vmatprep.subr.bf16.mxu0 %v14814_v34  ;;  %v14824_v21 = vld [vmem:[#allocation132_spill] sm:$0xff]  ;;  %v14825_v34 = vld [vmem:[#allocation133_spill] sm:$0xff] }
0x125e   :  { %7100 = vmatpush2.bf16.msra.mxu1 %v14815_v11  ;;  %7141 = vmatpush2.bf16.msra.mxu0 %v14816_v2  ;;  %v14826_v11 = vld [vmem:[#allocation134_spill] sm:$0xff]  ;;  %v14827_v2 = vld [vmem:[#allocation135_spill] sm:$0xff] }
0x125f   :  { %7101 = vmatprep.subr.bf16.mxu1 %v14817_v50  ;;  %7142 = vmatprep.subr.bf16.mxu0 %v14818_v27  ;;  %v14828_v50 = vld [vmem:[#allocation136_spill] sm:$0xff]  ;;  %v14829_v27 = vld [vmem:[#allocation137_spill] sm:$0xff] }
0x1262   :  { %7102 = vmatpush2.bf16.msra.mxu1 %v14819_v22  ;;  %7143 = vmatpush2.bf16.msra.mxu0 %v14820_v31  ;;  %v14830_v22 = vld [vmem:[#allocation138_spill] sm:$0xff]  ;;  %v14831_v31 = vld [vmem:[#allocation139_spill] sm:$0xff] }
0x1263   :  { %7103 = vmatprep.subr.bf16.mxu1 %v14821_v55  ;;  %7144 = vmatprep.subr.bf16.mxu0 %v14822_v7  ;;  %v14832_v55 = vld [vmem:[#allocation140_spill] sm:$0xff] }
0x1264   :  { %v14833_v7 = vld [vmem:[#allocation84_spill] sm:$0xff] }
0x1266   :  { %7104 = vmatpush2.bf16.msra.mxu1 %v14823_v10  ;;  %7145 = vmatpush2.bf16.msra.mxu0 %v14824_v21  ;;  %v14834_v10 = vld [vmem:[#allocation85_spill] sm:$0xff] }
0x1267   :  { %7105 = vmatprep.subr.bf16.mxu1 %v14825_v34  ;;  %7146 = vmatprep.subr.bf16.mxu0 %v14826_v11  ;;  %v14835_v11 = vld [vmem:[#allocation86_spill] sm:$0xff]  ;;  %v14844_v34 = vld [vmem:[#allocation92_spill] sm:$0xff] }
0x126a   :  { %7106 = vmatpush2.bf16.msra.mxu1 %v14827_v2  ;;  %7147 = vmatpush2.bf16.msra.mxu0 %v14828_v50  ;;  %v14836_v2 = vld [vmem:[#allocation87_spill] sm:$0xff]  ;;  %v14837_v50 = vld [vmem:[#allocation88_spill] sm:$0xff] }
0x126b   :  { %7107 = vmatprep.subr.bf16.mxu1 %v14829_v27  ;;  %7148 = vmatprep.subr.bf16.mxu0 %v14830_v22  ;;  %v14838_v27 = vld [vmem:[#allocation89_spill] sm:$0xff]  ;;  %v14839_v22 = vld [vmem:[#allocation90_spill] sm:$0xff] }
0x126e   :  { %7108 = vmatpush2.bf16.msra.mxu1 %v14831_v31  ;;  %7149 = vmatpush2.bf16.msra.mxu0 %v14832_v55  ;;  %v14840_v31 = vld [vmem:[#allocation146_spill] sm:$0xff]  ;;  %v14841_v55 = vld [vmem:[#allocation147_spill] sm:$0xff] }
0x126f   :  { %7257 = vmatprep.subr.bf16.mxu1 %v14833_v7  ;;  %7298 = vmatprep.subr.bf16.mxu0 %v14834_v10  ;;  %v14842_v7 = vld [vmem:[#allocation148_spill] sm:$0xff]  ;;  %v14843_v10 = vld [vmem:[#allocation91_spill] sm:$0xff] }
0x1271   :  { %7110 = vmatmul.mubr.bf16.vlgmr.msra.gmra.mxu1 %v12404_v20  ;;  %7151 = vmatmul.mubr.bf16.vlgmr.msra.gmra.mxu0 %v12404_v20  ;;  %v14845_v20 = vld [vmem:[#allocation93_spill] sm:$0xff] }
0x1272   :  { %7258 = vmatpush1.bf16.msra.mxu1 %v14835_v11  ;;  %7299 = vmatpush1.bf16.msra.mxu0 %v14836_v2  ;;  %v14846_v11 = vld [vmem:[#allocation94_spill] sm:$0xff]  ;;  %v14847_v2 = vld [vmem:[#allocation95_spill] sm:$0xff] }
0x1273   :  { %7259 = vmatprep.subr.bf16.mxu1 %v14837_v50  ;;  %7300 = vmatprep.subr.bf16.mxu0 %v14838_v27  ;;  %v14848_v50 = vld [vmem:[#allocation109_spill] sm:$0xff]  ;;  %v14849_v27 = vld [vmem:[#allocation110_spill] sm:$0xff] }
0x1276   :  { %7260 = vmatpush1.bf16.msra.mxu1 %v14839_v22  ;;  %7301 = vmatpush1.bf16.msra.mxu0 %v14840_v31  ;;  %v14850_v22 = vld [vmem:[#allocation111_spill] sm:$0xff]  ;;  %v14851_v31 = vld [vmem:[#allocation114_spill] sm:$0xff] }
0x1277   :  { %7261 = vmatprep.subr.bf16.mxu1 %v14841_v55  ;;  %7302 = vmatprep.subr.bf16.mxu0 %v14842_v7  ;;  %v14852_v55 = vld [vmem:[#allocation115_spill] sm:$0xff]  ;;  %v14853_v7 = vld [vmem:[#allocation149_spill] sm:$0xff] }
0x127a   :  { %7262 = vmatpush1.bf16.msra.mxu1 %v14843_v10  ;;  %7303 = vmatpush1.bf16.msra.mxu0 %v14844_v34  ;;  %v14854_v10 = vld [vmem:[#allocation150_spill] sm:$0xff]  ;;  %v14855_v34 = vld [vmem:[#allocation96_spill] sm:$0xff] }
0x127b   :  { %7263 = vmatprep.subr.bf16.mxu1 %v14845_v20  ;;  %7304 = vmatprep.subr.bf16.mxu0 %v14846_v11  ;;  %v14856_v20 = vld [vmem:[#allocation97_spill] sm:$0xff]  ;;  %v14857_v11 = vld [vmem:[#allocation98_spill] sm:$0xff] }
0x127e   :  { %7264 = vmatpush1.bf16.msra.mxu1 %v14847_v2  ;;  %7305 = vmatpush1.bf16.msra.mxu0 %v14848_v50  ;;  %v14858_v2 = vld [vmem:[#allocation99_spill] sm:$0xff]  ;;  %v14859_v50 = vld [vmem:[#allocation100_spill] sm:$0xff] }
0x127f   :  { %7265 = vmatprep.subr.bf16.mxu1 %v14849_v27  ;;  %7306 = vmatprep.subr.bf16.mxu0 %v14850_v22  ;;  %v14860_v27 = vld [vmem:[#allocation101_spill] sm:$0xff]  ;;  %v14861_v22 = vld [vmem:[#allocation102_spill] sm:$0xff] }
0x1282   :  { %7266 = vmatpush1.bf16.msra.mxu1 %v14851_v31  ;;  %7307 = vmatpush1.bf16.msra.mxu0 %v14852_v55  ;;  %v14862_v31 = vld [vmem:[#allocation103_spill] sm:$0xff]  ;;  %v14863_v55 = vld [vmem:[#allocation104_spill] sm:$0xff] }
0x1283   :  { %7267 = vmatprep.subr.bf16.mxu1 %v14853_v7  ;;  %7308 = vmatprep.subr.bf16.mxu0 %v14854_v10  ;;  %v14864_v7 = vld [vmem:[#allocation105_spill] sm:$0xff]  ;;  %v14865_v10 = vld [vmem:[#allocation106_spill] sm:$0xff] }
0x1286   :  { %7268 = vmatpush1.bf16.msra.mxu1 %v14855_v34  ;;  %7309 = vmatpush1.bf16.msra.mxu0 %v14856_v20  ;;  %v14866_v34 = vld [vmem:[#allocation107_spill] sm:$0xff]  ;;  %v14867_v20 = vld [vmem:[#allocation108_spill] sm:$0xff] }
0x1287   :  { %7269 = vmatprep.subr.bf16.mxu1 %v14857_v11  ;;  %7310 = vmatprep.subr.bf16.mxu0 %v14858_v2  ;;  %v14868_v11 = vld [vmem:[#allocation112_spill] sm:$0xff]  ;;  %v14869_v2 = vld [vmem:[#allocation113_spill] sm:$0xff] }
0x128a   :  { %7270 = vmatpush1.bf16.msra.mxu1 %v14859_v50  ;;  %7311 = vmatpush1.bf16.msra.mxu0 %v14860_v27  ;;  %v14870_v50 = vld [vmem:[#allocation17_spill] sm:$0xff]  ;;  %v14871_v27 = vld [vmem:[#allocation18_spill] sm:$0xff] }
0x128b   :  { %7271 = vmatprep.subr.bf16.mxu1 %v14861_v22  ;;  %7312 = vmatprep.subr.bf16.mxu0 %v14862_v31  ;;  %v14872_v22 = vld [vmem:[#allocation19_spill] sm:$0xff]  ;;  %v14873_v31 = vld [vmem:[#allocation20_spill] sm:$0xff] }
0x128e   :  { %7272 = vmatpush1.bf16.msra.mxu1 %v14863_v55  ;;  %7313 = vmatpush1.bf16.msra.mxu0 %v14864_v7  ;;  %v14874_v55 = vld [vmem:[#allocation21_spill] sm:$0xff]  ;;  %v14875_v7 = vld [vmem:[#allocation22_spill] sm:$0xff] }
0x128f   :  { %7273 = vmatprep.subr.bf16.mxu1 %v14865_v10  ;;  %7314 = vmatprep.subr.bf16.mxu0 %v14866_v34  ;;  %v14876_v10 = vld [vmem:[#allocation23_spill] sm:$0xff]  ;;  %v14877_v34 = vld [vmem:[#allocation24_spill] sm:$0xff] }
0x1292   :  { %7274 = vmatpush2.bf16.msra.mxu1 %v14867_v20  ;;  %7315 = vmatpush2.bf16.msra.mxu0 %v14868_v11  ;;  %v14878_v20 = vld [vmem:[#allocation25_spill] sm:$0xff]  ;;  %v14879_v11 = vld [vmem:[#allocation26_spill] sm:$0xff] }
0x1293   :  { %7275 = vmatprep.subr.bf16.mxu1 %v14869_v2  ;;  %7316 = vmatprep.subr.bf16.mxu0 %v14870_v50  ;;  %v14880_v2 = vld [vmem:[#allocation27_spill] sm:$0xff]  ;;  %v14881_v50 = vld [vmem:[#allocation28_spill] sm:$0xff] }
0x1296   :  { %7276 = vmatpush2.bf16.msra.mxu1 %v14871_v27  ;;  %7317 = vmatpush2.bf16.msra.mxu0 %v14872_v22  ;;  %v14882_v27 = vld [vmem:[#allocation29_spill] sm:$0xff]  ;;  %v14883_v22 = vld [vmem:[#allocation30_spill] sm:$0xff] }
0x1297   :  { %7277 = vmatprep.subr.bf16.mxu1 %v14873_v31  ;;  %7318 = vmatprep.subr.bf16.mxu0 %v14874_v55  ;;  %v14884_v31 = vld [vmem:[#allocation31_spill] sm:$0xff]  ;;  %v14885_v55 = vld [vmem:[#allocation32_spill] sm:$0xff] }
0x129a   :  { %7278 = vmatpush2.bf16.msra.mxu1 %v14875_v7  ;;  %7319 = vmatpush2.bf16.msra.mxu0 %v14876_v10  ;;  %v14886_v7 = vld [vmem:[#allocation33_spill] sm:$0xff]  ;;  %v14887_v10 = vld [vmem:[#allocation34_spill] sm:$0xff] }
0x129b   :  { %7279 = vmatprep.subr.bf16.mxu1 %v14877_v34  ;;  %7320 = vmatprep.subr.bf16.mxu0 %v14878_v20  ;;  %v14888_v34 = vld [vmem:[#allocation35_spill] sm:$0xff]  ;;  %v14889_v20 = vld [vmem:[#allocation36_spill] sm:$0xff] }
0x129e   :  { %7280 = vmatpush2.bf16.msra.mxu1 %v14879_v11  ;;  %7321 = vmatpush2.bf16.msra.mxu0 %v14880_v2  ;;  %v14890_v11 = vld [vmem:[#allocation37_spill] sm:$0xff]  ;;  %v14891_v2 = vld [vmem:[#allocation38_spill] sm:$0xff] }
0x129f   :  { %7281 = vmatprep.subr.bf16.mxu1 %v14881_v50  ;;  %7322 = vmatprep.subr.bf16.mxu0 %v14882_v27  ;;  %v14892_v50 = vld [vmem:[#allocation39_spill] sm:$0xff]  ;;  %v14893_v27 = vld [vmem:[#allocation40_spill] sm:$0xff] }
0x12a2   :  { %7282 = vmatpush2.bf16.msra.mxu1 %v14883_v22  ;;  %7323 = vmatpush2.bf16.msra.mxu0 %v14884_v31  ;;  %v14894_v22 = vld [vmem:[#allocation41_spill] sm:$0xff]  ;;  %v14895_v31 = vld [vmem:[#allocation42_spill] sm:$0xff] }
0x12a3   :  { %7283 = vmatprep.subr.bf16.mxu1 %v14885_v55  ;;  %7324 = vmatprep.subr.bf16.mxu0 %v14886_v7  ;;  %v14896_v55 = vld [vmem:[#allocation43_spill] sm:$0xff]  ;;  %v14897_v7 = vld [vmem:[#allocation44_spill] sm:$0xff] }
0x12a6   :  { %7284 = vmatpush2.bf16.msra.mxu1 %v14887_v10  ;;  %7325 = vmatpush2.bf16.msra.mxu0 %v14888_v34  ;;  %v14898_v10 = vld [vmem:[#allocation45_spill] sm:$0xff] }
0x12a7   :  { %7285 = vmatprep.subr.bf16.mxu1 %v14889_v20  ;;  %7326 = vmatprep.subr.bf16.mxu0 %v14890_v11 }
0x12aa   :  { %7286 = vmatpush2.bf16.msra.mxu1 %v14891_v2  ;;  %7327 = vmatpush2.bf16.msra.mxu0 %v14892_v50 }
0x12ab   :  { %7287 = vmatprep.subr.bf16.mxu1 %v14893_v27  ;;  %7328 = vmatprep.subr.bf16.mxu0 %v14894_v22 }
0x12ae   :  { %7288 = vmatpush2.bf16.msra.mxu1 %v14895_v31  ;;  %7329 = vmatpush2.bf16.msra.mxu0 %v14896_v55 }
0x12af   :  { %7339 = vmatprep.subr.bf16.mxu1 %v14897_v7  ;;  %7380 = vmatprep.subr.bf16.mxu0 %v14898_v10 }
0x12f1   :  { %v7029_v34 = vpop.f32.mrf.mxu1  ;;  %v7070_v20 = vpop.f32.mrf.mxu0 }
0x12f2   :  { %v7167_v37 = vrot.slane %v7029_v34, 3  ;;  %v7169_v27 = vrot.slane %v7070_v20, 3 }
0x12f3   :  { %v7031_v21 = vpop.f32.mrf.mxu1  ;;  %v7072_v11 = vpop.f32.mrf.mxu0 }
0x12f4   :  { %v7168_v14 = vrot.slane %v7031_v21, 3  ;;  %v7183_v22 = vadd.f32 %v7167_v37, %v11764_v25  ;;  %v7185_v31 = vadd.f32 %v7169_v27, %v11768_v32  ;;  %v7170_v55 = vrot.slane %v7072_v11, 3 }
0x12f5   :  { %v7033_v62 = vpop.f32.mrf.mxu1  ;;  %v7074_v2 = vpop.f32.mrf.mxu0 }
0x12f6   :  { %v7184_v7 = vadd.f32 %v7168_v14, %v11770_v46  ;;  %v8559_v60 = vmul.f32 -1.442695, %v7183_v22  ;;  %v8561_v10 = vmul.f32 -1.442695, %v7185_v31  ;;  %v7186_v53 = vadd.f32 %v7170_v55, %v14526_v52 }
0x12f7   :  { %v7034_v48 = vpop.f32.mrf.mxu1  ;;  %v7075_v50 = vpop.f32.mrf.mxu0 }
0x12f8   :  { %v8560_v57 = vmul.f32 -1.442695, %v7184_v7  ;;  %9224 = vpow2.f32 %v8559_v60  ;;  %v8562_v62 = vmul.f32 -1.442695, %v7186_v53 }
0x12f9   :  { %9226 = vpow2.f32 %v8561_v10 }
0x12fa   :  { %9228 = vpow2.f32 %v8560_v57 }
0x12fb   :  { %9230 = vpow2.f32 %v8562_v62 }
0x1305   :  { %v9225_v48 = vpop.eup %9224 }
0x1306   :  { %v9227_v34 = vpop.eup %9226  ;;  %v7197_v2 = vadd.f32 1.0, %v9225_v48 }
0x1307   :  { %v9229_v21 = vpop.eup %9228  ;;  %v7209_v37 = vadd.f32 1.0, %v9227_v34 }
0x1308   :  { %v9231_v50 = vpop.eup %9230  ;;  %v7198_v27 = vadd.f32 1.0, %v9229_v21  ;;  %9232 = vrcp.f32 %v7197_v2 }
0x1309   :  { %9234 = vrcp.f32 %v7209_v37  ;;  %v7210_v31 = vadd.f32 1.0, %v9231_v50 }
0x130a   :  { %9236 = vrcp.f32 %v7198_v27  ;;  %v7231_v27 = vrot.slane %v12398_v9, 7 }
0x1331   :  { %v7111_v11 = vpop.f32.mrf.mxu1  ;;  %v7152_v20 = vpop.f32.mrf.mxu0 }
0x1332   :  { %v7171_v14 = vrot.slane %v7111_v11, 3  ;;  %v7173_v22 = vrot.slane %v7152_v20, 3  ;;  %v9233_v20 = vpop.eup %9232 }
0x1333   :  { %v7113_v55 = vpop.f32.mrf.mxu1  ;;  %v7154_v60 = vpop.f32.mrf.mxu0 }
0x1334   :  { %v7187_v53 = vadd.f32 %v7171_v14, %v11786_v24  ;;  %v7189_v57 = vadd.f32 %v7173_v22, %v11788_v47  ;;  %v7172_v7 = vrot.slane %v7113_v55, 3  ;;  %v7174_v10 = vrot.slane %v7154_v60, 3  ;;  %v9235_v14 = vpop.eup %9234 }
0x1335   :  { %v7115_v62 = vpop.f32.mrf.mxu1  ;;  %v7156_v48 = vpop.f32.mrf.mxu0 }
0x1336   :  { %9238 = vtanh.f32 %v7187_v53  ;;  %v8563_v34 = vmul.f32 -1.442695, %v7189_v57  ;;  %v7188_v21 = vadd.f32 %v7172_v7, %v11790_v63  ;;  %v7190_v2 = vadd.f32 %v7174_v10, %v11792_v3  ;;  %v9237_v22 = vpop.eup %9236 }
0x1337   :  { %9240 = vrcp.f32 %v7210_v31  ;;  %v7116_v37 = vpop.f32.mrf.mxu1  ;;  %v7157_v50 = vpop.f32.mrf.mxu0  ;;  %v7235_v53 = vmul.f32 %v9235_v14, %v7231_v27  ;;  %v7232_v7 = vrot.slane %v12401_v36, 7 }
0x1338   :  { %9242 = vpow2.f32 %v8563_v34  ;;  %v8564_v11 = vmul.f32 -1.442695, %v7190_v2 }
0x1339   :  { %9244 = vtanh.f32 %v7188_v21 }
0x133a   :  { %9246 = vpow2.f32 %v8564_v11 }
0x1343   :  { %v9239_v55 = vpop.eup %9238 }
0x1344   :  { %v9241_v60 = vpop.eup %9240  ;;  %v7237_v57 = vmul.f32 %v9239_v55, %v9233_v20 }
0x1345   :  { %v9243_v62 = vpop.eup %9242  ;;  %v7236_v2 = vmul.f32 %v9241_v60, %v7232_v7  ;;  %v14899_v7 = vld [vmem:[#allocation81_spill] sm:$0xff] }
0x1346   :  { %v9245_v10 = vpop.eup %9244  ;;  %v12548_v31 = vadd.f32 %v7237_v57, %v7235_v53  ;;  %v7223_v48 = vadd.f32 1.0, %v9243_v62 }
0x1347   :  { %v9247_v34 = vpop.eup %9246  ;;  %v7238_v21 = vmul.f32 %v9245_v10, %v9237_v22  ;;  %v14900_v10 = vld [vmem:[#allocation82_spill] sm:$0xff] }
0x1348   :  { %9248 = vtanh.f32 %v12548_v31  ;;  %v7224_v37 = vadd.f32 1.0, %v9247_v34  ;;  %v14902_v34 = vld [vmem:[#allocation117_spill] sm:$0xff] }
0x1349   :  { %9250 = vrcp.f32 %v7223_v48  ;;  %v12551_v50 = vadd.f32 %v7238_v21, %v7236_v2  ;;  %v14901_v48 = vld [vmem:[#allocation116_spill] sm:$0xff]  ;;  %v14903_v2 = vld [vmem:[#allocation118_spill] sm:$0xff]  ;;  %v14904_v21 = vld [vmem:[#allocation119_spill] sm:$0xff] }
0x134a   :  { %9252 = vrcp.f32 %v7224_v37  ;;  %v14905_v37 = vld [vmem:[#allocation120_spill] sm:$0xff] }
0x134b   :  { %9254 = vtanh.f32 %v12551_v50 }
0x1355   :  { %v9249_v9 = vpop.eup %9248 }
0x1356   :  { %v9251_v11 = vpop.eup %9250 }
0x1357   :  { %v9253_v20 = vpop.eup %9252  ;;  %v7243_v36 = vmul.f32 %v9251_v11, %v9249_v9  ;;  %v14906_v9 = vld [vmem:[#allocation121_spill] sm:$0xff]  ;;  %v14907_v11 = vld [vmem:[#allocation122_spill] sm:$0xff] }
0x1358   :  { %v9255_v14 = vpop.eup %9254 }
0x1359   :  { %v7244_v27 = vmul.f32 %v9255_v14, %v9253_v20  ;;  %v7245_v55 = vpack.c.bf16 %v7243_v36, %v7243_v36  ;;  %v14908_v20 = vld [vmem:[#allocation123_spill] sm:$0xff]  ;;  %v14909_v36 = vld [vmem:[#allocation124_spill] sm:$0xff]  ;;  %v14910_v14 = vld [vmem:[#allocation125_spill] sm:$0xff] }
0x135b   :  { %v7246_v53 = vpack.c.bf16 %v7244_v27, %v7244_v27  ;;  %v7248_v57 = vshrl.u32 %v7245_v55, 16  ;;  %v14911_v27 = vld [vmem:[#allocation126_spill] sm:$0xff]  ;;  %v14912_v55 = vld [vmem:[#allocation127_spill] sm:$0xff] }
0x135d   :  { %v7252_v60 = vshrl.u32 %v7246_v53, 16  ;;  %v12554_v62 = vrot.slane %v7248_v57, 2  ;;  %v14913_v53 = vld [vmem:[#allocation128_spill] sm:$0xff]  ;;  %v14914_v57 = vld [vmem:[#allocation129_spill] sm:$0xff] }
0x135f   :  { %v7254_v22 = vrot.slane %v7252_v60, 2  ;;  %v14915_v60 = vld [vmem:[#allocation130_spill] sm:$0xff] }
0x1361   :  { %7289 = vmatprep.mubr.bf16.mxu1 %v7254_v22  ;;  %7330 = vmatprep.mubr.bf16.mxu0 %v7254_v22 }
0x1362   :  { %7290 = vmatmul.mubr.bf16.vlgmr.msra.gmra.mxu1 %v12554_v62  ;;  %7331 = vmatmul.mubr.bf16.vlgmr.msra.gmra.mxu0 %v12554_v62 }
0x1363   :  { %7340 = vmatpush1.bf16.msra.mxu1 %v14433_v40  ;;  %7381 = vmatpush1.bf16.msra.mxu0 %v14434_v49 }
0x1364   :  { %7371 = vmatprep.mubr.bf16.mxu1 %v7254_v22  ;;  %7412 = vmatprep.mubr.bf16.mxu0 %v7254_v22  ;;  %v14916_v22 = vld [vmem:[#allocation131_spill] sm:$0xff] }
0x1365   :  { %7341 = vmatprep.subr.bf16.mxu1 %v14435_v16  ;;  %7382 = vmatprep.subr.bf16.mxu0 %v14436_v41 }
0x1367   :  { %7342 = vmatpush1.bf16.msra.mxu1 %v14437_v0  ;;  %7383 = vmatpush1.bf16.msra.mxu0 %v14438_v54 }
0x1368   :  { %7343 = vmatprep.subr.bf16.mxu1 %v14439_v44  ;;  %7384 = vmatprep.subr.bf16.mxu0 %v14440_v5 }
0x136b   :  { %7344 = vmatpush1.bf16.msra.mxu1 %v14527_v45  ;;  %7385 = vmatpush1.bf16.msra.mxu0 %v14528_v61 }
0x136c   :  { %7345 = vmatprep.subr.bf16.mxu1 %v14529_v28  ;;  %7386 = vmatprep.subr.bf16.mxu0 %v14530_v4 }
0x136f   :  { %7346 = vmatpush1.bf16.msra.mxu1 %v14531_v42  ;;  %7387 = vmatpush1.bf16.msra.mxu0 %v14532_v51 }
0x1370   :  { %7347 = vmatprep.subr.bf16.mxu1 %v14533_v13  ;;  %7388 = vmatprep.subr.bf16.mxu0 %v14620_v8 }
0x1373   :  { %7348 = vmatpush1.bf16.msra.mxu1 %v14621_v12  ;;  %7389 = vmatpush1.bf16.msra.mxu0 %v14622_v6 }
0x1374   :  { %7349 = vmatprep.subr.bf16.mxu1 %v14623_v17  ;;  %7390 = vmatprep.subr.bf16.mxu0 %v14624_v33 }
0x1377   :  { %7350 = vmatpush1.bf16.msra.mxu1 %v14625_v19  ;;  %7391 = vmatpush1.bf16.msra.mxu0 %v14626_v39 }
0x1378   :  { %7351 = vmatprep.subr.bf16.mxu1 %v14627_v15  ;;  %7392 = vmatprep.subr.bf16.mxu0 %v14628_v38 }
0x137b   :  { %7352 = vmatpush1.bf16.msra.mxu1 %v14629_v29  ;;  %7393 = vmatpush1.bf16.msra.mxu0 %v14630_v18 }
0x137c   :  { %7353 = vmatprep.subr.bf16.mxu1 %v14545_v23  ;;  %7394 = vmatprep.subr.bf16.mxu0 %v14546_v1 }
0x137f   :  { %7354 = vmatpush1.bf16.msra.mxu1 %v14547_v58  ;;  %7395 = vmatpush1.bf16.msra.mxu0 %v14631_v26 }
0x1380   :  { %7355 = vmatprep.subr.bf16.mxu1 %v14632_v59  ;;  %7396 = vmatprep.subr.bf16.mxu0 %v14550_v43 }
0x1383   :  { %7356 = vmatpush2.bf16.msra.mxu1 %v14551_v56  ;;  %7397 = vmatpush2.bf16.msra.mxu0 %v14552_v30 }
0x1384   :  { %7357 = vmatprep.subr.bf16.mxu1 %v14553_v35  ;;  %7398 = vmatprep.subr.bf16.mxu0 %v14899_v7 }
0x1387   :  { %7358 = vmatpush2.bf16.msra.mxu1 %v14900_v10  ;;  %7399 = vmatpush2.bf16.msra.mxu0 %v14901_v48 }
0x1388   :  { %7359 = vmatprep.subr.bf16.mxu1 %v14902_v34  ;;  %7400 = vmatprep.subr.bf16.mxu0 %v14903_v2 }
0x138b   :  { %7360 = vmatpush2.bf16.msra.mxu1 %v14904_v21  ;;  %7401 = vmatpush2.bf16.msra.mxu0 %v14905_v37 }
0x138c   :  { %7361 = vmatprep.subr.bf16.mxu1 %v14906_v9  ;;  %7402 = vmatprep.subr.bf16.mxu0 %v14907_v11  ;;  %v14917_v9 = vld [vmem:[#allocation132_spill] sm:$0xff]  ;;  %v14918_v11 = vld [vmem:[#allocation133_spill] sm:$0xff] }
0x138f   :  { %7362 = vmatpush2.bf16.msra.mxu1 %v14908_v20  ;;  %7403 = vmatpush2.bf16.msra.mxu0 %v14909_v36  ;;  %v14919_v20 = vld [vmem:[#allocation134_spill] sm:$0xff]  ;;  %v14920_v36 = vld [vmem:[#allocation135_spill] sm:$0xff] }
0x1390   :  { %7363 = vmatprep.subr.bf16.mxu1 %v14910_v14  ;;  %7404 = vmatprep.subr.bf16.mxu0 %v14911_v27  ;;  %v14921_v14 = vld [vmem:[#allocation136_spill] sm:$0xff]  ;;  %v14922_v27 = vld [vmem:[#allocation137_spill] sm:$0xff] }
0x1393   :  { %7364 = vmatpush2.bf16.msra.mxu1 %v14912_v55  ;;  %7405 = vmatpush2.bf16.msra.mxu0 %v14913_v53  ;;  %v14923_v55 = vld [vmem:[#allocation138_spill] sm:$0xff]  ;;  %v14924_v53 = vld [vmem:[#allocation139_spill] sm:$0xff] }
0x1394   :  { %7365 = vmatprep.subr.bf16.mxu1 %v14914_v57  ;;  %7406 = vmatprep.subr.bf16.mxu0 %v14915_v60  ;;  %v14925_v57 = vld [vmem:[#allocation140_spill] sm:$0xff] }
0x1395   :  { %v14926_v60 = vld [vmem:[#allocation84_spill] sm:$0xff] }
0x1397   :  { %7366 = vmatpush2.bf16.msra.mxu1 %v14916_v22  ;;  %7407 = vmatpush2.bf16.msra.mxu0 %v14917_v9  ;;  %v14927_v22 = vld [vmem:[#allocation85_spill] sm:$0xff] }
0x1398   :  { %7367 = vmatprep.subr.bf16.mxu1 %v14918_v11  ;;  %7408 = vmatprep.subr.bf16.mxu0 %v14919_v20  ;;  %v14928_v20 = vld [vmem:[#allocation86_spill] sm:$0xff]  ;;  %v14937_v11 = vld [vmem:[#allocation92_spill] sm:$0xff] }
0x139b   :  { %7368 = vmatpush2.bf16.msra.mxu1 %v14920_v36  ;;  %7409 = vmatpush2.bf16.msra.mxu0 %v14921_v14  ;;  %v14929_v36 = vld [vmem:[#allocation87_spill] sm:$0xff]  ;;  %v14930_v14 = vld [vmem:[#allocation88_spill] sm:$0xff] }
0x139c   :  { %7369 = vmatprep.subr.bf16.mxu1 %v14922_v27  ;;  %7410 = vmatprep.subr.bf16.mxu0 %v14923_v55  ;;  %v14931_v27 = vld [vmem:[#allocation89_spill] sm:$0xff]  ;;  %v14932_v55 = vld [vmem:[#allocation90_spill] sm:$0xff] }
0x139f   :  { %7370 = vmatpush2.bf16.msra.mxu1 %v14924_v53  ;;  %7411 = vmatpush2.bf16.msra.mxu0 %v14925_v57  ;;  %v14933_v53 = vld [vmem:[#allocation146_spill] sm:$0xff]  ;;  %v14934_v57 = vld [vmem:[#allocation147_spill] sm:$0xff] }
0x13a0   :  { %7515 = vmatprep.subr.bf16.mxu1 %v14926_v60  ;;  %7556 = vmatprep.subr.bf16.mxu0 %v14927_v22  ;;  %v14935_v60 = vld [vmem:[#allocation148_spill] sm:$0xff]  ;;  %v14936_v22 = vld [vmem:[#allocation91_spill] sm:$0xff] }
0x13a2   :  { %7372 = vmatmul.mubr.bf16.vlgmr.msra.gmra.mxu1 %v12554_v62  ;;  %7413 = vmatmul.mubr.bf16.vlgmr.msra.gmra.mxu0 %v12554_v62  ;;  %v14938_v62 = vld [vmem:[#allocation93_spill] sm:$0xff] }
0x13a3   :  { %7516 = vmatpush1.bf16.msra.mxu1 %v14928_v20  ;;  %7557 = vmatpush1.bf16.msra.mxu0 %v14929_v36  ;;  %v14939_v20 = vld [vmem:[#allocation94_spill] sm:$0xff]  ;;  %v14940_v36 = vld [vmem:[#allocation95_spill] sm:$0xff] }
0x13a4   :  { %7517 = vmatprep.subr.bf16.mxu1 %v14930_v14  ;;  %7558 = vmatprep.subr.bf16.mxu0 %v14931_v27  ;;  %v14941_v14 = vld [vmem:[#allocation109_spill] sm:$0xff]  ;;  %v14942_v27 = vld [vmem:[#allocation110_spill] sm:$0xff] }
0x13a7   :  { %7518 = vmatpush1.bf16.msra.mxu1 %v14932_v55  ;;  %7559 = vmatpush1.bf16.msra.mxu0 %v14933_v53  ;;  %v14943_v55 = vld [vmem:[#allocation111_spill] sm:$0xff]  ;;  %v14944_v53 = vld [vmem:[#allocation114_spill] sm:$0xff] }
0x13a8   :  { %7519 = vmatprep.subr.bf16.mxu1 %v14934_v57  ;;  %7560 = vmatprep.subr.bf16.mxu0 %v14935_v60  ;;  %v14945_v57 = vld [vmem:[#allocation115_spill] sm:$0xff]  ;;  %v14946_v60 = vld [vmem:[#allocation149_spill] sm:$0xff] }
0x13ab   :  { %7520 = vmatpush1.bf16.msra.mxu1 %v14936_v22  ;;  %7561 = vmatpush1.bf16.msra.mxu0 %v14937_v11  ;;  %v14947_v22 = vld [vmem:[#allocation150_spill] sm:$0xff]  ;;  %v14948_v11 = vld [vmem:[#allocation96_spill] sm:$0xff] }
0x13ac   :  { %7521 = vmatprep.subr.bf16.mxu1 %v14938_v62  ;;  %7562 = vmatprep.subr.bf16.mxu0 %v14939_v20  ;;  %v14949_v62 = vld [vmem:[#allocation97_spill] sm:$0xff]  ;;  %v14950_v20 = vld [vmem:[#allocation98_spill] sm:$0xff] }
0x13af   :  { %7522 = vmatpush1.bf16.msra.mxu1 %v14940_v36  ;;  %7563 = vmatpush1.bf16.msra.mxu0 %v14941_v14  ;;  %v14951_v36 = vld [vmem:[#allocation99_spill] sm:$0xff]  ;;  %v14952_v14 = vld [vmem:[#allocation100_spill] sm:$0xff] }
0x13b0   :  { %7523 = vmatprep.subr.bf16.mxu1 %v14942_v27  ;;  %7564 = vmatprep.subr.bf16.mxu0 %v14943_v55  ;;  %v14953_v27 = vld [vmem:[#allocation101_spill] sm:$0xff]  ;;  %v14954_v55 = vld [vmem:[#allocation102_spill] sm:$0xff] }
0x13b3   :  { %7524 = vmatpush1.bf16.msra.mxu1 %v14944_v53  ;;  %7565 = vmatpush1.bf16.msra.mxu0 %v14945_v57  ;;  %v14955_v53 = vld [vmem:[#allocation103_spill] sm:$0xff]  ;;  %v14956_v57 = vld [vmem:[#allocation104_spill] sm:$0xff] }
0x13b4   :  { %7525 = vmatprep.subr.bf16.mxu1 %v14946_v60  ;;  %7566 = vmatprep.subr.bf16.mxu0 %v14947_v22  ;;  %v14957_v60 = vld [vmem:[#allocation105_spill] sm:$0xff]  ;;  %v14958_v22 = vld [vmem:[#allocation106_spill] sm:$0xff] }
0x13b7   :  { %7526 = vmatpush1.bf16.msra.mxu1 %v14948_v11  ;;  %7567 = vmatpush1.bf16.msra.mxu0 %v14949_v62  ;;  %v14959_v11 = vld [vmem:[#allocation107_spill] sm:$0xff]  ;;  %v14960_v62 = vld [vmem:[#allocation108_spill] sm:$0xff] }
0x13b8   :  { %7527 = vmatprep.subr.bf16.mxu1 %v14950_v20  ;;  %7568 = vmatprep.subr.bf16.mxu0 %v14951_v36  ;;  %v14961_v20 = vld [vmem:[#allocation112_spill] sm:$0xff]  ;;  %v14962_v36 = vld [vmem:[#allocation113_spill] sm:$0xff] }
0x13bb   :  { %7528 = vmatpush1.bf16.msra.mxu1 %v14952_v14  ;;  %7569 = vmatpush1.bf16.msra.mxu0 %v14953_v27  ;;  %v14963_v14 = vld [vmem:[#allocation17_spill] sm:$0xff]  ;;  %v14964_v27 = vld [vmem:[#allocation18_spill] sm:$0xff] }
0x13bc   :  { %7529 = vmatprep.subr.bf16.mxu1 %v14954_v55  ;;  %7570 = vmatprep.subr.bf16.mxu0 %v14955_v53  ;;  %v14965_v55 = vld [vmem:[#allocation19_spill] sm:$0xff]  ;;  %v14966_v53 = vld [vmem:[#allocation20_spill] sm:$0xff] }
0x13bf   :  { %7530 = vmatpush1.bf16.msra.mxu1 %v14956_v57  ;;  %7571 = vmatpush1.bf16.msra.mxu0 %v14957_v60  ;;  %v14967_v57 = vld [vmem:[#allocation21_spill] sm:$0xff]  ;;  %v14968_v60 = vld [vmem:[#allocation22_spill] sm:$0xff] }
0x13c0   :  { %7531 = vmatprep.subr.bf16.mxu1 %v14958_v22  ;;  %7572 = vmatprep.subr.bf16.mxu0 %v14959_v11  ;;  %v14969_v22 = vld [vmem:[#allocation23_spill] sm:$0xff]  ;;  %v14970_v11 = vld [vmem:[#allocation24_spill] sm:$0xff] }
0x13c3   :  { %7532 = vmatpush2.bf16.msra.mxu1 %v14960_v62  ;;  %7573 = vmatpush2.bf16.msra.mxu0 %v14961_v20  ;;  %v14971_v62 = vld [vmem:[#allocation25_spill] sm:$0xff]  ;;  %v14972_v20 = vld [vmem:[#allocation26_spill] sm:$0xff] }
0x13c4   :  { %7533 = vmatprep.subr.bf16.mxu1 %v14962_v36  ;;  %7574 = vmatprep.subr.bf16.mxu0 %v14963_v14  ;;  %v14973_v36 = vld [vmem:[#allocation27_spill] sm:$0xff]  ;;  %v14974_v14 = vld [vmem:[#allocation28_spill] sm:$0xff] }
0x13c7   :  { %7534 = vmatpush2.bf16.msra.mxu1 %v14964_v27  ;;  %7575 = vmatpush2.bf16.msra.mxu0 %v14965_v55  ;;  %v14975_v27 = vld [vmem:[#allocation29_spill] sm:$0xff]  ;;  %v14976_v55 = vld [vmem:[#allocation30_spill] sm:$0xff] }
0x13c8   :  { %7535 = vmatprep.subr.bf16.mxu1 %v14966_v53  ;;  %7576 = vmatprep.subr.bf16.mxu0 %v14967_v57  ;;  %v14977_v53 = vld [vmem:[#allocation31_spill] sm:$0xff]  ;;  %v14978_v57 = vld [vmem:[#allocation32_spill] sm:$0xff] }
0x13cb   :  { %7536 = vmatpush2.bf16.msra.mxu1 %v14968_v60  ;;  %7577 = vmatpush2.bf16.msra.mxu0 %v14969_v22  ;;  %v14979_v60 = vld [vmem:[#allocation33_spill] sm:$0xff]  ;;  %v14980_v22 = vld [vmem:[#allocation34_spill] sm:$0xff] }
0x13cc   :  { %7537 = vmatprep.subr.bf16.mxu1 %v14970_v11  ;;  %7578 = vmatprep.subr.bf16.mxu0 %v14971_v62  ;;  %v14981_v11 = vld [vmem:[#allocation35_spill] sm:$0xff]  ;;  %v14982_v62 = vld [vmem:[#allocation36_spill] sm:$0xff] }
0x13cf   :  { %7538 = vmatpush2.bf16.msra.mxu1 %v14972_v20  ;;  %7579 = vmatpush2.bf16.msra.mxu0 %v14973_v36  ;;  %v14983_v20 = vld [vmem:[#allocation37_spill] sm:$0xff]  ;;  %v14984_v36 = vld [vmem:[#allocation38_spill] sm:$0xff] }
0x13d0   :  { %7539 = vmatprep.subr.bf16.mxu1 %v14974_v14  ;;  %7580 = vmatprep.subr.bf16.mxu0 %v14975_v27  ;;  %v14985_v14 = vld [vmem:[#allocation39_spill] sm:$0xff]  ;;  %v14986_v27 = vld [vmem:[#allocation40_spill] sm:$0xff] }
0x13d3   :  { %7540 = vmatpush2.bf16.msra.mxu1 %v14976_v55  ;;  %7581 = vmatpush2.bf16.msra.mxu0 %v14977_v53  ;;  %v14987_v55 = vld [vmem:[#allocation41_spill] sm:$0xff]  ;;  %v14988_v53 = vld [vmem:[#allocation42_spill] sm:$0xff] }
0x13d4   :  { %7541 = vmatprep.subr.bf16.mxu1 %v14978_v57  ;;  %7582 = vmatprep.subr.bf16.mxu0 %v14979_v60  ;;  %v14989_v57 = vld [vmem:[#allocation43_spill] sm:$0xff]  ;;  %v14990_v60 = vld [vmem:[#allocation44_spill] sm:$0xff] }
0x13d7   :  { %7542 = vmatpush2.bf16.msra.mxu1 %v14980_v22  ;;  %7583 = vmatpush2.bf16.msra.mxu0 %v14981_v11  ;;  %v14991_v22 = vld [vmem:[#allocation45_spill] sm:$0xff] }
0x13d8   :  { %7543 = vmatprep.subr.bf16.mxu1 %v14982_v62  ;;  %7584 = vmatprep.subr.bf16.mxu0 %v14983_v20 }
0x13db   :  { %7544 = vmatpush2.bf16.msra.mxu1 %v14984_v36  ;;  %7585 = vmatpush2.bf16.msra.mxu0 %v14985_v14 }
0x13dc   :  { %7545 = vmatprep.subr.bf16.mxu1 %v14986_v27  ;;  %7586 = vmatprep.subr.bf16.mxu0 %v14987_v55 }
0x13df   :  { %7546 = vmatpush2.bf16.msra.mxu1 %v14988_v53  ;;  %7587 = vmatpush2.bf16.msra.mxu0 %v14989_v57 }
0x13e0   :  { %7597 = vmatprep.subr.bf16.mxu1 %v14990_v60  ;;  %7638 = vmatprep.subr.bf16.mxu0 %v14991_v22 }
0x1422   :  { %v7291_v11 = vpop.f32.mrf.mxu1  ;;  %v7332_v62 = vpop.f32.mrf.mxu0 }
0x1423   :  { %v7429_v2 = vrot.slane %v7291_v11, 2  ;;  %v7431_v27 = vrot.slane %v7332_v62, 2 }
0x1424   :  { %v7293_v9 = vpop.f32.mrf.mxu1  ;;  %v7334_v20 = vpop.f32.mrf.mxu0 }
0x1425   :  { %v7430_v34 = vrot.slane %v7293_v9, 2  ;;  %v7445_v55 = vadd.f32 %v7429_v2, %v11764_v25  ;;  %v7447_v53 = vadd.f32 %v7431_v27, %v11768_v32  ;;  %v7432_v57 = vrot.slane %v7334_v20, 2 }
0x1426   :  { %v7295_v37 = vpop.f32.mrf.mxu1  ;;  %v7336_v36 = vpop.f32.mrf.mxu0 }
0x1427   :  { %v7446_v60 = vadd.f32 %v7430_v34, %v11770_v46  ;;  %v8565_v48 = vmul.f32 -1.442695, %v7445_v55  ;;  %v8567_v22 = vmul.f32 -1.442695, %v7447_v53  ;;  %v7448_v10 = vadd.f32 %v7432_v57, %v14526_v52 }
0x1428   :  { %v7296_v21 = vpop.f32.mrf.mxu1  ;;  %v7337_v14 = vpop.f32.mrf.mxu0 }
0x1429   :  { %v8566_v7 = vmul.f32 -1.442695, %v7446_v60  ;;  %9256 = vpow2.f32 %v8565_v48  ;;  %v8568_v37 = vmul.f32 -1.442695, %v7448_v10 }
0x142a   :  { %9258 = vpow2.f32 %v8567_v22 }
0x142b   :  { %9260 = vpow2.f32 %v8566_v7 }
0x142c   :  { %9262 = vpow2.f32 %v8568_v37 }
0x1436   :  { %v9257_v21 = vpop.eup %9256 }
0x1437   :  { %v9259_v11 = vpop.eup %9258  ;;  %v7459_v62 = vadd.f32 1.0, %v9257_v21 }
0x1438   :  { %v9261_v9 = vpop.eup %9260  ;;  %v7471_v2 = vadd.f32 1.0, %v9259_v11 }
0x1439   :  { %v9263_v36 = vpop.eup %9262  ;;  %v7460_v14 = vadd.f32 1.0, %v9261_v9  ;;  %9264 = vrcp.f32 %v7459_v62 }
0x143a   :  { %9266 = vrcp.f32 %v7471_v2  ;;  %v7472_v53 = vadd.f32 1.0, %v9263_v36 }
0x143b   :  { %9268 = vrcp.f32 %v7460_v14  ;;  %v7493_v14 = vrot.slane %v12548_v31, 7 }
0x1462   :  { %v7373_v20 = vpop.f32.mrf.mxu1  ;;  %v7414_v27 = vpop.f32.mrf.mxu0 }
0x1463   :  { %v7433_v34 = vrot.slane %v7373_v20, 2  ;;  %v7435_v55 = vrot.slane %v7414_v27, 2  ;;  %v9265_v27 = vpop.eup %9264 }
0x1464   :  { %v7375_v57 = vpop.f32.mrf.mxu1  ;;  %v7416_v48 = vpop.f32.mrf.mxu0 }
0x1465   :  { %v7449_v10 = vadd.f32 %v7433_v34, %v11786_v24  ;;  %v7451_v7 = vadd.f32 %v7435_v55, %v11788_v47  ;;  %v7434_v60 = vrot.slane %v7375_v57, 2  ;;  %v7436_v22 = vrot.slane %v7416_v48, 2  ;;  %v9267_v34 = vpop.eup %9266 }
0x1466   :  { %v7377_v37 = vpop.f32.mrf.mxu1  ;;  %v7418_v21 = vpop.f32.mrf.mxu0 }
0x1467   :  { %9270 = vtanh.f32 %v7449_v10  ;;  %v8569_v11 = vmul.f32 -1.442695, %v7451_v7  ;;  %v7450_v9 = vadd.f32 %v7434_v60, %v11790_v63  ;;  %v7452_v62 = vadd.f32 %v7436_v22, %v11792_v3  ;;  %v9269_v55 = vpop.eup %9268 }
0x1468   :  { %9272 = vrcp.f32 %v7472_v53  ;;  %v7378_v2 = vpop.f32.mrf.mxu1  ;;  %v7419_v36 = vpop.f32.mrf.mxu0  ;;  %v7497_v10 = vmul.f32 %v9267_v34, %v7493_v14  ;;  %v7494_v60 = vrot.slane %v12551_v50, 7 }
0x1469   :  { %9274 = vpow2.f32 %v8569_v11  ;;  %v8570_v20 = vmul.f32 -1.442695, %v7452_v62 }
0x146a   :  { %9276 = vtanh.f32 %v7450_v9 }
0x146b   :  { %9278 = vpow2.f32 %v8570_v20 }
0x1474   :  { %v9271_v57 = vpop.eup %9270 }
0x1475   :  { %v9273_v48 = vpop.eup %9272  ;;  %v7499_v7 = vmul.f32 %v9271_v57, %v9265_v27 }
0x1476   :  { %v9275_v37 = vpop.eup %9274  ;;  %v7498_v62 = vmul.f32 %v9273_v48, %v7494_v60  ;;  %v7785_v60 = vld [vmem:[%s12935_s10 + $0x30] sm:$0xff] }
0x1477   :  { %v9277_v22 = vpop.eup %9276  ;;  %v12698_v53 = vadd.f32 %v7499_v7, %v7497_v10  ;;  %v7485_v21 = vadd.f32 1.0, %v9275_v37  ;;  %v7786_v37 = vld [vmem:[%s12935_s10 + $0x38] sm:$0xff] }
0x1478   :  { %v9279_v11 = vpop.eup %9278  ;;  %v7500_v9 = vmul.f32 %v9277_v22, %v9269_v55  ;;  %v7787_v55 = vld [vmem:[%s12935_s10 + $0x40] sm:$0xff]  ;;  %v7784_v22 = vld [vmem:[%s12935_s10 + $0x28] sm:$0xff] }
0x1479   :  { %9280 = vtanh.f32 %v12698_v53  ;;  %v7486_v2 = vadd.f32 1.0, %v9279_v11  ;;  %v7782_v11 = vld [vmem:[%s12935_s10 + $0x18] sm:$0xff] }
0x147a   :  { %9282 = vrcp.f32 %v7485_v21  ;;  %v12701_v36 = vadd.f32 %v7500_v9, %v7498_v62  ;;  %v7783_v21 = vld [vmem:[%s12935_s10 + $0x20] sm:$0xff]  ;;  %v7781_v62 = vld [vmem:[%s12935_s10 + $0x10] sm:$0xff]  ;;  %v7780_v9 = vld [vmem:[%s12935_s10 + $0x8] sm:$0xff] }
0x147b   :  { %9284 = vrcp.f32 %v7486_v2  ;;  %v7779_v2 = vld [vmem:[%s12935_s10] sm:$0xff] }
0x147c   :  { %9286 = vtanh.f32 %v12701_v36 }
0x1486   :  { %v9281_v31 = vpop.eup %9280 }
0x1487   :  { %v9283_v20 = vpop.eup %9282 }
0x1488   :  { %v9285_v27 = vpop.eup %9284  ;;  %v7505_v50 = vmul.f32 %v9283_v20, %v9281_v31  ;;  %v15020_v31 = vld [vmem:[#allocation83_spill] sm:$0xff]  ;;  %v7810_v20 = vld [vmem:[%s12936_s11 + $0x78] sm:$0xff] }
0x1489   :  { %v9287_v34 = vpop.eup %9286 }
0x148a   :  { %v7506_v14 = vmul.f32 %v9287_v34, %v9285_v27  ;;  %v7507_v57 = vpack.c.bf16 %v7505_v50, %v7505_v50  ;;  %v7809_v27 = vld [vmem:[%s12936_s11 + $0x70] sm:$0xff]  ;;  %v7808_v50 = vld [vmem:[%s12936_s11 + $0x68] sm:$0xff]  ;;  %v7807_v34 = vld [vmem:[%s12936_s11 + $0x60] sm:$0xff] }
0x148c   :  { %v7508_v10 = vpack.c.bf16 %v7506_v14, %v7506_v14  ;;  %v12704_v48 = vrot.slane %v7507_v57, 3  ;;  %v7806_v14 = vld [vmem:[%s12936_s11 + $0x58] sm:$0xff]  ;;  %v7805_v57 = vld [vmem:[%s12936_s11 + $0x50] sm:$0xff] }
0x148e   :  { %v7512_v7 = vrot.slane %v7508_v10, 3  ;;  %v7804_v10 = vld [vmem:[%s12936_s11 + $0x48] sm:$0xff] }
0x1490   :  { %7547 = vmatprep.mubr.bf16.mxu1 %v7512_v7  ;;  %7588 = vmatprep.mubr.bf16.mxu0 %v7512_v7 }
0x1491   :  { %7548 = vmatmul.mubr.bf16.vlgmr.msra.gmra.mxu1 %v12704_v48  ;;  %7589 = vmatmul.mubr.bf16.vlgmr.msra.gmra.mxu0 %v12704_v48 }
0x1492   :  { %7598 = vmatpush1.bf16.msra.mxu1 %v14433_v40  ;;  %7639 = vmatpush1.bf16.msra.mxu0 %v14434_v49  ;;  %v14992_v40 = vld [vmem:[#allocation81_spill] sm:$0xff]  ;;  %v14993_v49 = vld [vmem:[#allocation82_spill] sm:$0xff] }
0x1493   :  { %7629 = vmatprep.mubr.bf16.mxu1 %v7512_v7  ;;  %7670 = vmatprep.mubr.bf16.mxu0 %v7512_v7  ;;  %v7803_v7 = vld [vmem:[%s12936_s11 + $0x40] sm:$0xff] }
0x1494   :  { %7599 = vmatprep.subr.bf16.mxu1 %v14435_v16  ;;  %7640 = vmatprep.subr.bf16.mxu0 %v14436_v41  ;;  %v14994_v16 = vld [vmem:[#allocation116_spill] sm:$0xff]  ;;  %v14995_v41 = vld [vmem:[#allocation117_spill] sm:$0xff] }
0x1496   :  { %7600 = vmatpush1.bf16.msra.mxu1 %v14437_v0  ;;  %7641 = vmatpush1.bf16.msra.mxu0 %v14438_v54  ;;  %v14996_v0 = vld [vmem:[#allocation118_spill] sm:$0xff]  ;;  %v14997_v54 = vld [vmem:[#allocation119_spill] sm:$0xff] }
0x1497   :  { %7601 = vmatprep.subr.bf16.mxu1 %v14439_v44  ;;  %7642 = vmatprep.subr.bf16.mxu0 %v14440_v5  ;;  %v14998_v44 = vld [vmem:[#allocation120_spill] sm:$0xff]  ;;  %v14999_v5 = vld [vmem:[#allocation121_spill] sm:$0xff] }
0x149a   :  { %7602 = vmatpush1.bf16.msra.mxu1 %v14527_v45  ;;  %7643 = vmatpush1.bf16.msra.mxu0 %v14528_v61  ;;  %v15000_v45 = vld [vmem:[#allocation122_spill] sm:$0xff]  ;;  %v15001_v61 = vld [vmem:[#allocation123_spill] sm:$0xff] }
0x149b   :  { %7603 = vmatprep.subr.bf16.mxu1 %v14529_v28  ;;  %7644 = vmatprep.subr.bf16.mxu0 %v14530_v4  ;;  %v15002_v28 = vld [vmem:[#allocation124_spill] sm:$0xff]  ;;  %v15003_v4 = vld [vmem:[#allocation125_spill] sm:$0xff] }
0x149e   :  { %7604 = vmatpush1.bf16.msra.mxu1 %v14531_v42  ;;  %7645 = vmatpush1.bf16.msra.mxu0 %v14532_v51  ;;  %v15004_v42 = vld [vmem:[#allocation126_spill] sm:$0xff]  ;;  %v15005_v51 = vld [vmem:[#allocation127_spill] sm:$0xff] }
0x149f   :  { %7605 = vmatprep.subr.bf16.mxu1 %v14533_v13  ;;  %7646 = vmatprep.subr.bf16.mxu0 %v14620_v8  ;;  %v15006_v13 = vld [vmem:[#allocation128_spill] sm:$0xff] }
0x14a0   :  { %v15014_v8 = vld [vmem:[#allocation136_spill] sm:$0xff] }
0x14a2   :  { %7606 = vmatpush1.bf16.msra.mxu1 %v14621_v12  ;;  %7647 = vmatpush1.bf16.msra.mxu0 %v14622_v6  ;;  %v15015_v12 = vld [vmem:[#allocation137_spill] sm:$0xff]  ;;  %v15016_v6 = vld [vmem:[#allocation138_spill] sm:$0xff] }
0x14a3   :  { %7607 = vmatprep.subr.bf16.mxu1 %v14623_v17  ;;  %7648 = vmatprep.subr.bf16.mxu0 %v14624_v33  ;;  %v15017_v17 = vld [vmem:[#allocation139_spill] sm:$0xff]  ;;  %v15018_v33 = vld [vmem:[#allocation140_spill] sm:$0xff] }
0x14a6   :  { %7608 = vmatpush1.bf16.msra.mxu1 %v14625_v19  ;;  %7649 = vmatpush1.bf16.msra.mxu0 %v14626_v39  ;;  %v15019_v19 = vmov 0.0   ;;  %v7794_v39 = vld [vmem:[%s12935_s10 + $0x78] sm:$0xff] }
0x14a7   :  { %7609 = vmatprep.subr.bf16.mxu1 %v14627_v15  ;;  %7650 = vmatprep.subr.bf16.mxu0 %v14628_v38  ;;  %v7793_v15 = vld [vmem:[%s12935_s10 + $0x70] sm:$0xff]  ;;  %v7792_v38 = vld [vmem:[%s12935_s10 + $0x68] sm:$0xff] }
0x14aa   :  { %7610 = vmatpush1.bf16.msra.mxu1 %v14629_v29  ;;  %7651 = vmatpush1.bf16.msra.mxu0 %v14630_v18  ;;  %v7791_v29 = vld [vmem:[%s12935_s10 + $0x60] sm:$0xff]  ;;  %v7790_v18 = vld [vmem:[%s12935_s10 + $0x58] sm:$0xff] }
0x14ab   :  { %7611 = vmatprep.subr.bf16.mxu1 %v14545_v23  ;;  %7652 = vmatprep.subr.bf16.mxu0 %v14546_v1  ;;  %v15007_v23 = vld [vmem:[#allocation129_spill] sm:$0xff]  ;;  %v15008_v1 = vld [vmem:[#allocation130_spill] sm:$0xff] }
0x14ae   :  { %7612 = vmatpush1.bf16.msra.mxu1 %v14547_v58  ;;  %7653 = vmatpush1.bf16.msra.mxu0 %v14631_v26  ;;  %v15009_v58 = vld [vmem:[#allocation131_spill] sm:$0xff]  ;;  %v7789_v26 = vld [vmem:[%s12935_s10 + $0x50] sm:$0xff] }
0x14af   :  { %7613 = vmatprep.subr.bf16.mxu1 %v14632_v59  ;;  %7654 = vmatprep.subr.bf16.mxu0 %v14550_v43  ;;  %v15010_v43 = vld [vmem:[#allocation132_spill] sm:$0xff] }
0x14b0   :  { %v7788_v59 = vld [vmem:[%s12935_s10 + $0x48] sm:$0xff] }
0x14b2   :  { %7614 = vmatpush2.bf16.msra.mxu1 %v14551_v56  ;;  %7655 = vmatpush2.bf16.msra.mxu0 %v14552_v30  ;;  %v15011_v56 = vld [vmem:[#allocation133_spill] sm:$0xff]  ;;  %v15012_v30 = vld [vmem:[#allocation134_spill] sm:$0xff] }
0x14b3   :  { %7615 = vmatprep.subr.bf16.mxu1 %v14553_v35  ;;  %7656 = vmatprep.subr.bf16.mxu0 %v14992_v40  ;;  %v15013_v35 = vld [vmem:[#allocation135_spill] sm:$0xff]  ;;  %v7801_v40 = vld [vmem:[%s12936_s11 + $0x30] sm:$0xff] }
0x14b6   :  { %7616 = vmatpush2.bf16.msra.mxu1 %v14993_v49  ;;  %7657 = vmatpush2.bf16.msra.mxu0 %v14994_v16  ;;  %v7800_v49 = vld [vmem:[%s12936_s11 + $0x28] sm:$0xff]  ;;  %v7799_v16 = vld [vmem:[%s12936_s11 + $0x20] sm:$0xff] }
0x14b7   :  { %7617 = vmatprep.subr.bf16.mxu1 %v14995_v41  ;;  %7658 = vmatprep.subr.bf16.mxu0 %v14996_v0  ;;  %v7798_v41 = vld [vmem:[%s12936_s11 + $0x18] sm:$0xff]  ;;  %v7797_v0 = vld [vmem:[%s12936_s11 + $0x10] sm:$0xff] }
0x14ba   :  { %7618 = vmatpush2.bf16.msra.mxu1 %v14997_v54  ;;  %7659 = vmatpush2.bf16.msra.mxu0 %v14998_v44  ;;  %v7796_v54 = vld [vmem:[%s12936_s11 + $0x8] sm:$0xff]  ;;  %v7795_v44 = vld [vmem:[%s12936_s11] sm:$0xff] }
0x14bb   :  { %7619 = vmatprep.subr.bf16.mxu1 %v14999_v5  ;;  %7660 = vmatprep.subr.bf16.mxu0 %v15000_v45 }
0x14be   :  { %7620 = vmatpush2.bf16.msra.mxu1 %v15001_v61  ;;  %7661 = vmatpush2.bf16.msra.mxu0 %v15002_v28 }
0x14bf   :  { %7621 = vmatprep.subr.bf16.mxu1 %v15003_v4  ;;  %7662 = vmatprep.subr.bf16.mxu0 %v15004_v42 }
0x14c2   :  { %7622 = vmatpush2.bf16.msra.mxu1 %v15005_v51  ;;  %7663 = vmatpush2.bf16.msra.mxu0 %v15006_v13 }
0x14c3   :  { %7623 = vmatprep.subr.bf16.mxu1 %v15007_v23  ;;  %7664 = vmatprep.subr.bf16.mxu0 %v15008_v1 }
0x14c6   :  { %7624 = vmatpush2.bf16.msra.mxu1 %v15009_v58  ;;  %7665 = vmatpush2.bf16.msra.mxu0 %v15010_v43 }
0x14c7   :  { %7625 = vmatprep.subr.bf16.mxu1 %v15011_v56  ;;  %7666 = vmatprep.subr.bf16.mxu0 %v15012_v30 }
0x14ca   :  { %7626 = vmatpush2.bf16.msra.mxu1 %v15013_v35  ;;  %7667 = vmatpush2.bf16.msra.mxu0 %v15014_v8 }
0x14cb   :  { %7627 = vmatprep.subr.bf16.mxu1 %v15015_v12  ;;  %7668 = vmatprep.subr.bf16.mxu0 %v15016_v6 }
0x14ce   :  { %7628 = vmatpush2.bf16.msra.mxu1 %v15017_v17  ;;  %7669 = vmatpush2.bf16.msra.mxu0 %v15018_v33 }
0x14cf   :  { %8720 = vmatprep.subr.mxu0 %v15019_v19  ;;  %8685 = vmatprep.subr.mxu1 %v15019_v19 }
0x14d1   :  { %7630 = vmatmul.mubr.bf16.vlgmr.msra.gmra.mxu1 %v12704_v48  ;;  %7671 = vmatmul.mubr.bf16.vlgmr.msra.gmra.mxu0 %v12704_v48  ;;  %v7802_v48 = vld [vmem:[%s12936_s11 + $0x38] sm:$0xff] }
0x14d2   :  { %8721 = vmatpush3.msra.mxu0 %v7794_v39  ;;  %8752 = vmatprep.mubr.msk.f32.mxu0 %vm9439_vm0, %v15019_v19 }
0x14d3   :  { %8722 = vmatprep.subr.mxu0 %v15019_v19  ;;  %8717 = vmatprep.mubr.msk.f32.mxu1 %vm9439_vm0, %v15019_v19 }
0x14d4   :  { %8723 = vmatpush3.msra.mxu0 %v7793_v15  ;;  %8686 = vmatpush3.msra.mxu1 %v7810_v20 }
0x14d5   :  { %8724 = vmatprep.subr.mxu0 %v15019_v19  ;;  %8687 = vmatprep.subr.mxu1 %v15019_v19 }
0x14d6   :  { %8725 = vmatpush3.msra.mxu0 %v7792_v38  ;;  %8688 = vmatpush3.msra.mxu1 %v7809_v27 }
0x14d7   :  { %8726 = vmatprep.subr.mxu0 %v15019_v19  ;;  %8689 = vmatprep.subr.mxu1 %v15019_v19 }
0x14d8   :  { %8727 = vmatpush3.msra.mxu0 %v7791_v29  ;;  %8690 = vmatpush3.msra.mxu1 %v7808_v50 }
0x14d9   :  { %8728 = vmatprep.subr.mxu0 %v15019_v19  ;;  %8691 = vmatprep.subr.mxu1 %v15019_v19 }
0x14da   :  { %8729 = vmatpush3.msra.mxu0 %v7790_v18  ;;  %8692 = vmatpush3.msra.mxu1 %v7807_v34 }
0x14db   :  { %8730 = vmatprep.subr.mxu0 %v15019_v19  ;;  %8693 = vmatprep.subr.mxu1 %v15019_v19 }
0x14dc   :  { %8731 = vmatpush3.msra.mxu0 %v7789_v26  ;;  %8694 = vmatpush3.msra.mxu1 %v7806_v14 }
0x14dd   :  { %8732 = vmatprep.subr.mxu0 %v15019_v19  ;;  %8695 = vmatprep.subr.mxu1 %v15019_v19 }
0x14de   :  { %8733 = vmatpush3.msra.mxu0 %v7788_v59  ;;  %8696 = vmatpush3.msra.mxu1 %v7805_v57  ;;  %v7751_v57 = vrot.slane %v12698_v53, 7 }
0x14df   :  { %8734 = vmatprep.subr.mxu0 %v15019_v19  ;;  %8697 = vmatprep.subr.mxu1 %v15019_v19 }
0x14e0   :  { %8735 = vmatpush3.msra.mxu0 %v7787_v55  ;;  %8698 = vmatpush3.msra.mxu1 %v7804_v10 }
0x14e1   :  { %8736 = vmatprep.subr.mxu0 %v15019_v19  ;;  %8699 = vmatprep.subr.mxu1 %v15019_v19 }
0x14e2   :  { %8737 = vmatpush3.msra.mxu0 %v7786_v37  ;;  %8700 = vmatpush3.msra.mxu1 %v7803_v7 }
0x14e3   :  { %8738 = vmatprep.subr.mxu0 %v15019_v19  ;;  %8701 = vmatprep.subr.mxu1 %v15019_v19 }
0x14e4   :  { %8739 = vmatpush3.msra.mxu0 %v7785_v60  ;;  %8702 = vmatpush3.msra.mxu1 %v7802_v48 }
0x14e5   :  { %8740 = vmatprep.subr.mxu0 %v15019_v19  ;;  %8703 = vmatprep.subr.mxu1 %v15019_v19 }
0x14e6   :  { %8741 = vmatpush3.msra.mxu0 %v7784_v22  ;;  %8704 = vmatpush3.msra.mxu1 %v7801_v40 }
0x14e7   :  { %8742 = vmatprep.subr.mxu0 %v15019_v19  ;;  %8705 = vmatprep.subr.mxu1 %v15019_v19 }
0x14e8   :  { %8743 = vmatpush3.msra.mxu0 %v7783_v21  ;;  %8706 = vmatpush3.msra.mxu1 %v7800_v49 }
0x14e9   :  { %8744 = vmatprep.subr.mxu0 %v15019_v19  ;;  %8707 = vmatprep.subr.mxu1 %v15019_v19 }
0x14ea   :  { %8745 = vmatpush3.msra.mxu0 %v7782_v11  ;;  %8708 = vmatpush3.msra.mxu1 %v7799_v16 }
0x14eb   :  { %8746 = vmatprep.subr.mxu0 %v15019_v19  ;;  %8709 = vmatprep.subr.mxu1 %v15019_v19 }
0x14ec   :  { %8747 = vmatpush3.msra.mxu0 %v7781_v62  ;;  %8710 = vmatpush3.msra.mxu1 %v7798_v41 }
0x14ed   :  { %8748 = vmatprep.subr.mxu0 %v15019_v19  ;;  %8711 = vmatprep.subr.mxu1 %v15019_v19 }
0x14ee   :  { %8749 = vmatpush3.msra.mxu0 %v7780_v9  ;;  %8712 = vmatpush3.msra.mxu1 %v7797_v0 }
0x14ef   :  { %8750 = vmatprep.subr.mxu0 %v15019_v19  ;;  %8713 = vmatprep.subr.mxu1 %v15019_v19 }
0x14f0   :  { %8751 = vmatpush3.msra.mxu0 %v7779_v2  ;;  %8714 = vmatpush3.msra.mxu1 %v7796_v54 }
0x14f1   :  { %8753 = vmatmul.mubr.f32.vlgmr.msra.gmra.mxu0 %v15020_v31  ;;  %8715 = vmatprep.subr.mxu1 %v15019_v19 }
0x14f2   :  { %8716 = vmatpush3.msra.mxu1 %v7795_v44 }
0x1551   :  { %v7549_v5 = vpop.f32.mrf.mxu1  ;;  %v7590_v45 = vpop.f32.mrf.mxu0 }
0x1552   :  { %v7687_v23 = vrot.slane %v7549_v5, 1  ;;  %v7689_v1 = vrot.slane %v7590_v45, 1 }
0x1553   :  { %v7551_v61 = vpop.f32.mrf.mxu1  ;;  %v7592_v28 = vpop.f32.mrf.mxu0 }
0x1554   :  { %v7688_v58 = vrot.slane %v7551_v61, 1  ;;  %v7703_v43 = vadd.f32 %v7687_v23, %v11764_v25  ;;  %v7705_v56 = vadd.f32 %v7689_v1, %v11768_v32  ;;  %v7690_v30 = vrot.slane %v7592_v28, 1 }
0x1555   :  { %v7553_v4 = vpop.f32.mrf.mxu1  ;;  %v7594_v42 = vpop.f32.mrf.mxu0 }
0x1556   :  { %v7704_v35 = vadd.f32 %v7688_v58, %v11770_v46  ;;  %v8571_v8 = vmul.f32 -1.442695, %v7703_v43  ;;  %v8573_v12 = vmul.f32 -1.442695, %v7705_v56  ;;  %v7706_v6 = vadd.f32 %v7690_v30, %v14526_v52  ;;  %v8577_v56 = vld [vmem:[%s12937_s12] ss:$0 sm:$0xff] }
0x1557   :  { %v7554_v51 = vpop.f32.mrf.mxu1  ;;  %v7595_v13 = vpop.f32.mrf.mxu0  ;;  %s9404_s12 = scalar_lea.vmem %s7979_s14, 32 }
0x1558   :  { %v8572_v17 = vmul.f32 -1.442695, %v7704_v35  ;;  %9288 = vpow2.f32 %v8571_v8  ;;  %v8574_v33 = vmul.f32 -1.442695, %v7706_v6  ;;  %p9405_p6 = scmp.ne.s32.totalorder %s7979_s14, %s9404_s12  ;;  %p9410_p8 = scmp.lt.s32.totalorder %s9404_s12, %s9404_s12 }
0x1559   :  { %9290 = vpow2.f32 %v8573_v12 }
0x155a   :  { %9292 = vpow2.f32 %v8572_v17  ;;  %p9411_p9 = por %p9410_p8, %p9409_p7 }
0x155b   :  { %9294 = vpow2.f32 %v8574_v33 }
0x155c   :  { %p9412_p10 = pnand %p9411_p9, %p9405_p6 }
0x1565   :  { %v9289_v19 = vpop.eup %9288 }
0x1566   :  { %v9291_v39 = vpop.eup %9290  ;;  %v7717_v38 = vadd.f32 1.0, %v9289_v19 }
0x1567   :  { %v9293_v15 = vpop.eup %9292  ;;  %v7729_v25 = vadd.f32 1.0, %v9291_v39 }
0x1568   :  { %v9295_v29 = vpop.eup %9294  ;;  %v7718_v32 = vadd.f32 1.0, %v9293_v15  ;;  %9296 = vrcp.f32 %v7717_v38 }
0x1569   :  { %9298 = vrcp.f32 %v7729_v25  ;;  %v7730_v52 = vadd.f32 1.0, %v9295_v29 }
0x156a   :  { %9300 = vrcp.f32 %v7718_v32 }
0x1591   :  { %v7631_v18 = vpop.f32.mrf.mxu1  ;;  %v7672_v26 = vpop.f32.mrf.mxu0 }
0x1592   :  { %v7691_v46 = vrot.slane %v7631_v18, 1  ;;  %v7693_v59 = vrot.slane %v7672_v26, 1 }
0x1593   :  { %v7633_v55 = vpop.f32.mrf.mxu1  ;;  %v7674_v37 = vpop.f32.mrf.mxu0 }
0x1594   :  { %v7707_v60 = vadd.f32 %v7691_v46, %v11786_v24  ;;  %v7709_v22 = vadd.f32 %v7693_v59, %v11788_v47  ;;  %v7692_v21 = vrot.slane %v7633_v55, 1  ;;  %v7694_v11 = vrot.slane %v7674_v37, 1  ;;  %v9297_v24 = vpop.eup %9296 }
0x1595   :  { %v7635_v62 = vpop.f32.mrf.mxu1  ;;  %v7676_v9 = vpop.f32.mrf.mxu0 }
0x1596   :  { %9302 = vtanh.f32 %v7707_v60  ;;  %v8575_v2 = vmul.f32 -1.442695, %v7709_v22  ;;  %v7708_v31 = vadd.f32 %v7692_v21, %v11790_v63  ;;  %v7710_v20 = vadd.f32 %v7694_v11, %v11792_v3  ;;  %v9299_v47 = vpop.eup %9298 }
0x1597   :  { %9304 = vrcp.f32 %v7730_v52  ;;  %v7636_v27 = vpop.f32.mrf.mxu1  ;;  %v7677_v50 = vpop.f32.mrf.mxu0  ;;  %v7755_v48 = vmul.f32 %v9299_v47, %v7751_v57  ;;  %v7752_v63 = vrot.slane %v12701_v36, 7 }
0x1598   :  { %9306 = vpow2.f32 %v8575_v2  ;;  %v8576_v34 = vmul.f32 -1.442695, %v7710_v20  ;;  %v9301_v14 = vpop.eup %9300 }
0x1599   :  { %9308 = vtanh.f32 %v7708_v31 }
0x159a   :  { %9310 = vpow2.f32 %v8576_v34 }
0x15a3   :  { %v9303_v10 = vpop.eup %9302 }
0x15a4   :  { %v9305_v7 = vpop.eup %9304  ;;  %v7757_v40 = vmul.f32 %v9303_v10, %v9297_v24 }
0x15a5   :  { %v9307_v49 = vpop.eup %9306  ;;  %v7756_v54 = vmul.f32 %v9305_v7, %v7752_v63 }
0x15a6   :  { %v9309_v3 = vpop.eup %9308  ;;  %v7759_v16 = vadd.f32 %v7757_v40, %v7755_v48  ;;  %v7743_v41 = vadd.f32 1.0, %v9307_v49 }
0x15a7   :  { %v9311_v0 = vpop.eup %9310  ;;  %v7758_v44 = vmul.f32 %v9309_v3, %v9301_v14 }
0x15a8   :  { %9312 = vtanh.f32 %v7759_v16  ;;  %v7744_v5 = vadd.f32 1.0, %v9311_v0 }
0x15a9   :  { %9314 = vrcp.f32 %v7743_v41  ;;  %v7760_v45 = vadd.f32 %v7758_v44, %v7756_v54 }
0x15aa   :  { %9316 = vrcp.f32 %v7744_v5 }
0x15ab   :  { %9318 = vtanh.f32 %v7760_v45 }
0x15b1   :  { %v7947_v53 = vpop.f32.mrf.mxu0 }
0x15b3   :  { %v8754_v61 = vpop.f32.mrf.mxu0 }
0x15b5   :  { %v9313_v28 = vpop.eup %9312 }
0x15b6   :  { %v9315_v4 = vpop.eup %9314 }
0x15b7   :  { %v9317_v42 = vpop.eup %9316  ;;  %v7763_v51 = vmul.f32 %v9315_v4, %v9313_v28 }
0x15b8   :  { %v9319_v13 = vpop.eup %9318 }
0x15b9   :  { %v7764_v36 = vmul.f32 %v9319_v13, %v9317_v42  ;;  %v7773_v23 = vrot.slane %v7763_v51, 7 }
0x15bb   :  { %v7776_v1 = vrot.slane %v7764_v36, 6 }
0x15bd   :  { %v7778_v58 = vsel %vm402_vm1, %v7773_v23, %v7776_v1 }
0x15be   :  { %8718 = vmatmul.mubr.f32.vlgmr.msra.gmra.mxu1 %v7778_v58 }
0x167e   :  { %v7877_v43 = vpop.f32.mrf.mxu1 }
0x167f   :  { %v7948_v30 = vadd.f32 %v7947_v53, %v7877_v43 }
0x1680   :  { %v8719_v35 = vpop.f32.mrf.mxu1 }
0x1681   :  { %v7958_v8 = vadd.f32 %v8577_v56, %v7948_v30 }
0x1683   :  { %v7960_v12 = vsel %vm7959_vm8, %v7958_v8, -inf }
0x1684   :  { %7961 = vmax.xlane.f32.xlu0 %v7960_v12 }
0x170d   :  { %v7962_v6 = vpop.xlane.xlu0 %7961 }
0x170e   :  { %v7963_v17 = vsub.f32 %v7958_v8, %v7962_v6 }
0x1710   :  { %v7964_v33 = vmul.f32 1.442695, %v7963_v17 }
0x1712   :  { %9320 = vpow2.f32 %v7964_v33 }
0x171f   :  { %v9321_v19 = vpop.eup %9320 }
0x1720   :  { %v7966_v39 = vsel %vm7959_vm8, %v9321_v19, 0.0 }
0x1721   :  { %7967 = vadd.xlane.f32.xlu0 %v7966_v39 }
0x17aa   :  { %v7968_v15 = vpop.xlane.xlu0 %7967 }
0x17ab   :  { %9322 = vrcp.f32 %v7968_v15 }
0x17b8   :  { %v9323_v38 = vpop.eup %9322 }
0x17b9   :  { %v7970_v25 = vmul.f32 %v9323_v38, %v9321_v19 }
0x17bb   :  { %7971 = vst.msk [vmem:[#allocation10] sm:$0x3] %vm7959_vm8, %v7970_v25 }
0x17bc   :  { %9415 = shalt.err (!%p9412_p10)
}
0x17bd   :  { %7981 = dma.vmem_to_hbm [thread:$0]  %s7979_s14, 32, %s12938_s13, [#allocation4]  }
0x17be   :  { %9430 = dma.done.wait [#allocation4], 32  }
0x17bf   :  { %9431 = vsyncadd [#allocation4], 4294967264 }
0x17c0   :  { %7985 = vsyncpa [#allocation3], 1 }
0x17c1   :  { %7986 = vsyncpa [#allocation6], 1 }
0x17c2   :  { %7987 = vsyncpa [#allocation9], 1 }
0x17c3   :  { %7988 = vsyncpa [#allocation4], 1 }

</bundles_post_ra>
